<compile_context>
chip_gen: v5e
topology: v5e:2x2
jax: 0.10.0
libtpu: 0.0.40
codegen_flags: <defaults>
</compile_context>

<pallas_src>
import functools

import jax
import jax.numpy as jnp
from jax import lax
from jax.experimental import pallas as pl
from jax.experimental.pallas import tpu as pltpu


COUT_PAD = 8    # classifier's single output channel padded to 8 lanes for the matmul
SH_HALO = 8     # sublane halo rows of the +/-1 pixel-shift scratch


def _round_up(x, m):
    return ((x + m - 1) // m) * m


def _disc_fused_kernel(x_col_ref, w1_ref, b1_ref, w2_ref, b2_ref,
                       w3_ref, b3_ref, w4_ref, b4_ref,
                       o_ref,
                       act_ref, col_ref, sh0_ref, sh1_ref,
                       *, H, W, C1, C2, slope):
    """Fused Discriminator_img forward for ONE batch element.

    x_col_ref : (H*W, 9*Cin)     bf16  wrapper-built 9-tap im2col of the input (conv1)
    w1_ref    : (9*Cin, C1)      bf16  conv1 weight, K = (dy*3+dx)*Cin + c
    w2_ref    : (9*C1, C2)       bf16  dx-major: K = dx*(3*C1) + dy*C1 + c
    w3_ref    : (9*C2, C2)       bf16  dx-major
    w4_ref    : (9*C2, COUT_PAD) bf16  dx-major, Cout zero-padded 1 -> 8
    b*_ref    : (1, C) / (1, 1)  f32
    o_ref     : (H*W, 1)         f32   dense classifier output column
    act_ref   : (ROWS, CMAX)     bf16  flat activation scratch with zero vertical halo
    col_ref   : (H*W, 3*CMAX)    bf16  dy-only im2col scratch
    sh*_ref   : (H*W + 16, SH_C) f32   sublane-haloed scratch for the +/-1 pixel shift
    """
    HW = H * W
    ROWS, CMAX = act_ref.shape
    BASE = _round_up(W, 8)     # 8-aligned first image row; >= W rows of zero halo above

    # Vertical zero halo, re-done every grid step (scratch is per-core on v7x,
    # so this must NOT be gated on program_id == 0).
    act_ref[0:BASE, :] = jnp.zeros((BASE, CMAX), jnp.bfloat16)
    act_ref[BASE + HW:ROWS, :] = jnp.zeros((ROWS - BASE - HW, CMAX), jnp.bfloat16)

    # w-coordinate of each output pixel (row-major p = h*W + w); shared by all layers.
    w_of_p = lax.broadcasted_iota(jnp.int32, (HW, 1), 0) % W
    not_left = w_of_p > 0            # dx = 0 tap reads column w-1
    not_right = w_of_p < (W - 1)     # dx = 2 tap reads column w+1

    def bias_leaky_store(pre, b_ref, cout):
        a = pre + b_ref[...]
        a = jnp.where(a > 0, a, slope * a)          # LeakyReLU(0.2)
        ab = a.astype(jnp.bfloat16)
        act_ref[BASE:BASE + HW, 0:cout] = ab        # source of next layer's dy=0/2 slabs
        col_ref[:, cout:2 * cout] = ab              # next layer's centre (dy=1) chunk

    def conv3x3(w_ref, cin, cout):
        """3x3 conv on act_ref[:, :cin]: dy-only im2col (aligned slabs) + one matmul
        per dx column; the +/-1 pixel (dx) shift is applied to the f32 partials via a
        sublane-haloed scratch read, masked by not_left / not_right."""
        k3 = 3 * cin
        col_ref[:, 0:cin] = act_ref[BASE - W:BASE - W + HW, 0:cin]            # dy = 0
        col_ref[:, 2 * cin:3 * cin] = act_ref[BASE + W:BASE + W + HW, 0:cin]  # dy = 2
        lhs = col_ref[:, 0:k3]
        p0 = jnp.dot(lhs, w_ref[0:k3, :], preferred_element_type=jnp.float32)
        p1 = jnp.dot(lhs, w_ref[k3:2 * k3, :], preferred_element_type=jnp.float32)
        p2 = jnp.dot(lhs, w_ref[2 * k3:3 * k3, :], preferred_element_type=jnp.float32)
        # out[p] = p1[p] + p0[p-1]*(w>0) + p2[p+1]*(w<W-1)
        sh0_ref[SH_HALO:SH_HALO + HW, 0:cout] = p0
        sh1_ref[SH_HALO:SH_HALO + HW, 0:cout] = p2
        t0 = sh0_ref[SH_HALO - 1:SH_HALO - 1 + HW, 0:cout]   # p0 at pixel p-1
        t2 = sh1_ref[SH_HALO + 1:SH_HALO + 1 + HW, 0:cout]   # p2 at pixel p+1
        return (p1 + jnp.where(not_left, t0, 0.0)
                + jnp.where(not_right, t2, 0.0))

    # conv1 + LeakyReLU: single K = 9*Cin matmul on the wrapper-built im2col.
    a1 = jnp.dot(x_col_ref[...], w1_ref[...], preferred_element_type=jnp.float32)
    bias_leaky_store(a1, b1_ref, C1)

    # conv2 / conv3 + LeakyReLU (deep-K, aligned dy-only im2col).
    bias_leaky_store(conv3x3(w2_ref, C1, C2), b2_ref, C2)
    bias_leaky_store(conv3x3(w3_ref, C2, C2), b3_ref, C2)

    # classifier (true Cout == 1, padded to 8 for the matmul), no activation.
    a4 = conv3x3(w4_ref, C2, COUT_PAD) + b4_ref[...]
    o_ref[...] = a4[:, 0:1]


def _prep_w_taps(w_oihw):
    """OIHW -> (9*Cin, Cout) with K = (dy*3 + dx)*Cin + c (matches _input_im2col)."""
    cout, cin, kh, kw = w_oihw.shape
    return jnp.transpose(w_oihw, (2, 3, 1, 0)).reshape(kh * kw * cin, cout)


def _prep_w_dx_major(w_oihw):
    """OIHW -> (9*Cin, Cout) with K = dx*(3*Cin) + dy*Cin + c (per-dx chunks)."""
    cout, cin, kh, kw = w_oihw.shape
    return jnp.transpose(w_oihw, (3, 2, 1, 0)).reshape(kh * kw * cin, cout)


def _input_im2col(x_nchw):
    """(N, Cin, H, W) -> (N, H*W, 9*Cin) with the same K ordering as _prep_w_taps."""
    N, cin, H, W = x_nchw.shape
    x = jnp.transpose(x_nchw, (0, 2, 3, 1))                    # NHWC
    xp = jnp.pad(x, ((0, 0), (1, 1), (1, 1), (0, 0)))
    taps = [xp[:, dy:dy + H, dx:dx + W, :] for dy in range(3) for dx in range(3)]
    col = jnp.concatenate(taps, axis=-1)                       # (N, H, W, 9*Cin)
    return col.reshape(N, H * W, 9 * cin)


def discriminator_img_forward(x_nchw, params):
    """Forward pass matching the PyTorch module; returns the flattened output."""
    (w1, b1), (w2, b2), (w3, b3), (w4, b4) = params            # OIHW weights, (Cout,) biases
    N, C_in, H, W = x_nchw.shape
    assert W % 8 == 0, "flat-row activation layout assumes W % 8 == 0"
    C1 = w1.shape[0]                                           # ndf1
    C2 = w2.shape[0]                                           # ndf2
    HW = H * W
    BASE = _round_up(W, 8)
    ROWS = _round_up(BASE + HW + W, 8)
    CMAX = max(C1, C2)
    SH_C = max(C2, COUT_PAD)

    # bf16 operands for the MXU; accumulation / bias / LeakyReLU stay f32.
    x_col = _input_im2col(x_nchw).astype(jnp.bfloat16)         # (N, HW, 9*C_in)
    w1m = _prep_w_taps(w1).astype(jnp.bfloat16)                # (9*C_in, C1)
    w2m = _prep_w_dx_major(w2).astype(jnp.bfloat16)            # (9*C1, C2)
    w3m = _prep_w_dx_major(w3).astype(jnp.bfloat16)            # (9*C2, C2)
    w4m = jnp.pad(_prep_w_dx_major(w4),                        # (9*C2, 1) -> (9*C2, 8)
                  ((0, 0), (0, COUT_PAD - 1))).astype(jnp.bfloat16)
    b1m = b1.reshape(1, -1).astype(jnp.float32)
    b2m = b2.reshape(1, -1).astype(jnp.float32)
    b3m = b3.reshape(1, -1).astype(jnp.float32)
    b4m = b4.reshape(1, 1).astype(jnp.float32)

    kernel = functools.partial(_disc_fused_kernel,
                               H=H, W=W, C1=C1, C2=C2, slope=0.2)
    const = lambda n: (0, 0)

    out = pl.pallas_call(
        kernel,
        out_shape=jax.ShapeDtypeStruct((N, HW, 1), jnp.float32),
        grid=(N,),
        in_specs=[
            pl.BlockSpec((None, HW, 9 * C_in), lambda n: (n, 0, 0)),
            pl.BlockSpec((9 * C_in, C1), const),
            pl.BlockSpec((1, C1), const),
            pl.BlockSpec((9 * C1, C2), const),
            pl.BlockSpec((1, C2), const),
            pl.BlockSpec((9 * C2, C2), const),
            pl.BlockSpec((1, C2), const),
            pl.BlockSpec((9 * C2, COUT_PAD), const),
            pl.BlockSpec((1, 1), const),
        ],
        out_specs=pl.BlockSpec((None, HW, 1), lambda n: (n, 0, 0)),
        scratch_shapes=[
            pltpu.VMEM((ROWS, CMAX), jnp.bfloat16),             # flat act + zero halo
            pltpu.VMEM((HW, 3 * CMAX), jnp.bfloat16),           # dy-only im2col slab
            pltpu.VMEM((HW + 2 * SH_HALO, SH_C), jnp.float32),  # +/-1 shift scratch (dx=0)
            pltpu.VMEM((HW + 2 * SH_HALO, SH_C), jnp.float32),  # +/-1 shift scratch (dx=2)
        ],
        compiler_params=pltpu.CompilerParams(
            dimension_semantics=("parallel",)),
    )(x_col, w1m, b1m, w2m, b2m, w3m, b3m, w4m, b4m)

    # torch.flatten of the (N, 1, H, W) classifier output has order (n, h, w),
    # which is exactly our (N, HW, 1) layout flattened -> pure reshape, no gather.
    return out.reshape(-1)


def init_conv_params(key, cin, cout):
    """Deterministic synthetic init (kaiming-uniform-ish), PyTorch OIHW layout."""
    kw, kb = jax.random.split(key)
    fan_in = cin * 9
    bound = 1.0 / jnp.sqrt(fan_in)
    w = jax.random.uniform(kw, (cout, cin, 3, 3), jnp.float32, -bound, bound)
    b = jax.random.uniform(kb, (cout,), jnp.float32, -bound, bound)
    return w, b


def _reference_forward(x_nchw, params, *, bf16_operands):
    """Pure-JAX reference (lax.conv).  bf16_operands matches the kernel's
    quantisation points (bf16 matmul operands, f32 accumulation/bias/LeakyReLU)."""
    x = x_nchw
    for i, (w, b) in enumerate(params):
        lhs, rhs = x, w
        if bf16_operands:
            lhs = lhs.astype(jnp.bfloat16)
            rhs = rhs.astype(jnp.bfloat16)
        y = lax.conv_general_dilated(
            lhs, rhs, window_strides=(1, 1), padding="SAME",
            dimension_numbers=("NCHW", "OIHW", "NCHW"),
            preferred_element_type=jnp.float32)
        y = y + b.reshape(1, -1, 1, 1)
        if i < 3:
            y = jnp.where(y > 0, y, 0.2 * y)
        x = y
    return x.reshape(-1)


if __name__ == "__main__":
    key = jax.random.PRNGKey(0)
    k_in, k1, k2, k3, k4 = jax.random.split(key, 5)

    # Small shapes consistent with the module: batch=2, input_size=4, 16x16 spatial.
    N, C_IN, H, W = 2, 4, 16, 16
    NDF1, NDF2 = 256, 128

    x = jax.random.normal(k_in, (N, C_IN, H, W), jnp.float32)
    params = [
        init_conv_params(k1, C_IN, NDF1),   # conv1
        init_conv_params(k2, NDF1, NDF2),   # conv2
        init_conv_params(k3, NDF2, NDF2),   # conv3
        init_conv_params(k4, NDF2, 1),      # classifier
    ]

    fwd = jax.jit(discriminator_img_forward)
    out = jax.block_until_ready(fwd(x, params))
    assert out.shape == (N * H * W,)

    # Tight check vs a reference with matching bf16 operand quantisation (tolerance
    # allows the dx-split f32 reassociation), plus a looser sanity check vs the
    # pure-f32 module semantics.
    ref_bf16 = jax.block_until_ready(
        _reference_forward(x, params, bf16_operands=True))
    ref_f32 = jax.block_until_ready(
        _reference_forward(x, params, bf16_operands=False))
    assert jnp.allclose(out, ref_bf16, atol=5e-3, rtol=5e-3), float(
        jnp.max(jnp.abs(out - ref_bf16)))
    assert jnp.allclose(out, ref_f32, atol=3e-2, rtol=3e-2), float(
        jnp.max(jnp.abs(out - ref_f32)))

    print("KERNEL_OK")
</pallas_src>

<mosaic_0001>
module attributes {stable_mosaic.version = 11 : i64} {
  func.func @_disc_fused_kernel(%arg0: i32, %arg1: memref<1x256x36xbf16, #tpu.memory_space<vmem>>, %arg2: memref<36x256xbf16, #tpu.memory_space<vmem>>, %arg3: memref<1x256xf32, #tpu.memory_space<vmem>>, %arg4: memref<2304x128xbf16, #tpu.memory_space<vmem>>, %arg5: memref<1x128xf32, #tpu.memory_space<vmem>>, %arg6: memref<1152x128xbf16, #tpu.memory_space<vmem>>, %arg7: memref<1x128xf32, #tpu.memory_space<vmem>>, %arg8: memref<1152x8xbf16, #tpu.memory_space<vmem>>, %arg9: memref<1x1xf32, #tpu.memory_space<vmem>>, %arg10: memref<1x256x1xf32, #tpu.memory_space<vmem>>, %arg11: memref<288x256xbf16, #tpu.memory_space<vmem>>, %arg12: memref<256x768xbf16, #tpu.memory_space<vmem>>, %arg13: memref<272x128xf32, #tpu.memory_space<vmem>>, %arg14: memref<272x128xf32, #tpu.memory_space<vmem>>) attributes {dimension_semantics = [#tpu.dimension_semantics<parallel>], iteration_bounds = array<i64: 2>, scalar_prefetch = 0 : i64, scratch_operands = 4 : i64, tpu.core_type = #tpu.core_type<tc>, window_params = [{transform_indices = @transform_0, window_bounds = array<i64: 1, 256, 36>}, {pipeline_mode = #tpu.pipeline_mode<synchronous>, transform_indices = @transform_1, window_bounds = array<i64: 36, 256>}, {pipeline_mode = #tpu.pipeline_mode<synchronous>, transform_indices = @transform_2, window_bounds = array<i64: 1, 256>}, {pipeline_mode = #tpu.pipeline_mode<synchronous>, transform_indices = @transform_3, window_bounds = array<i64: 2304, 128>}, {pipeline_mode = #tpu.pipeline_mode<synchronous>, transform_indices = @transform_4, window_bounds = array<i64: 1, 128>}, {pipeline_mode = #tpu.pipeline_mode<synchronous>, transform_indices = @transform_5, window_bounds = array<i64: 1152, 128>}, {pipeline_mode = #tpu.pipeline_mode<synchronous>, transform_indices = @transform_6, window_bounds = array<i64: 1, 128>}, {pipeline_mode = #tpu.pipeline_mode<synchronous>, transform_indices = @transform_7, window_bounds = array<i64: 1152, 8>}, {pipeline_mode = #tpu.pipeline_mode<synchronous>, transform_indices = @transform_8, window_bounds = array<i64: 1, 1>}, {transform_indices = @transform_9, window_bounds = array<i64: 1, 256, 1>}]} {
    %cst = arith.constant 0.000000e+00 : bf16
    %0 = vector.broadcast %cst : bf16 to vector<16x256xbf16>
    %c0 = arith.constant 0 : index
    %c0_0 = arith.constant 0 : index
    %1 = vector.load %arg11[%c0, %c0_0] : memref<288x256xbf16, #tpu.memory_space<vmem>>, vector<16x256xbf16>
    tpu.vector_store %arg11[%c0, %c0_0], %0 {strides = array<i32>} : memref<288x256xbf16, #tpu.memory_space<vmem>>, vector<16x256xbf16>,
    %cst_1 = arith.constant 0.000000e+00 : bf16
    %2 = vector.broadcast %cst_1 : bf16 to vector<16x256xbf16>
    %c272 = arith.constant 272 : index
    %c0_2 = arith.constant 0 : index
    %3 = vector.load %arg11[%c272, %c0_2] : memref<288x256xbf16, #tpu.memory_space<vmem>>, vector<16x256xbf16>
    tpu.vector_store %arg11[%c272, %c0_2], %2 {strides = array<i32>} : memref<288x256xbf16, #tpu.memory_space<vmem>>, vector<16x256xbf16>,
    %4 = tpu.iota {dimensions = array<i32: 0>} : vector<256x1xi32>
    %c16_i32 = arith.constant 16 : i32
    %c0_i32 = arith.constant 0 : i32
    %5 = arith.cmpi eq, %c16_i32, %c0_i32 : i32
    %c1_i32 = arith.constant 1 : i32
    %6 = arith.select %5, %c1_i32, %c16_i32 : i32
    %7 = vector.broadcast %6 : i32 to vector<256x1xi32>
    %8 = arith.remsi %4, %7 : vector<256x1xi32>
    %c0_i32_3 = arith.constant 0 : i32
    %9 = vector.broadcast %c0_i32_3 : i32 to vector<256x1xi32>
    %10 = arith.cmpi ne, %8, %9 : vector<256x1xi32>
    %c0_i32_4 = arith.constant 0 : i32
    %11 = vector.broadcast %c0_i32_4 : i32 to vector<256x1xi32>
    %12 = arith.cmpi slt, %8, %11 : vector<256x1xi32>
    %c0_i32_5 = arith.constant 0 : i32
    %13 = arith.cmpi slt, %6, %c0_i32_5 : i32
    %14 = vector.broadcast %13 : i1 to vector<256x1xi1>
    %15 = vector.broadcast %14 : vector<256x1xi1> to vector<256x1xi1>
    %16 = arith.xori %12, %15 : vector<256x1xi1>
    %17 = arith.andi %16, %10 : vector<256x1xi1>
    %18 = vector.broadcast %6 : i32 to vector<256x1xi32>
    %19 = arith.addi %8, %18 : vector<256x1xi32>
    %20 = arith.select %17, %19, %8 : vector<256x1xi1>, vector<256x1xi32>
    %c0_i32_6 = arith.constant 0 : i32
    %21 = vector.broadcast %c0_i32_6 : i32 to vector<256x1xi32>
    %22 = arith.cmpi sgt, %20, %21 : vector<256x1xi32>
    %c15_i32 = arith.constant 15 : i32
    %23 = vector.broadcast %c15_i32 : i32 to vector<256x1xi32>
    %24 = arith.cmpi slt, %20, %23 : vector<256x1xi32>
    %c0_7 = arith.constant 0 : index
    %c0_8 = arith.constant 0 : index
    %c0_9 = arith.constant 0 : index
    %25 = vector.load %arg1[%c0_7, %c0_8, %c0_9] : memref<1x256x36xbf16, #tpu.memory_space<vmem>>, vector<1x256x36xbf16>
    %26 = vector.shape_cast %25 : vector<1x256x36xbf16> to vector<256x36xbf16>
    %c0_10 = arith.constant 0 : index
    %c0_11 = arith.constant 0 : index
    %27 = vector.load %arg2[%c0_10, %c0_11] : memref<36x256xbf16, #tpu.memory_space<vmem>>, vector<36x256xbf16>
    %cst_12 = arith.constant dense<0.000000e+00> : vector<256x256xf32>
    %28 = tpu.matmul %26, %27, %cst_12 {dimension_numbers = #tpu.dot_dimension_numbers<[1], [0], [0], [1], [0, 0, 1, 1], [], []>} : vector<256x36xbf16>, vector<36x256xbf16>, vector<256x256xf32> -> vector<256x256xf32>
    %c0_13 = arith.constant 0 : index
    %c0_14 = arith.constant 0 : index
    %29 = vector.load %arg3[%c0_13, %c0_14] : memref<1x256xf32, #tpu.memory_space<vmem>>, vector<1x256xf32>
    %30 = vector.broadcast %29 : vector<1x256xf32> to vector<256x256xf32>
    %31 = arith.addf %28, %30 : vector<256x256xf32>
    %cst_15 = arith.constant 0.000000e+00 : f32
    %32 = vector.broadcast %cst_15 : f32 to vector<256x256xf32>
    %33 = arith.cmpf ogt, %31, %32 : vector<256x256xf32>
    %cst_16 = arith.constant 2.000000e-01 : f32
    %34 = vector.broadcast %cst_16 : f32 to vector<256x256xf32>
    %35 = arith.mulf %34, %31 : vector<256x256xf32>
    %36 = arith.select %33, %31, %35 : vector<256x256xi1>, vector<256x256xf32>
    %37 = arith.truncf %36 : vector<256x256xf32> to vector<256x256xbf16>
    %c16 = arith.constant 16 : index
    %c0_17 = arith.constant 0 : index
    %38 = vector.load %arg11[%c16, %c0_17] : memref<288x256xbf16, #tpu.memory_space<vmem>>, vector<256x256xbf16>
    tpu.vector_store %arg11[%c16, %c0_17], %37 {strides = array<i32>} : memref<288x256xbf16, #tpu.memory_space<vmem>>, vector<256x256xbf16>,
    %c0_18 = arith.constant 0 : index
    %c256 = arith.constant 256 : index
    %39 = vector.load %arg12[%c0_18, %c256] : memref<256x768xbf16, #tpu.memory_space<vmem>>, vector<256x256xbf16>
    tpu.vector_store %arg12[%c0_18, %c256], %37 {strides = array<i32>} : memref<256x768xbf16, #tpu.memory_space<vmem>>, vector<256x256xbf16>,
    %c0_19 = arith.constant 0 : index
    %c0_20 = arith.constant 0 : index
    %40 = vector.load %arg11[%c0_19, %c0_20] : memref<288x256xbf16, #tpu.memory_space<vmem>>, vector<256x256xbf16>
    %c0_21 = arith.constant 0 : index
    %c0_22 = arith.constant 0 : index
    %41 = vector.load %arg12[%c0_21, %c0_22] : memref<256x768xbf16, #tpu.memory_space<vmem>>, vector<256x256xbf16>
    tpu.vector_store %arg12[%c0_21, %c0_22], %40 {strides = array<i32>} : memref<256x768xbf16, #tpu.memory_space<vmem>>, vector<256x256xbf16>,
    %c32 = arith.constant 32 : index
    %c0_23 = arith.constant 0 : index
    %42 = vector.load %arg11[%c32, %c0_23] : memref<288x256xbf16, #tpu.memory_space<vmem>>, vector<256x256xbf16>
    %c0_24 = arith.constant 0 : index
    %c512 = arith.constant 512 : index
    %43 = vector.load %arg12[%c0_24, %c512] : memref<256x768xbf16, #tpu.memory_space<vmem>>, vector<256x256xbf16>
    tpu.vector_store %arg12[%c0_24, %c512], %42 {strides = array<i32>} : memref<256x768xbf16, #tpu.memory_space<vmem>>, vector<256x256xbf16>,
    %c0_25 = arith.constant 0 : index
    %c0_26 = arith.constant 0 : index
    %44 = vector.load %arg12[%c0_25, %c0_26] : memref<256x768xbf16, #tpu.memory_space<vmem>>, vector<256x768xbf16>
    %c0_27 = arith.constant 0 : index
    %c0_28 = arith.constant 0 : index
    %45 = vector.load %arg4[%c0_27, %c0_28] : memref<2304x128xbf16, #tpu.memory_space<vmem>>, vector<768x128xbf16>
    %cst_29 = arith.constant dense<0.000000e+00> : vector<256x128xf32>
    %46 = tpu.matmul %44, %45, %cst_29 {dimension_numbers = #tpu.dot_dimension_numbers<[1], [0], [0], [1], [0, 0, 1, 1], [], []>} : vector<256x768xbf16>, vector<768x128xbf16>, vector<256x128xf32> -> vector<256x128xf32>
    %c768 = arith.constant 768 : index
    %c0_30 = arith.constant 0 : index
    %47 = vector.load %arg4[%c768, %c0_30] : memref<2304x128xbf16, #tpu.memory_space<vmem>>, vector<768x128xbf16>
    %cst_31 = arith.constant dense<0.000000e+00> : vector<256x128xf32>
    %48 = tpu.matmul %44, %47, %cst_31 {dimension_numbers = #tpu.dot_dimension_numbers<[1], [0], [0], [1], [0, 0, 1, 1], [], []>} : vector<256x768xbf16>, vector<768x128xbf16>, vector<256x128xf32> -> vector<256x128xf32>
    %c1536 = arith.constant 1536 : index
    %c0_32 = arith.constant 0 : index
    %49 = vector.load %arg4[%c1536, %c0_32] : memref<2304x128xbf16, #tpu.memory_space<vmem>>, vector<768x128xbf16>
    %cst_33 = arith.constant dense<0.000000e+00> : vector<256x128xf32>
    %50 = tpu.matmul %44, %49, %cst_33 {dimension_numbers = #tpu.dot_dimension_numbers<[1], [0], [0], [1], [0, 0, 1, 1], [], []>} : vector<256x768xbf16>, vector<768x128xbf16>, vector<256x128xf32> -> vector<256x128xf32>
    %c8 = arith.constant 8 : index
    %c0_34 = arith.constant 0 : index
    %51 = vector.load %arg13[%c8, %c0_34] : memref<272x128xf32, #tpu.memory_space<vmem>>, vector<256x128xf32>
    tpu.vector_store %arg13[%c8, %c0_34], %46 {strides = array<i32>} : memref<272x128xf32, #tpu.memory_space<vmem>>, vector<256x128xf32>,
    %c8_35 = arith.constant 8 : index
    %c0_36 = arith.constant 0 : index
    %52 = vector.load %arg14[%c8_35, %c0_36] : memref<272x128xf32, #tpu.memory_space<vmem>>, vector<256x128xf32>
    tpu.vector_store %arg14[%c8_35, %c0_36], %50 {strides = array<i32>} : memref<272x128xf32, #tpu.memory_space<vmem>>, vector<256x128xf32>,
    %c7 = arith.constant 7 : index
    %c0_37 = arith.constant 0 : index
    %53 = vector.load %arg13[%c7, %c0_37] : memref<272x128xf32, #tpu.memory_space<vmem>>, vector<256x128xf32>
    %c9 = arith.constant 9 : index
    %c0_38 = arith.constant 0 : index
    %54 = vector.load %arg14[%c9, %c0_38] : memref<272x128xf32, #tpu.memory_space<vmem>>, vector<256x128xf32>
    %cst_39 = arith.constant 0.000000e+00 : f32
    %55 = vector.shape_cast %22 : vector<256x1xi1> to vector<256x1xi1>
    %56 = vector.broadcast %55 : vector<256x1xi1> to vector<256x128xi1>
    %57 = vector.broadcast %cst_39 : f32 to vector<256x128xf32>
    %58 = arith.select %56, %53, %57 : vector<256x128xi1>, vector<256x128xf32>
    %59 = arith.addf %48, %58 : vector<256x128xf32>
    %cst_40 = arith.constant 0.000000e+00 : f32
    %60 = vector.shape_cast %24 : vector<256x1xi1> to vector<256x1xi1>
    %61 = vector.broadcast %60 : vector<256x1xi1> to vector<256x128xi1>
    %62 = vector.broadcast %cst_40 : f32 to vector<256x128xf32>
    %63 = arith.select %61, %54, %62 : vector<256x128xi1>, vector<256x128xf32>
    %64 = arith.addf %59, %63 : vector<256x128xf32>
    %c0_41 = arith.constant 0 : index
    %c0_42 = arith.constant 0 : index
    %65 = vector.load %arg5[%c0_41, %c0_42] : memref<1x128xf32, #tpu.memory_space<vmem>>, vector<1x128xf32>
    %66 = vector.broadcast %65 : vector<1x128xf32> to vector<256x128xf32>
    %67 = arith.addf %64, %66 : vector<256x128xf32>
    %cst_43 = arith.constant 0.000000e+00 : f32
    %68 = vector.broadcast %cst_43 : f32 to vector<256x128xf32>
    %69 = arith.cmpf ogt, %67, %68 : vector<256x128xf32>
    %cst_44 = arith.constant 2.000000e-01 : f32
    %70 = vector.broadcast %cst_44 : f32 to vector<256x128xf32>
    %71 = arith.mulf %70, %67 : vector<256x128xf32>
    %72 = arith.select %69, %67, %71 : vector<256x128xi1>, vector<256x128xf32>
    %73 = arith.truncf %72 : vector<256x128xf32> to vector<256x128xbf16>
    %c16_45 = arith.constant 16 : index
    %c0_46 = arith.constant 0 : index
    %74 = vector.load %arg11[%c16_45, %c0_46] : memref<288x256xbf16, #tpu.memory_space<vmem>>, vector<256x128xbf16>
    tpu.vector_store %arg11[%c16_45, %c0_46], %73 {strides = array<i32>} : memref<288x256xbf16, #tpu.memory_space<vmem>>, vector<256x128xbf16>,
    %c0_47 = arith.constant 0 : index
    %c128 = arith.constant 128 : index
    %75 = vector.load %arg12[%c0_47, %c128] : memref<256x768xbf16, #tpu.memory_space<vmem>>, vector<256x128xbf16>
    tpu.vector_store %arg12[%c0_47, %c128], %73 {strides = array<i32>} : memref<256x768xbf16, #tpu.memory_space<vmem>>, vector<256x128xbf16>,
    %c0_48 = arith.constant 0 : index
    %c0_49 = arith.constant 0 : index
    %76 = vector.load %arg11[%c0_48, %c0_49] : memref<288x256xbf16, #tpu.memory_space<vmem>>, vector<256x128xbf16>
    %c0_50 = arith.constant 0 : index
    %c0_51 = arith.constant 0 : index
    %77 = vector.load %arg12[%c0_50, %c0_51] : memref<256x768xbf16, #tpu.memory_space<vmem>>, vector<256x128xbf16>
    tpu.vector_store %arg12[%c0_50, %c0_51], %76 {strides = array<i32>} : memref<256x768xbf16, #tpu.memory_space<vmem>>, vector<256x128xbf16>,
    %c32_52 = arith.constant 32 : index
    %c0_53 = arith.constant 0 : index
    %78 = vector.load %arg11[%c32_52, %c0_53] : memref<288x256xbf16, #tpu.memory_space<vmem>>, vector<256x128xbf16>
    %c0_54 = arith.constant 0 : index
    %c256_55 = arith.constant 256 : index
    %79 = vector.load %arg12[%c0_54, %c256_55] : memref<256x768xbf16, #tpu.memory_space<vmem>>, vector<256x128xbf16>
    tpu.vector_store %arg12[%c0_54, %c256_55], %78 {strides = array<i32>} : memref<256x768xbf16, #tpu.memory_space<vmem>>, vector<256x128xbf16>,
    %c0_56 = arith.constant 0 : index
    %c0_57 = arith.constant 0 : index
    %80 = vector.load %arg12[%c0_56, %c0_57] : memref<256x768xbf16, #tpu.memory_space<vmem>>, vector<256x384xbf16>
    %c0_58 = arith.constant 0 : index
    %c0_59 = arith.constant 0 : index
    %81 = vector.load %arg6[%c0_58, %c0_59] : memref<1152x128xbf16, #tpu.memory_space<vmem>>, vector<384x128xbf16>
    %cst_60 = arith.constant dense<0.000000e+00> : vector<256x128xf32>
    %82 = tpu.matmul %80, %81, %cst_60 {dimension_numbers = #tpu.dot_dimension_numbers<[1], [0], [0], [1], [0, 0, 1, 1], [], []>} : vector<256x384xbf16>, vector<384x128xbf16>, vector<256x128xf32> -> vector<256x128xf32>
    %c384 = arith.constant 384 : index
    %c0_61 = arith.constant 0 : index
    %83 = vector.load %arg6[%c384, %c0_61] : memref<1152x128xbf16, #tpu.memory_space<vmem>>, vector<384x128xbf16>
    %cst_62 = arith.constant dense<0.000000e+00> : vector<256x128xf32>
    %84 = tpu.matmul %80, %83, %cst_62 {dimension_numbers = #tpu.dot_dimension_numbers<[1], [0], [0], [1], [0, 0, 1, 1], [], []>} : vector<256x384xbf16>, vector<384x128xbf16>, vector<256x128xf32> -> vector<256x128xf32>
    %c768_63 = arith.constant 768 : index
    %c0_64 = arith.constant 0 : index
    %85 = vector.load %arg6[%c768_63, %c0_64] : memref<1152x128xbf16, #tpu.memory_space<vmem>>, vector<384x128xbf16>
    %cst_65 = arith.constant dense<0.000000e+00> : vector<256x128xf32>
    %86 = tpu.matmul %80, %85, %cst_65 {dimension_numbers = #tpu.dot_dimension_numbers<[1], [0], [0], [1], [0, 0, 1, 1], [], []>} : vector<256x384xbf16>, vector<384x128xbf16>, vector<256x128xf32> -> vector<256x128xf32>
    %c8_66 = arith.constant 8 : index
    %c0_67 = arith.constant 0 : index
    %87 = vector.load %arg13[%c8_66, %c0_67] : memref<272x128xf32, #tpu.memory_space<vmem>>, vector<256x128xf32>
    tpu.vector_store %arg13[%c8_66, %c0_67], %82 {strides = array<i32>} : memref<272x128xf32, #tpu.memory_space<vmem>>, vector<256x128xf32>,
    %c8_68 = arith.constant 8 : index
    %c0_69 = arith.constant 0 : index
    %88 = vector.load %arg14[%c8_68, %c0_69] : memref<272x128xf32, #tpu.memory_space<vmem>>, vector<256x128xf32>
    tpu.vector_store %arg14[%c8_68, %c0_69], %86 {strides = array<i32>} : memref<272x128xf32, #tpu.memory_space<vmem>>, vector<256x128xf32>,
    %c7_70 = arith.constant 7 : index
    %c0_71 = arith.constant 0 : index
    %89 = vector.load %arg13[%c7_70, %c0_71] : memref<272x128xf32, #tpu.memory_space<vmem>>, vector<256x128xf32>
    %c9_72 = arith.constant 9 : index
    %c0_73 = arith.constant 0 : index
    %90 = vector.load %arg14[%c9_72, %c0_73] : memref<272x128xf32, #tpu.memory_space<vmem>>, vector<256x128xf32>
    %cst_74 = arith.constant 0.000000e+00 : f32
    %91 = vector.shape_cast %22 : vector<256x1xi1> to vector<256x1xi1>
    %92 = vector.broadcast %91 : vector<256x1xi1> to vector<256x128xi1>
    %93 = vector.broadcast %cst_74 : f32 to vector<256x128xf32>
    %94 = arith.select %92, %89, %93 : vector<256x128xi1>, vector<256x128xf32>
    %95 = arith.addf %84, %94 : vector<256x128xf32>
    %cst_75 = arith.constant 0.000000e+00 : f32
    %96 = vector.shape_cast %24 : vector<256x1xi1> to vector<256x1xi1>
    %97 = vector.broadcast %96 : vector<256x1xi1> to vector<256x128xi1>
    %98 = vector.broadcast %cst_75 : f32 to vector<256x128xf32>
    %99 = arith.select %97, %90, %98 : vector<256x128xi1>, vector<256x128xf32>
    %100 = arith.addf %95, %99 : vector<256x128xf32>
    %c0_76 = arith.constant 0 : index
    %c0_77 = arith.constant 0 : index
    %101 = vector.load %arg7[%c0_76, %c0_77] : memref<1x128xf32, #tpu.memory_space<vmem>>, vector<1x128xf32>
    %102 = vector.broadcast %101 : vector<1x128xf32> to vector<256x128xf32>
    %103 = arith.addf %100, %102 : vector<256x128xf32>
    %cst_78 = arith.constant 0.000000e+00 : f32
    %104 = vector.broadcast %cst_78 : f32 to vector<256x128xf32>
    %105 = arith.cmpf ogt, %103, %104 : vector<256x128xf32>
    %cst_79 = arith.constant 2.000000e-01 : f32
    %106 = vector.broadcast %cst_79 : f32 to vector<256x128xf32>
    %107 = arith.mulf %106, %103 : vector<256x128xf32>
    %108 = arith.select %105, %103, %107 : vector<256x128xi1>, vector<256x128xf32>
    %109 = arith.truncf %108 : vector<256x128xf32> to vector<256x128xbf16>
    %c16_80 = arith.constant 16 : index
    %c0_81 = arith.constant 0 : index
    %110 = vector.load %arg11[%c16_80, %c0_81] : memref<288x256xbf16, #tpu.memory_space<vmem>>, vector<256x128xbf16>
    tpu.vector_store %arg11[%c16_80, %c0_81], %109 {strides = array<i32>} : memref<288x256xbf16, #tpu.memory_space<vmem>>, vector<256x128xbf16>,
    %c0_82 = arith.constant 0 : index
    %c128_83 = arith.constant 128 : index
    %111 = vector.load %arg12[%c0_82, %c128_83] : memref<256x768xbf16, #tpu.memory_space<vmem>>, vector<256x128xbf16>
    tpu.vector_store %arg12[%c0_82, %c128_83], %109 {strides = array<i32>} : memref<256x768xbf16, #tpu.memory_space<vmem>>, vector<256x128xbf16>,
    %c0_84 = arith.constant 0 : index
    %c0_85 = arith.constant 0 : index
    %112 = vector.load %arg11[%c0_84, %c0_85] : memref<288x256xbf16, #tpu.memory_space<vmem>>, vector<256x128xbf16>
    %c0_86 = arith.constant 0 : index
    %c0_87 = arith.constant 0 : index
    %113 = vector.load %arg12[%c0_86, %c0_87] : memref<256x768xbf16, #tpu.memory_space<vmem>>, vector<256x128xbf16>
    tpu.vector_store %arg12[%c0_86, %c0_87], %112 {strides = array<i32>} : memref<256x768xbf16, #tpu.memory_space<vmem>>, vector<256x128xbf16>,
    %c32_88 = arith.constant 32 : index
    %c0_89 = arith.constant 0 : index
    %114 = vector.load %arg11[%c32_88, %c0_89] : memref<288x256xbf16, #tpu.memory_space<vmem>>, vector<256x128xbf16>
    %c0_90 = arith.constant 0 : index
    %c256_91 = arith.constant 256 : index
    %115 = vector.load %arg12[%c0_90, %c256_91] : memref<256x768xbf16, #tpu.memory_space<vmem>>, vector<256x128xbf16>
    tpu.vector_store %arg12[%c0_90, %c256_91], %114 {strides = array<i32>} : memref<256x768xbf16, #tpu.memory_space<vmem>>, vector<256x128xbf16>,
    %c0_92 = arith.constant 0 : index
    %c0_93 = arith.constant 0 : index
    %116 = vector.load %arg12[%c0_92, %c0_93] : memref<256x768xbf16, #tpu.memory_space<vmem>>, vector<256x384xbf16>
    %c0_94 = arith.constant 0 : index
    %c0_95 = arith.constant 0 : index
    %117 = vector.load %arg8[%c0_94, %c0_95] : memref<1152x8xbf16, #tpu.memory_space<vmem>>, vector<384x8xbf16>
    %cst_96 = arith.constant dense<0.000000e+00> : vector<256x8xf32>
    %118 = tpu.matmul %116, %117, %cst_96 {dimension_numbers = #tpu.dot_dimension_numbers<[1], [0], [0], [1], [0, 0, 1, 1], [], []>} : vector<256x384xbf16>, vector<384x8xbf16>, vector<256x8xf32> -> vector<256x8xf32>
    %c384_97 = arith.constant 384 : index
    %c0_98 = arith.constant 0 : index
    %119 = vector.load %arg8[%c384_97, %c0_98] : memref<1152x8xbf16, #tpu.memory_space<vmem>>, vector<384x8xbf16>
    %cst_99 = arith.constant dense<0.000000e+00> : vector<256x8xf32>
    %120 = tpu.matmul %116, %119, %cst_99 {dimension_numbers = #tpu.dot_dimension_numbers<[1], [0], [0], [1], [0, 0, 1, 1], [], []>} : vector<256x384xbf16>, vector<384x8xbf16>, vector<256x8xf32> -> vector<256x8xf32>
    %c768_100 = arith.constant 768 : index
    %c0_101 = arith.constant 0 : index
    %121 = vector.load %arg8[%c768_100, %c0_101] : memref<1152x8xbf16, #tpu.memory_space<vmem>>, vector<384x8xbf16>
    %cst_102 = arith.constant dense<0.000000e+00> : vector<256x8xf32>
    %122 = tpu.matmul %116, %121, %cst_102 {dimension_numbers = #tpu.dot_dimension_numbers<[1], [0], [0], [1], [0, 0, 1, 1], [], []>} : vector<256x384xbf16>, vector<384x8xbf16>, vector<256x8xf32> -> vector<256x8xf32>
    %c8_103 = arith.constant 8 : index
    %c0_104 = arith.constant 0 : index
    %123 = vector.load %arg13[%c8_103, %c0_104] : memref<272x128xf32, #tpu.memory_space<vmem>>, vector<256x8xf32>
    tpu.vector_store %arg13[%c8_103, %c0_104], %118 {strides = array<i32>} : memref<272x128xf32, #tpu.memory_space<vmem>>, vector<256x8xf32>,
    %c8_105 = arith.constant 8 : index
    %c0_106 = arith.constant 0 : index
    %124 = vector.load %arg14[%c8_105, %c0_106] : memref<272x128xf32, #tpu.memory_space<vmem>>, vector<256x8xf32>
    tpu.vector_store %arg14[%c8_105, %c0_106], %122 {strides = array<i32>} : memref<272x128xf32, #tpu.memory_space<vmem>>, vector<256x8xf32>,
    %c7_107 = arith.constant 7 : index
    %c0_108 = arith.constant 0 : index
    %125 = vector.load %arg13[%c7_107, %c0_108] : memref<272x128xf32, #tpu.memory_space<vmem>>, vector<256x8xf32>
    %c9_109 = arith.constant 9 : index
    %c0_110 = arith.constant 0 : index
    %126 = vector.load %arg14[%c9_109, %c0_110] : memref<272x128xf32, #tpu.memory_space<vmem>>, vector<256x8xf32>
    %cst_111 = arith.constant 0.000000e+00 : f32
    %127 = vector.shape_cast %22 : vector<256x1xi1> to vector<256x1xi1>
    %128 = vector.broadcast %127 : vector<256x1xi1> to vector<256x8xi1>
    %129 = vector.broadcast %cst_111 : f32 to vector<256x8xf32>
    %130 = arith.select %128, %125, %129 : vector<256x8xi1>, vector<256x8xf32>
    %131 = arith.addf %120, %130 : vector<256x8xf32>
    %cst_112 = arith.constant 0.000000e+00 : f32
    %132 = vector.shape_cast %24 : vector<256x1xi1> to vector<256x1xi1>
    %133 = vector.broadcast %132 : vector<256x1xi1> to vector<256x8xi1>
    %134 = vector.broadcast %cst_112 : f32 to vector<256x8xf32>
    %135 = arith.select %133, %126, %134 : vector<256x8xi1>, vector<256x8xf32>
    %136 = arith.addf %131, %135 : vector<256x8xf32>
    %c0_113 = arith.constant 0 : index
    %c0_114 = arith.constant 0 : index
    %137 = vector.load %arg9[%c0_113, %c0_114] : memref<1x1xf32, #tpu.memory_space<vmem>>, vector<1x1xf32>
    %138 = vector.broadcast %137 : vector<1x1xf32> to vector<256x8xf32>
    %139 = arith.addf %136, %138 : vector<256x8xf32>
    %140 = vector.extract_strided_slice %139 {offsets = [0, 0], sizes = [256, 1], strides = [1, 1]} : vector<256x8xf32> to vector<256x1xf32>
    %c0_115 = arith.constant 0 : index
    %c0_116 = arith.constant 0 : index
    %c0_117 = arith.constant 0 : index
    %141 = vector.load %arg10[%c0_115, %c0_116, %c0_117] : memref<1x256x1xf32, #tpu.memory_space<vmem>>, vector<1x256x1xf32>
    %142 = vector.shape_cast %141 : vector<1x256x1xf32> to vector<256x1xf32>
    %143 = vector.shape_cast %140 : vector<256x1xf32> to vector<1x256x1xf32>
    tpu.vector_store %arg10[%c0_115, %c0_116, %c0_117], %143 {strides = array<i32>} : memref<1x256x1xf32, #tpu.memory_space<vmem>>, vector<1x256x1xf32>,
    return
  }
  func.func @transform_0(%arg0: i32) -> (i32, i32, i32) {
    %c0_i32 = arith.constant 0 : i32
    %c0_i32_0 = arith.constant 0 : i32
    %c0_i32_1 = arith.constant 0 : i32
    return %arg0, %c0_i32, %c0_i32_0 : i32, i32, i32
  }
  func.func @transform_1(%arg0: i32) -> (i32, i32) {
    %c0_i32 = arith.constant 0 : i32
    %c0_i32_0 = arith.constant 0 : i32
    %c0_i32_1 = arith.constant 0 : i32
    return %c0_i32, %c0_i32_0 : i32, i32
  }
  func.func @transform_2(%arg0: i32) -> (i32, i32) {
    %c0_i32 = arith.constant 0 : i32
    %c0_i32_0 = arith.constant 0 : i32
    %c0_i32_1 = arith.constant 0 : i32
    return %c0_i32, %c0_i32_0 : i32, i32
  }
  func.func @transform_3(%arg0: i32) -> (i32, i32) {
    %c0_i32 = arith.constant 0 : i32
    %c0_i32_0 = arith.constant 0 : i32
    %c0_i32_1 = arith.constant 0 : i32
    return %c0_i32, %c0_i32_0 : i32, i32
  }
  func.func @transform_4(%arg0: i32) -> (i32, i32) {
    %c0_i32 = arith.constant 0 : i32
    %c0_i32_0 = arith.constant 0 : i32
    %c0_i32_1 = arith.constant 0 : i32
    return %c0_i32, %c0_i32_0 : i32, i32
  }
  func.func @transform_5(%arg0: i32) -> (i32, i32) {
    %c0_i32 = arith.constant 0 : i32
    %c0_i32_0 = arith.constant 0 : i32
    %c0_i32_1 = arith.constant 0 : i32
    return %c0_i32, %c0_i32_0 : i32, i32
  }
  func.func @transform_6(%arg0: i32) -> (i32, i32) {
    %c0_i32 = arith.constant 0 : i32
    %c0_i32_0 = arith.constant 0 : i32
    %c0_i32_1 = arith.constant 0 : i32
    return %c0_i32, %c0_i32_0 : i32, i32
  }
  func.func @transform_7(%arg0: i32) -> (i32, i32) {
    %c0_i32 = arith.constant 0 : i32
    %c0_i32_0 = arith.constant 0 : i32
    %c0_i32_1 = arith.constant 0 : i32
    return %c0_i32, %c0_i32_0 : i32, i32
  }
  func.func @transform_8(%arg0: i32) -> (i32, i32) {
    %c0_i32 = arith.constant 0 : i32
    %c0_i32_0 = arith.constant 0 : i32
    %c0_i32_1 = arith.constant 0 : i32
    return %c0_i32, %c0_i32_0 : i32, i32
  }
  func.func @transform_9(%arg0: i32) -> (i32, i32, i32) {
    %c0_i32 = arith.constant 0 : i32
    %c0_i32_0 = arith.constant 0 : i32
    %c0_i32_1 = arith.constant 0 : i32
    return %arg0, %c0_i32, %c0_i32_0 : i32, i32, i32
  }
}

</mosaic_0001>

<bundles_post_ra>
// kernel: discriminator_img_forward.1
= control target key start
LH: loop header
LB: loop body
LE: loop exit
PB: predicated region body
PF: predicated region fallthrough
CT: control target
= control target key end

     0   :  { %s12619_s11 = smov 0   ;;  %s16157_s0 = inlined_call_operand.vmem [shape: bf16[2,256,36], index: 0, kind: input, shape index: {}]   ;;  %s16158_s1 = inlined_call_operand.vmem [shape: bf16[36,256], index: 1, kind: input, shape index: {}]   ;;  %s16159_s2 = inlined_call_operand.vmem [shape: f32[1,256], index: 2, kind: input, shape index: {}]   ;;  %s16160_s3 = inlined_call_operand.vmem [shape: bf16[2304,128], index: 3, kind: input, shape index: {}]   ;;  %s16161_s4 = inlined_call_operand.vmem [shape: f32[1,128], index: 4, kind: input, shape index: {}]   ;;  %s16162_s5 = inlined_call_operand.vmem [shape: bf16[1152,128], index: 5, kind: input, shape index: {}]   ;;  %s16163_s6 = inlined_call_operand.vmem [shape: f32[1,128], index: 6, kind: input, shape index: {}]   ;;  %s16164_s7 = inlined_call_operand.vmem [shape: bf16[1152,8], index: 7, kind: input, shape index: {}]   ;;  %s16165_s8 = inlined_call_operand.<no memory space> [shape: f32[1,1], index: 8, kind: input, shape index: {}]   ;;  %s16166_s9 = inlined_call_operand.vmem [shape: f32[2,256,1], index: 9, kind: output, shape index: {}]  }
   0x1   :  { %v14_v0 = vstv %s16165_s8 }
   0x2   :  { %15 = vst [vmem:[#allocation6] sm:$0x1] %v14_v0 }
   0x3 LB: > { %s9983_s12 = sadd.s32 4294967295, %s12563_s11   ;;  %p9987_p0 = scmp.ge.s32.totalorder %s12563_s11, 1  ;;  %s12563_s11 = sphi %s12619_s11, %s21_s11  }
   0x4   : > { %p289_p1 = scmp.lt.s32.totalorder %s12563_s11, 3 }
   0x6   : > { %p290_p2 = pnand %p9987_p0, %p289_p1 }
   0x8   : > { %293 = sbr.rel (%p290_p2) target bundleno = 2919 (0xb67), region = 56 }
   0xd   : > { %v857_v1 = vld [vmem:[%s16158_s1 + $0x20] sm:$0x33]  ;;  %p325_p3 = scmp.lt.s32.totalorder %s9983_s12, 1  ;;  %vm1018_vm0 = vcmask 1041408   ;;  %v10066_v4 = vld [vmem:[%s16158_s1 + $0x10] sm:$0xf] }
   0xe   : > { %v957_v2 = vunpack.c.l.b16 %v857_v1  ;;  %v958_v3 = vunpack.c.h.b16 %v857_v1  ;;  %v12047_v5 = vld [vmem:[%s16158_s1 + $0x14] sm:$0xf0]  ;;  %v12046_v8 = vld [vmem:[%s16158_s1 + $0x14] sm:$0xf]  ;;  %v10068_v9 = vld [vmem:[%s16158_s1 + $0x18] sm:$0xf0] }
   0xf   : > { %s16990_s12 = smov (!%p325_p3, %s9983_s12), 1  ;;  %v10067_v12 = vor.u32 %v12047_v5, %v10066_v4  ;;  %v10071_v13 = vor.u32 %v12046_v8, %v10068_v9  ;;  %v10058_v14 = vld [vmem:[%s16158_s1] sm:$0xf]  ;;  %v12045_v15 = vld [vmem:[%s16158_s1 + $0x4] sm:$0xf0]  ;;  %v12159_v20 = vld [vmem:[%s16160_s3 + $0x78] sm:$0xff] }
  0x10   : > { %v963_v6 = vpack.c.b16 %v957_v2, %v957_v2  ;;  %v964_v7 = vpack.c.b16 %v958_v3, %v958_v3  ;;  %v12044_v16 = vld [vmem:[%s16158_s1 + $0x4] sm:$0xf]  ;;  %v10060_v17 = vld [vmem:[%s16158_s1 + $0x8] sm:$0xf0]  ;;  %s12026_s30 = sshll.u32 %s16990_s12, 7  ;;  %v10059_v18 = vor.u32 %v12045_v15, %v10058_v14  ;;  %v12151_v21 = vld [vmem:[%s16160_s3 + $0x38] sm:$0xff] }
  0x11   : > { %v10063_v19 = vor.u32 %v12044_v16, %v10060_v17  ;;  %s12660_s14 = scalar_lea.vmem %s16157_s0, %s12026_s30  ;;  %vm969_vm1 = vcmask 293888   ;;  %v12158_v25 = vld [vmem:[%s16160_s3 + $0x70] sm:$0xff]  ;;  %v12157_v29 = vld [vmem:[%s16160_s3 + $0x68] sm:$0xff]  ;;  %v12156_v33 = vld [vmem:[%s16160_s3 + $0x60] sm:$0xff]  ;;  %v12565_v51 = vmov 0   ;;  %s12027_s22 = sshll.u32 %s16990_s12, 8 }
  0x12   : > { %v1020_v10 = vsel %vm1018_vm0, %v963_v6, 0  ;;  %v1023_v11 = vsel %vm1018_vm0, %v964_v7, 0  ;;  %v12028_v22 = vld [vmem:[%s12660_s14] sm:$0xff]  ;;  %v12037_v24 = vld [vmem:[%s12660_s14 + $0x48] sm:$0xff]  ;;  %v12150_v26 = vld [vmem:[%s16160_s3 + $0x30] sm:$0xff]  ;;  %336 = vst [vmem:[#allocation2 + $0xa0] sm:$0xff] %v12565_v51  ;;  %12551 = vset.pattern.permute.xlu0 %v12565_v51  ;;  %s15966_s25 = scalar_lea.vmem %s16166_s9, %s12027_s22 }
  0x13   : > { %1030 = vmatpush.bf16.msra.mxu0 %v1020_v10  ;;  %1119 = vmatpush.bf16.msra.mxu1 %v1023_v11  ;;  %v12670_v23 = vld [vmem:[%s12660_s14 + $0x40] sm:$0xff]  ;;  %v12029_v27 = vld [vmem:[%s12660_s14 + $0x8] sm:$0xff]  ;;  %v12038_v28 = vld [vmem:[%s12660_s14 + $0x50] sm:$0xff]  ;;  %337 = vst [vmem:[#allocation2 + $0xc0] sm:$0xff] %v12565_v51 }
  0x14   : > { %12531 = vmatpush.bf16.msra.mxu3 %v1023_v11  ;;  %12528 = vmatpush.bf16.msra.mxu2 %v1020_v10  ;;  %v12149_v30 = vld [vmem:[%s16160_s3 + $0x28] sm:$0xff]  ;;  %v12030_v31 = vld [vmem:[%s12660_s14 + $0x10] sm:$0xff]  ;;  %v12039_v32 = vld [vmem:[%s12660_s14 + $0x58] sm:$0xff]  ;;  %1523 = vst [vmem:[#allocation3] sm:$0xff] %v12565_v51 }
  0x15   : > { %v12148_v34 = vld [vmem:[%s16160_s3 + $0x20] sm:$0xff]  ;;  %v12031_v35 = vld [vmem:[%s12660_s14 + $0x18] sm:$0xff]  ;;  %v12041_v40 = vld [vmem:[%s12660_s14 + $0x68] sm:$0xff]  ;;  %1524 = vst [vmem:[#allocation3 + $0x18] sm:$0xff] %v12565_v51 }
  0x16   : > { %v12040_v36 = vld [vmem:[%s12660_s14 + $0x60] sm:$0xff]  ;;  %v12155_v37 = vld [vmem:[%s16160_s3 + $0x58] sm:$0xff]  ;;  %v12154_v41 = vld [vmem:[%s16160_s3 + $0x50] sm:$0xff]  ;;  %338 = vst [vmem:[#allocation2 + $0x110] sm:$0xff] %v12565_v51 }
  0x17   : > { %1031 = vmatpush.bf16.msra.mxu0 %v10067_v12  ;;  %1120 = vmatpush.bf16.msra.mxu1 %v10071_v13  ;;  %v12147_v38 = vld [vmem:[%s16160_s3 + $0x18] sm:$0xff]  ;;  %v12032_v39 = vld [vmem:[%s12660_s14 + $0x20] sm:$0xff]  ;;  %v12146_v42 = vld [vmem:[%s16160_s3 + $0x10] sm:$0xff]  ;;  %339 = vst [vmem:[#allocation2 + $0x38] sm:$0xff] %v12565_v51 }
  0x18   : > { %12532 = vmatpush.bf16.msra.mxu3 %v10071_v13  ;;  %12529 = vmatpush.bf16.msra.mxu2 %v10067_v12  ;;  %v12033_v43 = vld [vmem:[%s12660_s14 + $0x28] sm:$0xff]  ;;  %v12042_v44 = vld [vmem:[%s12660_s14 + $0x70] sm:$0xff]  ;;  %v12167_v47 = vld [vmem:[%s16160_s3 + $0xb8] sm:$0xff]  ;;  %1617 = vst [vmem:[#allocation3 + $0x2e0] sm:$0xff] %v12565_v51 }
  0x19   : > { %v12153_v45 = vld [vmem:[%s16160_s3 + $0x48] sm:$0xff]  ;;  %v12175_v48 = vld [vmem:[%s16160_s3 + $0xf8] sm:$0xff]  ;;  %v12166_v49 = vld [vmem:[%s16160_s3 + $0xb0] sm:$0xff]  ;;  %1618 = vst [vmem:[#allocation3 + $0x2f8] sm:$0xff] %v12565_v51 }
  0x1a   : > { %v12145_v46 = vld [vmem:[%s16160_s3 + $0x8] sm:$0xff]  ;;  %v12174_v50 = vld [vmem:[%s16160_s3 + $0xf0] sm:$0xff]  ;;  %v12144_v53 = vld [vmem:[%s16160_s3] sm:$0xff] }
  0x1b   : > { %1032 = vmatpush.bf16.msra.mxu0 %v10059_v18  ;;  %1121 = vmatpush.bf16.msra.mxu1 %v10063_v19  ;;  %v12034_v52 = vld [vmem:[%s12660_s14 + $0x30] sm:$0xff]  ;;  %v12043_v54 = vld [vmem:[%s12660_s14 + $0x78] sm:$0xff]  ;;  %v12152_v55 = vld [vmem:[%s16160_s3 + $0x40] sm:$0xff] }
  0x1c   : > { %12533 = vmatpush.bf16.msra.mxu3 %v10063_v19  ;;  %12530 = vmatpush.bf16.msra.mxu2 %v10059_v18  ;;  %v12165_v56 = vld [vmem:[%s16160_s3 + $0xa8] sm:$0xff]  ;;  %v12164_v58 = vld [vmem:[%s16160_s3 + $0xa0] sm:$0xff]  ;;  %v12163_v60 = vld [vmem:[%s16160_s3 + $0x98] sm:$0xff] }
  0x1d   : > { %v12173_v57 = vld [vmem:[%s16160_s3 + $0xe8] sm:$0xff]  ;;  %v12172_v59 = vld [vmem:[%s16160_s3 + $0xe0] sm:$0xff]  ;;  %v12171_v61 = vld [vmem:[%s16160_s3 + $0xd8] sm:$0xff] }
  0x1e   : > { %10072 = vmatmul.msk.bf16.vlgmr.msra.gmra.mxu0 %vm969_vm1, %v12028_v22  ;;  %10088 = vmatmul.msk.bf16.vlgmr.msra.gmra.mxu1 %vm969_vm1, %v12028_v22  ;;  %v10106_v62 = vld [vmem:[#allocation3] sm:$0xf]  ;;  %v12051_v63 = vld [vmem:[#allocation3 + $0x14] sm:$0xf0]  ;;  %v12162_v1 = vld [vmem:[%s16160_s3 + $0x90] sm:$0xff] }
  0x1f   : > { %10096 = vmatmul.msk.bf16.vlgmr.msra.gmra.mxu3 %vm969_vm1, %v12670_v23  ;;  %10081 = vmatmul.msk.bf16.vlgmr.msra.gmra.mxu2 %vm969_vm1, %v12037_v24  ;;  %v12035_v0 = vld [vmem:[%s12660_s14 + $0x38] sm:$0xff]  ;;  %v12170_v2 = vld [vmem:[%s16160_s3 + $0xd0] sm:$0xff]  ;;  %v12793_v3 = vor.u32 %v12051_v63, %v10106_v62  ;;  %v5529_v4 = vld [vmem:[#allocation2 + $0xa0] sm:$0xf] }
  0x20   : > { %2668 = vmatpush.bf16.msrb.mxu3 %v12159_v20  ;;  %2579 = vmatpush.bf16.msrb.mxu2 %v12151_v21  ;;  %v5530_v5 = vld [vmem:[#allocation2 + $0xc0] sm:$0xf]  ;;  %5561 = vst [vmem:[#allocation3] sm:$0xf] %v5529_v4  ;;  %v12161_v6 = vld [vmem:[%s16160_s3 + $0x88] sm:$0xff]  ;;  %v12183_v15 = vld [vmem:[%s16160_s3 + $0x138] sm:$0xff] }
  0x21   : > { %2757 = vmatpush.bf16.msrb.mxu0 %v12167_v47  ;;  %2846 = vmatpush.bf16.msrb.mxu1 %v12175_v48  ;;  %16457 = vst [vmem:[#allocation7_spill] sm:$0xff] %v12793_v3  ;;  %v12169_v7 = vld [vmem:[%s16160_s3 + $0xc8] sm:$0xff]  ;;  %v7806_v8 = vld [vmem:[#allocation2 + $0xa0] sm:$0xf]  ;;  %v12191_v16 = vld [vmem:[%s16160_s3 + $0x178] sm:$0xff] }
  0x22   : > { %5562 = vst [vmem:[#allocation3 + $0x18] sm:$0xf] %v5530_v5  ;;  %v7807_v9 = vld [vmem:[#allocation2 + $0xc0] sm:$0xf]  ;;  %v12048_v19 = vld [vmem:[#allocation3 + $0x4] sm:$0xf] }
  0x23   : > { %v12160_v10 = vld [vmem:[%s16160_s3 + $0x80] sm:$0xff]  ;;  %v10108_v20 = vld [vmem:[#allocation3 + $0x18] sm:$0xf0] }
  0x24   : > { %2669 = vmatpush.bf16.msrb.mxu3 %v12158_v25  ;;  %2580 = vmatpush.bf16.msrb.mxu2 %v12150_v26  ;;  %v12168_v11 = vld [vmem:[%s16160_s3 + $0xc0] sm:$0xff] }
  0x25   : > { %2758 = vmatpush.bf16.msrb.mxu0 %v12166_v49  ;;  %2847 = vmatpush.bf16.msrb.mxu1 %v12174_v50  ;;  %v858_v13 = vld [vmem:[%s16159_s2] sm:$0x3] }
  0x26   : > { %v12824_v17 = vperm.slane %v858_v13, 0  ;;  %v12826_v18 = vperm.slane %v858_v13, 1 }
  0x27   : > { %v12811_v12 = vld [vmem:[#allocation3] sm:$0xf] }
  0x28   : > { %2670 = vmatpush.bf16.msrb.mxu3 %v12157_v29  ;;  %2581 = vmatpush.bf16.msrb.mxu2 %v12149_v30  ;;  %16458 = vst [vmem:[#allocation8_spill] sm:$0xff] %v12811_v12 }
  0x29   : > { %2759 = vmatpush.bf16.msrb.mxu0 %v12165_v56  ;;  %2848 = vmatpush.bf16.msrb.mxu1 %v12173_v57  ;;  %v12816_v14 = vld [vmem:[#allocation3 + $0x14] sm:$0xf0]  ;;  %7838 = vst [vmem:[#allocation3] sm:$0xf] %v7806_v8 }
  0x2a   : > { %16459 = vst [vmem:[#allocation9_spill] sm:$0xff] %v12816_v14 }
  0x2b   : > { %7839 = vst [vmem:[#allocation3 + $0x18] sm:$0xf] %v7807_v9 }
  0x2c   : > { %2671 = vmatpush.bf16.msrb.mxu3 %v12156_v33  ;;  %2582 = vmatpush.bf16.msrb.mxu2 %v12148_v34 }
  0x2d   : > { %2760 = vmatpush.bf16.msrb.mxu0 %v12164_v58  ;;  %2849 = vmatpush.bf16.msrb.mxu1 %v12172_v59 }
  0x2e   : > { %10073 = vmatmul.msk.bf16.gmra.mxu0 %vm969_vm1, %v12029_v27  ;;  %10089 = vmatmul.msk.bf16.gmra.mxu1 %vm969_vm1, %v12029_v27 }
  0x2f   : > { %10097 = vmatmul.msk.bf16.gmra.mxu3 %vm969_vm1, %v12037_v24  ;;  %10082 = vmatmul.msk.bf16.gmra.mxu2 %vm969_vm1, %v12038_v28  ;;  %v12828_v24 = vor.u32 %v12048_v19, %v10108_v20 }
  0x30   : > { %2672 = vmatpush.bf16.msrb.mxu3 %v12155_v37  ;;  %2583 = vmatpush.bf16.msrb.mxu2 %v12147_v38 }
  0x31   : > { %2761 = vmatpush.bf16.msrb.mxu0 %v12163_v60  ;;  %2850 = vmatpush.bf16.msrb.mxu1 %v12171_v61  ;;  %16460 = vst [vmem:[#allocation10_spill] sm:$0xff] %v12828_v24 }
  0x34   : > { %2673 = vmatpush.bf16.msrb.mxu3 %v12154_v41  ;;  %2584 = vmatpush.bf16.msrb.mxu2 %v12146_v42 }
  0x35   : > { %2762 = vmatpush.bf16.msrb.mxu0 %v12162_v1  ;;  %2851 = vmatpush.bf16.msrb.mxu1 %v12170_v2 }
  0x38   : > { %2674 = vmatpush.bf16.msrb.mxu3 %v12153_v45  ;;  %2585 = vmatpush.bf16.msrb.mxu2 %v12145_v46 }
  0x39   : > { %2763 = vmatpush.bf16.msrb.mxu0 %v12161_v6  ;;  %2852 = vmatpush.bf16.msrb.mxu1 %v12169_v7 }
  0x3c   : > { %2586 = vmatpush.bf16.msrb.mxu2 %v12144_v53  ;;  %2675 = vmatpush.bf16.msrb.mxu3 %v12152_v55 }
  0x3d   : > { %2764 = vmatpush.bf16.msrb.mxu0 %v12160_v10  ;;  %2853 = vmatpush.bf16.msrb.mxu1 %v12168_v11 }
  0x3e   : > { %10074 = vmatmul.msk.bf16.gmra.mxu0 %vm969_vm1, %v12030_v31  ;;  %10090 = vmatmul.msk.bf16.gmra.mxu1 %vm969_vm1, %v12030_v31 }
  0x3f   : > { %10098 = vmatmul.msk.bf16.gmra.mxu3 %vm969_vm1, %v12038_v28  ;;  %10083 = vmatmul.msk.bf16.gmra.mxu2 %vm969_vm1, %v12039_v32 }
  0x40   : > { %2935 = vmatpush.bf16.msra.mxu2 %v12183_v15  ;;  %3024 = vmatpush.bf16.msra.mxu3 %v12191_v16 }
  0x4e   : > { %10075 = vmatmul.msk.bf16.gmra.mxu0 %vm969_vm1, %v12031_v35  ;;  %10091 = vmatmul.msk.bf16.gmra.mxu1 %vm969_vm1, %v12031_v35 }
  0x4f   : > { %10099 = vmatmul.msk.bf16.gmra.mxu3 %vm969_vm1, %v12039_v32  ;;  %10084 = vmatmul.msk.bf16.gmra.mxu2 %vm969_vm1, %v12040_v36 }
  0x5e   : > { %10076 = vmatmul.msk.bf16.gmra.mxu0 %vm969_vm1, %v12032_v39  ;;  %10092 = vmatmul.msk.bf16.gmra.mxu1 %vm969_vm1, %v12032_v39 }
  0x5f   : > { %10100 = vmatmul.msk.bf16.gmra.mxu3 %vm969_vm1, %v12040_v36  ;;  %10085 = vmatmul.msk.bf16.gmra.mxu2 %vm969_vm1, %v12041_v40 }
  0x6e   : > { %10077 = vmatmul.msk.bf16.gmra.mxu0 %vm969_vm1, %v12033_v43  ;;  %10093 = vmatmul.msk.bf16.gmra.mxu1 %vm969_vm1, %v12033_v43 }
  0x6f   : > { %10101 = vmatmul.msk.bf16.gmra.mxu3 %vm969_vm1, %v12041_v40  ;;  %10086 = vmatmul.msk.bf16.gmra.mxu2 %vm969_vm1, %v12042_v44 }
  0x7e   : > { %10078 = vmatmul.msk.bf16.gmra.mxu0 %vm969_vm1, %v12034_v52  ;;  %10094 = vmatmul.msk.bf16.gmra.mxu1 %vm969_vm1, %v12034_v52 }
  0x7f   : > { %10102 = vmatmul.msk.bf16.gmra.mxu3 %vm969_vm1, %v12042_v44  ;;  %10087 = vmatmul.msk.bf16.gmra.mxu2 %vm969_vm1, %v12043_v54 }
  0x8e   : > { %10079 = vmatmul.msk.bf16.gmra.mxu0 %vm969_vm1, %v12035_v0  ;;  %10095 = vmatmul.msk.bf16.gmra.mxu1 %vm969_vm1, %v12035_v0 }
  0x8f   : > { %10103 = vmatmul.msk.bf16.gmra.mxu3 %vm969_vm1, %v12043_v54  ;;  %2587 = vmatmul.bf16.vlgmr.msrb.gmra.mxu2 %v12793_v3 }
  0x9b   : > { %v1034_v21 = vpop.f32.mrf.mxu0  ;;  %v1123_v22 = vpop.f32.mrf.mxu1 }
  0x9c   : > { %v1035_v25 = vadd.f32 %v1034_v21, %v12824_v17  ;;  %v1124_v26 = vadd.f32 %v1123_v22, %v12826_v18  ;;  %v12182_v21 = vld [vmem:[%s16160_s3 + $0x130] sm:$0xff] }
  0x9d   : > { %v12190_v22 = vld [vmem:[%s16160_s3 + $0x170] sm:$0xff]  ;;  %2936 = vmatpush.bf16.msra.mxu2 %v12182_v21 }
  0x9e   : > { %vm1203_vm2 = vcmp.gt.f32.partialorder %v1035_v25, 0.0  ;;  %v1267_v27 = vmul.f32 0.2, %v1035_v25  ;;  %vm1204_vm3 = vcmp.gt.f32.partialorder %v1124_v26, 0.0  ;;  %v1268_v28 = vmul.f32 0.2, %v1124_v26  ;;  %10080 = vmatmul.msk.bf16.gmra.mxu0 %vm969_vm1, %v12670_v23  ;;  %3025 = vmatpush.bf16.msra.mxu3 %v12190_v22 }
  0x9f   : > { %2676 = vmatmul.bf16.vlgmr.msrb.gmra.mxu3 %v12828_v24 }
  0xa0   : > { %v1331_v29 = vsel %vm1203_vm2, %v1035_v25, %v1267_v27  ;;  %v1332_v30 = vsel %vm1204_vm3, %v1124_v26, %v1268_v28 }
  0xa1   : > { %v1395_v31 = vpack.c.bf16 %v1332_v30, %v1331_v29 }
  0xa2   : > { %v12835_v32 = vpop.f32.mrf.mxu3  ;;  %v1079_v33 = vpop.f32.mrf.mxu2 }
  0xa3   : > { %1427 = vst [vmem:[#allocation2 + $0xf8] sm:$0xff] %v1395_v31  ;;  %v1036_v34 = vpop.f32.mrf.mxu0  ;;  %v1125_v35 = vpop.f32.mrf.mxu1  ;;  %v1080_v46 = vadd.f32 %v1079_v33, %v12824_v17 }
  0xa4   : > { %1459 = vst [vmem:[#allocation3 + $0x8] sm:$0xff] %v1395_v31  ;;  %v1037_v36 = vadd.f32 %v1036_v34, %v12824_v17  ;;  %v1126_v37 = vadd.f32 %v1125_v35, %v12826_v18 }
  0xa5   : > { %1525 = vst [vmem:[#allocation3 + $0x30] sm:$0xff] %v1395_v31  ;;  %v1303_v51 = vmul.f32 0.2, %v1080_v46  ;;  %vm1239_vm8 = vcmp.gt.f32.partialorder %v1080_v46, 0.0 }
  0xa6   : > { %vm1205_vm4 = vcmp.gt.f32.partialorder %v1037_v36, 0.0  ;;  %v1269_v38 = vmul.f32 0.2, %v1037_v36  ;;  %vm1206_vm5 = vcmp.gt.f32.partialorder %v1126_v37, 0.0  ;;  %v1270_v23 = vmul.f32 0.2, %v1126_v37 }
  0xa7   : > { %v1367_v1 = vsel %vm1239_vm8, %v1080_v46, %v1303_v51 }
  0xa8   : > { %v1333_v39 = vsel %vm1205_vm4, %v1037_v36, %v1269_v38  ;;  %v1334_v40 = vsel %vm1206_vm5, %v1126_v37, %v1270_v23 }
  0xa9   : > { %v1396_v41 = vpack.c.bf16 %v1334_v40, %v1333_v39 }
  0xaa   : > { %v12839_v42 = vpop.f32.mrf.mxu3  ;;  %v1081_v43 = vpop.f32.mrf.mxu2 }
  0xab   : > { %1428 = vst [vmem:[#allocation2 + $0x58] sm:$0xff] %v1396_v41  ;;  %v1039_v44 = vpop.f32.mrf.mxu0  ;;  %v1128_v45 = vpop.f32.mrf.mxu1  ;;  %v10114_v55 = vld [vmem:[#allocation3 + $0x8] sm:$0xf]  ;;  %v12049_v56 = vld [vmem:[#allocation3 + $0xc] sm:$0xf]  ;;  %v1082_v20 = vadd.f32 %v1081_v43, %v12824_v17 }
  0xac   : > { %1460 = vst [vmem:[#allocation3 + $0x20] sm:$0xff] %v1396_v41  ;;  %v1040_v47 = vadd.f32 %v1039_v44, %v12824_v17  ;;  %v1129_v48 = vadd.f32 %v1128_v45, %v12826_v18  ;;  %v10130_v58 = vld [vmem:[#allocation3 + $0x30] sm:$0xf]  ;;  %v12054_v59 = vld [vmem:[#allocation3 + $0x34] sm:$0xf] }
  0xad   : > { %1526 = vst [vmem:[#allocation3 + $0x48] sm:$0xff] %v1396_v41  ;;  %v1305_v34 = vmul.f32 0.2, %v1082_v20  ;;  %vm1241_vm12 = vcmp.gt.f32.partialorder %v1082_v20, 0.0 }
  0xae   : > { %vm1207_vm6 = vcmp.gt.f32.partialorder %v1040_v47, 0.0  ;;  %v1271_v49 = vmul.f32 0.2, %v1040_v47  ;;  %vm1208_vm7 = vcmp.gt.f32.partialorder %v1129_v48, 0.0  ;;  %v1272_v50 = vmul.f32 0.2, %v1129_v48 }
  0xaf   : > { %v1369_v41 = vsel %vm1241_vm12, %v1082_v20, %v1305_v34 }
  0xb0   : > { %v1335_v52 = vsel %vm1207_vm6, %v1040_v47, %v1271_v49  ;;  %v1336_v53 = vsel %vm1208_vm7, %v1129_v48, %v1272_v50 }
  0xb1   : > { %v1397_v54 = vpack.c.bf16 %v1336_v53, %v1335_v52 }
  0xb2   : > { %v1168_v57 = vpop.f32.mrf.mxu3  ;;  %v1084_v60 = vpop.f32.mrf.mxu2 }
  0xb3   : > { %1429 = vst [vmem:[#allocation2 + $0x20] sm:$0xff] %v1397_v54  ;;  %v1041_v61 = vpop.f32.mrf.mxu0  ;;  %v1130_v62 = vpop.f32.mrf.mxu1  ;;  %v12052_v63 = vld [vmem:[#allocation3 + $0x1c] sm:$0xf0]  ;;  %v10116_v0 = vld [vmem:[#allocation3 + $0x20] sm:$0xf0]  ;;  %v1169_v2 = vadd.f32 %v1168_v57, %v12826_v18  ;;  %v1085_v38 = vadd.f32 %v1084_v60, %v12824_v17 }
  0xb4   : > { %1461 = vst [vmem:[#allocation3 + $0x38] sm:$0xff] %v1397_v54  ;;  %v1042_v4 = vadd.f32 %v1041_v61, %v12824_v17  ;;  %v1131_v5 = vadd.f32 %v1130_v62, %v12826_v18  ;;  %v12847_v6 = vor.u32 %v12052_v63, %v10114_v55  ;;  %v12849_v7 = vor.u32 %v12049_v56, %v10116_v0  ;;  %v12057_v8 = vld [vmem:[#allocation3 + $0x44] sm:$0xf0]  ;;  %v10132_v9 = vld [vmem:[#allocation3 + $0x48] sm:$0xf0] }
  0xb5   : > { %1587 = vst [vmem:[#allocation3 + $0x10] sm:$0xff] %v1397_v54  ;;  %vm1240_vm9 = vcmp.gt.f32.partialorder %v1169_v2, 0.0  ;;  %v1304_v10 = vmul.f32 0.2, %v1169_v2  ;;  %v12851_v11 = vor.u32 %v12057_v8, %v10130_v58  ;;  %v12853_v13 = vor.u32 %v12054_v59, %v10132_v9 }
  0xb6   : > { %16461 = vst [vmem:[#allocation11_spill] sm:$0xff] %v12847_v6  ;;  %vm1209_vm10 = vcmp.gt.f32.partialorder %v1042_v4, 0.0  ;;  %v1273_v15 = vmul.f32 0.2, %v1042_v4  ;;  %vm1210_vm11 = vcmp.gt.f32.partialorder %v1131_v5, 0.0  ;;  %2765 = vmatmul.bf16.vlgmr.msrb.gmra.mxu0 %v12847_v6  ;;  %2854 = vmatmul.bf16.vlgmr.msrb.gmra.mxu1 %v12849_v7  ;;  %vm1243_vm0 = vcmp.gt.f32.partialorder %v1085_v38, 0.0 }
  0xb7   : > { %16462 = vst [vmem:[#allocation12_spill] sm:$0xff] %v12849_v7  ;;  %v1274_v16 = vmul.f32 0.2, %v1131_v5  ;;  %v1368_v19 = vsel %vm1240_vm9, %v1169_v2, %v1304_v10  ;;  %2592 = vmatmul.bf16.gmra.mxu2 %v12851_v11  ;;  %2681 = vmatmul.bf16.gmra.mxu3 %v12853_v13  ;;  %v1307_v46 = vmul.f32 0.2, %v1085_v38 }
  0xb8   : > { %16463 = vst [vmem:[#allocation13_spill] sm:$0xff] %v12851_v11  ;;  %v1337_v25 = vsel %vm1209_vm10, %v1042_v4, %v1273_v15  ;;  %v1413_v26 = vpack.c.bf16 %v1368_v19, %v1367_v1 }
  0xb9   : > { %16464 = vst [vmem:[#allocation14_spill] sm:$0xff] %v12853_v13  ;;  %v1338_v27 = vsel %vm1210_vm11, %v1131_v5, %v1274_v16  ;;  %v1371_v60 = vsel %vm1243_vm0, %v1085_v38, %v1307_v46 }
  0xba   : > { %1527 = vst [vmem:[#allocation3 + $0x60] sm:$0xff] %v1397_v54  ;;  %v1398_v28 = vpack.c.bf16 %v1338_v27, %v1337_v25  ;;  %v1170_v29 = vpop.f32.mrf.mxu3  ;;  %v1086_v30 = vpop.f32.mrf.mxu2 }
  0xbb   : > { %1445 = vst [vmem:[#allocation2 + $0xd0] sm:$0xff] %v1413_v26  ;;  %v1044_v31 = vpop.f32.mrf.mxu0  ;;  %v1133_v33 = vpop.f32.mrf.mxu1  ;;  %v1171_v35 = vadd.f32 %v1170_v29, %v12826_v18  ;;  %v10138_v53 = vld [vmem:[#allocation3 + $0x38] sm:$0xf]  ;;  %v12055_v54 = vld [vmem:[#allocation3 + $0x3c] sm:$0xf]  ;;  %v1087_v15 = vadd.f32 %v1086_v30, %v12824_v17 }
  0xbc   : > { %1477 = vst [vmem:[#allocation3 + $0x1b8] sm:$0xff] %v1413_v26  ;;  %v1045_v36 = vadd.f32 %v1044_v31, %v12824_v17  ;;  %v1134_v37 = vadd.f32 %v1133_v33, %v12826_v18 }
  0xbd   : > { %1430 = vst [vmem:[#allocation2 + $0x118] sm:$0xff] %v1398_v28  ;;  %vm1242_vm13 = vcmp.gt.f32.partialorder %v1171_v35, 0.0  ;;  %v1306_v23 = vmul.f32 0.2, %v1171_v35  ;;  %v1309_v30 = vmul.f32 0.2, %v1087_v15 }
  0xbe   : > { %1462 = vst [vmem:[#allocation3 + $0x50] sm:$0xff] %v1398_v28  ;;  %vm1211_vm14 = vcmp.gt.f32.partialorder %v1045_v36, 0.0  ;;  %v1275_v39 = vmul.f32 0.2, %v1045_v36  ;;  %vm1212_vm15 = vcmp.gt.f32.partialorder %v1134_v37, 0.0  ;;  %vm1245_vm4 = vcmp.gt.f32.partialorder %v1087_v15, 0.0 }
  0xbf   : > { %1588 = vst [vmem:[#allocation3 + $0x28] sm:$0xff] %v1398_v28  ;;  %v1276_v40 = vmul.f32 0.2, %v1134_v37  ;;  %v1370_v43 = vsel %vm1242_vm13, %v1171_v35, %v1306_v23 }
  0xc0   : > { %1543 = vst [vmem:[#allocation3 + $0x1e0] sm:$0xff] %v1413_v26  ;;  %v1339_v44 = vsel %vm1211_vm14, %v1045_v36, %v1275_v39  ;;  %v1414_v45 = vpack.c.bf16 %v1370_v43, %v1369_v41 }
  0xc1   : > { %1528 = vst [vmem:[#allocation3 + $0x78] sm:$0xff] %v1398_v28  ;;  %v1340_v47 = vsel %vm1212_vm15, %v1134_v37, %v1276_v40  ;;  %v10154_v0 = vld [vmem:[#allocation3 + $0x60] sm:$0xf]  ;;  %v12060_v1 = vld [vmem:[#allocation3 + $0x64] sm:$0xf]  ;;  %v1373_v40 = vsel %vm1245_vm4, %v1087_v15, %v1309_v30  ;;  %v12189_v30 = vld [vmem:[%s16160_s3 + $0x168] sm:$0xff] }
  0xc2   : > { %v1399_v48 = vpack.c.bf16 %v1340_v47, %v1339_v44  ;;  %1446 = vst [vmem:[#allocation2 + $0x50] sm:$0xff] %v1414_v45  ;;  %v1173_v49 = vpop.f32.mrf.mxu3  ;;  %v1089_v50 = vpop.f32.mrf.mxu2  ;;  %v1571_v4 = vld [vmem:[#allocation2 + $0xd0] sm:$0xff]  ;;  %3026 = vmatpush.bf16.msra.mxu3 %v12189_v30 }
  0xc3   : > { %1478 = vst [vmem:[#allocation3 + $0x1d0] sm:$0xff] %v1414_v45  ;;  %v1046_v51 = vpop.f32.mrf.mxu0  ;;  %v1135_v52 = vpop.f32.mrf.mxu1  ;;  %v1174_v55 = vadd.f32 %v1173_v49, %v12826_v18  ;;  %v1090_v35 = vadd.f32 %v1089_v50, %v12824_v17 }
  0xc4   : > { %1431 = vst [vmem:[#allocation2 + $0x70] sm:$0xff] %v1399_v48  ;;  %v1047_v56 = vadd.f32 %v1046_v51, %v12824_v17  ;;  %v1136_v57 = vadd.f32 %v1135_v52, %v12826_v18 }
  0xc5   : > { %v12058_v58 = vld [vmem:[#allocation3 + $0x4c] sm:$0xf0]  ;;  %v10140_v59 = vld [vmem:[#allocation3 + $0x50] sm:$0xf0]  ;;  %1463 = vst [vmem:[#allocation3 + $0x68] sm:$0xff] %v1399_v48  ;;  %vm1244_vm1 = vcmp.gt.f32.partialorder %v1174_v55, 0.0 }
  0xc6   : > { %v12874_v61 = vor.u32 %v12058_v58, %v10138_v53  ;;  %v12876_v62 = vor.u32 %v12055_v54, %v10140_v59  ;;  %v1308_v63 = vmul.f32 0.2, %v1174_v55  ;;  %1529 = vst [vmem:[#allocation3 + $0x90] sm:$0xff] %v1399_v48  ;;  %vm1213_vm2 = vcmp.gt.f32.partialorder %v1047_v56, 0.0 }
  0xc7   : > { %v1277_v2 = vmul.f32 0.2, %v1047_v56  ;;  %vm1214_vm3 = vcmp.gt.f32.partialorder %v1136_v57, 0.0  ;;  %v1278_v5 = vmul.f32 0.2, %v1136_v57  ;;  %1603 = vst [vmem:[#allocation3 + $0x190] sm:$0xff] %v1571_v4 }
  0xc8   : > { %16465 = vst [vmem:[#allocation15_spill] sm:$0xff] %v12874_v61  ;;  %2770 = vmatmul.bf16.gmra.mxu0 %v12874_v61  ;;  %2859 = vmatmul.bf16.gmra.mxu1 %v12876_v62  ;;  %v1372_v8 = vsel %vm1244_vm1, %v1174_v55, %v1308_v63  ;;  %v12063_v9 = vld [vmem:[#allocation3 + $0x74] sm:$0xf0]  ;;  %v10156_v10 = vld [vmem:[#allocation3 + $0x78] sm:$0xf0]  ;;  %vm1247_vm8 = vcmp.gt.f32.partialorder %v1090_v35, 0.0 }
  0xc9   : > { %16466 = vst [vmem:[#allocation16_spill] sm:$0xff] %v12876_v62  ;;  %v1341_v16 = vsel %vm1213_vm2, %v1047_v56, %v1277_v2  ;;  %v1415_v19 = vpack.c.bf16 %v1372_v8, %v1371_v60  ;;  %v12881_v20 = vor.u32 %v12063_v9, %v10154_v0  ;;  %v12883_v21 = vor.u32 %v12060_v1, %v10156_v10  ;;  %v1512_v37 = vld [vmem:[#allocation2 + $0x50] sm:$0xff] }
  0xca   : > { %v1342_v22 = vsel %vm1214_vm3, %v1136_v57, %v1278_v5  ;;  %v1175_v26 = vpop.f32.mrf.mxu3  ;;  %v12887_v27 = vpop.f32.mrf.mxu2  ;;  %v1311_v45 = vmul.f32 0.2, %v1090_v35  ;;  %1544 = vst [vmem:[#allocation3 + $0x1f8] sm:$0xff] %v1512_v37  ;;  %v1572_v8 = vld [vmem:[#allocation2 + $0x50] sm:$0xff] }
  0xcb   : > { %16467 = vst [vmem:[#allocation17_spill] sm:$0xff] %v12881_v20  ;;  %v1400_v25 = vpack.c.bf16 %v1342_v22, %v1341_v16  ;;  %2597 = vmatmul.bf16.gmra.mxu2 %v12881_v20  ;;  %2686 = vmatmul.bf16.gmra.mxu3 %v12883_v21  ;;  %v1049_v28 = vpop.f32.mrf.mxu0  ;;  %v1138_v29 = vpop.f32.mrf.mxu1  ;;  %v1176_v31 = vadd.f32 %v1175_v26, %v12826_v18  ;;  %v1557_v23 = vld [vmem:[#allocation2 + $0x70] sm:$0xff] }
  0xcc   : > { %16468 = vst [vmem:[#allocation18_spill] sm:$0xff] %v12883_v21  ;;  %v1050_v33 = vadd.f32 %v1049_v28, %v12824_v17  ;;  %v1139_v34 = vadd.f32 %v1138_v29, %v12826_v18  ;;  %v10162_v52 = vld [vmem:[#allocation3 + $0x68] sm:$0xf]  ;;  %v12061_v53 = vld [vmem:[#allocation3 + $0x6c] sm:$0xf]  ;;  %v1375_v59 = vsel %vm1247_vm8, %v1090_v35, %v1311_v45 }
  0xcd   : > { %1447 = vst [vmem:[#allocation2 + $0x98] sm:$0xff] %v1415_v19  ;;  %vm1246_vm5 = vcmp.gt.f32.partialorder %v1176_v31, 0.0  ;;  %v1310_v36 = vmul.f32 0.2, %v1176_v31  ;;  %v10178_v1 = vld [vmem:[#allocation3 + $0x90] sm:$0xf] }
  0xce   : > { %1479 = vst [vmem:[#allocation3 + $0x1e8] sm:$0xff] %v1415_v19  ;;  %vm1215_vm6 = vcmp.gt.f32.partialorder %v1050_v33, 0.0  ;;  %v1279_v38 = vmul.f32 0.2, %v1050_v33  ;;  %vm1216_vm7 = vcmp.gt.f32.partialorder %v1139_v34, 0.0  ;;  %v12181_v29 = vld [vmem:[%s16160_s3 + $0x128] sm:$0xff] }
  0xcf   : > { %1432 = vst [vmem:[#allocation2 + $0x100] sm:$0xff] %v1400_v25  ;;  %v1280_v39 = vmul.f32 0.2, %v1139_v34  ;;  %v1374_v41 = vsel %vm1246_vm5, %v1176_v31, %v1310_v36  ;;  %v12066_v2 = vld [vmem:[#allocation3 + $0x94] sm:$0xf]  ;;  %2937 = vmatpush.bf16.msra.mxu2 %v12181_v29 }
  0xd0   : > { %1464 = vst [vmem:[#allocation3 + $0x80] sm:$0xff] %v1400_v25  ;;  %v1343_v43 = vsel %vm1215_vm6, %v1050_v33, %v1279_v38  ;;  %v1416_v44 = vpack.c.bf16 %v1374_v41, %v1373_v40 }
  0xd1   : > { %1545 = vst [vmem:[#allocation3 + $0x210] sm:$0xff] %v1415_v19  ;;  %v1344_v46 = vsel %vm1216_vm7, %v1139_v34, %v1280_v39  ;;  %v1092_v19 = vadd.f32 %v12887_v27, %v12824_v17 }
  0xd2   : > { %1530 = vst [vmem:[#allocation3 + $0xa8] sm:$0xff] %v1400_v25  ;;  %v1401_v47 = vpack.c.bf16 %v1344_v46, %v1343_v43  ;;  %v1178_v48 = vpop.f32.mrf.mxu3  ;;  %v1094_v49 = vpop.f32.mrf.mxu2 }
  0xd3   : > { %1589 = vst [vmem:[#allocation3 + $0x40] sm:$0xff] %v1557_v23  ;;  %v1051_v50 = vpop.f32.mrf.mxu0  ;;  %v1140_v51 = vpop.f32.mrf.mxu1  ;;  %v1179_v54 = vadd.f32 %v1178_v48, %v12826_v18  ;;  %v1313_v37 = vmul.f32 0.2, %v1092_v19  ;;  %vm1249_vm12 = vcmp.gt.f32.partialorder %v1092_v19, 0.0  ;;  %v1095_v40 = vadd.f32 %v1094_v49, %v12824_v17 }
  0xd4   : > { %1448 = vst [vmem:[#allocation2 + $0x78] sm:$0xff] %v1416_v44  ;;  %v1052_v55 = vadd.f32 %v1051_v50, %v12824_v17  ;;  %v1141_v56 = vadd.f32 %v1140_v51, %v12826_v18 }
  0xd5   : > { %1480 = vst [vmem:[#allocation3 + $0x200] sm:$0xff] %v1416_v44  ;;  %vm1248_vm9 = vcmp.gt.f32.partialorder %v1179_v54, 0.0  ;;  %v1312_v0 = vmul.f32 0.2, %v1179_v54  ;;  %vm1251_vm0 = vcmp.gt.f32.partialorder %v1095_v40, 0.0 }
  0xd6   : > { %1433 = vst [vmem:[#allocation2 + $0x108] sm:$0xff] %v1401_v47  ;;  %v1558_v4 = vld [vmem:[#allocation2 + $0x100] sm:$0xff]  ;;  %vm1217_vm10 = vcmp.gt.f32.partialorder %v1052_v55, 0.0  ;;  %v1281_v5 = vmul.f32 0.2, %v1052_v55  ;;  %vm1218_vm11 = vcmp.gt.f32.partialorder %v1141_v56, 0.0 }
  0xd7   : > { %v12064_v57 = vld [vmem:[#allocation3 + $0x7c] sm:$0xf0]  ;;  %v10164_v58 = vld [vmem:[#allocation3 + $0x80] sm:$0xf0]  ;;  %1465 = vst [vmem:[#allocation3 + $0x98] sm:$0xff] %v1401_v47  ;;  %v1376_v10 = vsel %vm1248_vm9, %v1179_v54, %v1312_v0 }
  0xd8   : > { %v12897_v60 = vor.u32 %v12064_v57, %v10162_v52  ;;  %v12899_v63 = vor.u32 %v12061_v53, %v10164_v58  ;;  %1531 = vst [vmem:[#allocation3 + $0xc0] sm:$0xff] %v1401_v47  ;;  %v1282_v9 = vmul.f32 0.2, %v1141_v56  ;;  %v1345_v22 = vsel %vm1217_vm10, %v1052_v55, %v1281_v5 }
  0xd9   : > { %v12069_v15 = vld [vmem:[#allocation3 + $0xa4] sm:$0xf0]  ;;  %v10180_v16 = vld [vmem:[#allocation3 + $0xa8] sm:$0xf0]  ;;  %v1417_v25 = vpack.c.bf16 %v1376_v10, %v1375_v59  ;;  %1590 = vst [vmem:[#allocation3 + $0x58] sm:$0xff] %v1558_v4  ;;  %v1377_v47 = vsel %vm1249_vm12, %v1092_v19, %v1313_v37 }
  0xda   : > { %16469 = vst [vmem:[#allocation19_spill] sm:$0xff] %v12897_v60  ;;  %2775 = vmatmul.bf16.gmra.mxu0 %v12897_v60  ;;  %2864 = vmatmul.bf16.gmra.mxu1 %v12899_v63  ;;  %v12905_v26 = vor.u32 %v12069_v15, %v10178_v1  ;;  %v12907_v28 = vor.u32 %v12066_v2, %v10180_v16  ;;  %v1180_v27 = vpop.f32.mrf.mxu3  ;;  %v12918_v34 = vpop.f32.mrf.mxu2  ;;  %v1315_v52 = vmul.f32 0.2, %v1095_v40 }
  0xdb   : > { %16470 = vst [vmem:[#allocation20_spill] sm:$0xff] %v12899_v63  ;;  %v1346_v31 = vsel %vm1218_vm11, %v1141_v56, %v1282_v9  ;;  %v1054_v35 = vpop.f32.mrf.mxu0  ;;  %v1143_v36 = vpop.f32.mrf.mxu1  ;;  %v1181_v38 = vadd.f32 %v1180_v27, %v12826_v18  ;;  %v1514_v43 = vld [vmem:[#allocation2 + $0x78] sm:$0xff]  ;;  %v1097_v27 = vadd.f32 %v12918_v34, %v12824_v17 }
  0xdc   : > { %16471 = vst [vmem:[#allocation21_spill] sm:$0xff] %v12905_v26  ;;  %v1402_v33 = vpack.c.bf16 %v1346_v31, %v1345_v22  ;;  %2602 = vmatmul.bf16.gmra.mxu2 %v12905_v26  ;;  %2691 = vmatmul.bf16.gmra.mxu3 %v12907_v28  ;;  %v1055_v23 = vadd.f32 %v1054_v35, %v12824_v17 }
  0xdd   : > { %16472 = vst [vmem:[#allocation22_spill] sm:$0xff] %v12907_v28  ;;  %v1144_v39 = vadd.f32 %v1143_v36, %v12826_v18  ;;  %vm1250_vm13 = vcmp.gt.f32.partialorder %v1181_v38, 0.0  ;;  %v1314_v41 = vmul.f32 0.2, %v1181_v38  ;;  %v1559_v45 = vld [vmem:[#allocation2 + $0x108] sm:$0xff]  ;;  %vm1253_vm4 = vcmp.gt.f32.partialorder %v1097_v27, 0.0 }
  0xde   : > { %1604 = vst [vmem:[#allocation3 + $0x1a8] sm:$0xff] %v1572_v8  ;;  %vm1219_vm14 = vcmp.gt.f32.partialorder %v1055_v23, 0.0  ;;  %v1283_v44 = vmul.f32 0.2, %v1055_v23  ;;  %v10186_v58 = vld [vmem:[#allocation3 + $0x98] sm:$0xf]  ;;  %v1379_v8 = vsel %vm1251_vm0, %v1095_v40, %v1315_v52 }
  0xdf   : > { %1449 = vst [vmem:[#allocation2 + $0xc8] sm:$0xff] %v1417_v25  ;;  %vm1220_vm15 = vcmp.gt.f32.partialorder %v1144_v39, 0.0  ;;  %v1284_v46 = vmul.f32 0.2, %v1144_v39  ;;  %v1378_v48 = vsel %vm1250_vm13, %v1181_v38, %v1314_v41  ;;  %v12067_v59 = vld [vmem:[#allocation3 + $0x9c] sm:$0xf] }
  0xe0   : > { %1481 = vst [vmem:[#allocation3 + $0x218] sm:$0xff] %v1417_v25  ;;  %v1347_v50 = vsel %vm1219_vm14, %v1055_v23, %v1283_v44  ;;  %v1418_v51 = vpack.c.bf16 %v1378_v48, %v1377_v47  ;;  %v10202_v16 = vld [vmem:[#allocation3 + $0xc0] sm:$0xf]  ;;  %v12072_v19 = vld [vmem:[#allocation3 + $0xc4] sm:$0xf] }
  0xe1   : > { %1434 = vst [vmem:[#allocation2 + $0x88] sm:$0xff] %v1402_v33  ;;  %v1348_v53 = vsel %vm1220_vm15, %v1144_v39, %v1284_v46  ;;  %v1317_v34 = vmul.f32 0.2, %v1097_v27 }
  0xe2   : > { %1466 = vst [vmem:[#allocation3 + $0xb0] sm:$0xff] %v1402_v33  ;;  %v1403_v49 = vpack.c.bf16 %v1348_v53, %v1347_v50  ;;  %v1183_v54 = vpop.f32.mrf.mxu3  ;;  %v1099_v55 = vpop.f32.mrf.mxu2 }
  0xe3   : > { %1547 = vst [vmem:[#allocation3 + $0x240] sm:$0xff] %v1417_v25  ;;  %v1056_v56 = vpop.f32.mrf.mxu0  ;;  %v1145_v57 = vpop.f32.mrf.mxu1  ;;  %v1184_v0 = vadd.f32 %v1183_v54, %v12826_v18  ;;  %v1100_v47 = vadd.f32 %v1099_v55, %v12824_v17 }
  0xe4   : > { %1532 = vst [vmem:[#allocation3 + $0xd8] sm:$0xff] %v1402_v33  ;;  %v1057_v1 = vadd.f32 %v1056_v56, %v12824_v17  ;;  %v1146_v2 = vadd.f32 %v1145_v57, %v12826_v18 }
  0xe5   : > { %1546 = vst [vmem:[#allocation3 + $0x228] sm:$0xff] %v1514_v43  ;;  %vm1252_vm1 = vcmp.gt.f32.partialorder %v1184_v0, 0.0  ;;  %v1316_v15 = vmul.f32 0.2, %v1184_v0  ;;  %vm1255_vm8 = vcmp.gt.f32.partialorder %v1100_v47, 0.0 }
  0xe6   : > { %1591 = vst [vmem:[#allocation3 + $0x70] sm:$0xff] %v1559_v45  ;;  %vm1221_vm2 = vcmp.gt.f32.partialorder %v1057_v1, 0.0  ;;  %v1285_v22 = vmul.f32 0.2, %v1057_v1  ;;  %vm1222_vm3 = vcmp.gt.f32.partialorder %v1146_v2, 0.0 }
  0xe7   : > { %1450 = vst [vmem:[#allocation2 + $0xb0] sm:$0xff] %v1418_v51  ;;  %v1286_v29 = vmul.f32 0.2, %v1146_v2  ;;  %v1380_v30 = vsel %vm1252_vm1, %v1184_v0, %v1316_v15 }
  0xe8   : > { %1482 = vst [vmem:[#allocation3 + $0x230] sm:$0xff] %v1418_v51  ;;  %v1560_v25 = vld [vmem:[#allocation2 + $0x88] sm:$0xff]  ;;  %v1349_v35 = vsel %vm1221_vm2, %v1057_v1, %v1285_v22  ;;  %v1419_v36 = vpack.c.bf16 %v1380_v30, %v1379_v8 }
  0xe9   : > { %1435 = vst [vmem:[#allocation2 + $0xe8] sm:$0xff] %v1403_v49  ;;  %v12070_v4 = vld [vmem:[#allocation3 + $0xac] sm:$0xf0]  ;;  %v10188_v5 = vld [vmem:[#allocation3 + $0xb0] sm:$0xf0]  ;;  %v1350_v23 = vsel %vm1222_vm3, %v1146_v2, %v1286_v29 }
  0xea   : > { %1467 = vst [vmem:[#allocation3 + $0xc8] sm:$0xff] %v1403_v49  ;;  %v12928_v9 = vor.u32 %v12070_v4, %v10186_v58  ;;  %v12930_v10 = vor.u32 %v12067_v59, %v10188_v5  ;;  %v1404_v39 = vpack.c.bf16 %v1350_v23, %v1349_v35  ;;  %v1185_v40 = vpop.f32.mrf.mxu3  ;;  %v1101_v48 = vpop.f32.mrf.mxu2  ;;  %v1319_v58 = vmul.f32 0.2, %v1100_v47 }
  0xeb   : > { %1533 = vst [vmem:[#allocation3 + $0xf0] sm:$0xff] %v1403_v49  ;;  %v12075_v31 = vld [vmem:[#allocation3 + $0xd4] sm:$0xf0]  ;;  %v10204_v33 = vld [vmem:[#allocation3 + $0xd8] sm:$0xf0]  ;;  %v1059_v41 = vpop.f32.mrf.mxu0  ;;  %v1148_v43 = vpop.f32.mrf.mxu1  ;;  %v1186_v44 = vadd.f32 %v1185_v40, %v12826_v18  ;;  %v1381_v49 = vsel %vm1253_vm4, %v1097_v27, %v1317_v34  ;;  %v1102_v34 = vadd.f32 %v1101_v48, %v12824_v17 }
  0xec   : > { %16473 = vst [vmem:[#allocation23_spill] sm:$0xff] %v12928_v9  ;;  %2780 = vmatmul.bf16.gmra.mxu0 %v12928_v9  ;;  %2869 = vmatmul.bf16.gmra.mxu1 %v12930_v10  ;;  %v12936_v37 = vor.u32 %v12075_v31, %v10202_v16  ;;  %v12938_v38 = vor.u32 %v12072_v19, %v10204_v33  ;;  %v12117_v14 = vld [vmem:[#allocation3 + $0x224] sm:$0xf0]  ;;  %v10372_v12 = vld [vmem:[#allocation3 + $0x228] sm:$0xf0] }
  0xed   : > { %16474 = vst [vmem:[#allocation24_spill] sm:$0xff] %v12930_v10  ;;  %v1060_v45 = vadd.f32 %v1059_v41, %v12824_v17  ;;  %v1149_v46 = vadd.f32 %v1148_v43, %v12826_v18  ;;  %vm1254_vm5 = vcmp.gt.f32.partialorder %v1186_v44, 0.0  ;;  %v1318_v50 = vmul.f32 0.2, %v1186_v44 }
  0xee   : > { %16475 = vst [vmem:[#allocation25_spill] sm:$0xff] %v12936_v37  ;;  %2607 = vmatmul.bf16.gmra.mxu2 %v12936_v37  ;;  %2696 = vmatmul.bf16.gmra.mxu3 %v12938_v38  ;;  %vm1257_vm12 = vcmp.gt.f32.partialorder %v1102_v34, 0.0 }
  0xef   : > { %16476 = vst [vmem:[#allocation26_spill] sm:$0xff] %v12938_v38  ;;  %vm1223_vm6 = vcmp.gt.f32.partialorder %v1060_v45, 0.0  ;;  %vm1224_vm7 = vcmp.gt.f32.partialorder %v1149_v46, 0.0  ;;  %v1288_v53 = vmul.f32 0.2, %v1149_v46  ;;  %v1382_v54 = vsel %vm1254_vm5, %v1186_v44, %v1318_v50  ;;  %v12180_v50 = vld [vmem:[%s16160_s3 + $0x120] sm:$0xff] }
  0xf0   : > { %1548 = vst [vmem:[#allocation3 + $0x258] sm:$0xff] %v1418_v51  ;;  %v1287_v51 = vmul.f32 0.2, %v1060_v45  ;;  %v1561_v52 = vld [vmem:[#allocation2 + $0xe8] sm:$0xff]  ;;  %v1420_v57 = vpack.c.bf16 %v1382_v54, %v1381_v49  ;;  %2938 = vmatpush.bf16.msra.mxu2 %v12180_v50 }
  0xf1   : > { %1592 = vst [vmem:[#allocation3 + $0x88] sm:$0xff] %v1560_v25  ;;  %v1352_v59 = vsel %vm1224_vm7, %v1149_v46, %v1288_v53  ;;  %v10210_v4 = vld [vmem:[#allocation3 + $0xc8] sm:$0xf]  ;;  %v12073_v5 = vld [vmem:[#allocation3 + $0xcc] sm:$0xf]  ;;  %v1383_v25 = vsel %vm1255_vm8, %v1100_v47, %v1319_v58 }
  0xf2   : > { %1451 = vst [vmem:[#allocation2 + $0x40] sm:$0xff] %v1419_v36  ;;  %v1351_v56 = vsel %vm1223_vm6, %v1060_v45, %v1287_v51  ;;  %v1188_v0 = vpop.f32.mrf.mxu3  ;;  %v10226_v33 = vld [vmem:[#allocation3 + $0xf0] sm:$0xf]  ;;  %v12078_v27 = vld [vmem:[#allocation3 + $0xf4] sm:$0xf]  ;;  %v12188_v51 = vld [vmem:[%s16160_s3 + $0x160] sm:$0xff] }
  0xf3   : > { %1483 = vst [vmem:[#allocation3 + $0x248] sm:$0xff] %v1419_v36  ;;  %v1405_v55 = vpack.c.bf16 %v1352_v59, %v1351_v56  ;;  %v1061_v1 = vpop.f32.mrf.mxu0  ;;  %v1150_v2 = vpop.f32.mrf.mxu1  ;;  %v1189_v8 = vadd.f32 %v1188_v0, %v12826_v18  ;;  %v1321_v56 = vmul.f32 0.2, %v1102_v34  ;;  %3027 = vmatpush.bf16.msra.mxu3 %v12188_v51 }
  0xf4   : > { %1436 = vst [vmem:[#allocation2 + $0x28] sm:$0xff] %v1404_v39  ;;  %v1062_v15 = vadd.f32 %v1061_v1, %v12824_v17  ;;  %v1151_v16 = vadd.f32 %v1150_v2, %v12826_v18 }
  0xf5   : > { %1468 = vst [vmem:[#allocation3 + $0xe0] sm:$0xff] %v1404_v39  ;;  %vm1256_vm9 = vcmp.gt.f32.partialorder %v1189_v8, 0.0  ;;  %v1320_v31 = vmul.f32 0.2, %v1189_v8 }
  0xf6   : > { %1549 = vst [vmem:[#allocation3 + $0x270] sm:$0xff] %v1419_v36  ;;  %vm1225_vm10 = vcmp.gt.f32.partialorder %v1062_v15, 0.0  ;;  %v1289_v35 = vmul.f32 0.2, %v1062_v15  ;;  %vm1226_vm11 = vcmp.gt.f32.partialorder %v1151_v16, 0.0  ;;  %v1104_v36 = vpop.f32.mrf.mxu2 }
  0xf7   : > { %1534 = vst [vmem:[#allocation3 + $0x108] sm:$0xff] %v1404_v39  ;;  %v1290_v39 = vmul.f32 0.2, %v1151_v16  ;;  %v1384_v40 = vsel %vm1256_vm9, %v1189_v8, %v1320_v31 }
  0xf8   : > { %1593 = vst [vmem:[#allocation3 + $0xa0] sm:$0xff] %v1561_v52  ;;  %v1353_v44 = vsel %vm1225_vm10, %v1062_v15, %v1289_v35  ;;  %v1421_v45 = vpack.c.bf16 %v1384_v40, %v1383_v25 }
  0xf9   : > { %1452 = vst [vmem:[#allocation2 + $0xe0] sm:$0xff] %v1420_v57  ;;  %v1354_v52 = vsel %vm1226_vm11, %v1151_v16, %v1290_v39 }
  0xfa   : > { %1484 = vst [vmem:[#allocation3 + $0x260] sm:$0xff] %v1420_v57  ;;  %v1406_v53 = vpack.c.bf16 %v1354_v52, %v1353_v44  ;;  %v1190_v48 = vpop.f32.mrf.mxu3 }
  0xfb   : > { %1437 = vst [vmem:[#allocation2 + $0x8] sm:$0xff] %v1405_v55  ;;  %v1562_v23 = vld [vmem:[#allocation2 + $0x28] sm:$0xff]  ;;  %v1064_v49 = vpop.f32.mrf.mxu0  ;;  %v1153_v54 = vpop.f32.mrf.mxu1  ;;  %v1191_v58 = vadd.f32 %v1190_v48, %v12826_v18 }
  0xfc   : > { %v12076_v19 = vld [vmem:[#allocation3 + $0xdc] sm:$0xf0]  ;;  %v10212_v22 = vld [vmem:[#allocation3 + $0xe0] sm:$0xf0]  ;;  %1469 = vst [vmem:[#allocation3 + $0xf8] sm:$0xff] %v1405_v55  ;;  %v1154_v59 = vadd.f32 %v1153_v54, %v12826_v18 }
  0xfd   : > { %v12950_v29 = vor.u32 %v12076_v19, %v10210_v4  ;;  %v12952_v30 = vor.u32 %v12073_v5, %v10212_v22  ;;  %1535 = vst [vmem:[#allocation3 + $0x120] sm:$0xff] %v1405_v55  ;;  %v1105_v55 = vadd.f32 %v1104_v36, %v12824_v17  ;;  %vm1258_vm13 = vcmp.gt.f32.partialorder %v1191_v58, 0.0 }
  0xfe   : > { %v12081_v41 = vld [vmem:[#allocation3 + $0x104] sm:$0xf0]  ;;  %v10228_v43 = vld [vmem:[#allocation3 + $0x108] sm:$0xf0]  ;;  %1550 = vst [vmem:[#allocation3 + $0x288] sm:$0xff] %v1420_v57  ;;  %v1065_v57 = vadd.f32 %v1064_v49, %v12824_v17  ;;  %vm1228_vm15 = vcmp.gt.f32.partialorder %v1154_v59, 0.0  ;;  %v1385_v5 = vsel %vm1257_vm12, %v1102_v34, %v1321_v56  ;;  %v1106_v22 = vpop.f32.mrf.mxu2 }
  0xff   : > { %16477 = vst [vmem:[#allocation27_spill] sm:$0xff] %v12950_v29  ;;  %2785 = vmatmul.bf16.gmra.mxu0 %v12950_v29  ;;  %2874 = vmatmul.bf16.gmra.mxu1 %v12952_v30  ;;  %v12957_v46 = vor.u32 %v12081_v41, %v10226_v33  ;;  %v12959_v47 = vor.u32 %v12078_v27, %v10228_v43  ;;  %v1322_v0 = vmul.f32 0.2, %v1191_v58  ;;  %v1292_v4 = vmul.f32 0.2, %v1154_v59 }
 0x100   : > { %16478 = vst [vmem:[#allocation28_spill] sm:$0xff] %v12952_v30  ;;  %vm1227_vm14 = vcmp.gt.f32.partialorder %v1065_v57, 0.0  ;;  %v1291_v1 = vmul.f32 0.2, %v1065_v57  ;;  %v1323_v19 = vmul.f32 0.2, %v1105_v55 }
 0x101   : > { %16479 = vst [vmem:[#allocation29_spill] sm:$0xff] %v12957_v46  ;;  %2612 = vmatmul.bf16.gmra.mxu2 %v12957_v46  ;;  %2701 = vmatmul.bf16.gmra.mxu3 %v12959_v47  ;;  %v1386_v8 = vsel %vm1258_vm13, %v1191_v58, %v1322_v0  ;;  %v1356_v25 = vsel %vm1228_vm15, %v1154_v59, %v1292_v4  ;;  %vm1259_vm0 = vcmp.gt.f32.partialorder %v1105_v55, 0.0 }
 0x102   : > { %16480 = vst [vmem:[#allocation30_spill] sm:$0xff] %v12959_v47  ;;  %v1563_v2 = vld [vmem:[#allocation2 + $0x8] sm:$0xff]  ;;  %v1355_v15 = vsel %vm1227_vm14, %v1065_v57, %v1291_v1  ;;  %v1422_v16 = vpack.c.bf16 %v1386_v8, %v1385_v5  ;;  %v1193_v33 = vpop.f32.mrf.mxu3  ;;  %v1387_v44 = vsel %vm1259_vm0, %v1105_v55, %v1323_v19  ;;  %v1107_v59 = vadd.f32 %v1106_v22, %v12824_v17 }
 0x103   : > { %1594 = vst [vmem:[#allocation3 + $0xb8] sm:$0xff] %v1562_v23  ;;  %v1407_v31 = vpack.c.bf16 %v1356_v25, %v1355_v15  ;;  %v1066_v27 = vpop.f32.mrf.mxu0  ;;  %v1155_v35 = vpop.f32.mrf.mxu1  ;;  %v10234_v36 = vld [vmem:[#allocation3 + $0xf8] sm:$0xf]  ;;  %v12079_v23 = vld [vmem:[#allocation3 + $0xfc] sm:$0xf]  ;;  %v1194_v39 = vadd.f32 %v1193_v33, %v12826_v18 }
 0x104   : > { %1453 = vst [vmem:[#allocation2 + $0xa8] sm:$0xff] %v1421_v45  ;;  %v1067_v40 = vadd.f32 %v1066_v27, %v12824_v17  ;;  %v1156_v41 = vadd.f32 %v1155_v35, %v12826_v18  ;;  %v10250_v52 = vld [vmem:[#allocation3 + $0x120] sm:$0xf]  ;;  %v1325_v25 = vmul.f32 0.2, %v1107_v59  ;;  %vm1261_vm4 = vcmp.gt.f32.partialorder %v1107_v59, 0.0 }
 0x105   : > { %1485 = vst [vmem:[#allocation3 + $0x278] sm:$0xff] %v1421_v45  ;;  %vm1260_vm1 = vcmp.gt.f32.partialorder %v1194_v39, 0.0  ;;  %v1324_v51 = vmul.f32 0.2, %v1194_v39  ;;  %v12179_v35 = vld [vmem:[%s16160_s3 + $0x118] sm:$0xff] }
 0x106   : > { %1438 = vst [vmem:[#allocation2 + $0x68] sm:$0xff] %v1406_v53  ;;  %vm1229_vm2 = vcmp.gt.f32.partialorder %v1067_v40, 0.0  ;;  %v1293_v48 = vmul.f32 0.2, %v1067_v40  ;;  %vm1230_vm3 = vcmp.gt.f32.partialorder %v1156_v41, 0.0  ;;  %v1109_v15 = vpop.f32.mrf.mxu2  ;;  %2939 = vmatpush.bf16.msra.mxu2 %v12179_v35 }
 0x107   : > { %1470 = vst [vmem:[#allocation3 + $0x110] sm:$0xff] %v1406_v53  ;;  %v1294_v54 = vmul.f32 0.2, %v1156_v41  ;;  %v1388_v56 = vsel %vm1260_vm1, %v1194_v39, %v1324_v51  ;;  %v1110_v27 = vadd.f32 %v1109_v15, %v12824_v17 }
 0x108   : > { %1551 = vst [vmem:[#allocation3 + $0x2a0] sm:$0xff] %v1421_v45  ;;  %v1357_v55 = vsel %vm1229_vm2, %v1067_v40, %v1293_v48  ;;  %v1423_v0 = vpack.c.bf16 %v1388_v56, %v1387_v44 }
 0x109   : > { %1536 = vst [vmem:[#allocation3 + $0x138] sm:$0xff] %v1406_v53  ;;  %v12084_v53 = vld [vmem:[#allocation3 + $0x124] sm:$0xf]  ;;  %v1358_v4 = vsel %vm1230_vm3, %v1156_v41, %v1294_v54  ;;  %v1389_v41 = vsel %vm1261_vm4, %v1107_v59, %v1325_v25  ;;  %vm1263_vm8 = vcmp.gt.f32.partialorder %v1110_v27, 0.0 }
 0x10a   : > { %1595 = vst [vmem:[#allocation3 + $0xd0] sm:$0xff] %v1563_v2  ;;  %v1408_v5 = vpack.c.bf16 %v1358_v4, %v1357_v55  ;;  %v1195_v8 = vpop.f32.mrf.mxu3 }
 0x10b   : > { %1454 = vst [vmem:[#allocation2 + $0x18] sm:$0xff] %v1422_v16  ;;  %v1069_v19 = vpop.f32.mrf.mxu0  ;;  %v1158_v22 = vpop.f32.mrf.mxu1 }
 0x10c   : > { %1486 = vst [vmem:[#allocation3 + $0x290] sm:$0xff] %v1422_v16  ;;  %v1070_v33 = vadd.f32 %v1069_v19, %v12824_v17 }
 0x10d   : > { %1439 = vst [vmem:[#allocation2 + $0x10] sm:$0xff] %v1407_v31  ;;  %v1564_v49 = vld [vmem:[#allocation2 + $0x68] sm:$0xff] }
 0x10e   : > { %v12082_v43 = vld [vmem:[#allocation3 + $0x10c] sm:$0xf0]  ;;  %v10236_v34 = vld [vmem:[#allocation3 + $0x110] sm:$0xf0]  ;;  %1471 = vst [vmem:[#allocation3 + $0x128] sm:$0xff] %v1407_v31  ;;  %vm1231_vm6 = vcmp.gt.f32.partialorder %v1070_v33, 0.0  ;;  %v1111_v15 = vpop.f32.mrf.mxu2 }
 0x10f   : > { %v12978_v45 = vor.u32 %v12082_v43, %v10234_v36  ;;  %v12980_v50 = vor.u32 %v12079_v23, %v10236_v34  ;;  %1537 = vst [vmem:[#allocation3 + $0x150] sm:$0xff] %v1407_v31  ;;  %v1196_v31 = vadd.f32 %v1195_v8, %v12826_v18  ;;  %v1295_v23 = vmul.f32 0.2, %v1070_v33  ;;  %v12187_v34 = vld [vmem:[%s16160_s3 + $0x158] sm:$0xff]  ;;  %v10442_v30 = vld [vmem:[#allocation3 + $0x2a0] sm:$0xf] }
 0x110   : > { %v12087_v58 = vld [vmem:[#allocation3 + $0x134] sm:$0xf0]  ;;  %v10252_v57 = vld [vmem:[#allocation3 + $0x138] sm:$0xf0]  ;;  %1552 = vst [vmem:[#allocation3 + $0x2b8] sm:$0xff] %v1422_v16  ;;  %v1159_v16 = vadd.f32 %v1158_v22, %v12826_v18  ;;  %3028 = vmatpush.bf16.msra.mxu3 %v12187_v34 }
 0x111   : > { %16481 = vst [vmem:[#allocation31_spill] sm:$0xff] %v12978_v45  ;;  %2790 = vmatmul.bf16.gmra.mxu0 %v12978_v45  ;;  %2879 = vmatmul.bf16.gmra.mxu1 %v12980_v50  ;;  %v12985_v1 = vor.u32 %v12087_v58, %v10250_v52  ;;  %v12987_v2 = vor.u32 %v12084_v53, %v10252_v57  ;;  %vm1262_vm5 = vcmp.gt.f32.partialorder %v1196_v31, 0.0  ;;  %v1326_v36 = vmul.f32 0.2, %v1196_v31  ;;  %v12132_v29 = vld [vmem:[#allocation3 + $0x2a4] sm:$0xf] }
 0x112   : > { %16482 = vst [vmem:[#allocation32_spill] sm:$0xff] %v12980_v50  ;;  %vm1232_vm7 = vcmp.gt.f32.partialorder %v1159_v16, 0.0  ;;  %v1296_v40 = vmul.f32 0.2, %v1159_v16  ;;  %v1359_v44 = vsel %vm1231_vm6, %v1070_v33, %v1295_v23  ;;  %v1327_v52 = vmul.f32 0.2, %v1110_v27 }
 0x113   : > { %16483 = vst [vmem:[#allocation33_spill] sm:$0xff] %v12985_v1  ;;  %2617 = vmatmul.bf16.gmra.mxu2 %v12985_v1  ;;  %2706 = vmatmul.bf16.gmra.mxu3 %v12987_v2  ;;  %v1390_v43 = vsel %vm1262_vm5, %v1196_v31, %v1326_v36  ;;  %v1071_v54 = vpop.f32.mrf.mxu0  ;;  %v1160_v56 = vpop.f32.mrf.mxu1  ;;  %v1164_v36 = vadd.f32 %v12835_v32, %v12826_v18 }
 0x114   : > { %16484 = vst [vmem:[#allocation34_spill] sm:$0xff] %v12987_v2  ;;  %v1565_v39 = vld [vmem:[#allocation2 + $0x10] sm:$0xff]  ;;  %v1424_v51 = vpack.c.bf16 %v1390_v43, %v1389_v41  ;;  %v1360_v53 = vsel %vm1232_vm7, %v1159_v16, %v1296_v40  ;;  %v1072_v55 = vadd.f32 %v1071_v54, %v12824_v17  ;;  %v1391_v8 = vsel %vm1263_vm8, %v1110_v27, %v1327_v52 }
 0x115   : > { %1596 = vst [vmem:[#allocation3 + $0xe8] sm:$0xff] %v1564_v49  ;;  %v1409_v48 = vpack.c.bf16 %v1360_v53, %v1359_v44  ;;  %v1198_v49 = vpop.f32.mrf.mxu3  ;;  %v10258_v58 = vld [vmem:[#allocation3 + $0x128] sm:$0xf]  ;;  %v12085_v57 = vld [vmem:[#allocation3 + $0x12c] sm:$0xf]  ;;  %v1112_v41 = vadd.f32 %v1111_v15, %v12824_v17  ;;  %vm1236_vm13 = vcmp.gt.f32.partialorder %v1164_v36, 0.0 }
 0x116   : > { %1455 = vst [vmem:[#allocation2 + $0xf0] sm:$0xff] %v1423_v0  ;;  %v1199_v59 = vadd.f32 %v1198_v49, %v12826_v18  ;;  %v10274_v31 = vld [vmem:[#allocation3 + $0x150] sm:$0xf]  ;;  %v12090_v33 = vld [vmem:[#allocation3 + $0x154] sm:$0xf]  ;;  %vm1233_vm10 = vcmp.gt.f32.partialorder %v1072_v55, 0.0 }
 0x117   : > { %1487 = vst [vmem:[#allocation3 + $0x2a8] sm:$0xff] %v1423_v0  ;;  %v1297_v16 = vmul.f32 0.2, %v1072_v55  ;;  %v1329_v54 = vmul.f32 0.2, %v1112_v41  ;;  %vm1265_vm12 = vcmp.gt.f32.partialorder %v1112_v41, 0.0 }
 0x118   : > { %1440 = vst [vmem:[#allocation2 + $0xb8] sm:$0xff] %v1408_v5  ;;  %vm1264_vm9 = vcmp.gt.f32.partialorder %v1199_v59, 0.0  ;;  %v1328_v25 = vmul.f32 0.2, %v1199_v59  ;;  %v10444_v45 = vld [vmem:[#allocation3 + $0x2b8] sm:$0xf0] }
 0x119   : > { %1472 = vst [vmem:[#allocation3 + $0x140] sm:$0xff] %v1408_v5  ;;  %v1361_v43 = vsel %vm1233_vm10, %v1072_v55, %v1297_v16  ;;  %v1393_v15 = vsel %vm1265_vm12, %v1112_v41, %v1329_v54 }
 0x11a   : > { %1553 = vst [vmem:[#allocation3 + $0x2d0] sm:$0xff] %v1423_v0  ;;  %v1161_v0 = vadd.f32 %v1160_v56, %v12826_v18  ;;  %v1392_v27 = vsel %vm1264_vm9, %v1199_v59, %v1328_v25  ;;  %v1166_v59 = vadd.f32 %v12839_v42, %v12826_v18 }
 0x11b   : > { %1538 = vst [vmem:[#allocation3 + $0x168] sm:$0xff] %v1408_v5  ;;  %v1425_v34 = vpack.c.bf16 %v1392_v27, %v1391_v8  ;;  %v1074_v49 = vpop.f32.mrf.mxu0  ;;  %v1574_v8 = vld [vmem:[#allocation2 + $0x78] sm:$0xff] }
 0x11c   : > { %1597 = vst [vmem:[#allocation3 + $0x100] sm:$0xff] %v1565_v39  ;;  %vm1234_vm11 = vcmp.gt.f32.partialorder %v1161_v0, 0.0  ;;  %v1298_v23 = vmul.f32 0.2, %v1161_v0  ;;  %vm1238_vm0 = vcmp.gt.f32.partialorder %v1166_v59, 0.0 }
 0x11d   : > { %1456 = vst [vmem:[#allocation2] sm:$0xff] %v1424_v51 }
 0x11e   : > { %1488 = vst [vmem:[#allocation3 + $0x2c0] sm:$0xff] %v1424_v51  ;;  %v1362_v53 = vsel %vm1234_vm11, %v1161_v0, %v1298_v23  ;;  %v1573_v0 = vld [vmem:[#allocation2 + $0x98] sm:$0xff] }
 0x11f   : > { %1441 = vst [vmem:[#allocation2 + $0x80] sm:$0xff] %v1409_v48  ;;  %v1566_v35 = vld [vmem:[#allocation2 + $0xb8] sm:$0xff]  ;;  %v1410_v32 = vpack.c.bf16 %v1362_v53, %v1361_v43 }
 0x120   : > { %v12088_v4 = vld [vmem:[#allocation3 + $0x13c] sm:$0xf0]  ;;  %v10260_v5 = vld [vmem:[#allocation3 + $0x140] sm:$0xf0]  ;;  %1473 = vst [vmem:[#allocation3 + $0x158] sm:$0xff] %v1409_v48 }
 0x121   : > { %v13005_v19 = vor.u32 %v12088_v4, %v10258_v58  ;;  %v13007_v22 = vor.u32 %v12085_v57, %v10260_v5  ;;  %1539 = vst [vmem:[#allocation3 + $0x180] sm:$0xff] %v1409_v48  ;;  %v1200_v48 = vpop.f32.mrf.mxu3  ;;  %v1300_v58 = vmul.f32 0.2, %v1164_v36  ;;  %v1075_v57 = vadd.f32 %v1074_v49, %v12824_v17  ;;  %v2588_v5 = vpop.f32.mrf.mxu2  ;;  %v10466_v6 = vld [vmem:[#allocation3 + $0x2d0] sm:$0xf] }
 0x122   : > { %v12093_v39 = vld [vmem:[#allocation3 + $0x164] sm:$0xf0]  ;;  %v10276_v40 = vld [vmem:[#allocation3 + $0x168] sm:$0xf0]  ;;  %1554 = vst [vmem:[#allocation3 + $0x2e8] sm:$0xff] %v1424_v51  ;;  %v1201_v56 = vadd.f32 %v1200_v48, %v12826_v18 }
 0x123   : > { %16485 = vst [vmem:[#allocation35_spill] sm:$0xff] %v13005_v19  ;;  %2795 = vmatmul.bf16.gmra.mxu0 %v13005_v19  ;;  %2884 = vmatmul.bf16.gmra.mxu1 %v13007_v22  ;;  %v13014_v44 = vor.u32 %v12093_v39, %v10274_v31  ;;  %v13016_v52 = vor.u32 %v12090_v33, %v10276_v40  ;;  %vm1235_vm15 = vcmp.gt.f32.partialorder %v1075_v57, 0.0  ;;  %v1299_v4 = vmul.f32 0.2, %v1075_v57  ;;  %v1076_v39 = vpop.f32.mrf.mxu0 }
 0x124   : > { %16486 = vst [vmem:[#allocation36_spill] sm:$0xff] %v13007_v22  ;;  %vm1266_vm14 = vcmp.gt.f32.partialorder %v1201_v56, 0.0  ;;  %v1330_v55 = vmul.f32 0.2, %v1201_v56  ;;  %v1364_v31 = vsel %vm1236_vm13, %v1164_v36, %v1300_v58  ;;  %v1077_v41 = vadd.f32 %v1076_v39, %v12824_v17  ;;  %v12247_v17 = vld [vmem:[%s16160_s3 + $0x338] sm:$0xff] }
 0x125   : > { %16487 = vst [vmem:[#allocation37_spill] sm:$0xff] %v13014_v44  ;;  %2622 = vmatmul.bf16.gmra.mxu2 %v13014_v44  ;;  %2711 = vmatmul.bf16.gmra.mxu3 %v13016_v52  ;;  %v1363_v33 = vsel %vm1235_vm15, %v1075_v57, %v1299_v4 }
 0x126   : > { %16488 = vst [vmem:[#allocation38_spill] sm:$0xff] %v13016_v52  ;;  %v1567_v51 = vld [vmem:[#allocation2 + $0x80] sm:$0xff]  ;;  %v1394_v25 = vsel %vm1266_vm14, %v1201_v56, %v1330_v55  ;;  %v1411_v23 = vpack.c.bf16 %v1364_v31, %v1363_v33  ;;  %vm1237_vm1 = vcmp.gt.f32.partialorder %v1077_v41, 0.0  ;;  %v1301_v58 = vmul.f32 0.2, %v1077_v41  ;;  %v1575_v55 = vld [vmem:[#allocation2 + $0xc8] sm:$0xff]  ;;  %3593 = vmatpush.bf16.msra.mxu0 %v12247_v17 }
 0x127   : > { %1598 = vst [vmem:[#allocation3 + $0x118] sm:$0xff] %v1566_v35  ;;  %v1426_v16 = vpack.c.bf16 %v1394_v25, %v1393_v15  ;;  %v1302_v35 = vmul.f32 0.2, %v1166_v59  ;;  %v10282_v18 = vld [vmem:[#allocation3 + $0x158] sm:$0xf] }
 0x128   : > { %1457 = vst [vmem:[#allocation2 + $0x30] sm:$0xff] %v1425_v34  ;;  %v12091_v42 = vld [vmem:[#allocation3 + $0x15c] sm:$0xf]  ;;  %v10298_v43 = vld [vmem:[#allocation3 + $0x180] sm:$0xf] }
 0x129   : > { %1489 = vst [vmem:[#allocation3 + $0x2d8] sm:$0xff] %v1425_v34  ;;  %v2677_v27 = vpop.f32.mrf.mxu3  ;;  %v12096_v34 = vld [vmem:[#allocation3 + $0x184] sm:$0xf]  ;;  %v1366_v4 = vsel %vm1238_vm0, %v1166_v59, %v1302_v35  ;;  %v12178_v59 = vld [vmem:[%s16160_s3 + $0x110] sm:$0xff]  ;;  %v12141_v62 = vld [vmem:[#allocation3 + $0x2e4] sm:$0xf0] }
 0x12a   : > { %1442 = vst [vmem:[#allocation2 + $0x90] sm:$0xff] %v1410_v32  ;;  %v2678_v40 = vadd.f32 %v2677_v27, %v2588_v5  ;;  %v1365_v5 = vsel %vm1237_vm1, %v1077_v41, %v1301_v58  ;;  %v12186_v35 = vld [vmem:[%s16160_s3 + $0x150] sm:$0xff]  ;;  %2940 = vmatpush.bf16.msra.mxu2 %v12178_v59  ;;  %v10468_v61 = vld [vmem:[#allocation3 + $0x2e8] sm:$0xf0] }
 0x12b   : > { %1474 = vst [vmem:[#allocation3 + $0x170] sm:$0xff] %v1410_v32  ;;  %v1412_v15 = vpack.c.bf16 %v1366_v4, %v1365_v5  ;;  %3029 = vmatpush.bf16.msra.mxu3 %v12186_v35  ;;  %v1581_v35 = vld [vmem:[#allocation2 + $0xf0] sm:$0xff] }
 0x12c   : > { %1540 = vst [vmem:[#allocation3 + $0x198] sm:$0xff] %v1410_v32 }
 0x12d   : > { %1599 = vst [vmem:[#allocation3 + $0x130] sm:$0xff] %v1567_v51 }
 0x12e   : > { %1605 = vst [vmem:[#allocation3 + $0x1c0] sm:$0xff] %v1573_v0  ;;  %v1576_v0 = vld [vmem:[#allocation2 + $0xb0] sm:$0xff] }
 0x12f   : > { %1606 = vst [vmem:[#allocation3 + $0x1d8] sm:$0xff] %v1574_v8  ;;  %v2590_v8 = vpop.f32.mrf.mxu2 }
 0x130   : > { %1458 = vst [vmem:[#allocation2 + $0xd8] sm:$0xff] %v1426_v16  ;;  %v13158_v10 = vld [vmem:[#allocation3 + $0x2d8] sm:$0xf] }
 0x131   : > { %1443 = vst [vmem:[#allocation2 + $0x60] sm:$0xff] %v1411_v23  ;;  %v1568_v32 = vld [vmem:[#allocation2 + $0x90] sm:$0xff]  ;;  %v2679_v25 = vpop.f32.mrf.mxu3 }
 0x132   : > { %1475 = vst [vmem:[#allocation3 + $0x188] sm:$0xff] %v1411_v23  ;;  %v12094_v53 = vld [vmem:[#allocation3 + $0x16c] sm:$0xf0]  ;;  %v10284_v36 = vld [vmem:[#allocation3 + $0x170] sm:$0xf0]  ;;  %v2680_v31 = vadd.f32 %v2679_v25, %v2590_v8 }
 0x133   : > { %1541 = vst [vmem:[#allocation3 + $0x1b0] sm:$0xff] %v1411_v23  ;;  %v13025_v48 = vor.u32 %v12094_v53, %v10282_v18  ;;  %v13027_v49 = vor.u32 %v12091_v42, %v10284_v36  ;;  %v12099_v54 = vld [vmem:[#allocation3 + $0x194] sm:$0xf0]  ;;  %v10300_v56 = vld [vmem:[#allocation3 + $0x198] sm:$0xf0]  ;;  %v1578_v23 = vld [vmem:[#allocation2 + $0xe0] sm:$0xff] }
 0x134   : > { %1490 = vst [vmem:[#allocation3 + $0x2f0] sm:$0xff] %v1426_v16  ;;  %v13029_v57 = vor.u32 %v12099_v54, %v10298_v43  ;;  %v13031_v51 = vor.u32 %v12096_v34, %v10300_v56  ;;  %v1577_v16 = vld [vmem:[#allocation2 + $0x40] sm:$0xff]  ;;  %v1579_v18 = vld [vmem:[#allocation2 + $0xa8] sm:$0xff]  ;;  %v2766_v43 = vpop.f32.mrf.mxu0  ;;  %v2855_v34 = vpop.f32.mrf.mxu1  ;;  %v1580_v36 = vld [vmem:[#allocation2 + $0x18] sm:$0xff] }
 0x135   : > { %16489 = vst [vmem:[#allocation39_spill] sm:$0xff] %v13025_v48  ;;  %2800 = vmatmul.bf16.gmra.mxu0 %v13025_v48  ;;  %2889 = vmatmul.bf16.gmra.mxu1 %v13027_v49 }
 0x136   : > { %16490 = vst [vmem:[#allocation40_spill] sm:$0xff] %v13027_v49  ;;  %2627 = vmatmul.bf16.gmra.mxu2 %v13029_v57  ;;  %2716 = vmatmul.bf16.gmra.mxu3 %v13031_v51  ;;  %v12123_v49 = vld [vmem:[#allocation3 + $0x254] sm:$0xf0] }
 0x137   : > { %16491 = vst [vmem:[#allocation41_spill] sm:$0xff] %v13029_v57 }
 0x138   : > { %16492 = vst [vmem:[#allocation42_spill] sm:$0xff] %v13031_v51  ;;  %v1569_v33 = vld [vmem:[#allocation2 + $0x60] sm:$0xff] }
 0x139   : > { %1600 = vst [vmem:[#allocation3 + $0x148] sm:$0xff] %v1568_v32  ;;  %v10306_v42 = vld [vmem:[#allocation3 + $0x188] sm:$0xf]  ;;  %v12097_v27 = vld [vmem:[#allocation3 + $0x18c] sm:$0xf]  ;;  %v2767_v32 = vadd.f32 %v2766_v43, %v2678_v40 }
 0x13a   : > { %1607 = vst [vmem:[#allocation3 + $0x1f0] sm:$0xff] %v1575_v55  ;;  %v10322_v17 = vld [vmem:[#allocation3 + $0x1b0] sm:$0xf]  ;;  %v2593_v40 = vpop.f32.mrf.mxu2 }
 0x13b   : > { %1608 = vst [vmem:[#allocation3 + $0x208] sm:$0xff] %v1576_v0  ;;  %v12102_v0 = vld [vmem:[#allocation3 + $0x1b4] sm:$0xf]  ;;  %v13051_v4 = vadd.f32 %v2855_v34, %v2767_v32  ;;  %v1582_v34 = vld [vmem:[#allocation2] sm:$0xff]  ;;  %v12103_v32 = vld [vmem:[#allocation3 + $0x1bc] sm:$0xf] }
 0x13c   : > { %1444 = vst [vmem:[#allocation2 + $0x48] sm:$0xff] %v1412_v15  ;;  %v2768_v25 = vpop.f32.mrf.mxu0 }
 0x13d   : > { %1476 = vst [vmem:[#allocation3 + $0x1a0] sm:$0xff] %v1412_v15 }
 0x13e   : > { %1542 = vst [vmem:[#allocation3 + $0x1c8] sm:$0xff] %v1412_v15  ;;  %v2682_v15 = vpop.f32.mrf.mxu3 }
 0x13f   : > { %1601 = vst [vmem:[#allocation3 + $0x160] sm:$0xff] %v1569_v33  ;;  %v2857_v33 = vpop.f32.mrf.mxu1 }
 0x140   : > { %1609 = vst [vmem:[#allocation3 + $0x220] sm:$0xff] %v1577_v16  ;;  %v2683_v16 = vadd.f32 %v2682_v15, %v2593_v40  ;;  %v10346_v15 = vld [vmem:[#allocation3 + $0x1e0] sm:$0xf] }
 0x141   : > { %1610 = vst [vmem:[#allocation3 + $0x238] sm:$0xff] %v1578_v23  ;;  %v2769_v23 = vadd.f32 %v2768_v25, %v2680_v31  ;;  %v12111_v31 = vld [vmem:[#allocation3 + $0x1f4] sm:$0xf0]  ;;  %v12108_v25 = vld [vmem:[#allocation3 + $0x1e4] sm:$0xf] }
 0x142   : > { %1611 = vst [vmem:[#allocation3 + $0x250] sm:$0xff] %v1579_v18  ;;  %v12106_v18 = vld [vmem:[#allocation3 + $0x1cc] sm:$0xf0] }
 0x143   : > { %v1570_v39 = vld [vmem:[#allocation2 + $0x48] sm:$0xff]  ;;  %1612 = vst [vmem:[#allocation3 + $0x268] sm:$0xff] %v1580_v36  ;;  %v13061_v59 = vadd.f32 %v2857_v33, %v2769_v23  ;;  %v10330_v36 = vld [vmem:[#allocation3 + $0x1b8] sm:$0xf]  ;;  %v12246_v33 = vld [vmem:[%s16160_s3 + $0x330] sm:$0xff]  ;;  %v13074_v23 = vor.u32 %v12111_v31, %v10346_v15 }
 0x144   : > { %v12100_v41 = vld [vmem:[#allocation3 + $0x19c] sm:$0xf0]  ;;  %v10308_v53 = vld [vmem:[#allocation3 + $0x1a0] sm:$0xf0]  ;;  %1602 = vst [vmem:[#allocation3 + $0x178] sm:$0xff] %v1570_v39  ;;  %3594 = vmatpush.bf16.msra.mxu0 %v12246_v33 }
 0x145   : > { %v13047_v54 = vor.u32 %v12100_v41, %v10306_v42  ;;  %v13049_v56 = vor.u32 %v12097_v27, %v10308_v53  ;;  %v12105_v58 = vld [vmem:[#allocation3 + $0x1c4] sm:$0xf0]  ;;  %v10324_v55 = vld [vmem:[#allocation3 + $0x1c8] sm:$0xf0]  ;;  %1613 = vst [vmem:[#allocation3 + $0x280] sm:$0xff] %v1581_v35  ;;  %v2595_v27 = vpop.f32.mrf.mxu2  ;;  %v2771_v41 = vpop.f32.mrf.mxu0 }
 0x146   : > { %v13053_v5 = vor.u32 %v12105_v58, %v10322_v17  ;;  %v13055_v8 = vor.u32 %v12102_v0, %v10324_v55  ;;  %v10332_v42 = vld [vmem:[#allocation3 + $0x1d0] sm:$0xf0]  ;;  %v2684_v39 = vpop.f32.mrf.mxu3  ;;  %1614 = vst [vmem:[#allocation3 + $0x298] sm:$0xff] %v1582_v34  ;;  %v2772_v58 = vadd.f32 %v2771_v41, %v2683_v16  ;;  %v13063_v55 = vor.u32 %v12106_v18, %v10330_v36  ;;  %v10348_v0 = vld [vmem:[#allocation3 + $0x1f8] sm:$0xf0]  ;;  %v12185_v36 = vld [vmem:[%s16160_s3 + $0x148] sm:$0xff] }
 0x147   : > { %16493 = vst [vmem:[#allocation43_spill] sm:$0xff] %v13047_v54  ;;  %2805 = vmatmul.bf16.gmra.mxu0 %v13047_v54  ;;  %2894 = vmatmul.bf16.gmra.mxu1 %v13049_v56  ;;  %v2685_v43 = vadd.f32 %v2684_v39, %v2595_v27  ;;  %v2860_v53 = vpop.f32.mrf.mxu1  ;;  %v13065_v17 = vor.u32 %v12103_v32, %v10332_v42  ;;  %v1583_v32 = vld [vmem:[#allocation2 + $0x30] sm:$0xff]  ;;  %v10356_v31 = vld [vmem:[#allocation3 + $0x200] sm:$0xf0]  ;;  %v12109_v33 = vld [vmem:[#allocation3 + $0x1ec] sm:$0xf] }
 0x148   : > { %16494 = vst [vmem:[#allocation44_spill] sm:$0xff] %v13049_v56  ;;  %2632 = vmatmul.bf16.gmra.mxu2 %v13053_v5  ;;  %2721 = vmatmul.bf16.gmra.mxu3 %v13055_v8  ;;  %v13067_v40 = vadd.f32 %v2860_v53, %v2772_v58  ;;  %v13076_v16 = vor.u32 %v12108_v25, %v10348_v0  ;;  %v12177_v53 = vld [vmem:[%s16160_s3 + $0x108] sm:$0xff]  ;;  %v12112_v58 = vld [vmem:[#allocation3 + $0x1fc] sm:$0xf0] }
 0x149   : > { %16495 = vst [vmem:[#allocation45_spill] sm:$0xff] %v13053_v5  ;;  %2941 = vmatpush.bf16.msra.mxu2 %v12177_v53  ;;  %3030 = vmatpush.bf16.msra.mxu3 %v12185_v36  ;;  %v10354_v25 = vld [vmem:[#allocation3 + $0x1e8] sm:$0xf] }
 0x14a   : > { %16496 = vst [vmem:[#allocation46_spill] sm:$0xff] %v13055_v8 }
 0x14b   : > { %16497 = vst [vmem:[#allocation47_spill] sm:$0xff] %v13063_v55 }
 0x14c   : > { %16498 = vst [vmem:[#allocation48_spill] sm:$0xff] %v13065_v17 }
 0x14d   : > { %16499 = vst [vmem:[#allocation49_spill] sm:$0xff] %v13074_v23  ;;  %v2773_v35 = vpop.f32.mrf.mxu0 }
 0x14e   : > { %16500 = vst [vmem:[#allocation50_spill] sm:$0xff] %v13076_v16  ;;  %v2774_v42 = vadd.f32 %v2773_v35, %v2685_v43  ;;  %v2598_v27 = vpop.f32.mrf.mxu2  ;;  %v2687_v39 = vpop.f32.mrf.mxu3  ;;  %v1584_v43 = vld [vmem:[#allocation2 + $0xd8] sm:$0xff] }
 0x14f   : > { %v2862_v18 = vpop.f32.mrf.mxu1  ;;  %v2688_v34 = vadd.f32 %v2687_v39, %v2598_v27  ;;  %1615 = vst [vmem:[#allocation3 + $0x2b0] sm:$0xff] %v1583_v32  ;;  %v10370_v32 = vld [vmem:[#allocation3 + $0x210] sm:$0xf] }
 0x150   : > { %v13080_v41 = vadd.f32 %v2862_v18, %v2774_v42  ;;  %1616 = vst [vmem:[#allocation3 + $0x2c8] sm:$0xff] %v1584_v43  ;;  %v13088_v18 = vor.u32 %v12112_v58, %v10354_v25  ;;  %v13090_v42 = vor.u32 %v12109_v33, %v10356_v31 }
 0x152   : > { %16501 = vst [vmem:[#allocation51_spill] sm:$0xff] %v13088_v18 }
 0x153   : > { %16502 = vst [vmem:[#allocation52_spill] sm:$0xff] %v13090_v42 }
 0x156   : > { %v2600_v27 = vpop.f32.mrf.mxu2  ;;  %v2689_v39 = vpop.f32.mrf.mxu3 }
 0x157   : > { %2810 = vmatmul.bf16.gmra.mxu0 %v13063_v55  ;;  %2899 = vmatmul.bf16.gmra.mxu1 %v13065_v17  ;;  %v2776_v0 = vpop.f32.mrf.mxu0  ;;  %v2865_v15 = vpop.f32.mrf.mxu1  ;;  %v2690_v53 = vadd.f32 %v2689_v39, %v2600_v27  ;;  %v12114_v17 = vld [vmem:[#allocation3 + $0x214] sm:$0xf]  ;;  %v13096_v55 = vor.u32 %v12117_v14, %v10370_v32  ;;  %v10378_v14 = vld [vmem:[#allocation3 + $0x218] sm:$0xf]  ;;  %v12115_v32 = vld [vmem:[#allocation3 + $0x21c] sm:$0xf] }
 0x158   : > { %2637 = vmatmul.bf16.gmra.mxu2 %v13074_v23  ;;  %2726 = vmatmul.bf16.gmra.mxu3 %v13076_v16  ;;  %v2777_v35 = vadd.f32 %v2776_v0, %v2688_v34  ;;  %v13098_v34 = vor.u32 %v12114_v17, %v10372_v12  ;;  %v10380_v27 = vld [vmem:[#allocation3 + $0x230] sm:$0xf0] }
 0x159   : > { %16503 = vst [vmem:[#allocation53_spill] sm:$0xff] %v13096_v55 }
 0x15a   : > { %v13092_v36 = vadd.f32 %v2865_v15, %v2777_v35  ;;  %16504 = vst [vmem:[#allocation54_spill] sm:$0xff] %v13098_v34  ;;  %v12118_v35 = vld [vmem:[#allocation3 + $0x22c] sm:$0xf0] }
 0x15b   : > { %v13104_v17 = vor.u32 %v12118_v35, %v10378_v14 }
 0x15d   : > { %16505 = vst [vmem:[#allocation55_spill] sm:$0xff] %v13104_v17 }
 0x15f   : > { %v2778_v58 = vpop.f32.mrf.mxu0  ;;  %v2867_v31 = vpop.f32.mrf.mxu1 }
 0x160   : > { %v2779_v43 = vadd.f32 %v2778_v58, %v2690_v53  ;;  %v2603_v0 = vpop.f32.mrf.mxu2  ;;  %v2692_v15 = vpop.f32.mrf.mxu3  ;;  %v10396_v53 = vld [vmem:[#allocation3 + $0x258] sm:$0xf0] }
 0x161   : > { %v2693_v25 = vadd.f32 %v2692_v15, %v2603_v0  ;;  %v12245_v0 = vld [vmem:[%s16160_s3 + $0x328] sm:$0xff] }
 0x162   : > { %v13102_v33 = vadd.f32 %v2867_v31, %v2779_v43  ;;  %v10394_v31 = vld [vmem:[#allocation3 + $0x240] sm:$0xf]  ;;  %v12120_v43 = vld [vmem:[#allocation3 + $0x244] sm:$0xf]  ;;  %3595 = vmatpush.bf16.msra.mxu0 %v12245_v0  ;;  %v12121_v0 = vld [vmem:[#allocation3 + $0x24c] sm:$0xf] }
 0x163   : > { %v13115_v15 = vor.u32 %v12123_v49, %v10394_v31  ;;  %v12176_v49 = vld [vmem:[%s16160_s3 + $0x100] sm:$0xff] }
 0x164   : > { %2942 = vmatpush.bf16.msra.mxu2 %v12176_v49  ;;  %v10418_v49 = vld [vmem:[#allocation3 + $0x270] sm:$0xf] }
 0x165   : > { %16507 = vst [vmem:[#allocation57_spill] sm:$0xff] %v13115_v15 }
 0x167   : > { %2815 = vmatmul.bf16.gmra.mxu0 %v13088_v18  ;;  %2904 = vmatmul.bf16.gmra.mxu1 %v13090_v42  ;;  %v13106_v18 = vor.u32 %v12115_v32, %v10380_v27  ;;  %v12184_v32 = vld [vmem:[%s16160_s3 + $0x140] sm:$0xff] }
 0x168   : > { %2642 = vmatmul.bf16.gmra.mxu2 %v13096_v55  ;;  %2731 = vmatmul.bf16.gmra.mxu3 %v13098_v34  ;;  %v2605_v56 = vpop.f32.mrf.mxu2  ;;  %v2694_v54 = vpop.f32.mrf.mxu3 }
 0x169   : > { %v2781_v39 = vpop.f32.mrf.mxu0  ;;  %v2870_v42 = vpop.f32.mrf.mxu1  ;;  %16506 = vst [vmem:[#allocation56_spill] sm:$0xff] %v13106_v18  ;;  %v2695_v58 = vadd.f32 %v2694_v54, %v2605_v56  ;;  %3031 = vmatpush.bf16.msra.mxu3 %v12184_v32  ;;  %v12126_v32 = vld [vmem:[#allocation3 + $0x274] sm:$0xf] }
 0x16a   : > { %v2782_v12 = vadd.f32 %v2781_v39, %v2693_v25  ;;  %v13117_v25 = vor.u32 %v12120_v43, %v10396_v53  ;;  %v10404_v53 = vld [vmem:[#allocation3 + $0x260] sm:$0xf0] }
 0x16c   : > { %v13108_v48 = vadd.f32 %v2870_v42, %v2782_v12  ;;  %16508 = vst [vmem:[#allocation58_spill] sm:$0xff] %v13117_v25  ;;  %v12124_v12 = vld [vmem:[#allocation3 + $0x25c] sm:$0xf0] }
 0x171   : > { %v2783_v54 = vpop.f32.mrf.mxu0  ;;  %v2872_v56 = vpop.f32.mrf.mxu1 }
 0x172   : > { %v2784_v42 = vadd.f32 %v2783_v54, %v2695_v58  ;;  %v2608_v35 = vpop.f32.mrf.mxu2  ;;  %v2697_v27 = vpop.f32.mrf.mxu3  ;;  %v10402_v58 = vld [vmem:[#allocation3 + $0x248] sm:$0xf] }
 0x173   : > { %v2698_v39 = vadd.f32 %v2697_v27, %v2608_v35  ;;  %v13129_v35 = vor.u32 %v12124_v12, %v10402_v58 }
 0x174   : > { %v13121_v14 = vadd.f32 %v2872_v56, %v2784_v42  ;;  %v13131_v56 = vor.u32 %v12121_v0, %v10404_v53 }
 0x175   : > { %16509 = vst [vmem:[#allocation59_spill] sm:$0xff] %v13129_v35 }
 0x176   : > { %16510 = vst [vmem:[#allocation60_spill] sm:$0xff] %v13131_v56 }
 0x177   : > { %2820 = vmatmul.bf16.gmra.mxu0 %v13104_v17  ;;  %2909 = vmatmul.bf16.gmra.mxu1 %v13106_v18  ;;  %v12129_v18 = vld [vmem:[#allocation3 + $0x284] sm:$0xf0]  ;;  %v10420_v17 = vld [vmem:[#allocation3 + $0x288] sm:$0xf0] }
 0x178   : > { %2647 = vmatmul.bf16.gmra.mxu2 %v13115_v15  ;;  %2736 = vmatmul.bf16.gmra.mxu3 %v13117_v25  ;;  %v13140_v12 = vor.u32 %v12129_v18, %v10418_v49  ;;  %v13142_v53 = vor.u32 %v12126_v32, %v10420_v17  ;;  %v12254_v18 = vld [vmem:[%s16160_s3 + $0x370] sm:$0xff]  ;;  %v12253_v17 = vld [vmem:[%s16160_s3 + $0x368] sm:$0xff] }
 0x179   : > { %v12130_v49 = vld [vmem:[#allocation3 + $0x28c] sm:$0xf0]  ;;  %v10428_v32 = vld [vmem:[#allocation3 + $0x290] sm:$0xf0] }
 0x17a   : > { %v2610_v42 = vpop.f32.mrf.mxu2  ;;  %v2699_v27 = vpop.f32.mrf.mxu3  ;;  %16511 = vst [vmem:[#allocation61_spill] sm:$0xff] %v13140_v12 }
 0x17b   : > { %v2700_v22 = vadd.f32 %v2699_v27, %v2610_v42  ;;  %16512 = vst [vmem:[#allocation62_spill] sm:$0xff] %v13142_v53 }
 0x17c   : > { %v2786_v31 = vpop.f32.mrf.mxu0  ;;  %v2875_v43 = vpop.f32.mrf.mxu1 }
 0x17d   : > { %v2787_v54 = vadd.f32 %v2786_v31, %v2698_v39  ;;  %v12255_v39 = vld [vmem:[%s16160_s3 + $0x378] sm:$0xff] }
 0x17e   : > { %3682 = vmatpush.bf16.msra.mxu1 %v12255_v39 }
 0x17f   : > { %v13133_v19 = vadd.f32 %v2875_v43, %v2787_v54 }
 0x182   : > { %3683 = vmatpush.bf16.msra.mxu1 %v12254_v18 }
 0x184   : > { %v2788_v31 = vpop.f32.mrf.mxu0  ;;  %v2877_v43 = vpop.f32.mrf.mxu1 }
 0x185   : > { %v2789_v58 = vadd.f32 %v2788_v31, %v2700_v22  ;;  %v2613_v0 = vpop.f32.mrf.mxu2  ;;  %v2702_v54 = vpop.f32.mrf.mxu3  ;;  %v12127_v22 = vld [vmem:[#allocation3 + $0x27c] sm:$0xf] }
 0x186   : > { %v2703_v42 = vadd.f32 %v2702_v54, %v2613_v0  ;;  %v12135_v54 = vld [vmem:[#allocation3 + $0x2b4] sm:$0xf0]  ;;  %3684 = vmatpush.bf16.msra.mxu1 %v12253_v17  ;;  %v5623_v17 = vld [vmem:[#allocation2 + $0x110] sm:$0xf] }
 0x187   : > { %2825 = vmatmul.bf16.gmra.mxu0 %v13129_v35  ;;  %2914 = vmatmul.bf16.gmra.mxu1 %v13131_v56  ;;  %v13146_v27 = vadd.f32 %v2877_v43, %v2789_v58  ;;  %v10426_v35 = vld [vmem:[#allocation3 + $0x278] sm:$0xf]  ;;  %v13156_v43 = vor.u32 %v12127_v22, %v10428_v32  ;;  %v13172_v32 = vor.u32 %v12132_v29, %v10444_v45 }
 0x188   : > { %2652 = vmatmul.bf16.gmra.mxu2 %v13140_v12  ;;  %2741 = vmatmul.bf16.gmra.mxu3 %v13142_v53  ;;  %v13154_v50 = vor.u32 %v12130_v49, %v10426_v35  ;;  %v12244_v35 = vld [vmem:[%s16160_s3 + $0x320] sm:$0xff]  ;;  %v13170_v49 = vor.u32 %v12135_v54, %v10442_v30  ;;  %5655 = vst [vmem:[#allocation3 + $0x2d8] sm:$0xf] %v5623_v17  ;;  %v12243_v22 = vld [vmem:[%s16160_s3 + $0x318] sm:$0xff]  ;;  %v12250_v17 = vld [vmem:[%s16160_s3 + $0x350] sm:$0xff] }
 0x189   : > { %16514 = vst [vmem:[#allocation64_spill] sm:$0xff] %v13156_v43  ;;  %3596 = vmatpush.bf16.msra.mxu0 %v12244_v35 }
 0x18a   : > { %16513 = vst [vmem:[#allocation63_spill] sm:$0xff] %v13154_v50 }
 0x18b   : > { %16515 = vst [vmem:[#allocation65_spill] sm:$0xff] %v13170_v49 }
 0x18c   : > { %16516 = vst [vmem:[#allocation66_spill] sm:$0xff] %v13172_v32 }
 0x18d   : > { %v2615_v58 = vpop.f32.mrf.mxu2  ;;  %v2704_v0 = vpop.f32.mrf.mxu3  ;;  %3597 = vmatpush.bf16.msra.mxu0 %v12243_v22  ;;  %v12241_v22 = vld [vmem:[%s16160_s3 + $0x308] sm:$0xff] }
 0x18e   : > { %v2791_v39 = vpop.f32.mrf.mxu0  ;;  %v2880_v56 = vpop.f32.mrf.mxu1  ;;  %v2705_v18 = vadd.f32 %v2704_v0, %v2615_v58 }
 0x18f   : > { %v2792_v31 = vadd.f32 %v2791_v39, %v2703_v42  ;;  %v12252_v42 = vld [vmem:[%s16160_s3 + $0x360] sm:$0xff]  ;;  %v13174_v39 = vld [vmem:[#allocation3 + $0x2ec] sm:$0xf0] }
 0x190   : > { %3685 = vmatpush.bf16.msra.mxu1 %v12252_v42  ;;  %v12242_v42 = vld [vmem:[%s16160_s3 + $0x310] sm:$0xff] }
 0x191   : > { %v13160_v9 = vadd.f32 %v2880_v56, %v2792_v31  ;;  %v5624_v56 = vld [vmem:[#allocation2 + $0x38] sm:$0xf]  ;;  %3598 = vmatpush.bf16.msra.mxu0 %v12242_v42 }
 0x192   : > { %5656 = vst [vmem:[#allocation3 + $0x2f0] sm:$0xf] %v5624_v56  ;;  %v12251_v31 = vld [vmem:[%s16160_s3 + $0x358] sm:$0xff] }
 0x193   : > { %v12263_v56 = vld [vmem:[%s16160_s3 + $0x3b8] sm:$0xff] }
 0x194   : > { %3686 = vmatpush.bf16.msra.mxu1 %v12251_v31  ;;  %v12249_v31 = vld [vmem:[%s16160_s3 + $0x348] sm:$0xff]  ;;  %3771 = vmatpush.bf16.msrb.mxu2 %v12263_v56  ;;  %v12138_v56 = vld [vmem:[#allocation3 + $0x2d4] sm:$0xf] }
 0x195   : > { %3599 = vmatpush.bf16.msra.mxu0 %v12241_v22  ;;  %v13220_v22 = vor.u32 %v12138_v56, %v10468_v61  ;;  %v13228_v56 = vor.u32 %v13174_v39, %v13158_v10 }
 0x196   : > { %v2793_v29 = vpop.f32.mrf.mxu0  ;;  %v2882_v30 = vpop.f32.mrf.mxu1 }
 0x197   : > { %2830 = vmatmul.bf16.gmra.mxu0 %v13154_v50  ;;  %2919 = vmatmul.bf16.gmra.mxu1 %v13156_v43  ;;  %v2794_v45 = vadd.f32 %v2793_v29, %v2705_v18  ;;  %v2618_v58 = vpop.f32.mrf.mxu2  ;;  %v2707_v0 = vpop.f32.mrf.mxu3  ;;  %v12271_v18 = vld [vmem:[%s16160_s3 + $0x3f8] sm:$0xff]  ;;  %v12136_v29 = vld [vmem:[#allocation3 + $0x2bc] sm:$0xf0]  ;;  %v12133_v43 = vld [vmem:[#allocation3 + $0x2ac] sm:$0xf]  ;;  %16520 = vst [vmem:[#allocation70_spill] sm:$0xff] %v13220_v22 }
 0x198   : > { %2657 = vmatmul.bf16.gmra.mxu2 %v13170_v49  ;;  %2746 = vmatmul.bf16.gmra.mxu3 %v13172_v32  ;;  %v2708_v54 = vadd.f32 %v2707_v0, %v2618_v58  ;;  %v10450_v0 = vld [vmem:[#allocation3 + $0x2a8] sm:$0xf]  ;;  %16521 = vst [vmem:[#allocation71_spill] sm:$0xff] %v13228_v56 }
 0x199   : > { %v13184_v35 = vadd.f32 %v2882_v30, %v2794_v45  ;;  %3687 = vmatpush.bf16.msra.mxu1 %v12250_v17  ;;  %v10452_v30 = vld [vmem:[#allocation3 + $0x2c0] sm:$0xf0]  ;;  %3860 = vmatpush.bf16.msrb.mxu3 %v12271_v18  ;;  %v13204_v63 = vor.u32 %v12136_v29, %v10450_v0  ;;  %v13218_v18 = vor.u32 %v12141_v62, %v10466_v6  ;;  %v10476_v0 = vld [vmem:[#allocation3 + $0x2f0] sm:$0xf0]  ;;  %v12139_v62 = vld [vmem:[#allocation3 + $0x2dc] sm:$0xf] }
 0x19a   : > { %v13206_v42 = vor.u32 %v12133_v43, %v10452_v30  ;;  %v12240_v43 = vld [vmem:[%s16160_s3 + $0x300] sm:$0xff] }
 0x19b   : > { %16517 = vst [vmem:[#allocation67_spill] sm:$0xff] %v13204_v63  ;;  %3600 = vmatpush.bf16.msra.mxu0 %v12240_v43  ;;  %v13230_v43 = vor.u32 %v12139_v62, %v10476_v0  ;;  %v12262_v62 = vld [vmem:[%s16160_s3 + $0x3b0] sm:$0xff] }
 0x19c   : > { %16518 = vst [vmem:[#allocation68_spill] sm:$0xff] %v13206_v42  ;;  %3772 = vmatpush.bf16.msrb.mxu2 %v12262_v62 }
 0x19d   : > { %3688 = vmatpush.bf16.msra.mxu1 %v12249_v31  ;;  %16519 = vst [vmem:[#allocation69_spill] sm:$0xff] %v13218_v18 }
 0x19e   : > { %16522 = vst [vmem:[#allocation72_spill] sm:$0xff] %v13230_v43 }
 0x19f   : > { %v2620_v17 = vpop.f32.mrf.mxu2  ;;  %v2709_v60 = vpop.f32.mrf.mxu3 }
 0x1a0   : > { %v2796_v45 = vpop.f32.mrf.mxu0  ;;  %v2885_v58 = vpop.f32.mrf.mxu1  ;;  %v2710_v7 = vadd.f32 %v2709_v60, %v2620_v17 }
 0x1a1   : > { %v2797_v50 = vadd.f32 %v2796_v45, %v2708_v54  ;;  %v12248_v54 = vld [vmem:[%s16160_s3 + $0x340] sm:$0xff] }
 0x1a2   : > { %3689 = vmatpush.bf16.msra.mxu1 %v12248_v54 }
 0x1a3   : > { %v13208_v32 = vadd.f32 %v2885_v58, %v2797_v50 }
 0x1a7   : > { %2835 = vmatmul.bf16.gmra.mxu0 %v13204_v63  ;;  %2924 = vmatmul.bf16.gmra.mxu1 %v13206_v42  ;;  %v12053_v63 = vld [vmem:[#allocation3 + $0x24] sm:$0xf0] }
 0x1a8   : > { %2662 = vmatmul.bf16.gmra.mxu2 %v13218_v18  ;;  %2751 = vmatmul.bf16.gmra.mxu3 %v13220_v22  ;;  %v2798_v60 = vpop.f32.mrf.mxu0  ;;  %v2887_v50 = vpop.f32.mrf.mxu1 }
 0x1a9   : > { %v2799_v31 = vadd.f32 %v2798_v60, %v2710_v7  ;;  %v2623_v29 = vpop.f32.mrf.mxu2  ;;  %v2712_v30 = vpop.f32.mrf.mxu3  ;;  %v10124_v7 = vld [vmem:[#allocation3 + $0x28] sm:$0xf0] }
 0x1aa   : > { %v2713_v45 = vadd.f32 %v2712_v30, %v2623_v29 }
 0x1ab   : > { %v13224_v58 = vadd.f32 %v2887_v50, %v2799_v31  ;;  %v10122_v50 = vld [vmem:[#allocation3 + $0x10] sm:$0xf]  ;;  %v12050_v31 = vld [vmem:[#allocation3 + $0x14] sm:$0xf] }
 0x1ac   : > { %v13236_v29 = vor.u32 %v12053_v63, %v10122_v50  ;;  %v13238_v30 = vor.u32 %v12050_v31, %v10124_v7  ;;  %v12270_v63 = vld [vmem:[%s16160_s3 + $0x3f0] sm:$0xff]  ;;  %v12059_v31 = vld [vmem:[#allocation3 + $0x54] sm:$0xf0] }
 0x1ad   : > { %3861 = vmatpush.bf16.msrb.mxu3 %v12270_v63 }
 0x1ae   : > { %16523 = vst [vmem:[#allocation73_spill] sm:$0xff] %v13236_v29 }
 0x1af   : > { %16524 = vst [vmem:[#allocation74_spill] sm:$0xff] %v13238_v30 }
 0x1b1   : > { %v2625_v54 = vpop.f32.mrf.mxu2  ;;  %v2714_v42 = vpop.f32.mrf.mxu3 }
 0x1b2   : > { %v2801_v17 = vpop.f32.mrf.mxu0  ;;  %v2890_v6 = vpop.f32.mrf.mxu1  ;;  %v2715_v60 = vadd.f32 %v2714_v42, %v2625_v54 }
 0x1b3   : > { %v2802_v61 = vadd.f32 %v2801_v17, %v2713_v45 }
 0x1b5   : > { %v13232_v22 = vadd.f32 %v2890_v6, %v2802_v61 }
 0x1b7   : > { %2840 = vmatmul.bf16.gmra.mxu0 %v13228_v56  ;;  %2929 = vmatmul.bf16.gmra.mxu1 %v13230_v43 }
 0x1b8   : > { %2943 = vmatmul.bf16.vlgmr.msra.gmra.mxu2 %v13236_v29  ;;  %3032 = vmatmul.bf16.vlgmr.msra.gmra.mxu3 %v13238_v30 }
 0x1b9   : > { %v2628_v42 = vpop.f32.mrf.mxu2  ;;  %v2717_v0 = vpop.f32.mrf.mxu3 }
 0x1ba   : > { %v2803_v10 = vpop.f32.mrf.mxu0  ;;  %v2892_v39 = vpop.f32.mrf.mxu1  ;;  %v2718_v17 = vadd.f32 %v2717_v0, %v2628_v42  ;;  %v12056_v0 = vld [vmem:[#allocation3 + $0x44] sm:$0xf] }
 0x1bb   : > { %v2804_v45 = vadd.f32 %v2803_v10, %v2715_v60  ;;  %v10148_v10 = vld [vmem:[#allocation3 + $0x58] sm:$0xf0] }
 0x1bc   : > { %v13256_v62 = vor.u32 %v12056_v0, %v10148_v10  ;;  %v10172_v10 = vld [vmem:[#allocation3 + $0x88] sm:$0xf0] }
 0x1bd   : > { %v13242_v6 = vadd.f32 %v2892_v39, %v2804_v45  ;;  %v10146_v45 = vld [vmem:[#allocation3 + $0x40] sm:$0xf] }
 0x1be   : > { %v13254_v43 = vor.u32 %v12059_v31, %v10146_v45  ;;  %16526 = vst [vmem:[#allocation76_spill] sm:$0xff] %v13256_v62  ;;  %v12065_v45 = vld [vmem:[#allocation3 + $0x84] sm:$0xf0] }
 0x1c0   : > { %16525 = vst [vmem:[#allocation75_spill] sm:$0xff] %v13254_v43 }
 0x1c1   : > { %v2630_v50 = vpop.f32.mrf.mxu2  ;;  %v2719_v60 = vpop.f32.mrf.mxu3 }
 0x1c2   : > { %v2720_v42 = vadd.f32 %v2719_v60, %v2630_v50 }
 0x1c4   : > { %v2806_v61 = vpop.f32.mrf.mxu0  ;;  %v2895_v54 = vpop.f32.mrf.mxu1 }
 0x1c5   : > { %v2807_v7 = vadd.f32 %v2806_v61, %v2718_v17 }
 0x1c7   : > { %v13250_v39 = vadd.f32 %v2895_v54, %v2807_v7  ;;  %3601 = vmatmul.bf16.vlgmr.msra.gmra.mxu0 %v12793_v3  ;;  %3690 = vmatmul.bf16.vlgmr.msra.gmra.mxu1 %v12828_v24 }
 0x1c8   : > { %2948 = vmatmul.bf16.gmra.mxu2 %v13254_v43  ;;  %3037 = vmatmul.bf16.gmra.mxu3 %v13256_v62 }
 0x1cb   : > { %v2633_v50 = vpop.f32.mrf.mxu2  ;;  %v2722_v54 = vpop.f32.mrf.mxu3 }
 0x1cc   : > { %v2808_v17 = vpop.f32.mrf.mxu0  ;;  %v2897_v63 = vpop.f32.mrf.mxu1  ;;  %v2723_v7 = vadd.f32 %v2722_v54, %v2633_v50 }
 0x1cd   : > { %v2809_v61 = vadd.f32 %v2808_v17, %v2720_v42  ;;  %v10170_v42 = vld [vmem:[#allocation3 + $0x70] sm:$0xf]  ;;  %v12062_v17 = vld [vmem:[#allocation3 + $0x74] sm:$0xf] }
 0x1ce   : > { %v13266_v62 = vor.u32 %v12065_v45, %v10170_v42 }
 0x1cf   : > { %v13260_v60 = vadd.f32 %v2897_v63, %v2809_v61  ;;  %v13268_v63 = vor.u32 %v12062_v17, %v10172_v10 }
 0x1d0   : > { %16527 = vst [vmem:[#allocation77_spill] sm:$0xff] %v13266_v62 }
 0x1d1   : > { %16528 = vst [vmem:[#allocation78_spill] sm:$0xff] %v13268_v63 }
 0x1d3   : > { %v2635_v30 = vpop.f32.mrf.mxu2  ;;  %v2724_v31 = vpop.f32.mrf.mxu3 }
 0x1d4   : > { %v2811_v3 = vpop.f32.mrf.mxu0  ;;  %v2900_v24 = vpop.f32.mrf.mxu1  ;;  %v2725_v0 = vadd.f32 %v2724_v31, %v2635_v30  ;;  %v12269_v31 = vld [vmem:[%s16160_s3 + $0x3e8] sm:$0xff] }
 0x1d5   : > { %v2812_v56 = vadd.f32 %v2811_v3, %v2723_v7  ;;  %v12261_v7 = vld [vmem:[%s16160_s3 + $0x3a8] sm:$0xff]  ;;  %3862 = vmatpush.bf16.msrb.mxu3 %v12269_v31 }
 0x1d6   : > { %3773 = vmatpush.bf16.msrb.mxu2 %v12261_v7 }
 0x1d7   : > { %v13262_v29 = vadd.f32 %v2900_v24, %v2812_v56  ;;  %3606 = vmatmul.bf16.gmra.mxu0 %v12851_v11  ;;  %3695 = vmatmul.bf16.gmra.mxu1 %v12853_v13  ;;  %v10196_v13 = vld [vmem:[#allocation3 + $0xb8] sm:$0xf0] }
 0x1d8   : > { %2953 = vmatmul.bf16.gmra.mxu2 %v13266_v62  ;;  %3042 = vmatmul.bf16.gmra.mxu3 %v13268_v63 }
 0x1db   : > { %v2638_v30 = vpop.f32.mrf.mxu2  ;;  %v2727_v24 = vpop.f32.mrf.mxu3 }
 0x1dc   : > { %v2813_v3 = vpop.f32.mrf.mxu0  ;;  %v2902_v61 = vpop.f32.mrf.mxu1  ;;  %v2728_v56 = vadd.f32 %v2727_v24, %v2638_v30  ;;  %v12068_v24 = vld [vmem:[#allocation3 + $0xa4] sm:$0xf] }
 0x1dd   : > { %v2814_v50 = vadd.f32 %v2813_v3, %v2725_v0  ;;  %v12071_v3 = vld [vmem:[#allocation3 + $0xb4] sm:$0xf0]  ;;  %v13286_v7 = vor.u32 %v12068_v24, %v10196_v13  ;;  %v10220_v13 = vld [vmem:[#allocation3 + $0xe8] sm:$0xf0] }
 0x1df   : > { %v13272_v54 = vadd.f32 %v2902_v61, %v2814_v50  ;;  %v10194_v50 = vld [vmem:[#allocation3 + $0xa0] sm:$0xf]  ;;  %16531 = vst [vmem:[#allocation81_spill] sm:$0xff] %v13286_v7 }
 0x1e0   : > { %v13284_v11 = vor.u32 %v12071_v3, %v10194_v50  ;;  %v12077_v50 = vld [vmem:[#allocation3 + $0xe4] sm:$0xf0] }
 0x1e2   : > { %16530 = vst [vmem:[#allocation80_spill] sm:$0xff] %v13284_v11 }
 0x1e3   : > { %v2640_v17 = vpop.f32.mrf.mxu2  ;;  %v2729_v0 = vpop.f32.mrf.mxu3 }
 0x1e4   : > { %v2816_v45 = vpop.f32.mrf.mxu0  ;;  %v2905_v10 = vpop.f32.mrf.mxu1  ;;  %v2730_v30 = vadd.f32 %v2729_v0, %v2640_v17 }
 0x1e5   : > { %v2817_v42 = vadd.f32 %v2816_v45, %v2728_v56 }
 0x1e7   : > { %v13280_v61 = vadd.f32 %v2905_v10, %v2817_v42  ;;  %3611 = vmatmul.bf16.gmra.mxu0 %v12881_v20  ;;  %3700 = vmatmul.bf16.gmra.mxu1 %v12883_v21 }
 0x1e8   : > { %2958 = vmatmul.bf16.gmra.mxu2 %v13284_v11  ;;  %3047 = vmatmul.bf16.gmra.mxu3 %v13286_v7 }
 0x1e9   : > { %16529 = vst [vmem:[#allocation79_spill] sm:$0xff] %v13280_v61 }
 0x1eb   : > { %v2643_v17 = vpop.f32.mrf.mxu2  ;;  %v2732_v10 = vpop.f32.mrf.mxu3 }
 0x1ec   : > { %v2818_v56 = vpop.f32.mrf.mxu0  ;;  %v2907_v31 = vpop.f32.mrf.mxu1  ;;  %v2733_v42 = vadd.f32 %v2732_v10, %v2643_v17 }
 0x1ed   : > { %v2819_v45 = vadd.f32 %v2818_v56, %v2730_v30  ;;  %v10218_v30 = vld [vmem:[#allocation3 + $0xd0] sm:$0xf]  ;;  %v12074_v56 = vld [vmem:[#allocation3 + $0xd4] sm:$0xf] }
 0x1ee   : > { %v13296_v7 = vor.u32 %v12077_v50, %v10218_v30 }
 0x1ef   : > { %v13290_v0 = vadd.f32 %v2907_v31, %v2819_v45  ;;  %v13298_v31 = vor.u32 %v12074_v56, %v10220_v13 }
 0x1f0   : > { %16532 = vst [vmem:[#allocation82_spill] sm:$0xff] %v13296_v7 }
 0x1f1   : > { %16533 = vst [vmem:[#allocation83_spill] sm:$0xff] %v13298_v31 }
 0x1f3   : > { %v2645_v62 = vpop.f32.mrf.mxu2  ;;  %v2734_v3 = vpop.f32.mrf.mxu3 }
 0x1f4   : > { %v2821_v20 = vpop.f32.mrf.mxu0  ;;  %v2910_v21 = vpop.f32.mrf.mxu1  ;;  %v2735_v24 = vadd.f32 %v2734_v3, %v2645_v62  ;;  %v12268_v3 = vld [vmem:[%s16160_s3 + $0x3e0] sm:$0xff] }
 0x1f5   : > { %v2822_v63 = vadd.f32 %v2821_v20, %v2733_v42  ;;  %v12260_v42 = vld [vmem:[%s16160_s3 + $0x3a0] sm:$0xff]  ;;  %3863 = vmatpush.bf16.msrb.mxu3 %v12268_v3 }
 0x1f6   : > { %3774 = vmatpush.bf16.msrb.mxu2 %v12260_v42 }
 0x1f7   : > { %v13292_v61 = vadd.f32 %v2910_v21, %v2822_v63  ;;  %3616 = vmatmul.bf16.gmra.mxu0 %v12905_v26  ;;  %3705 = vmatmul.bf16.gmra.mxu1 %v12907_v28  ;;  %v10244_v28 = vld [vmem:[#allocation3 + $0x118] sm:$0xf0] }
 0x1f8   : > { %2963 = vmatmul.bf16.gmra.mxu2 %v13296_v7  ;;  %3052 = vmatmul.bf16.gmra.mxu3 %v13298_v31 }
 0x1fb   : > { %v2648_v62 = vpop.f32.mrf.mxu2  ;;  %v2737_v21 = vpop.f32.mrf.mxu3 }
 0x1fc   : > { %v2823_v20 = vpop.f32.mrf.mxu0  ;;  %v2912_v45 = vpop.f32.mrf.mxu1  ;;  %v2738_v63 = vadd.f32 %v2737_v21, %v2648_v62  ;;  %v12080_v21 = vld [vmem:[#allocation3 + $0x104] sm:$0xf] }
 0x1fd   : > { %v2824_v17 = vadd.f32 %v2823_v20, %v2735_v24  ;;  %v12083_v20 = vld [vmem:[#allocation3 + $0x114] sm:$0xf0]  ;;  %v13316_v42 = vor.u32 %v12080_v21, %v10244_v28  ;;  %v10268_v28 = vld [vmem:[#allocation3 + $0x148] sm:$0xf0] }
 0x1ff   : > { %v13302_v10 = vadd.f32 %v2912_v45, %v2824_v17  ;;  %v10242_v17 = vld [vmem:[#allocation3 + $0x100] sm:$0xf]  ;;  %16536 = vst [vmem:[#allocation86_spill] sm:$0xff] %v13316_v42 }
 0x200   : > { %v13314_v26 = vor.u32 %v12083_v20, %v10242_v17  ;;  %v12089_v17 = vld [vmem:[#allocation3 + $0x144] sm:$0xf0] }
 0x202   : > { %16535 = vst [vmem:[#allocation85_spill] sm:$0xff] %v13314_v26 }
 0x203   : > { %v2650_v56 = vpop.f32.mrf.mxu2  ;;  %v2739_v24 = vpop.f32.mrf.mxu3 }
 0x204   : > { %v2826_v50 = vpop.f32.mrf.mxu0  ;;  %v2915_v13 = vpop.f32.mrf.mxu1  ;;  %v2740_v62 = vadd.f32 %v2739_v24, %v2650_v56 }
 0x205   : > { %v2827_v30 = vadd.f32 %v2826_v50, %v2738_v63 }
 0x207   : > { %v13310_v45 = vadd.f32 %v2915_v13, %v2827_v30  ;;  %3621 = vmatmul.bf16.gmra.mxu0 %v12936_v37  ;;  %3710 = vmatmul.bf16.gmra.mxu1 %v12938_v38 }
 0x208   : > { %2968 = vmatmul.bf16.gmra.mxu2 %v13314_v26  ;;  %3057 = vmatmul.bf16.gmra.mxu3 %v13316_v42 }
 0x209   : > { %16534 = vst [vmem:[#allocation84_spill] sm:$0xff] %v13310_v45 }
 0x20b   : > { %v2653_v56 = vpop.f32.mrf.mxu2  ;;  %v2742_v13 = vpop.f32.mrf.mxu3 }
 0x20c   : > { %v2828_v63 = vpop.f32.mrf.mxu0  ;;  %v2917_v3 = vpop.f32.mrf.mxu1  ;;  %v2743_v30 = vadd.f32 %v2742_v13, %v2653_v56 }
 0x20d   : > { %v2829_v50 = vadd.f32 %v2828_v63, %v2740_v62  ;;  %v10266_v62 = vld [vmem:[#allocation3 + $0x130] sm:$0xf]  ;;  %v12086_v63 = vld [vmem:[#allocation3 + $0x134] sm:$0xf] }
 0x20e   : > { %v13326_v42 = vor.u32 %v12089_v17, %v10266_v62 }
 0x20f   : > { %v13320_v24 = vadd.f32 %v2917_v3, %v2829_v50  ;;  %v13328_v3 = vor.u32 %v12086_v63, %v10268_v28 }
 0x210   : > { %16537 = vst [vmem:[#allocation87_spill] sm:$0xff] %v13326_v42 }
 0x211   : > { %16538 = vst [vmem:[#allocation88_spill] sm:$0xff] %v13328_v3 }
 0x213   : > { %v2655_v7 = vpop.f32.mrf.mxu2  ;;  %v2744_v20 = vpop.f32.mrf.mxu3 }
 0x214   : > { %v2831_v37 = vpop.f32.mrf.mxu0  ;;  %v2920_v38 = vpop.f32.mrf.mxu1  ;;  %v2745_v21 = vadd.f32 %v2744_v20, %v2655_v7  ;;  %v12267_v20 = vld [vmem:[%s16160_s3 + $0x3d8] sm:$0xff] }
 0x215   : > { %v2832_v31 = vadd.f32 %v2831_v37, %v2743_v30  ;;  %v12259_v30 = vld [vmem:[%s16160_s3 + $0x398] sm:$0xff]  ;;  %3864 = vmatpush.bf16.msrb.mxu3 %v12267_v20 }
 0x216   : > { %3775 = vmatpush.bf16.msrb.mxu2 %v12259_v30 }
 0x217   : > { %v13322_v45 = vadd.f32 %v2920_v38, %v2832_v31  ;;  %3626 = vmatmul.bf16.gmra.mxu0 %v12957_v46  ;;  %3715 = vmatmul.bf16.gmra.mxu1 %v12959_v47  ;;  %v10292_v47 = vld [vmem:[#allocation3 + $0x178] sm:$0xf0] }
 0x218   : > { %2973 = vmatmul.bf16.gmra.mxu2 %v13326_v42  ;;  %3062 = vmatmul.bf16.gmra.mxu3 %v13328_v3 }
 0x21b   : > { %v2658_v7 = vpop.f32.mrf.mxu2  ;;  %v2747_v38 = vpop.f32.mrf.mxu3 }
 0x21c   : > { %v2833_v37 = vpop.f32.mrf.mxu0  ;;  %v2922_v50 = vpop.f32.mrf.mxu1  ;;  %v2748_v31 = vadd.f32 %v2747_v38, %v2658_v7  ;;  %v12092_v38 = vld [vmem:[#allocation3 + $0x164] sm:$0xf] }
 0x21d   : > { %v2834_v56 = vadd.f32 %v2833_v37, %v2745_v21  ;;  %v12095_v37 = vld [vmem:[#allocation3 + $0x174] sm:$0xf0]  ;;  %v13346_v30 = vor.u32 %v12092_v38, %v10292_v47  ;;  %v10316_v47 = vld [vmem:[#allocation3 + $0x1a8] sm:$0xf0] }
 0x21f   : > { %v13332_v13 = vadd.f32 %v2922_v50, %v2834_v56  ;;  %v10290_v56 = vld [vmem:[#allocation3 + $0x160] sm:$0xf]  ;;  %16541 = vst [vmem:[#allocation91_spill] sm:$0xff] %v13346_v30 }
 0x220   : > { %v13344_v46 = vor.u32 %v12095_v37, %v10290_v56  ;;  %v12101_v56 = vld [vmem:[#allocation3 + $0x1a4] sm:$0xf0] }
 0x222   : > { %16540 = vst [vmem:[#allocation90_spill] sm:$0xff] %v13344_v46 }
 0x223   : > { %v2660_v63 = vpop.f32.mrf.mxu2  ;;  %v2749_v21 = vpop.f32.mrf.mxu3 }
 0x224   : > { %v2836_v17 = vpop.f32.mrf.mxu0  ;;  %v2925_v28 = vpop.f32.mrf.mxu1  ;;  %v2750_v7 = vadd.f32 %v2749_v21, %v2660_v63 }
 0x225   : > { %v2837_v62 = vadd.f32 %v2836_v17, %v2748_v31 }
 0x227   : > { %v13340_v50 = vadd.f32 %v2925_v28, %v2837_v62  ;;  %3631 = vmatmul.bf16.gmra.mxu0 %v12985_v1  ;;  %3720 = vmatmul.bf16.gmra.mxu1 %v12987_v2 }
 0x228   : > { %2978 = vmatmul.bf16.gmra.mxu2 %v13344_v46  ;;  %3067 = vmatmul.bf16.gmra.mxu3 %v13346_v30 }
 0x229   : > { %16539 = vst [vmem:[#allocation89_spill] sm:$0xff] %v13340_v50 }
 0x22b   : > { %v2663_v63 = vpop.f32.mrf.mxu2  ;;  %v2752_v28 = vpop.f32.mrf.mxu3 }
 0x22c   : > { %v2838_v31 = vpop.f32.mrf.mxu0  ;;  %v2927_v20 = vpop.f32.mrf.mxu1  ;;  %v2753_v62 = vadd.f32 %v2752_v28, %v2663_v63  ;;  %v12258_v28 = vld [vmem:[%s16160_s3 + $0x390] sm:$0xff] }
 0x22d   : > { %v2839_v17 = vadd.f32 %v2838_v31, %v2750_v7  ;;  %v10314_v7 = vld [vmem:[#allocation3 + $0x190] sm:$0xf]  ;;  %v12098_v31 = vld [vmem:[#allocation3 + $0x194] sm:$0xf]  ;;  %3776 = vmatpush.bf16.msrb.mxu2 %v12258_v28 }
 0x22e   : > { %v13356_v30 = vor.u32 %v12101_v56, %v10314_v7 }
 0x22f   : > { %v13350_v21 = vadd.f32 %v2927_v20, %v2839_v17  ;;  %v13358_v20 = vor.u32 %v12098_v31, %v10316_v47 }
 0x230   : > { %16542 = vst [vmem:[#allocation92_spill] sm:$0xff] %v13356_v30 }
 0x231   : > { %16543 = vst [vmem:[#allocation93_spill] sm:$0xff] %v13358_v20 }
 0x233   : > { %v2665_v42 = vpop.f32.mrf.mxu2  ;;  %v2754_v37 = vpop.f32.mrf.mxu3 }
 0x234   : > { %v2841_v1 = vpop.f32.mrf.mxu0  ;;  %v2930_v2 = vpop.f32.mrf.mxu1  ;;  %v2755_v38 = vadd.f32 %v2754_v37, %v2665_v42 }
 0x235   : > { %v2842_v3 = vadd.f32 %v2841_v1, %v2753_v62  ;;  %v12279_v1 = vld [vmem:[%s16160_s3 + $0x438] sm:$0xff]  ;;  %v12266_v62 = vld [vmem:[%s16160_s3 + $0x3d0] sm:$0xff] }
 0x236   : > { %3949 = vmatpush.bf16.msrb.mxu0 %v12279_v1  ;;  %3865 = vmatpush.bf16.msrb.mxu3 %v12266_v62 }
 0x237   : > { %v13352_v50 = vadd.f32 %v2930_v2, %v2842_v3  ;;  %3636 = vmatmul.bf16.gmra.mxu0 %v13014_v44  ;;  %3725 = vmatmul.bf16.gmra.mxu1 %v13016_v52  ;;  %v12107_v52 = vld [vmem:[#allocation3 + $0x1d4] sm:$0xf0]  ;;  %v10340_v44 = vld [vmem:[#allocation3 + $0x1d8] sm:$0xf0] }
 0x238   : > { %2983 = vmatmul.bf16.gmra.mxu2 %v13356_v30  ;;  %3072 = vmatmul.bf16.gmra.mxu3 %v13358_v20 }
 0x23b   : > { %v2944_v17 = vpop.f32.mrf.mxu2  ;;  %v3033_v63 = vpop.f32.mrf.mxu3 }
 0x23c   : > { %v2843_v2 = vpop.f32.mrf.mxu0  ;;  %v2932_v42 = vpop.f32.mrf.mxu1  ;;  %v2945_v37 = vadd.f32 %v2944_v17, %v13051_v4  ;;  %v10338_v4 = vld [vmem:[#allocation3 + $0x1c0] sm:$0xf] }
 0x23d   : > { %v2844_v3 = vadd.f32 %v2843_v2, %v2755_v38  ;;  %v13379_v17 = vor.u32 %v12107_v52, %v10338_v4  ;;  %v12113_v4 = vld [vmem:[#allocation3 + $0x204] sm:$0xf0] }
 0x23e   : > { %v3034_v47 = vadd.f32 %v3033_v63, %v2945_v37 }
 0x23f   : > { %v13372_v56 = vadd.f32 %v2932_v42, %v2844_v3  ;;  %v12104_v42 = vld [vmem:[#allocation3 + $0x1c4] sm:$0xf] }
 0x240   : > { %4127 = vst [vmem:[#allocation4 + $0x8] sm:$0xff] %v3034_v47  ;;  %v13381_v63 = vor.u32 %v12104_v42, %v10340_v44  ;;  %v10364_v42 = vld [vmem:[#allocation3 + $0x208] sm:$0xf0] }
 0x243   : > { %v2946_v1 = vpop.f32.mrf.mxu2  ;;  %v3035_v2 = vpop.f32.mrf.mxu3 }
 0x244   : > { %v3602_v7 = vpop.f32.mrf.mxu0  ;;  %v3691_v38 = vpop.f32.mrf.mxu1  ;;  %v2947_v20 = vadd.f32 %v2946_v1, %v13061_v59 }
 0x245   : > { %v13374_v31 = vadd.f32 %v3691_v38, %v3602_v7 }
 0x246   : > { %v3036_v3 = vadd.f32 %v3035_v2, %v2947_v20 }
 0x247   : > { %3641 = vmatmul.bf16.gmra.mxu0 %v13029_v57  ;;  %3730 = vmatmul.bf16.gmra.mxu1 %v13031_v51 }
 0x248   : > { %4128 = vst [vmem:[#allocation4 + $0x10] sm:$0xff] %v3036_v3  ;;  %2988 = vmatmul.bf16.gmra.mxu2 %v13379_v17  ;;  %3077 = vmatmul.bf16.gmra.mxu3 %v13381_v63 }
 0x24b   : > { %v2949_v59 = vpop.f32.mrf.mxu2  ;;  %v3038_v47 = vpop.f32.mrf.mxu3 }
 0x24c   : > { %v3604_v28 = vpop.f32.mrf.mxu0  ;;  %v3693_v62 = vpop.f32.mrf.mxu1  ;;  %v2950_v7 = vadd.f32 %v2949_v59, %v13067_v40 }
 0x24d   : > { %v13385_v37 = vadd.f32 %v3693_v62, %v3604_v28  ;;  %v10362_v28 = vld [vmem:[#allocation3 + $0x1f0] sm:$0xf]  ;;  %v12110_v62 = vld [vmem:[#allocation3 + $0x1f4] sm:$0xf] }
 0x24e   : > { %v3039_v38 = vadd.f32 %v3038_v47, %v2950_v7  ;;  %v13393_v40 = vor.u32 %v12113_v4, %v10362_v28  ;;  %v13395_v59 = vor.u32 %v12110_v62, %v10364_v42 }
 0x250   : > { %4129 = vst [vmem:[#allocation4 + $0x18] sm:$0xff] %v3039_v38 }
 0x253   : > { %v2951_v44 = vpop.f32.mrf.mxu2  ;;  %v3040_v2 = vpop.f32.mrf.mxu3 }
 0x254   : > { %v3607_v20 = vpop.f32.mrf.mxu0  ;;  %v3696_v52 = vpop.f32.mrf.mxu1  ;;  %v2952_v3 = vadd.f32 %v2951_v44, %v13080_v41  ;;  %v12278_v41 = vld [vmem:[%s16160_s3 + $0x430] sm:$0xff]  ;;  %v12257_v44 = vld [vmem:[%s16160_s3 + $0x388] sm:$0xff] }
 0x255   : > { %v13388_v1 = vadd.f32 %v3696_v52, %v3607_v20  ;;  %3950 = vmatpush.bf16.msrb.mxu0 %v12278_v41  ;;  %3777 = vmatpush.bf16.msrb.mxu2 %v12257_v44 }
 0x256   : > { %v3041_v51 = vadd.f32 %v3040_v2, %v2952_v3 }
 0x257   : > { %3646 = vmatmul.bf16.gmra.mxu0 %v13053_v5  ;;  %3735 = vmatmul.bf16.gmra.mxu1 %v13055_v8  ;;  %v10386_v5 = vld [vmem:[#allocation3 + $0x220] sm:$0xf] }
 0x258   : > { %4130 = vst [vmem:[#allocation4 + $0x20] sm:$0xff] %v3041_v51  ;;  %2993 = vmatmul.bf16.gmra.mxu2 %v13393_v40  ;;  %3082 = vmatmul.bf16.gmra.mxu3 %v13395_v59  ;;  %v12265_v51 = vld [vmem:[%s16160_s3 + $0x3c8] sm:$0xff] }
 0x259   : > { %3866 = vmatpush.bf16.msrb.mxu3 %v12265_v51 }
 0x25b   : > { %v2954_v20 = vpop.f32.mrf.mxu2  ;;  %v3043_v52 = vpop.f32.mrf.mxu3 }
 0x25c   : > { %v3609_v47 = vpop.f32.mrf.mxu0  ;;  %v3698_v7 = vpop.f32.mrf.mxu1  ;;  %v2955_v2 = vadd.f32 %v2954_v20, %v13092_v36  ;;  %v12116_v36 = vld [vmem:[#allocation3 + $0x224] sm:$0xf] }
 0x25d   : > { %v13402_v38 = vadd.f32 %v3698_v7, %v3609_v47  ;;  %v12119_v47 = vld [vmem:[#allocation3 + $0x234] sm:$0xf0]  ;;  %v10388_v7 = vld [vmem:[#allocation3 + $0x238] sm:$0xf0] }
 0x25e   : > { %v3044_v4 = vadd.f32 %v3043_v52, %v2955_v2  ;;  %v13416_v44 = vor.u32 %v12119_v47, %v10386_v5  ;;  %v13418_v52 = vor.u32 %v12116_v36, %v10388_v7  ;;  %v12125_v36 = vld [vmem:[#allocation3 + $0x264] sm:$0xf0] }
 0x260   : > { %4131 = vst [vmem:[#allocation4 + $0x28] sm:$0xff] %v3044_v4 }
 0x263   : > { %v2956_v62 = vpop.f32.mrf.mxu2  ;;  %v3045_v41 = vpop.f32.mrf.mxu3 }
 0x264   : > { %v3612_v42 = vpop.f32.mrf.mxu0  ;;  %v3701_v3 = vpop.f32.mrf.mxu1  ;;  %v2957_v8 = vadd.f32 %v2956_v62, %v13102_v33 }
 0x265   : > { %v13411_v28 = vadd.f32 %v3701_v3, %v3612_v42 }
 0x266   : > { %v3046_v20 = vadd.f32 %v3045_v41, %v2957_v8 }
 0x267   : > { %3651 = vmatmul.bf16.gmra.mxu0 %v13074_v23  ;;  %3740 = vmatmul.bf16.gmra.mxu1 %v13076_v16 }
 0x268   : > { %4132 = vst [vmem:[#allocation4 + $0x30] sm:$0xff] %v3046_v20  ;;  %2998 = vmatmul.bf16.gmra.mxu2 %v13416_v44  ;;  %3087 = vmatmul.bf16.gmra.mxu3 %v13418_v52  ;;  %v10412_v20 = vld [vmem:[#allocation3 + $0x268] sm:$0xf0] }
 0x26b   : > { %v2959_v33 = vpop.f32.mrf.mxu2  ;;  %v3048_v42 = vpop.f32.mrf.mxu3 }
 0x26c   : > { %v3614_v51 = vpop.f32.mrf.mxu0  ;;  %v3703_v2 = vpop.f32.mrf.mxu1  ;;  %v2960_v3 = vadd.f32 %v2959_v33, %v13108_v48 }
 0x26d   : > { %v13422_v4 = vadd.f32 %v3703_v2, %v3614_v51  ;;  %v10410_v51 = vld [vmem:[#allocation3 + $0x250] sm:$0xf]  ;;  %v12122_v2 = vld [vmem:[#allocation3 + $0x254] sm:$0xf] }
 0x26e   : > { %v3049_v62 = vadd.f32 %v3048_v42, %v2960_v3  ;;  %v13430_v48 = vor.u32 %v12125_v36, %v10410_v51  ;;  %v13432_v33 = vor.u32 %v12122_v2, %v10412_v20 }
 0x270   : > { %4133 = vst [vmem:[#allocation4 + $0x38] sm:$0xff] %v3049_v62 }
 0x273   : > { %v2961_v47 = vpop.f32.mrf.mxu2  ;;  %v3050_v7 = vpop.f32.mrf.mxu3 }
 0x274   : > { %v3617_v8 = vpop.f32.mrf.mxu0  ;;  %v3706_v5 = vpop.f32.mrf.mxu1  ;;  %v2962_v16 = vadd.f32 %v2961_v47, %v13121_v14  ;;  %v12277_v14 = vld [vmem:[%s16160_s3 + $0x428] sm:$0xff] }
 0x275   : > { %v13425_v41 = vadd.f32 %v3706_v5, %v3617_v8  ;;  %3951 = vmatpush.bf16.msrb.mxu0 %v12277_v14  ;;  %v12256_v5 = vld [vmem:[%s16160_s3 + $0x380] sm:$0xff] }
 0x276   : > { %v3051_v23 = vadd.f32 %v3050_v7, %v2962_v16  ;;  %3778 = vmatpush.bf16.msrb.mxu2 %v12256_v5 }
 0x277   : > { %3656 = vmatmul.bf16.gmra.mxu0 %v13096_v55  ;;  %3745 = vmatmul.bf16.gmra.mxu1 %v13098_v34  ;;  %v10434_v55 = vld [vmem:[#allocation3 + $0x280] sm:$0xf] }
 0x278   : > { %4134 = vst [vmem:[#allocation4 + $0x40] sm:$0xff] %v3051_v23  ;;  %3003 = vmatmul.bf16.gmra.mxu2 %v13430_v48  ;;  %3092 = vmatmul.bf16.gmra.mxu3 %v13432_v33  ;;  %v12264_v23 = vld [vmem:[%s16160_s3 + $0x3c0] sm:$0xff] }
 0x279   : > { %3867 = vmatpush.bf16.msrb.mxu3 %v12264_v23 }
 0x27b   : > { %v2964_v8 = vpop.f32.mrf.mxu2  ;;  %v3053_v16 = vpop.f32.mrf.mxu3 }
 0x27c   : > { %v3619_v42 = vpop.f32.mrf.mxu0  ;;  %v3708_v3 = vpop.f32.mrf.mxu1  ;;  %v2965_v47 = vadd.f32 %v2964_v8, %v13133_v19  ;;  %v12128_v19 = vld [vmem:[#allocation3 + $0x284] sm:$0xf]  ;;  %v12287_v8 = vld [vmem:[%s16160_s3 + $0x478] sm:$0xff] }
 0x27d   : > { %v13439_v62 = vadd.f32 %v3708_v3, %v3619_v42  ;;  %v12131_v42 = vld [vmem:[#allocation3 + $0x294] sm:$0xf0]  ;;  %v10436_v3 = vld [vmem:[#allocation3 + $0x298] sm:$0xf0]  ;;  %4038 = vmatpush.bf16.msrb.mxu1 %v12287_v8 }
 0x27e   : > { %v3054_v7 = vadd.f32 %v3053_v16, %v2965_v47  ;;  %v13456_v5 = vor.u32 %v12131_v42, %v10434_v55  ;;  %v13458_v23 = vor.u32 %v12128_v19, %v10436_v3  ;;  %v12137_v19 = vld [vmem:[#allocation3 + $0x2c4] sm:$0xf0] }
 0x280   : > { %4135 = vst [vmem:[#allocation4 + $0x48] sm:$0xff] %v3054_v7 }
 0x283   : > { %v2966_v2 = vpop.f32.mrf.mxu2  ;;  %v3055_v14 = vpop.f32.mrf.mxu3 }
 0x284   : > { %v3622_v36 = vpop.f32.mrf.mxu0  ;;  %v3711_v20 = vpop.f32.mrf.mxu1  ;;  %v2967_v34 = vadd.f32 %v2966_v2, %v13146_v27  ;;  %v12285_v2 = vld [vmem:[%s16160_s3 + $0x468] sm:$0xff] }
 0x285   : > { %v13448_v51 = vadd.f32 %v3711_v20, %v3622_v36 }
 0x286   : > { %v3056_v16 = vadd.f32 %v3055_v14, %v2967_v34  ;;  %v12286_v34 = vld [vmem:[%s16160_s3 + $0x470] sm:$0xff] }
 0x287   : > { %3661 = vmatmul.bf16.gmra.mxu0 %v13115_v15  ;;  %3750 = vmatmul.bf16.gmra.mxu1 %v13117_v25 }
 0x288   : > { %4136 = vst [vmem:[#allocation4 + $0x50] sm:$0xff] %v3056_v16  ;;  %3008 = vmatmul.bf16.gmra.mxu2 %v13456_v5  ;;  %3097 = vmatmul.bf16.gmra.mxu3 %v13458_v23 }
 0x289   : > { %4039 = vmatpush.bf16.msrb.mxu1 %v12286_v34  ;;  %v10458_v34 = vld [vmem:[#allocation3 + $0x2b0] sm:$0xf] }
 0x28b   : > { %v2969_v36 = vpop.f32.mrf.mxu2  ;;  %v3058_v20 = vpop.f32.mrf.mxu3 }
 0x28c   : > { %v3624_v27 = vpop.f32.mrf.mxu0  ;;  %v3713_v47 = vpop.f32.mrf.mxu1  ;;  %v2970_v55 = vadd.f32 %v2969_v36, %v13160_v9  ;;  %v12276_v9 = vld [vmem:[%s16160_s3 + $0x420] sm:$0xff] }
 0x28d   : > { %v13462_v7 = vadd.f32 %v3713_v47, %v3624_v27  ;;  %4040 = vmatpush.bf16.msrb.mxu1 %v12285_v2  ;;  %v10460_v47 = vld [vmem:[#allocation3 + $0x2c8] sm:$0xf0]  ;;  %v12284_v36 = vld [vmem:[%s16160_s3 + $0x460] sm:$0xff]  ;;  %3952 = vmatpush.bf16.msrb.mxu0 %v12276_v9 }
 0x28e   : > { %v3059_v14 = vadd.f32 %v3058_v20, %v2970_v55  ;;  %v12134_v55 = vld [vmem:[#allocation3 + $0x2b4] sm:$0xf] }
 0x290   : > { %4137 = vst [vmem:[#allocation4 + $0x58] sm:$0xff] %v3059_v14  ;;  %v13482_v14 = vor.u32 %v12137_v19, %v10458_v34  ;;  %v12199_v34 = vld [vmem:[%s16160_s3 + $0x1b8] sm:$0xff] }
 0x291   : > { %4041 = vmatpush.bf16.msrb.mxu1 %v12284_v36  ;;  %v12274_v36 = vld [vmem:[%s16160_s3 + $0x410] sm:$0xff]  ;;  %4639 = vmatpush.bf16.msra.mxu2 %v12199_v34  ;;  %v12272_v34 = vld [vmem:[%s16160_s3 + $0x400] sm:$0xff] }
 0x292   : > { %16544 = vst [vmem:[#allocation94_spill] sm:$0xff] %v13482_v14 }
 0x293   : > { %v2971_v16 = vpop.f32.mrf.mxu2  ;;  %v3060_v27 = vpop.f32.mrf.mxu3 }
 0x294   : > { %v3627_v42 = vpop.f32.mrf.mxu0  ;;  %v3716_v3 = vpop.f32.mrf.mxu1  ;;  %v2972_v20 = vadd.f32 %v2971_v16, %v13184_v35  ;;  %v12283_v35 = vld [vmem:[%s16160_s3 + $0x458] sm:$0xff] }
 0x295   : > { %v13471_v8 = vadd.f32 %v3716_v3, %v3627_v42  ;;  %v13484_v42 = vor.u32 %v12134_v55, %v10460_v47  ;;  %v12275_v3 = vld [vmem:[%s16160_s3 + $0x418] sm:$0xff]  ;;  %4042 = vmatpush.bf16.msrb.mxu1 %v12283_v35  ;;  %v12273_v35 = vld [vmem:[%s16160_s3 + $0x408] sm:$0xff] }
 0x296   : > { %v3061_v2 = vadd.f32 %v3060_v27, %v2972_v20  ;;  %3953 = vmatpush.bf16.msrb.mxu0 %v12275_v3  ;;  %v12282_v20 = vld [vmem:[%s16160_s3 + $0x450] sm:$0xff] }
 0x297   : > { %3666 = vmatmul.bf16.gmra.mxu0 %v13140_v12  ;;  %3755 = vmatmul.bf16.gmra.mxu1 %v13142_v53  ;;  %16545 = vst [vmem:[#allocation95_spill] sm:$0xff] %v13484_v42  ;;  %v10484_v53 = vld [vmem:[#allocation3 + $0x2f8] sm:$0xf0] }
 0x298   : > { %4138 = vst [vmem:[#allocation4 + $0x60] sm:$0xff] %v3061_v2  ;;  %3013 = vmatmul.bf16.gmra.mxu2 %v13482_v14  ;;  %3102 = vmatmul.bf16.gmra.mxu3 %v13484_v42  ;;  %v12207_v2 = vld [vmem:[%s16160_s3 + $0x1f8] sm:$0xff] }
 0x299   : > { %4043 = vmatpush.bf16.msrb.mxu1 %v12282_v20  ;;  %4728 = vmatpush.bf16.msra.mxu3 %v12207_v2 }
 0x29a   : > { %3954 = vmatpush.bf16.msrb.mxu0 %v12274_v36 }
 0x29b   : > { %v2974_v47 = vpop.f32.mrf.mxu2  ;;  %v3063_v9 = vpop.f32.mrf.mxu3 }
 0x29c   : > { %v3629_v16 = vpop.f32.mrf.mxu0  ;;  %v3718_v19 = vpop.f32.mrf.mxu1  ;;  %v2975_v55 = vadd.f32 %v2974_v47, %v13208_v32  ;;  %v12143_v32 = vld [vmem:[#allocation3 + $0x2f4] sm:$0xf0]  ;;  %v12140_v47 = vld [vmem:[#allocation3 + $0x2e4] sm:$0xf] }
 0x29d   : > { %v13494_v27 = vadd.f32 %v3718_v19, %v3629_v16  ;;  %v12281_v16 = vld [vmem:[%s16160_s3 + $0x448] sm:$0xff]  ;;  %v10482_v19 = vld [vmem:[#allocation3 + $0x2e0] sm:$0xf]  ;;  %v13526_v15 = vor.u32 %v12140_v47, %v10484_v53 }
 0x29e   : > { %v3064_v3 = vadd.f32 %v3063_v9, %v2975_v55  ;;  %3955 = vmatpush.bf16.msrb.mxu0 %v12273_v35  ;;  %4044 = vmatpush.bf16.msrb.mxu1 %v12281_v16  ;;  %v12280_v55 = vld [vmem:[%s16160_s3 + $0x440] sm:$0xff] }
 0x2a0   : > { %4139 = vst [vmem:[#allocation4 + $0x68] sm:$0xff] %v3064_v3  ;;  %v13524_v3 = vor.u32 %v12143_v32, %v10482_v19 }
 0x2a2   : > { %3956 = vmatpush.bf16.msrb.mxu0 %v12272_v34  ;;  %4045 = vmatpush.bf16.msrb.mxu1 %v12280_v55 }
 0x2a3   : > { %v2976_v36 = vpop.f32.mrf.mxu2  ;;  %v3065_v20 = vpop.f32.mrf.mxu3 }
 0x2a4   : > { %v3632_v12 = vpop.f32.mrf.mxu0  ;;  %v3721_v25 = vpop.f32.mrf.mxu1  ;;  %v2977_v2 = vadd.f32 %v2976_v36, %v13224_v58 }
 0x2a5   : > { %v13515_v9 = vadd.f32 %v3721_v25, %v3632_v12  ;;  %v16546_v25 = vld [vmem:[#allocation66_spill] sm:$0xff] }
 0x2a6   : > { %v3066_v12 = vadd.f32 %v3065_v20, %v2977_v2 }
 0x2a7   : > { %3671 = vmatmul.bf16.gmra.mxu0 %v13170_v49  ;;  %3760 = vmatmul.bf16.gmra.mxu1 %v16546_v25  ;;  %v16549_v25 = vld [vmem:[#allocation12_spill] sm:$0xff]  ;;  %v16551_v49 = vld [vmem:[#allocation74_spill] sm:$0xff] }
 0x2a8   : > { %4140 = vst [vmem:[#allocation4 + $0x70] sm:$0xff] %v3066_v12  ;;  %3018 = vmatmul.bf16.gmra.mxu2 %v13524_v3  ;;  %3107 = vmatmul.bf16.gmra.mxu3 %v13526_v15  ;;  %v16547_v12 = vld [vmem:[#allocation70_spill] sm:$0xff] }
 0x2ab   : > { %v2979_v58 = vpop.f32.mrf.mxu2  ;;  %v3068_v19 = vpop.f32.mrf.mxu3 }
 0x2ac   : > { %v3634_v35 = vpop.f32.mrf.mxu0  ;;  %v3723_v16 = vpop.f32.mrf.mxu1  ;;  %v2980_v53 = vadd.f32 %v2979_v58, %v13232_v22 }
 0x2ad   : > { %v13532_v57 = vadd.f32 %v3723_v16, %v3634_v35  ;;  %v16548_v16 = vld [vmem:[#allocation11_spill] sm:$0xff] }
 0x2ae   : > { %v3069_v32 = vadd.f32 %v3068_v19, %v2980_v53 }
 0x2b0   : > { %4141 = vst [vmem:[#allocation4 + $0x78] sm:$0xff] %v3069_v32 }
 0x2b3   : > { %v2981_v34 = vpop.f32.mrf.mxu2  ;;  %v3070_v55 = vpop.f32.mrf.mxu3 }
 0x2b4   : > { %v3637_v47 = vpop.f32.mrf.mxu0  ;;  %v3726_v36 = vpop.f32.mrf.mxu1  ;;  %v2982_v2 = vadd.f32 %v2981_v34, %v13242_v6  ;;  %v12198_v6 = vld [vmem:[%s16160_s3 + $0x1b0] sm:$0xff] }
 0x2b5   : > { %v13535_v20 = vadd.f32 %v3726_v36, %v3637_v47  ;;  %v12206_v47 = vld [vmem:[%s16160_s3 + $0x1f0] sm:$0xff]  ;;  %4640 = vmatpush.bf16.msra.mxu2 %v12198_v6 }
 0x2b6   : > { %v3071_v35 = vadd.f32 %v3070_v55, %v2982_v2  ;;  %4729 = vmatpush.bf16.msra.mxu3 %v12206_v47 }
 0x2b7   : > { %3676 = vmatmul.bf16.gmra.mxu0 %v13218_v18  ;;  %3765 = vmatmul.bf16.gmra.mxu1 %v16547_v12  ;;  %v16550_v18 = vld [vmem:[#allocation73_spill] sm:$0xff] }
 0x2b8   : > { %4142 = vst [vmem:[#allocation4 + $0x80] sm:$0xff] %v3071_v35  ;;  %3779 = vmatmul.bf16.vlgmr.msrb.gmra.mxu2 %v16548_v16  ;;  %3868 = vmatmul.bf16.vlgmr.msrb.gmra.mxu3 %v16549_v25  ;;  %v16552_v16 = vld [vmem:[#allocation15_spill] sm:$0xff] }
 0x2bb   : > { %v2984_v53 = vpop.f32.mrf.mxu2  ;;  %v3073_v32 = vpop.f32.mrf.mxu3 }
 0x2bc   : > { %v3639_v22 = vpop.f32.mrf.mxu0  ;;  %v3728_v58 = vpop.f32.mrf.mxu1  ;;  %v2985_v36 = vadd.f32 %v2984_v53, %v13250_v39  ;;  %v16553_v39 = vld [vmem:[#allocation16_spill] sm:$0xff] }
 0x2bd   : > { %v13542_v19 = vadd.f32 %v3728_v58, %v3639_v22 }
 0x2be   : > { %v3074_v34 = vadd.f32 %v3073_v32, %v2985_v36 }
 0x2c0   : > { %4143 = vst [vmem:[#allocation4 + $0x88] sm:$0xff] %v3074_v34 }
 0x2c3   : > { %v2986_v22 = vpop.f32.mrf.mxu2  ;;  %v3075_v58 = vpop.f32.mrf.mxu3 }
 0x2c4   : > { %v3642_v55 = vpop.f32.mrf.mxu0  ;;  %v3731_v2 = vpop.f32.mrf.mxu1  ;;  %v2987_v12 = vadd.f32 %v2986_v22, %v13260_v60 }
 0x2c5   : > { %v13551_v35 = vadd.f32 %v3731_v2, %v3642_v55 }
 0x2c6   : > { %v3076_v25 = vadd.f32 %v3075_v58, %v2987_v12 }
 0x2c7   : > { %3957 = vmatmul.bf16.vlgmr.msrb.gmra.mxu0 %v16550_v18  ;;  %4046 = vmatmul.bf16.vlgmr.msrb.gmra.mxu1 %v16551_v49  ;;  %v16554_v49 = vld [vmem:[#allocation76_spill] sm:$0xff] }
 0x2c8   : > { %4144 = vst [vmem:[#allocation4 + $0x90] sm:$0xff] %v3076_v25  ;;  %3784 = vmatmul.bf16.gmra.mxu2 %v16552_v16  ;;  %3873 = vmatmul.bf16.gmra.mxu3 %v16553_v39  ;;  %v16556_v18 = vld [vmem:[#allocation20_spill] sm:$0xff]  ;;  %v16561_v39 = vld [vmem:[#allocation23_spill] sm:$0xff] }
 0x2cb   : > { %v2989_v47 = vpop.f32.mrf.mxu2  ;;  %v3078_v36 = vpop.f32.mrf.mxu3 }
 0x2cc   : > { %v3644_v53 = vpop.f32.mrf.mxu0  ;;  %v3733_v32 = vpop.f32.mrf.mxu1  ;;  %v2990_v34 = vadd.f32 %v2989_v47, %v13262_v29 }
 0x2cd   : > { %v13558_v6 = vadd.f32 %v3733_v32, %v3644_v53  ;;  %v16555_v32 = vld [vmem:[#allocation19_spill] sm:$0xff] }
 0x2ce   : > { %v3079_v55 = vadd.f32 %v3078_v36, %v2990_v34 }
 0x2d0   : > { %4145 = vst [vmem:[#allocation4 + $0x98] sm:$0xff] %v3079_v55 }
 0x2d3   : > { %v2991_v12 = vpop.f32.mrf.mxu2  ;;  %v3080_v25 = vpop.f32.mrf.mxu3 }
 0x2d4   : > { %v3647_v60 = vpop.f32.mrf.mxu0  ;;  %v3736_v2 = vpop.f32.mrf.mxu1  ;;  %v2992_v58 = vadd.f32 %v2991_v12, %v13272_v54  ;;  %v12197_v54 = vld [vmem:[%s16160_s3 + $0x1a8] sm:$0xff] }
 0x2d5   : > { %v13561_v22 = vadd.f32 %v3736_v2, %v3647_v60  ;;  %v12205_v60 = vld [vmem:[%s16160_s3 + $0x1e8] sm:$0xff]  ;;  %4641 = vmatpush.bf16.msra.mxu2 %v12197_v54 }
 0x2d6   : > { %v3081_v53 = vadd.f32 %v3080_v25, %v2992_v58  ;;  %v16558_v2 = vld [vmem:[#allocation79_spill] sm:$0xff]  ;;  %4730 = vmatpush.bf16.msra.mxu3 %v12205_v60 }
 0x2d7   : > { %3962 = vmatmul.bf16.gmra.mxu0 %v13254_v43  ;;  %4051 = vmatmul.bf16.gmra.mxu1 %v16554_v49 }
 0x2d8   : > { %4146 = vst [vmem:[#allocation4 + $0xa0] sm:$0xff] %v3081_v53  ;;  %3789 = vmatmul.bf16.gmra.mxu2 %v16555_v32  ;;  %3878 = vmatmul.bf16.gmra.mxu3 %v16556_v18  ;;  %v16559_v18 = vld [vmem:[#allocation77_spill] sm:$0xff]  ;;  %v16560_v32 = vld [vmem:[#allocation78_spill] sm:$0xff] }
 0x2db   : > { %v2994_v34 = vpop.f32.mrf.mxu2  ;;  %v3083_v55 = vpop.f32.mrf.mxu3 }
 0x2dc   : > { %v3649_v29 = vpop.f32.mrf.mxu0  ;;  %v3738_v47 = vpop.f32.mrf.mxu1  ;;  %v2995_v12 = vadd.f32 %v2994_v34, %v16558_v2  ;;  %v16562_v34 = vld [vmem:[#allocation24_spill] sm:$0xff] }
 0x2dd   : > { %v13568_v36 = vadd.f32 %v3738_v47, %v3649_v29 }
 0x2de   : > { %v3084_v25 = vadd.f32 %v3083_v55, %v2995_v12 }
 0x2df   : > { %16557 = vst [vmem:[#allocation15_spill] sm:$0xff] %v13568_v36 }
 0x2e0   : > { %4147 = vst [vmem:[#allocation4 + $0xa8] sm:$0xff] %v3084_v25 }
 0x2e3   : > { %v2996_v47 = vpop.f32.mrf.mxu2  ;;  %v3085_v49 = vpop.f32.mrf.mxu3 }
 0x2e4   : > { %v3652_v58 = vpop.f32.mrf.mxu0  ;;  %v3741_v53 = vpop.f32.mrf.mxu1  ;;  %v2997_v43 = vadd.f32 %v2996_v47, %v13290_v0 }
 0x2e5   : > { %v13577_v29 = vadd.f32 %v3741_v53, %v3652_v58 }
 0x2e6   : > { %v3086_v36 = vadd.f32 %v3085_v49, %v2997_v43 }
 0x2e7   : > { %3967 = vmatmul.bf16.gmra.mxu0 %v16559_v18  ;;  %4056 = vmatmul.bf16.gmra.mxu1 %v16560_v32  ;;  %v16563_v32 = vld [vmem:[#allocation81_spill] sm:$0xff]  ;;  %v16565_v18 = vld [vmem:[#allocation28_spill] sm:$0xff] }
 0x2e8   : > { %4148 = vst [vmem:[#allocation4 + $0xb0] sm:$0xff] %v3086_v36  ;;  %3794 = vmatmul.bf16.gmra.mxu2 %v16561_v39  ;;  %3883 = vmatmul.bf16.gmra.mxu3 %v16562_v34  ;;  %v16570_v34 = vld [vmem:[#allocation31_spill] sm:$0xff] }
 0x2eb   : > { %v2999_v2 = vpop.f32.mrf.mxu2  ;;  %v3088_v12 = vpop.f32.mrf.mxu3 }
 0x2ec   : > { %v3654_v55 = vpop.f32.mrf.mxu0  ;;  %v3743_v54 = vpop.f32.mrf.mxu1  ;;  %v3000_v25 = vadd.f32 %v2999_v2, %v13292_v61 }
 0x2ed   : > { %v13584_v60 = vadd.f32 %v3743_v54, %v3654_v55  ;;  %v16564_v54 = vld [vmem:[#allocation27_spill] sm:$0xff] }
 0x2ee   : > { %v3089_v58 = vadd.f32 %v3088_v12, %v3000_v25 }
 0x2f0   : > { %4149 = vst [vmem:[#allocation4 + $0xb8] sm:$0xff] %v3089_v58 }
 0x2f3   : > { %v3001_v49 = vpop.f32.mrf.mxu2  ;;  %v3090_v43 = vpop.f32.mrf.mxu3 }
 0x2f4   : > { %v3657_v0 = vpop.f32.mrf.mxu0  ;;  %v3746_v53 = vpop.f32.mrf.mxu1  ;;  %v3002_v36 = vadd.f32 %v3001_v49, %v13302_v10  ;;  %v12196_v10 = vld [vmem:[%s16160_s3 + $0x1a0] sm:$0xff] }
 0x2f5   : > { %v13587_v47 = vadd.f32 %v3746_v53, %v3657_v0  ;;  %v12204_v0 = vld [vmem:[%s16160_s3 + $0x1e0] sm:$0xff]  ;;  %v16567_v53 = vld [vmem:[#allocation84_spill] sm:$0xff]  ;;  %4642 = vmatpush.bf16.msra.mxu2 %v12196_v10 }
 0x2f6   : > { %v3091_v55 = vadd.f32 %v3090_v43, %v3002_v36  ;;  %4731 = vmatpush.bf16.msra.mxu3 %v12204_v0 }
 0x2f7   : > { %3972 = vmatmul.bf16.gmra.mxu0 %v13284_v11  ;;  %4061 = vmatmul.bf16.gmra.mxu1 %v16563_v32 }
 0x2f8   : > { %4150 = vst [vmem:[#allocation4 + $0xc0] sm:$0xff] %v3091_v55  ;;  %3799 = vmatmul.bf16.gmra.mxu2 %v16564_v54  ;;  %3888 = vmatmul.bf16.gmra.mxu3 %v16565_v18  ;;  %v16568_v18 = vld [vmem:[#allocation82_spill] sm:$0xff]  ;;  %v16569_v54 = vld [vmem:[#allocation83_spill] sm:$0xff] }
 0x2fb   : > { %v3004_v25 = vpop.f32.mrf.mxu2  ;;  %v3093_v58 = vpop.f32.mrf.mxu3 }
 0x2fc   : > { %v3659_v61 = vpop.f32.mrf.mxu0  ;;  %v3748_v2 = vpop.f32.mrf.mxu1  ;;  %v3005_v49 = vadd.f32 %v3004_v25, %v16567_v53  ;;  %v16571_v25 = vld [vmem:[#allocation32_spill] sm:$0xff] }
 0x2fd   : > { %v13594_v12 = vadd.f32 %v3748_v2, %v3659_v61 }
 0x2fe   : > { %v3094_v43 = vadd.f32 %v3093_v58, %v3005_v49 }
 0x2ff   : > { %16566 = vst [vmem:[#allocation79_spill] sm:$0xff] %v13594_v12 }
 0x300   : > { %4151 = vst [vmem:[#allocation4 + $0xc8] sm:$0xff] %v3094_v43 }
 0x303   : > { %v3006_v2 = vpop.f32.mrf.mxu2  ;;  %v3095_v32 = vpop.f32.mrf.mxu3 }
 0x304   : > { %v3662_v36 = vpop.f32.mrf.mxu0  ;;  %v3751_v55 = vpop.f32.mrf.mxu1  ;;  %v3007_v11 = vadd.f32 %v3006_v2, %v13320_v24 }
 0x305   : > { %v13603_v61 = vadd.f32 %v3751_v55, %v3662_v36 }
 0x306   : > { %v3096_v12 = vadd.f32 %v3095_v32, %v3007_v11 }
 0x307   : > { %3977 = vmatmul.bf16.gmra.mxu0 %v16568_v18  ;;  %4066 = vmatmul.bf16.gmra.mxu1 %v16569_v54  ;;  %v16572_v54 = vld [vmem:[#allocation86_spill] sm:$0xff]  ;;  %v16574_v18 = vld [vmem:[#allocation36_spill] sm:$0xff] }
 0x308   : > { %4152 = vst [vmem:[#allocation4 + $0xd0] sm:$0xff] %v3096_v12  ;;  %3804 = vmatmul.bf16.gmra.mxu2 %v16570_v34  ;;  %3893 = vmatmul.bf16.gmra.mxu3 %v16571_v25  ;;  %v16579_v25 = vld [vmem:[#allocation39_spill] sm:$0xff] }
 0x30b   : > { %v3009_v53 = vpop.f32.mrf.mxu2  ;;  %v3098_v49 = vpop.f32.mrf.mxu3 }
 0x30c   : > { %v3664_v58 = vpop.f32.mrf.mxu0  ;;  %v3753_v10 = vpop.f32.mrf.mxu1  ;;  %v3010_v43 = vadd.f32 %v3009_v53, %v13322_v45 }
 0x30d   : > { %v13610_v0 = vadd.f32 %v3753_v10, %v3664_v58  ;;  %v16573_v10 = vld [vmem:[#allocation35_spill] sm:$0xff] }
 0x30e   : > { %v3099_v36 = vadd.f32 %v3098_v49, %v3010_v43 }
 0x310   : > { %4153 = vst [vmem:[#allocation4 + $0xd8] sm:$0xff] %v3099_v36 }
 0x313   : > { %v3011_v11 = vpop.f32.mrf.mxu2  ;;  %v3100_v32 = vpop.f32.mrf.mxu3 }
 0x314   : > { %v3667_v24 = vpop.f32.mrf.mxu0  ;;  %v3756_v55 = vpop.f32.mrf.mxu1  ;;  %v3012_v12 = vadd.f32 %v3011_v11, %v13332_v13  ;;  %v12195_v13 = vld [vmem:[%s16160_s3 + $0x198] sm:$0xff] }
 0x315   : > { %v13613_v2 = vadd.f32 %v3756_v55, %v3667_v24  ;;  %v12203_v24 = vld [vmem:[%s16160_s3 + $0x1d8] sm:$0xff]  ;;  %4643 = vmatpush.bf16.msra.mxu2 %v12195_v13 }
 0x316   : > { %v3101_v58 = vadd.f32 %v3100_v32, %v3012_v12  ;;  %v16576_v55 = vld [vmem:[#allocation89_spill] sm:$0xff]  ;;  %4732 = vmatpush.bf16.msra.mxu3 %v12203_v24 }
 0x317   : > { %3982 = vmatmul.bf16.gmra.mxu0 %v13314_v26  ;;  %4071 = vmatmul.bf16.gmra.mxu1 %v16572_v54 }
 0x318   : > { %4154 = vst [vmem:[#allocation4 + $0xe0] sm:$0xff] %v3101_v58  ;;  %3809 = vmatmul.bf16.gmra.mxu2 %v16573_v10  ;;  %3898 = vmatmul.bf16.gmra.mxu3 %v16574_v18  ;;  %v16577_v18 = vld [vmem:[#allocation87_spill] sm:$0xff]  ;;  %v16578_v10 = vld [vmem:[#allocation88_spill] sm:$0xff] }
 0x31b   : > { %v3014_v43 = vpop.f32.mrf.mxu2  ;;  %v3103_v36 = vpop.f32.mrf.mxu3 }
 0x31c   : > { %v3669_v45 = vpop.f32.mrf.mxu0  ;;  %v3758_v53 = vpop.f32.mrf.mxu1  ;;  %v3015_v11 = vadd.f32 %v3014_v43, %v16576_v55  ;;  %v16580_v43 = vld [vmem:[#allocation40_spill] sm:$0xff] }
 0x31d   : > { %v13620_v49 = vadd.f32 %v3758_v53, %v3669_v45 }
 0x31e   : > { %v3104_v32 = vadd.f32 %v3103_v36, %v3015_v11 }
 0x31f   : > { %16575 = vst [vmem:[#allocation23_spill] sm:$0xff] %v13620_v49 }
 0x320   : > { %4155 = vst [vmem:[#allocation4 + $0xe8] sm:$0xff] %v3104_v32 }
 0x323   : > { %v3016_v53 = vpop.f32.mrf.mxu2  ;;  %v3105_v54 = vpop.f32.mrf.mxu3 }
 0x324   : > { %v3672_v12 = vpop.f32.mrf.mxu0  ;;  %v3761_v58 = vpop.f32.mrf.mxu1  ;;  %v3017_v26 = vadd.f32 %v3016_v53, %v13350_v21 }
 0x325   : > { %v13629_v45 = vadd.f32 %v3761_v58, %v3672_v12 }
 0x326   : > { %v3106_v49 = vadd.f32 %v3105_v54, %v3017_v26 }
 0x327   : > { %3987 = vmatmul.bf16.gmra.mxu0 %v16577_v18  ;;  %4076 = vmatmul.bf16.gmra.mxu1 %v16578_v10  ;;  %v16581_v10 = vld [vmem:[#allocation91_spill] sm:$0xff] }
 0x328   : > { %4156 = vst [vmem:[#allocation4 + $0xf0] sm:$0xff] %v3106_v49  ;;  %3814 = vmatmul.bf16.gmra.mxu2 %v16579_v25  ;;  %3903 = vmatmul.bf16.gmra.mxu3 %v16580_v43  ;;  %v16586_v18 = vld [vmem:[#allocation47_spill] sm:$0xff] }
 0x32b   : > { %v3019_v55 = vpop.f32.mrf.mxu2  ;;  %v3108_v11 = vpop.f32.mrf.mxu3 }
 0x32c   : > { %v3674_v36 = vpop.f32.mrf.mxu0  ;;  %v3763_v13 = vpop.f32.mrf.mxu1  ;;  %v3020_v32 = vadd.f32 %v3019_v55, %v13352_v50  ;;  %v16582_v50 = vld [vmem:[#allocation43_spill] sm:$0xff]  ;;  %v16583_v55 = vld [vmem:[#allocation44_spill] sm:$0xff] }
 0x32d   : > { %v13636_v24 = vadd.f32 %v3763_v13, %v3674_v36  ;;  %v12215_v13 = vld [vmem:[%s16160_s3 + $0x238] sm:$0xff] }
 0x32e   : > { %v3109_v12 = vadd.f32 %v3108_v11, %v3020_v32  ;;  %4817 = vmatpush.bf16.msra.mxu0 %v12215_v13 }
 0x330   : > { %4157 = vst [vmem:[#allocation4 + $0xf8] sm:$0xff] %v3109_v12 }
 0x333   : > { %v3021_v26 = vpop.f32.mrf.mxu2  ;;  %v3110_v54 = vpop.f32.mrf.mxu3 }
 0x334   : > { %v3677_v21 = vpop.f32.mrf.mxu0  ;;  %v3766_v58 = vpop.f32.mrf.mxu1  ;;  %v3022_v49 = vadd.f32 %v3021_v26, %v13372_v56  ;;  %v12194_v26 = vld [vmem:[%s16160_s3 + $0x190] sm:$0xff] }
 0x335   : > { %v13639_v53 = vadd.f32 %v3766_v58, %v3677_v21  ;;  %4644 = vmatpush.bf16.msra.mxu2 %v12194_v26 }
 0x336   : > { %v3111_v36 = vadd.f32 %v3110_v54, %v3022_v49  ;;  %v12202_v54 = vld [vmem:[%s16160_s3 + $0x1d0] sm:$0xff] }
 0x337   : > { %3992 = vmatmul.bf16.gmra.mxu0 %v13344_v46  ;;  %4081 = vmatmul.bf16.gmra.mxu1 %v16581_v10 }
 0x338   : > { %4158 = vst [vmem:[#allocation4 + $0x100] sm:$0xff] %v3111_v36  ;;  %3819 = vmatmul.bf16.gmra.mxu2 %v16582_v50  ;;  %3908 = vmatmul.bf16.gmra.mxu3 %v16583_v55  ;;  %v16587_v55 = vld [vmem:[#allocation48_spill] sm:$0xff] }
 0x339   : > { %4733 = vmatpush.bf16.msra.mxu3 %v12202_v54 }
 0x33b   : > { %v3780_v56 = vpop.f32.mrf.mxu2  ;;  %v3869_v21 = vpop.f32.mrf.mxu3 }
 0x33c   : > { %v3679_v11 = vpop.f32.mrf.mxu0  ;;  %v3768_v32 = vpop.f32.mrf.mxu1  ;;  %v3781_v58 = vadd.f32 %v3780_v56, %v13374_v31  ;;  %v16585_v31 = vld [vmem:[#allocation93_spill] sm:$0xff] }
 0x33d   : > { %v13649_v12 = vadd.f32 %v3768_v32, %v3679_v11 }
 0x33e   : > { %v3870_v49 = vadd.f32 %v3869_v21, %v3781_v58 }
 0x33f   : > { %16584 = vst [vmem:[#allocation84_spill] sm:$0xff] %v13649_v12 }
 0x343   : > { %v3782_v11 = vpop.f32.mrf.mxu2  ;;  %v3871_v32 = vpop.f32.mrf.mxu3 }
 0x344   : > { %v3958_v36 = vpop.f32.mrf.mxu0  ;;  %v4047_v13 = vpop.f32.mrf.mxu1  ;;  %v3783_v56 = vadd.f32 %v3782_v11, %v13385_v37 }
 0x345   : > { %v3959_v10 = vadd.f32 %v3958_v36, %v3870_v49 }
 0x346   : > { %v3872_v21 = vadd.f32 %v3871_v32, %v3783_v56  ;;  %v12214_v56 = vld [vmem:[%s16160_s3 + $0x230] sm:$0xff] }
 0x347   : > { %v4048_v46 = vadd.f32 %v4047_v13, %v3959_v10  ;;  %3997 = vmatmul.bf16.gmra.mxu0 %v13356_v30  ;;  %4086 = vmatmul.bf16.gmra.mxu1 %v16585_v31 }
 0x348   : > { %3824 = vmatmul.bf16.gmra.mxu2 %v16586_v18  ;;  %3913 = vmatmul.bf16.gmra.mxu3 %v16587_v55 }
 0x349   : > { %4159 = vst [vmem:[#allocation5 + $0x8] sm:$0xff] %v4048_v46  ;;  %4818 = vmatpush.bf16.msra.mxu0 %v12214_v56 }
 0x34b   : > { %v3785_v50 = vpop.f32.mrf.mxu2  ;;  %v3874_v49 = vpop.f32.mrf.mxu3 }
 0x34c   : > { %v3960_v58 = vpop.f32.mrf.mxu0  ;;  %v4049_v26 = vpop.f32.mrf.mxu1  ;;  %v3786_v10 = vadd.f32 %v3785_v50, %v13388_v1  ;;  %v16588_v1 = vld [vmem:[#allocation51_spill] sm:$0xff]  ;;  %v16589_v50 = vld [vmem:[#allocation52_spill] sm:$0xff] }
 0x34d   : > { %v3961_v54 = vadd.f32 %v3960_v58, %v3872_v21 }
 0x34e   : > { %v3875_v13 = vadd.f32 %v3874_v49, %v3786_v10 }
 0x34f   : > { %v4050_v36 = vadd.f32 %v4049_v26, %v3961_v54 }
 0x351   : > { %4160 = vst [vmem:[#allocation5 + $0x10] sm:$0xff] %v4050_v36  ;;  %v12201_v36 = vld [vmem:[%s16160_s3 + $0x1c8] sm:$0xff] }
 0x352   : > { %4734 = vmatpush.bf16.msra.mxu3 %v12201_v36 }
 0x353   : > { %v3787_v37 = vpop.f32.mrf.mxu2  ;;  %v3876_v46 = vpop.f32.mrf.mxu3 }
 0x354   : > { %v3963_v30 = vpop.f32.mrf.mxu0  ;;  %v4052_v31 = vpop.f32.mrf.mxu1  ;;  %v3788_v32 = vadd.f32 %v3787_v37, %v13402_v38  ;;  %v12193_v38 = vld [vmem:[%s16160_s3 + $0x188] sm:$0xff] }
 0x355   : > { %v3964_v12 = vadd.f32 %v3963_v30, %v3875_v13  ;;  %4645 = vmatpush.bf16.msra.mxu2 %v12193_v38 }
 0x356   : > { %v3877_v21 = vadd.f32 %v3876_v46, %v3788_v32 }
 0x357   : > { %v4053_v11 = vadd.f32 %v4052_v31, %v3964_v12  ;;  %4002 = vmatmul.bf16.gmra.mxu0 %v13379_v17  ;;  %4091 = vmatmul.bf16.gmra.mxu1 %v13381_v63 }
 0x358   : > { %3829 = vmatmul.bf16.gmra.mxu2 %v16588_v1  ;;  %3918 = vmatmul.bf16.gmra.mxu3 %v16589_v50 }
 0x359   : > { %4161 = vst [vmem:[#allocation5 + $0x18] sm:$0xff] %v4053_v11 }
 0x35b   : > { %v3790_v31 = vpop.f32.mrf.mxu2  ;;  %v3879_v26 = vpop.f32.mrf.mxu3 }
 0x35c   : > { %v3965_v30 = vpop.f32.mrf.mxu0  ;;  %v4054_v58 = vpop.f32.mrf.mxu1  ;;  %v3791_v49 = vadd.f32 %v3790_v31, %v13411_v28 }
 0x35d   : > { %v3966_v12 = vadd.f32 %v3965_v30, %v3877_v21  ;;  %v16590_v21 = vld [vmem:[#allocation55_spill] sm:$0xff]  ;;  %v16591_v30 = vld [vmem:[#allocation56_spill] sm:$0xff] }
 0x35e   : > { %v3880_v10 = vadd.f32 %v3879_v26, %v3791_v49 }
 0x35f   : > { %v4055_v54 = vadd.f32 %v4054_v58, %v3966_v12 }
 0x361   : > { %4162 = vst [vmem:[#allocation5 + $0x20] sm:$0xff] %v4055_v54 }
 0x363   : > { %v3792_v11 = vpop.f32.mrf.mxu2  ;;  %v3881_v32 = vpop.f32.mrf.mxu3 }
 0x364   : > { %v3968_v13 = vpop.f32.mrf.mxu0  ;;  %v4057_v37 = vpop.f32.mrf.mxu1  ;;  %v3793_v28 = vadd.f32 %v3792_v11, %v13422_v4 }
 0x365   : > { %v3969_v46 = vadd.f32 %v3968_v13, %v3880_v10 }
 0x366   : > { %v3882_v58 = vadd.f32 %v3881_v32, %v3793_v28  ;;  %v12213_v28 = vld [vmem:[%s16160_s3 + $0x228] sm:$0xff] }
 0x367   : > { %v4058_v56 = vadd.f32 %v4057_v37, %v3969_v46  ;;  %4007 = vmatmul.bf16.gmra.mxu0 %v13393_v40  ;;  %4096 = vmatmul.bf16.gmra.mxu1 %v13395_v59 }
 0x368   : > { %3834 = vmatmul.bf16.gmra.mxu2 %v16590_v21  ;;  %3923 = vmatmul.bf16.gmra.mxu3 %v16591_v30 }
 0x369   : > { %4163 = vst [vmem:[#allocation5 + $0x28] sm:$0xff] %v4058_v56  ;;  %4819 = vmatpush.bf16.msra.mxu0 %v12213_v28 }
 0x36b   : > { %v3795_v54 = vpop.f32.mrf.mxu2  ;;  %v3884_v49 = vpop.f32.mrf.mxu3 }
 0x36c   : > { %v3970_v12 = vpop.f32.mrf.mxu0  ;;  %v4059_v31 = vpop.f32.mrf.mxu1  ;;  %v3796_v36 = vadd.f32 %v3795_v54, %v13425_v41  ;;  %v16592_v41 = vld [vmem:[#allocation59_spill] sm:$0xff] }
 0x36d   : > { %v3971_v26 = vadd.f32 %v3970_v12, %v3882_v58  ;;  %v16593_v58 = vld [vmem:[#allocation60_spill] sm:$0xff] }
 0x36e   : > { %v3885_v10 = vadd.f32 %v3884_v49, %v3796_v36 }
 0x36f   : > { %v4060_v38 = vadd.f32 %v4059_v31, %v3971_v26 }
 0x371   : > { %4164 = vst [vmem:[#allocation5 + $0x30] sm:$0xff] %v4060_v38 }
 0x373   : > { %v3797_v4 = vpop.f32.mrf.mxu2  ;;  %v3886_v11 = vpop.f32.mrf.mxu3 }
 0x374   : > { %v3973_v13 = vpop.f32.mrf.mxu0  ;;  %v4062_v37 = vpop.f32.mrf.mxu1  ;;  %v3798_v32 = vadd.f32 %v3797_v4, %v13439_v62  ;;  %v12192_v62 = vld [vmem:[%s16160_s3 + $0x180] sm:$0xff] }
 0x375   : > { %v3974_v46 = vadd.f32 %v3973_v13, %v3885_v10  ;;  %v12200_v13 = vld [vmem:[%s16160_s3 + $0x1c0] sm:$0xff]  ;;  %4646 = vmatpush.bf16.msra.mxu2 %v12192_v62 }
 0x376   : > { %v3887_v12 = vadd.f32 %v3886_v11, %v3798_v32  ;;  %4735 = vmatpush.bf16.msra.mxu3 %v12200_v13 }
 0x377   : > { %v4063_v56 = vadd.f32 %v4062_v37, %v3974_v46  ;;  %4012 = vmatmul.bf16.gmra.mxu0 %v13416_v44  ;;  %4101 = vmatmul.bf16.gmra.mxu1 %v13418_v52 }
 0x378   : > { %3839 = vmatmul.bf16.gmra.mxu2 %v16592_v41  ;;  %3928 = vmatmul.bf16.gmra.mxu3 %v16593_v58 }
 0x379   : > { %4165 = vst [vmem:[#allocation5 + $0x38] sm:$0xff] %v4063_v56 }
 0x37b   : > { %v3800_v49 = vpop.f32.mrf.mxu2  ;;  %v3889_v38 = vpop.f32.mrf.mxu3 }
 0x37c   : > { %v3975_v31 = vpop.f32.mrf.mxu0  ;;  %v4064_v26 = vpop.f32.mrf.mxu1  ;;  %v3801_v10 = vadd.f32 %v3800_v49, %v13448_v51 }
 0x37d   : > { %v3976_v54 = vadd.f32 %v3975_v31, %v3887_v12  ;;  %v12223_v12 = vld [vmem:[%s16160_s3 + $0x278] sm:$0xff]  ;;  %v16594_v31 = vld [vmem:[#allocation63_spill] sm:$0xff] }
 0x37e   : > { %v3890_v37 = vadd.f32 %v3889_v38, %v3801_v10  ;;  %4906 = vmatpush.bf16.msra.mxu1 %v12223_v12 }
 0x37f   : > { %v4065_v36 = vadd.f32 %v4064_v26, %v3976_v54  ;;  %v16595_v26 = vld [vmem:[#allocation64_spill] sm:$0xff] }
 0x381   : > { %4166 = vst [vmem:[#allocation5 + $0x40] sm:$0xff] %v4065_v36 }
 0x383   : > { %v3802_v56 = vpop.f32.mrf.mxu2  ;;  %v3891_v32 = vpop.f32.mrf.mxu3 }
 0x384   : > { %v3978_v46 = vpop.f32.mrf.mxu0  ;;  %v4067_v4 = vpop.f32.mrf.mxu1  ;;  %v3803_v51 = vadd.f32 %v3802_v56, %v13462_v7  ;;  %v12222_v7 = vld [vmem:[%s16160_s3 + $0x270] sm:$0xff]  ;;  %v12221_v56 = vld [vmem:[%s16160_s3 + $0x268] sm:$0xff] }
 0x385   : > { %v3979_v11 = vadd.f32 %v3978_v46, %v3890_v37  ;;  %4907 = vmatpush.bf16.msra.mxu1 %v12222_v7 }
 0x386   : > { %v3892_v54 = vadd.f32 %v3891_v32, %v3803_v51 }
 0x387   : > { %v4068_v28 = vadd.f32 %v4067_v4, %v3979_v11  ;;  %4017 = vmatmul.bf16.gmra.mxu0 %v13430_v48  ;;  %4106 = vmatmul.bf16.gmra.mxu1 %v13432_v33 }
 0x388   : > { %3844 = vmatmul.bf16.gmra.mxu2 %v16594_v31  ;;  %3933 = vmatmul.bf16.gmra.mxu3 %v16595_v26 }
 0x389   : > { %4167 = vst [vmem:[#allocation5 + $0x48] sm:$0xff] %v4068_v28  ;;  %4908 = vmatpush.bf16.msra.mxu1 %v12221_v56 }
 0x38b   : > { %v3805_v10 = vpop.f32.mrf.mxu2  ;;  %v3894_v62 = vpop.f32.mrf.mxu3 }
 0x38c   : > { %v3980_v49 = vpop.f32.mrf.mxu0  ;;  %v4069_v38 = vpop.f32.mrf.mxu1  ;;  %v3806_v37 = vadd.f32 %v3805_v10, %v13471_v8 }
 0x38d   : > { %v3981_v36 = vadd.f32 %v3980_v49, %v3892_v54  ;;  %v12212_v54 = vld [vmem:[%s16160_s3 + $0x220] sm:$0xff] }
 0x38e   : > { %v3895_v46 = vadd.f32 %v3894_v62, %v3806_v37  ;;  %v12220_v49 = vld [vmem:[%s16160_s3 + $0x260] sm:$0xff]  ;;  %4820 = vmatpush.bf16.msra.mxu0 %v12212_v54  ;;  %v12219_v37 = vld [vmem:[%s16160_s3 + $0x258] sm:$0xff] }
 0x38f   : > { %v4070_v13 = vadd.f32 %v4069_v38, %v3981_v36  ;;  %v16596_v38 = vld [vmem:[#allocation67_spill] sm:$0xff]  ;;  %v16597_v36 = vld [vmem:[#allocation68_spill] sm:$0xff]  ;;  %4909 = vmatpush.bf16.msra.mxu1 %v12220_v49 }
 0x390   : > { %v12209_v49 = vld [vmem:[%s16160_s3 + $0x208] sm:$0xff] }
 0x391   : > { %4168 = vst [vmem:[#allocation5 + $0x50] sm:$0xff] %v4070_v13 }
 0x393   : > { %v3807_v28 = vpop.f32.mrf.mxu2  ;;  %v3896_v51 = vpop.f32.mrf.mxu3  ;;  %4910 = vmatpush.bf16.msra.mxu1 %v12219_v37 }
 0x394   : > { %v3983_v4 = vpop.f32.mrf.mxu0  ;;  %v4072_v11 = vpop.f32.mrf.mxu1  ;;  %v3808_v8 = vadd.f32 %v3807_v28, %v13494_v27  ;;  %v12211_v27 = vld [vmem:[%s16160_s3 + $0x218] sm:$0xff]  ;;  %v12218_v28 = vld [vmem:[%s16160_s3 + $0x250] sm:$0xff] }
 0x395   : > { %v3984_v32 = vadd.f32 %v3983_v4, %v3895_v46  ;;  %4821 = vmatpush.bf16.msra.mxu0 %v12211_v27 }
 0x396   : > { %v3897_v10 = vadd.f32 %v3896_v51, %v3808_v8  ;;  %v12231_v51 = vld [vmem:[%s16160_s3 + $0x2b8] sm:$0xff] }
 0x397   : > { %v4073_v12 = vadd.f32 %v4072_v11, %v3984_v32  ;;  %4022 = vmatmul.bf16.gmra.mxu0 %v13456_v5  ;;  %4111 = vmatmul.bf16.gmra.mxu1 %v13458_v23  ;;  %v12210_v32 = vld [vmem:[%s16160_s3 + $0x210] sm:$0xff] }
 0x398   : > { %3849 = vmatmul.bf16.gmra.mxu2 %v16596_v38  ;;  %3938 = vmatmul.bf16.gmra.mxu3 %v16597_v36 }
 0x399   : > { %4169 = vst [vmem:[#allocation5 + $0x58] sm:$0xff] %v4073_v12  ;;  %v12239_v12 = vld [vmem:[%s16160_s3 + $0x2f8] sm:$0xff]  ;;  %4822 = vmatpush.bf16.msra.mxu0 %v12210_v32  ;;  %4995 = vmatpush.bf16.msrb.mxu2 %v12231_v51 }
 0x39a   : > { %4911 = vmatpush.bf16.msra.mxu1 %v12218_v28  ;;  %5084 = vmatpush.bf16.msrb.mxu3 %v12239_v12 }
 0x39b   : > { %v3810_v46 = vpop.f32.mrf.mxu2  ;;  %v3899_v4 = vpop.f32.mrf.mxu3 }
 0x39c   : > { %v3985_v62 = vpop.f32.mrf.mxu0  ;;  %v4074_v13 = vpop.f32.mrf.mxu1  ;;  %v3811_v56 = vadd.f32 %v3810_v46, %v13515_v9  ;;  %v12208_v46 = vld [vmem:[%s16160_s3 + $0x200] sm:$0xff] }
 0x39d   : > { %v3986_v7 = vadd.f32 %v3985_v62, %v3897_v10  ;;  %v12217_v10 = vld [vmem:[%s16160_s3 + $0x248] sm:$0xff]  ;;  %4823 = vmatpush.bf16.msra.mxu0 %v12209_v49 }
 0x39e   : > { %v3900_v9 = vadd.f32 %v3899_v4, %v3811_v56  ;;  %4912 = vmatpush.bf16.msra.mxu1 %v12217_v10  ;;  %v12216_v4 = vld [vmem:[%s16160_s3 + $0x240] sm:$0xff]  ;;  %v16599_v56 = vld [vmem:[#allocation72_spill] sm:$0xff] }
 0x39f   : > { %v4075_v11 = vadd.f32 %v4074_v13, %v3986_v7 }
 0x3a1   : > { %4170 = vst [vmem:[#allocation5 + $0x60] sm:$0xff] %v4075_v11  ;;  %v16598_v11 = vld [vmem:[#allocation71_spill] sm:$0xff]  ;;  %4824 = vmatpush.bf16.msra.mxu0 %v12208_v46  ;;  %v16601_v46 = vld [vmem:[#allocation10_spill] sm:$0xff] }
 0x3a2   : > { %4913 = vmatpush.bf16.msra.mxu1 %v12216_v4 }
 0x3a3   : > { %v3812_v62 = vpop.f32.mrf.mxu2  ;;  %v3901_v13 = vpop.f32.mrf.mxu3 }
 0x3a4   : > { %v3988_v8 = vpop.f32.mrf.mxu0  ;;  %v4077_v54 = vpop.f32.mrf.mxu1  ;;  %v3813_v7 = vadd.f32 %v3812_v62, %v13532_v57 }
 0x3a5   : > { %v3989_v27 = vadd.f32 %v3988_v8, %v3900_v9 }
 0x3a6   : > { %v3902_v32 = vadd.f32 %v3901_v13, %v3813_v7  ;;  %v16600_v7 = vld [vmem:[#allocation7_spill] sm:$0xff] }
 0x3a7   : > { %v4078_v37 = vadd.f32 %v4077_v54, %v3989_v27  ;;  %4027 = vmatmul.bf16.gmra.mxu0 %v13482_v14  ;;  %4116 = vmatmul.bf16.gmra.mxu1 %v13484_v42 }
 0x3a8   : > { %3854 = vmatmul.bf16.gmra.mxu2 %v16598_v11  ;;  %3943 = vmatmul.bf16.gmra.mxu3 %v16599_v56 }
 0x3a9   : > { %4171 = vst [vmem:[#allocation5 + $0x68] sm:$0xff] %v4078_v37 }
 0x3ab   : > { %v3815_v12 = vpop.f32.mrf.mxu2  ;;  %v3904_v9 = vpop.f32.mrf.mxu3 }
 0x3ac   : > { %v3990_v28 = vpop.f32.mrf.mxu0  ;;  %v4079_v51 = vpop.f32.mrf.mxu1  ;;  %v3816_v54 = vadd.f32 %v3815_v12, %v13535_v20 }
 0x3ad   : > { %v3991_v57 = vadd.f32 %v3990_v28, %v3902_v32 }
 0x3ae   : > { %v3905_v49 = vadd.f32 %v3904_v9, %v3816_v54 }
 0x3af   : > { %v4080_v8 = vadd.f32 %v4079_v51, %v3991_v57 }
 0x3b1   : > { %4172 = vst [vmem:[#allocation5 + $0x70] sm:$0xff] %v4080_v8  ;;  %v12230_v8 = vld [vmem:[%s16160_s3 + $0x2b0] sm:$0xff] }
 0x3b2   : > { %4996 = vmatpush.bf16.msrb.mxu2 %v12230_v8 }
 0x3b3   : > { %v3817_v37 = vpop.f32.mrf.mxu2  ;;  %v3906_v42 = vpop.f32.mrf.mxu3 }
 0x3b4   : > { %v3993_v10 = vpop.f32.mrf.mxu0  ;;  %v4082_v27 = vpop.f32.mrf.mxu1  ;;  %v3818_v13 = vadd.f32 %v3817_v37, %v13542_v19  ;;  %v16602_v37 = vld [vmem:[#allocation11_spill] sm:$0xff] }
 0x3b5   : > { %v3994_v62 = vadd.f32 %v3993_v10, %v3905_v49 }
 0x3b6   : > { %v3907_v20 = vadd.f32 %v3906_v42, %v3818_v13 }
 0x3b7   : > { %v4083_v14 = vadd.f32 %v4082_v27, %v3994_v62  ;;  %4032 = vmatmul.bf16.gmra.mxu0 %v13524_v3  ;;  %4121 = vmatmul.bf16.gmra.mxu1 %v13526_v15 }
 0x3b8   : > { %4647 = vmatmul.bf16.vlgmr.msra.gmra.mxu2 %v16600_v7  ;;  %4736 = vmatmul.bf16.vlgmr.msra.gmra.mxu3 %v16601_v46  ;;  %v16604_v7 = vld [vmem:[#allocation13_spill] sm:$0xff]  ;;  %v16605_v46 = vld [vmem:[#allocation14_spill] sm:$0xff] }
 0x3b9   : > { %4173 = vst [vmem:[#allocation5 + $0x78] sm:$0xff] %v4083_v14  ;;  %v12238_v14 = vld [vmem:[%s16160_s3 + $0x2f0] sm:$0xff] }
 0x3ba   : > { %5085 = vmatpush.bf16.msrb.mxu3 %v12238_v14 }
 0x3bb   : > { %v3820_v51 = vpop.f32.mrf.mxu2  ;;  %v3909_v57 = vpop.f32.mrf.mxu3 }
 0x3bc   : > { %v3995_v4 = vpop.f32.mrf.mxu0  ;;  %v4084_v32 = vpop.f32.mrf.mxu1  ;;  %v3821_v9 = vadd.f32 %v3820_v51, %v13551_v35  ;;  %v16603_v35 = vld [vmem:[#allocation12_spill] sm:$0xff] }
 0x3bd   : > { %v3996_v28 = vadd.f32 %v3995_v4, %v3907_v20 }
 0x3be   : > { %v3910_v19 = vadd.f32 %v3909_v57, %v3821_v9 }
 0x3bf   : > { %v4085_v12 = vadd.f32 %v4084_v32, %v3996_v28 }
 0x3c1   : > { %4174 = vst [vmem:[#allocation5 + $0x80] sm:$0xff] %v4085_v12 }
 0x3c3   : > { %v3822_v10 = vpop.f32.mrf.mxu2  ;;  %v3911_v27 = vpop.f32.mrf.mxu3 }
 0x3c4   : > { %v3998_v42 = vpop.f32.mrf.mxu0  ;;  %v4087_v54 = vpop.f32.mrf.mxu1  ;;  %v3823_v13 = vadd.f32 %v3822_v10, %v13558_v6  ;;  %v16606_v10 = vld [vmem:[#allocation16_spill] sm:$0xff] }
 0x3c5   : > { %v3999_v49 = vadd.f32 %v3998_v42, %v3910_v19 }
 0x3c6   : > { %v3912_v20 = vadd.f32 %v3911_v27, %v3823_v13  ;;  %v16607_v27 = vld [vmem:[#allocation15_spill] sm:$0xff] }
 0x3c7   : > { %v4088_v62 = vadd.f32 %v4087_v54, %v3999_v49  ;;  %4825 = vmatmul.bf16.vlgmr.msra.gmra.mxu0 %v16602_v37  ;;  %4914 = vmatmul.bf16.vlgmr.msra.gmra.mxu1 %v16603_v35  ;;  %v16608_v37 = vld [vmem:[#allocation17_spill] sm:$0xff]  ;;  %v16609_v35 = vld [vmem:[#allocation18_spill] sm:$0xff] }
 0x3c8   : > { %4652 = vmatmul.bf16.gmra.mxu2 %v16604_v7  ;;  %4741 = vmatmul.bf16.gmra.mxu3 %v16605_v46 }
 0x3c9   : > { %4175 = vst [vmem:[#allocation5 + $0x88] sm:$0xff] %v4088_v62 }
 0x3cb   : > { %v3825_v51 = vpop.f32.mrf.mxu2  ;;  %v3914_v57 = vpop.f32.mrf.mxu3 }
 0x3cc   : > { %v4000_v4 = vpop.f32.mrf.mxu0  ;;  %v4089_v32 = vpop.f32.mrf.mxu1  ;;  %v3826_v9 = vadd.f32 %v3825_v51, %v13561_v22  ;;  %v12237_v51 = vld [vmem:[%s16160_s3 + $0x2e8] sm:$0xff] }
 0x3cd   : > { %v4001_v28 = vadd.f32 %v4000_v4, %v3912_v20  ;;  %5086 = vmatpush.bf16.msrb.mxu3 %v12237_v51 }
 0x3ce   : > { %v3915_v8 = vadd.f32 %v3914_v57, %v3826_v9 }
 0x3cf   : > { %v4090_v12 = vadd.f32 %v4089_v32, %v4001_v28 }
 0x3d1   : > { %4176 = vst [vmem:[#allocation5 + $0x90] sm:$0xff] %v4090_v12 }
 0x3d3   : > { %v3827_v6 = vpop.f32.mrf.mxu2  ;;  %v3916_v54 = vpop.f32.mrf.mxu3 }
 0x3d4   : > { %v4003_v14 = vpop.f32.mrf.mxu0  ;;  %v4092_v19 = vpop.f32.mrf.mxu1  ;;  %v3828_v62 = vadd.f32 %v3827_v6, %v16607_v27  ;;  %v16610_v6 = vld [vmem:[#allocation19_spill] sm:$0xff] }
 0x3d5   : > { %v4004_v42 = vadd.f32 %v4003_v14, %v3915_v8 }
 0x3d6   : > { %v3917_v22 = vadd.f32 %v3916_v54, %v3828_v62 }
 0x3d7   : > { %v4093_v49 = vadd.f32 %v4092_v19, %v4004_v42  ;;  %4830 = vmatmul.bf16.gmra.mxu0 %v16552_v16  ;;  %4919 = vmatmul.bf16.gmra.mxu1 %v16606_v10  ;;  %v12229_v16 = vld [vmem:[%s16160_s3 + $0x2a8] sm:$0xff]  ;;  %v16613_v10 = vld [vmem:[#allocation22_spill] sm:$0xff] }
 0x3d8   : > { %4657 = vmatmul.bf16.gmra.mxu2 %v16608_v37  ;;  %4746 = vmatmul.bf16.gmra.mxu3 %v16609_v35 }
 0x3d9   : > { %4177 = vst [vmem:[#allocation5 + $0x98] sm:$0xff] %v4093_v49  ;;  %4997 = vmatpush.bf16.msrb.mxu2 %v12229_v16  ;;  %v16612_v49 = vld [vmem:[#allocation21_spill] sm:$0xff] }
 0x3db   : > { %v3830_v20 = vpop.f32.mrf.mxu2  ;;  %v3919_v4 = vpop.f32.mrf.mxu3 }
 0x3dc   : > { %v4005_v13 = vpop.f32.mrf.mxu0  ;;  %v4094_v7 = vpop.f32.mrf.mxu1  ;;  %v3831_v28 = vadd.f32 %v3830_v20, %v13577_v29  ;;  %v16611_v29 = vld [vmem:[#allocation20_spill] sm:$0xff] }
 0x3dd   : > { %v4006_v46 = vadd.f32 %v4005_v13, %v3917_v22 }
 0x3de   : > { %v3920_v57 = vadd.f32 %v3919_v4, %v3831_v28 }
 0x3df   : > { %v4095_v32 = vadd.f32 %v4094_v7, %v4006_v46 }
 0x3e1   : > { %4178 = vst [vmem:[#allocation5 + $0xa0] sm:$0xff] %v4095_v32 }
 0x3e3   : > { %v3832_v14 = vpop.f32.mrf.mxu2  ;;  %v3921_v19 = vpop.f32.mrf.mxu3 }
 0x3e4   : > { %v4008_v12 = vpop.f32.mrf.mxu0  ;;  %v4097_v9 = vpop.f32.mrf.mxu1  ;;  %v3833_v54 = vadd.f32 %v3832_v14, %v13584_v60  ;;  %v16617_v14 = vld [vmem:[#allocation26_spill] sm:$0xff] }
 0x3e5   : > { %v4009_v8 = vadd.f32 %v4008_v12, %v3920_v57  ;;  %v16614_v57 = vld [vmem:[#allocation24_spill] sm:$0xff]  ;;  %v16615_v12 = vld [vmem:[#allocation79_spill] sm:$0xff] }
 0x3e6   : > { %v3922_v27 = vadd.f32 %v3921_v19, %v3833_v54 }
 0x3e7   : > { %v4098_v42 = vadd.f32 %v4097_v9, %v4009_v8  ;;  %4835 = vmatmul.bf16.gmra.mxu0 %v16610_v6  ;;  %4924 = vmatmul.bf16.gmra.mxu1 %v16611_v29  ;;  %v16616_v8 = vld [vmem:[#allocation25_spill] sm:$0xff] }
 0x3e8   : > { %4662 = vmatmul.bf16.gmra.mxu2 %v16612_v49  ;;  %4751 = vmatmul.bf16.gmra.mxu3 %v16613_v10 }
 0x3e9   : > { %4179 = vst [vmem:[#allocation5 + $0xa8] sm:$0xff] %v4098_v42 }
 0x3eb   : > { %v3835_v22 = vpop.f32.mrf.mxu2  ;;  %v3924_v13 = vpop.f32.mrf.mxu3 }
 0x3ec   : > { %v4010_v62 = vpop.f32.mrf.mxu0  ;;  %v4099_v37 = vpop.f32.mrf.mxu1  ;;  %v3836_v46 = vadd.f32 %v3835_v22, %v13587_v47 }
 0x3ed   : > { %v4011_v35 = vadd.f32 %v4010_v62, %v3922_v27  ;;  %v12236_v27 = vld [vmem:[%s16160_s3 + $0x2e0] sm:$0xff] }
 0x3ee   : > { %v3925_v20 = vadd.f32 %v3924_v13, %v3836_v46  ;;  %5087 = vmatpush.bf16.msrb.mxu3 %v12236_v27  ;;  %v16624_v27 = vld [vmem:[#allocation33_spill] sm:$0xff] }
 0x3ef   : > { %v4100_v7 = vadd.f32 %v4099_v37, %v4011_v35 }
 0x3f1   : > { %4180 = vst [vmem:[#allocation5 + $0xb0] sm:$0xff] %v4100_v7 }
 0x3f3   : > { %v3837_v60 = vpop.f32.mrf.mxu2  ;;  %v3926_v16 = vpop.f32.mrf.mxu3 }
 0x3f4   : > { %v4013_v4 = vpop.f32.mrf.mxu0  ;;  %v4102_v32 = vpop.f32.mrf.mxu1  ;;  %v3838_v9 = vadd.f32 %v3837_v60, %v16615_v12 }
 0x3f5   : > { %v4014_v28 = vadd.f32 %v4013_v4, %v3925_v20  ;;  %v16618_v20 = vld [vmem:[#allocation27_spill] sm:$0xff] }
 0x3f6   : > { %v3927_v47 = vadd.f32 %v3926_v16, %v3838_v9 }
 0x3f7   : > { %v4103_v51 = vadd.f32 %v4102_v32, %v4014_v28  ;;  %4840 = vmatmul.bf16.gmra.mxu0 %v16561_v39  ;;  %4929 = vmatmul.bf16.gmra.mxu1 %v16614_v57  ;;  %v12228_v39 = vld [vmem:[%s16160_s3 + $0x2a0] sm:$0xff]  ;;  %v16620_v32 = vld [vmem:[#allocation29_spill] sm:$0xff] }
 0x3f8   : > { %4667 = vmatmul.bf16.gmra.mxu2 %v16616_v8  ;;  %4756 = vmatmul.bf16.gmra.mxu3 %v16617_v14  ;;  %v16621_v28 = vld [vmem:[#allocation30_spill] sm:$0xff] }
 0x3f9   : > { %4181 = vst [vmem:[#allocation5 + $0xb8] sm:$0xff] %v4103_v51  ;;  %4998 = vmatpush.bf16.msrb.mxu2 %v12228_v39 }
 0x3fb   : > { %v3840_v29 = vpop.f32.mrf.mxu2  ;;  %v3929_v54 = vpop.f32.mrf.mxu3 }
 0x3fc   : > { %v4015_v19 = vpop.f32.mrf.mxu0  ;;  %v4104_v42 = vpop.f32.mrf.mxu1  ;;  %v3841_v10 = vadd.f32 %v3840_v29, %v13603_v61  ;;  %v16619_v61 = vld [vmem:[#allocation28_spill] sm:$0xff] }
 0x3fd   : > { %v4016_v6 = vadd.f32 %v4015_v19, %v3927_v47 }
 0x3fe   : > { %v3930_v62 = vadd.f32 %v3929_v54, %v3841_v10  ;;  %v16623_v10 = vld [vmem:[#allocation23_spill] sm:$0xff] }
 0x3ff   : > { %v4105_v49 = vadd.f32 %v4104_v42, %v4016_v6 }
 0x401   : > { %4182 = vst [vmem:[#allocation5 + $0xc0] sm:$0xff] %v4105_v49  ;;  %v16622_v49 = vld [vmem:[#allocation32_spill] sm:$0xff] }
 0x403   : > { %v3842_v13 = vpop.f32.mrf.mxu2  ;;  %v3931_v7 = vpop.f32.mrf.mxu3 }
 0x404   : > { %v4018_v37 = vpop.f32.mrf.mxu0  ;;  %v4107_v35 = vpop.f32.mrf.mxu1  ;;  %v3843_v4 = vadd.f32 %v3842_v13, %v13610_v0 }
 0x405   : > { %v4019_v22 = vadd.f32 %v4018_v37, %v3930_v62  ;;  %v16625_v62 = vld [vmem:[#allocation34_spill] sm:$0xff] }
 0x406   : > { %v3932_v60 = vadd.f32 %v3931_v7, %v3843_v4 }
 0x407   : > { %v4108_v46 = vadd.f32 %v4107_v35, %v4019_v22  ;;  %4845 = vmatmul.bf16.gmra.mxu0 %v16618_v20  ;;  %4934 = vmatmul.bf16.gmra.mxu1 %v16619_v61  ;;  %v12235_v61 = vld [vmem:[%s16160_s3 + $0x2d8] sm:$0xff] }
 0x408   : > { %4672 = vmatmul.bf16.gmra.mxu2 %v16620_v32  ;;  %4761 = vmatmul.bf16.gmra.mxu3 %v16621_v28 }
 0x409   : > { %4183 = vst [vmem:[#allocation5 + $0xc8] sm:$0xff] %v4108_v46  ;;  %5088 = vmatpush.bf16.msrb.mxu3 %v12235_v61  ;;  %v16633_v61 = vmov 0 }
 0x40b   : > { %v3845_v12 = vpop.f32.mrf.mxu2  ;;  %v3934_v9 = vpop.f32.mrf.mxu3 }
 0x40c   : > { %v4020_v16 = vpop.f32.mrf.mxu0  ;;  %v4109_v51 = vpop.f32.mrf.mxu1  ;;  %v3846_v14 = vadd.f32 %v3845_v12, %v13613_v2  ;;  %v16626_v12 = vld [vmem:[#allocation35_spill] sm:$0xff] }
 0x40d   : > { %v4021_v57 = vadd.f32 %v4020_v16, %v3932_v60 }
 0x40e   : > { %v3935_v47 = vadd.f32 %v3934_v9, %v3846_v14  ;;  %v16629_v14 = vld [vmem:[#allocation38_spill] sm:$0xff] }
 0x40f   : > { %v4110_v8 = vadd.f32 %v4109_v51, %v4021_v57 }
 0x411   : > { %4184 = vst [vmem:[#allocation5 + $0xd0] sm:$0xff] %v4110_v8  ;;  %v16628_v8 = vld [vmem:[#allocation37_spill] sm:$0xff] }
 0x413   : > { %v3847_v0 = vpop.f32.mrf.mxu2  ;;  %v3936_v29 = vpop.f32.mrf.mxu3 }
 0x414   : > { %v4023_v19 = vpop.f32.mrf.mxu0  ;;  %v4112_v42 = vpop.f32.mrf.mxu1  ;;  %v3848_v39 = vadd.f32 %v3847_v0, %v16623_v10 }
 0x415   : > { %v4024_v6 = vadd.f32 %v4023_v19, %v3935_v47 }
 0x416   : > { %v3937_v2 = vadd.f32 %v3936_v29, %v3848_v39 }
 0x417   : > { %v4113_v54 = vadd.f32 %v4112_v42, %v4024_v6  ;;  %4850 = vmatmul.bf16.gmra.mxu0 %v16570_v34  ;;  %4939 = vmatmul.bf16.gmra.mxu1 %v16622_v49  ;;  %v12227_v34 = vld [vmem:[%s16160_s3 + $0x298] sm:$0xff] }
 0x418   : > { %4677 = vmatmul.bf16.gmra.mxu2 %v16624_v27  ;;  %4766 = vmatmul.bf16.gmra.mxu3 %v16625_v62 }
 0x419   : > { %4185 = vst [vmem:[#allocation5 + $0xd8] sm:$0xff] %v4113_v54  ;;  %4999 = vmatpush.bf16.msrb.mxu2 %v12227_v34  ;;  %v340_v54 = vlaneseq  ;;  %v16632_v34 = vld [vmem:[#allocation42_spill] sm:$0xff] }
 0x41b   : > { %v3850_v13 = vpop.f32.mrf.mxu2  ;;  %v3939_v7 = vpop.f32.mrf.mxu3  ;;  %v13835_v39 = vshrl.u32 %v340_v54, 7 }
 0x41c   : > { %v4025_v37 = vpop.f32.mrf.mxu0  ;;  %v4114_v35 = vpop.f32.mrf.mxu1  ;;  %v3851_v20 = vadd.f32 %v3850_v13, %v13629_v45  ;;  %v16627_v45 = vld [vmem:[#allocation36_spill] sm:$0xff] }
 0x41d   : > { %v4026_v22 = vadd.f32 %v4025_v37, %v3937_v2 }
 0x41e   : > { %v3940_v4 = vadd.f32 %v3939_v7, %v3851_v20  ;;  %v16630_v7 = vld [vmem:[#allocation84_spill] sm:$0xff]  ;;  %v16631_v20 = vld [vmem:[#allocation41_spill] sm:$0xff] }
 0x41f   : > { %v4115_v46 = vadd.f32 %v4114_v35, %v4026_v22  ;;  %v377_v22 = vand.u32 15, %v13835_v39 }
 0x421   : > { %4186 = vst [vmem:[#allocation5 + $0xe0] sm:$0xff] %v4115_v46  ;;  %vm13846_vm2 = vcmp.gt.s32.totalorder %v377_v22, 0  ;;  %v4193_v22 = vld [vmem:[#allocation4 + $0x17] sm:$0xff] }
 0x422   : > { %v16634_v61 = vsel %vm13846_vm2, 4294967295, %v16633_v61 }
 0x423   : > { %v3852_v16 = vpop.f32.mrf.mxu2  ;;  %v3941_v51 = vpop.f32.mrf.mxu3  ;;  %16635 = vst [vmem:[#allocation31_spill] sm:$0xff] %v16634_v61 }
 0x424   : > { %v4028_v32 = vpop.f32.mrf.mxu0  ;;  %v4117_v28 = vpop.f32.mrf.mxu1  ;;  %v3853_v9 = vadd.f32 %v3852_v16, %v13636_v24 }
 0x425   : > { %v4029_v60 = vadd.f32 %v4028_v32, %v3940_v4  ;;  %v4191_v4 = vld [vmem:[#allocation4 + $0x7] sm:$0xff] }
 0x426   : > { %v3942_v47 = vadd.f32 %v3941_v51, %v3853_v9  ;;  %v12234_v9 = vld [vmem:[%s16160_s3 + $0x2d0] sm:$0xff] }
 0x427   : > { %v4118_v57 = vadd.f32 %v4117_v28, %v4029_v60  ;;  %4855 = vmatmul.bf16.gmra.mxu0 %v16626_v12  ;;  %4944 = vmatmul.bf16.gmra.mxu1 %v16627_v45  ;;  %v4319_v60 = vsel %vm13846_vm2, %v4191_v4, 0.0  ;;  %v12226_v45 = vld [vmem:[%s16160_s3 + $0x290] sm:$0xff] }
 0x428   : > { %4682 = vmatmul.bf16.gmra.mxu2 %v16628_v8  ;;  %4771 = vmatmul.bf16.gmra.mxu3 %v16629_v14  ;;  %v343_v14 = vadd.s32 16, %v13835_v39 }
 0x429   : > { %4187 = vst [vmem:[#allocation5 + $0xe8] sm:$0xff] %v4118_v57  ;;  %5000 = vmatpush.bf16.msrb.mxu2 %v12226_v45  ;;  %5089 = vmatpush.bf16.msrb.mxu3 %v12234_v9 }
 0x42b   : > { %v3855_v0 = vpop.f32.mrf.mxu2  ;;  %v3944_v29 = vpop.f32.mrf.mxu3 }
 0x42c   : > { %v4030_v19 = vpop.f32.mrf.mxu0  ;;  %v4119_v42 = vpop.f32.mrf.mxu1  ;;  %v3856_v10 = vadd.f32 %v3855_v0, %v13639_v53  ;;  %v12343_v53 = vld [vmem:[%s16162_s5 + $0x38] sm:$0xff] }
 0x42d   : > { %v4031_v6 = vadd.f32 %v4030_v19, %v3942_v47  ;;  %6169 = vmatpush.bf16.msrb.mxu0 %v12343_v53 }
 0x42e   : > { %v3945_v27 = vadd.f32 %v3944_v29, %v3856_v10 }
 0x42f   : > { %v4120_v49 = vadd.f32 %v4119_v42, %v4031_v6  ;;  %v4192_v6 = vld [vmem:[#allocation4 + $0xf] sm:$0xff] }
 0x431   : > { %4188 = vst [vmem:[#allocation5 + $0xf0] sm:$0xff] %v4120_v49  ;;  %v391_v49 = vand.u32 15, %v343_v14 }
 0x433   : > { %v3857_v37 = vpop.f32.mrf.mxu2  ;;  %v3946_v35 = vpop.f32.mrf.mxu3  ;;  %vm13865_vm3 = vcmp.gt.s32.totalorder %v391_v49, 0 }
 0x434   : > { %v4033_v24 = vpop.f32.mrf.mxu0  ;;  %v4122_v62 = vpop.f32.mrf.mxu1  ;;  %v3858_v46 = vadd.f32 %v3857_v37, %v16630_v7  ;;  %v16639_v37 = vld [vmem:[#allocation46_spill] sm:$0xff]  ;;  %v4321_v53 = vsel %vm13865_vm3, %v4193_v22, 0.0 }
 0x435   : > { %v4034_v2 = vadd.f32 %v4033_v24, %v3945_v27  ;;  %v16636_v27 = vld [vmem:[#allocation43_spill] sm:$0xff]  ;;  %v16637_v24 = vld [vmem:[#allocation44_spill] sm:$0xff] }
 0x436   : > { %v3947_v32 = vadd.f32 %v3946_v35, %v3858_v46  ;;  %v16640_v35 = vmov 0 }
 0x437   : > { %v4123_v13 = vadd.f32 %v4122_v62, %v4034_v2  ;;  %4860 = vmatmul.bf16.gmra.mxu0 %v16579_v25  ;;  %4949 = vmatmul.bf16.gmra.mxu1 %v16580_v43  ;;  %v16638_v2 = vld [vmem:[#allocation45_spill] sm:$0xff]  ;;  %v16641_v35 = vsel %vm13865_vm3, 4294967295, %v16640_v35 }
 0x438   : > { %4687 = vmatmul.bf16.gmra.mxu2 %v16631_v20  ;;  %4776 = vmatmul.bf16.gmra.mxu3 %v16632_v34  ;;  %16642 = vst [vmem:[#allocation89_spill] sm:$0xff] %v16641_v35 }
 0x439   : > { %4189 = vst [vmem:[#allocation5 + $0xf8] sm:$0xff] %v4123_v13 }
 0x43b   : > { %v4648_v16 = vpop.f32.mrf.mxu2  ;;  %v4737_v51 = vpop.f32.mrf.mxu3 }
 0x43c   : > { %v4035_v25 = vpop.f32.mrf.mxu0  ;;  %v4124_v43 = vpop.f32.mrf.mxu1  ;;  %v4649_v57 = vadd.f32 %v4648_v16, %v4319_v60 }
 0x43d   : > { %v4036_v28 = vadd.f32 %v4035_v25, %v3947_v32 }
 0x43e   : > { %v4738_v8 = vadd.f32 %v4737_v51, %v4649_v57  ;;  %v4194_v51 = vld [vmem:[#allocation4 + $0x1f] sm:$0xff] }
 0x43f   : > { %v4125_v12 = vadd.f32 %v4124_v43, %v4036_v28  ;;  %v345_v43 = vadd.s32 32, %v13835_v39 }
 0x441   : > { %4190 = vst [vmem:[#allocation5 + $0x100] sm:$0xff] %v4125_v12  ;;  %v405_v9 = vand.u32 15, %v345_v43 }
 0x443   : > { %v4650_v0 = vpop.f32.mrf.mxu2  ;;  %v4739_v29 = vpop.f32.mrf.mxu3  ;;  %vm13883_vm4 = vcmp.gt.s32.totalorder %v405_v9, 0 }
 0x444   : > { %v4826_v47 = vpop.f32.mrf.mxu0  ;;  %v4915_v19 = vpop.f32.mrf.mxu1  ;;  %v4651_v54 = vadd.f32 %v4650_v0, %v4192_v6  ;;  %v16645_v6 = vmov 0  ;;  %v4195_v0 = vld [vmem:[#allocation4 + $0x27] sm:$0xff] }
 0x445   : > { %v4827_v42 = vadd.f32 %v4826_v47, %v4738_v8  ;;  %v12342_v47 = vld [vmem:[%s16162_s5 + $0x30] sm:$0xff]  ;;  %v16646_v6 = vsel %vm13883_vm4, 4294967295, %v16645_v6 }
 0x446   : > { %v4740_v62 = vadd.f32 %v4739_v29, %v4651_v54  ;;  %16647 = vst [vmem:[#allocation39_spill] sm:$0xff] %v16646_v6  ;;  %6170 = vmatpush.bf16.msrb.mxu0 %v12342_v47 }
 0x447   : > { %v13859_v10 = vadd.f32 %v4915_v19, %v4827_v42  ;;  %4865 = vmatmul.bf16.gmra.mxu0 %v16636_v27  ;;  %4954 = vmatmul.bf16.gmra.mxu1 %v16637_v24  ;;  %v16643_v19 = vld [vmem:[#allocation49_spill] sm:$0xff]  ;;  %v16644_v42 = vld [vmem:[#allocation50_spill] sm:$0xff] }
 0x448   : > { %4692 = vmatmul.bf16.gmra.mxu2 %v16638_v2  ;;  %4781 = vmatmul.bf16.gmra.mxu3 %v16639_v37  ;;  %v12225_v2 = vld [vmem:[%s16160_s3 + $0x288] sm:$0xff] }
 0x449   : > { %v12233_v37 = vld [vmem:[%s16160_s3 + $0x2c8] sm:$0xff]  ;;  %5001 = vmatpush.bf16.msrb.mxu2 %v12225_v2 }
 0x44a   : > { %5090 = vmatpush.bf16.msrb.mxu3 %v12233_v37 }
 0x44b   : > { %v4653_v20 = vpop.f32.mrf.mxu2  ;;  %v4742_v34 = vpop.f32.mrf.mxu3 }
 0x44c   : > { %v4828_v13 = vpop.f32.mrf.mxu0  ;;  %v4917_v7 = vpop.f32.mrf.mxu1  ;;  %v4654_v4 = vadd.f32 %v4653_v20, %v4321_v53  ;;  %v4196_v20 = vld [vmem:[#allocation4 + $0x2f] sm:$0xff] }
 0x44d   : > { %v4829_v46 = vadd.f32 %v4828_v13, %v4740_v62  ;;  %v347_v13 = vadd.s32 48, %v13835_v39 }
 0x44e   : > { %v4743_v25 = vadd.f32 %v4742_v34, %v4654_v4 }
 0x44f   : > { %v13871_v32 = vadd.f32 %v4917_v7, %v4829_v46  ;;  %v419_v43 = vand.u32 15, %v347_v13 }
 0x451   : > { %vm13904_vm5 = vcmp.gt.s32.totalorder %v419_v43, 0 }
 0x453   : > { %v4655_v57 = vpop.f32.mrf.mxu2  ;;  %v4744_v12 = vpop.f32.mrf.mxu3 }
 0x454   : > { %v4831_v28 = vpop.f32.mrf.mxu0  ;;  %v4920_v60 = vpop.f32.mrf.mxu1  ;;  %v4656_v45 = vadd.f32 %v4655_v57, %v4194_v51  ;;  %v16649_v51 = vld [vmem:[#allocation54_spill] sm:$0xff]  ;;  %v16650_v57 = vmov 0 }
 0x455   : > { %v4832_v16 = vadd.f32 %v4831_v28, %v4743_v25  ;;  %v16651_v57 = vsel %vm13904_vm5, 4294967295, %v16650_v57 }
 0x456   : > { %v4745_v14 = vadd.f32 %v4744_v12, %v4656_v45  ;;  %16652 = vst [vmem:[#allocation40_spill] sm:$0xff] %v16651_v57  ;;  %v4197_v12 = vld [vmem:[#allocation4 + $0x37] sm:$0xff] }
 0x457   : > { %v13874_v8 = vadd.f32 %v4920_v60, %v4832_v16  ;;  %4870 = vmatmul.bf16.gmra.mxu0 %v16586_v18  ;;  %4959 = vmatmul.bf16.gmra.mxu1 %v16587_v55  ;;  %v4323_v55 = vsel %vm13883_vm4, %v4195_v0, 0.0  ;;  %v16648_v16 = vld [vmem:[#allocation53_spill] sm:$0xff]  ;;  %v4325_v47 = vsel %vm13904_vm5, %v4197_v12, 0.0  ;;  %v12224_v12 = vld [vmem:[%s16160_s3 + $0x280] sm:$0xff] }
 0x458   : > { %4697 = vmatmul.bf16.gmra.mxu2 %v16643_v19  ;;  %4786 = vmatmul.bf16.gmra.mxu3 %v16644_v42 }
 0x459   : > { %5002 = vmatpush.bf16.msrb.mxu2 %v12224_v12 }
 0x45b   : > { %v4658_v49 = vpop.f32.mrf.mxu2  ;;  %v4747_v27 = vpop.f32.mrf.mxu3 }
 0x45c   : > { %v4833_v29 = vpop.f32.mrf.mxu0  ;;  %v4922_v54 = vpop.f32.mrf.mxu1  ;;  %v4659_v24 = vadd.f32 %v4658_v49, %v4323_v55  ;;  %v4198_v49 = vld [vmem:[#allocation4 + $0x3f] sm:$0xff] }
 0x45d   : > { %v4834_v18 = vadd.f32 %v4833_v29, %v4745_v14  ;;  %v349_v29 = vadd.s32 64, %v13835_v39 }
 0x45e   : > { %v4748_v22 = vadd.f32 %v4747_v27, %v4659_v24 }
 0x45f   : > { %v13889_v62 = vadd.f32 %v4922_v54, %v4834_v18  ;;  %v433_v37 = vand.u32 15, %v349_v29 }
 0x461   : > { %vm13922_vm6 = vcmp.gt.s32.totalorder %v433_v37, 0  ;;  %v4201_v37 = vld [vmem:[#allocation4 + $0x57] sm:$0xff] }
 0x463   : > { %v4660_v34 = vpop.f32.mrf.mxu2  ;;  %v4749_v4 = vpop.f32.mrf.mxu3 }
 0x464   : > { %v4836_v7 = vpop.f32.mrf.mxu0  ;;  %v4925_v46 = vpop.f32.mrf.mxu1  ;;  %v4661_v25 = vadd.f32 %v4660_v34, %v4196_v20  ;;  %v16655_v20 = vmov 0  ;;  %v4199_v34 = vld [vmem:[#allocation4 + $0x47] sm:$0xff] }
 0x465   : > { %v4837_v53 = vadd.f32 %v4836_v7, %v4748_v22  ;;  %v12341_v7 = vld [vmem:[%s16162_s5 + $0x28] sm:$0xff]  ;;  %v16656_v20 = vsel %vm13922_vm6, 4294967295, %v16655_v20 }
 0x466   : > { %v4750_v60 = vadd.f32 %v4749_v4, %v4661_v25  ;;  %16657 = vst [vmem:[#allocation47_spill] sm:$0xff] %v16656_v20  ;;  %6171 = vmatpush.bf16.msrb.mxu0 %v12341_v7 }
 0x467   : > { %v13898_v28 = vadd.f32 %v4925_v46, %v4837_v53  ;;  %4875 = vmatmul.bf16.gmra.mxu0 %v16588_v1  ;;  %4964 = vmatmul.bf16.gmra.mxu1 %v16589_v50  ;;  %v16653_v46 = vld [vmem:[#allocation57_spill] sm:$0xff]  ;;  %v16654_v53 = vld [vmem:[#allocation58_spill] sm:$0xff] }
 0x468   : > { %4702 = vmatmul.bf16.gmra.mxu2 %v16648_v16  ;;  %4791 = vmatmul.bf16.gmra.mxu3 %v16649_v51 }
 0x46b   : > { %v4663_v19 = vpop.f32.mrf.mxu2  ;;  %v4752_v1 = vpop.f32.mrf.mxu3 }
 0x46c   : > { %v4838_v45 = vpop.f32.mrf.mxu0  ;;  %v4927_v9 = vpop.f32.mrf.mxu1  ;;  %v4664_v42 = vadd.f32 %v4663_v19, %v4325_v47 }
 0x46d   : > { %v4839_v14 = vadd.f32 %v4838_v45, %v4750_v60  ;;  %v12232_v45 = vld [vmem:[%s16160_s3 + $0x2c0] sm:$0xff] }
 0x46e   : > { %v4753_v0 = vadd.f32 %v4752_v1, %v4664_v42  ;;  %5091 = vmatpush.bf16.msrb.mxu3 %v12232_v45  ;;  %v4200_v42 = vld [vmem:[#allocation4 + $0x4f] sm:$0xff] }
 0x46f   : > { %v13910_v50 = vadd.f32 %v4927_v9, %v4839_v14  ;;  %v351_v14 = vadd.s32 80, %v13835_v39 }
 0x473   : > { %v4665_v27 = vpop.f32.mrf.mxu2  ;;  %v4754_v24 = vpop.f32.mrf.mxu3 }
 0x474   : > { %v4841_v54 = vpop.f32.mrf.mxu0  ;;  %v4930_v18 = vpop.f32.mrf.mxu1  ;;  %v4666_v2 = vadd.f32 %v4665_v27, %v4198_v49  ;;  %v16658_v27 = vld [vmem:[#allocation61_spill] sm:$0xff] }
 0x475   : > { %v4842_v55 = vadd.f32 %v4841_v54, %v4753_v0 }
 0x476   : > { %v4755_v13 = vadd.f32 %v4754_v24, %v4666_v2  ;;  %v16659_v24 = vld [vmem:[#allocation62_spill] sm:$0xff]  ;;  %v16660_v2 = vmov 0 }
 0x477   : > { %v13913_v22 = vadd.f32 %v4930_v18, %v4842_v55  ;;  %4880 = vmatmul.bf16.gmra.mxu0 %v16590_v21  ;;  %4969 = vmatmul.bf16.gmra.mxu1 %v16591_v30  ;;  %v4327_v30 = vsel %vm13922_vm6, %v4199_v34, 0.0  ;;  %v447_v18 = vand.u32 15, %v351_v14 }
 0x478   : > { %4707 = vmatmul.bf16.gmra.mxu2 %v16653_v46  ;;  %4796 = vmatmul.bf16.gmra.mxu3 %v16654_v53 }
 0x479   : > { %vm13945_vm7 = vcmp.gt.s32.totalorder %v447_v18, 0 }
 0x47a   : > { %v16661_v2 = vsel %vm13945_vm7, 4294967295, %v16660_v2 }
 0x47b   : > { %v4668_v43 = vpop.f32.mrf.mxu2  ;;  %v4757_v60 = vpop.f32.mrf.mxu3  ;;  %16662 = vst [vmem:[#allocation48_spill] sm:$0xff] %v16661_v2 }
 0x47c   : > { %v4843_v4 = vpop.f32.mrf.mxu0  ;;  %v4932_v25 = vpop.f32.mrf.mxu1  ;;  %v4669_v16 = vadd.f32 %v4668_v43, %v4327_v30  ;;  %v4202_v43 = vld [vmem:[#allocation4 + $0x5f] sm:$0xff] }
 0x47d   : > { %v4844_v21 = vadd.f32 %v4843_v4, %v4755_v13  ;;  %v353_v4 = vadd.s32 96, %v13835_v39 }
 0x47e   : > { %v4758_v9 = vadd.f32 %v4757_v60, %v4669_v16 }
 0x47f   : > { %v13928_v51 = vadd.f32 %v4932_v25, %v4844_v21  ;;  %v461_v45 = vand.u32 15, %v353_v4 }
 0x481   : > { %vm13967_vm8 = vcmp.gt.s32.totalorder %v461_v45, 0  ;;  %v4205_v45 = vld [vmem:[#allocation4 + $0x77] sm:$0xff] }
 0x483   : > { %v4670_v0 = vpop.f32.mrf.mxu2  ;;  %v4759_v29 = vpop.f32.mrf.mxu3 }
 0x484   : > { %v4846_v47 = vpop.f32.mrf.mxu0  ;;  %v4935_v19 = vpop.f32.mrf.mxu1  ;;  %v4671_v54 = vadd.f32 %v4670_v0, %v4200_v42  ;;  %v16665_v42 = vmov 0  ;;  %v4203_v0 = vld [vmem:[#allocation4 + $0x67] sm:$0xff] }
 0x485   : > { %v4847_v1 = vadd.f32 %v4846_v47, %v4758_v9  ;;  %v12340_v47 = vld [vmem:[%s16162_s5 + $0x20] sm:$0xff]  ;;  %v16666_v42 = vsel %vm13967_vm8, 4294967295, %v16665_v42 }
 0x486   : > { %v13941_v49 = vadd.f32 %v4759_v29, %v4671_v54  ;;  %16667 = vst [vmem:[#allocation51_spill] sm:$0xff] %v16666_v42  ;;  %6172 = vmatpush.bf16.msrb.mxu0 %v12340_v47 }
 0x487   : > { %v13937_v55 = vadd.f32 %v4935_v19, %v4847_v1  ;;  %4885 = vmatmul.bf16.gmra.mxu0 %v16592_v41  ;;  %4974 = vmatmul.bf16.gmra.mxu1 %v16593_v58  ;;  %v4329_v41 = vsel %vm13945_vm7, %v4201_v37, 0.0  ;;  %v16663_v19 = vld [vmem:[#allocation65_spill] sm:$0xff]  ;;  %v16664_v1 = vld [vmem:[#allocation66_spill] sm:$0xff]  ;;  %v355_v37 = vadd.s32 112, %v13835_v39 }
 0x488   : > { %4712 = vmatmul.bf16.gmra.mxu2 %v16658_v27  ;;  %4801 = vmatmul.bf16.gmra.mxu3 %v16659_v24 }
 0x48b   : > { %v4673_v46 = vpop.f32.mrf.mxu2  ;;  %v4762_v58 = vpop.f32.mrf.mxu3 }
 0x48c   : > { %v13949_v13 = vpop.f32.mrf.mxu0  ;;  %v13951_v7 = vpop.f32.mrf.mxu1  ;;  %v4674_v53 = vadd.f32 %v4673_v46, %v4329_v41 }
 0x48e   : > { %v4763_v34 = vadd.f32 %v4762_v58, %v4674_v53  ;;  %v4204_v53 = vld [vmem:[#allocation4 + $0x6f] sm:$0xff] }
 0x493   : > { %v4675_v60 = vpop.f32.mrf.mxu2  ;;  %v4764_v16 = vpop.f32.mrf.mxu3 }
 0x494   : > { %v4851_v25 = vpop.f32.mrf.mxu0  ;;  %v4940_v21 = vpop.f32.mrf.mxu1  ;;  %v4676_v12 = vadd.f32 %v4675_v60, %v4202_v43  ;;  %v16668_v60 = vld [vmem:[#allocation69_spill] sm:$0xff] }
 0x495   : > { %v4852_v30 = vadd.f32 %v4851_v25, %v4763_v34 }
 0x496   : > { %v13960_v14 = vadd.f32 %v4764_v16, %v4676_v12  ;;  %v16669_v16 = vld [vmem:[#allocation70_spill] sm:$0xff]  ;;  %v16670_v12 = vmov 0 }
 0x497   : > { %v13956_v9 = vadd.f32 %v4940_v21, %v4852_v30  ;;  %4890 = vmatmul.bf16.gmra.mxu0 %v16594_v31  ;;  %4979 = vmatmul.bf16.gmra.mxu1 %v16595_v26  ;;  %v4331_v26 = vsel %vm13967_vm8, %v4203_v0, 0.0  ;;  %v475_v21 = vand.u32 15, %v355_v37  ;;  %v4206_v37 = vld [vmem:[#allocation4 + $0x7f] sm:$0xff] }
 0x498   : > { %4717 = vmatmul.bf16.gmra.mxu2 %v16663_v19  ;;  %4806 = vmatmul.bf16.gmra.mxu3 %v16664_v1 }
 0x499   : > { %vm13986_vm9 = vcmp.gt.s32.totalorder %v475_v21, 0  ;;  %v16673_v21 = vld [vmem:[#allocation73_spill] sm:$0xff] }
 0x49a   : > { %v16671_v12 = vsel %vm13986_vm9, 4294967295, %v16670_v12 }
 0x49b   : > { %v4678_v54 = vpop.f32.mrf.mxu2  ;;  %v4767_v18 = vpop.f32.mrf.mxu3  ;;  %16672 = vst [vmem:[#allocation52_spill] sm:$0xff] %v16671_v12 }
 0x49c   : > { %v13971_v29 = vpop.f32.mrf.mxu0  ;;  %v13973_v31 = vpop.f32.mrf.mxu1  ;;  %v4679_v27 = vadd.f32 %v4678_v54, %v4331_v26  ;;  %v357_v54 = vadd.s32 128, %v13835_v39 }
 0x49e   : > { %v4768_v24 = vadd.f32 %v4767_v18, %v4679_v27 }
 0x4a3   : > { %v4680_v34 = vpop.f32.mrf.mxu2  ;;  %v4769_v4 = vpop.f32.mrf.mxu3 }
 0x4a4   : > { %v4856_v41 = vpop.f32.mrf.mxu0  ;;  %v4945_v46 = vpop.f32.mrf.mxu1  ;;  %v4681_v25 = vadd.f32 %v4680_v34, %v4204_v53  ;;  %v489_v53 = vand.u32 15, %v357_v54  ;;  %v359_v54 = vadd.s32 144, %v13835_v39 }
 0x4a5   : > { %v4857_v58 = vadd.f32 %v4856_v41, %v4768_v24 }
 0x4a6   : > { %v13982_v43 = vadd.f32 %v4769_v4, %v4681_v25  ;;  %v12339_v25 = vld [vmem:[%s16162_s5 + $0x18] sm:$0xff]  ;;  %vm14008_vm10 = vcmp.gt.s32.totalorder %v489_v53, 0  ;;  %v503_v53 = vand.u32 15, %v359_v54 }
 0x4a7   : > { %v13978_v30 = vadd.f32 %v4945_v46, %v4857_v58  ;;  %4895 = vmatmul.bf16.gmra.mxu0 %v16596_v38  ;;  %4984 = vmatmul.bf16.gmra.mxu1 %v16597_v36  ;;  %v4333_v38 = vsel %vm13986_vm9, %v4205_v45, 0.0  ;;  %v4207_v45 = vld [vmem:[#allocation4 + $0x87] sm:$0xff] }
 0x4a8   : > { %4722 = vmatmul.bf16.gmra.mxu2 %v16668_v60  ;;  %4811 = vmatmul.bf16.gmra.mxu3 %v16669_v16  ;;  %v16674_v60 = vld [vmem:[#allocation74_spill] sm:$0xff]  ;;  %v16675_v16 = vmov 0  ;;  %vm14025_vm11 = vcmp.gt.s32.totalorder %v503_v53, 0 }
 0x4a9   : > { %v16676_v16 = vsel %vm14008_vm10, 4294967295, %v16675_v16  ;;  %6173 = vmatpush.bf16.msrb.mxu0 %v12339_v25 }
 0x4aa   : > { %16677 = vst [vmem:[#allocation55_spill] sm:$0xff] %v16676_v16 }
 0x4ab   : > { %v4683_v1 = vpop.f32.mrf.mxu2  ;;  %v4772_v36 = vpop.f32.mrf.mxu3 }
 0x4ac   : > { %v13990_v47 = vpop.f32.mrf.mxu0  ;;  %v13992_v19 = vpop.f32.mrf.mxu1  ;;  %v4684_v0 = vadd.f32 %v4683_v1, %v4333_v38 }
 0x4ae   : > { %v4773_v26 = vadd.f32 %v4772_v36, %v4684_v0 }
 0x4b3   : > { %v4685_v41 = vpop.f32.mrf.mxu2  ;;  %v4774_v46 = vpop.f32.mrf.mxu3 }
 0x4b4   : > { %v4861_v18 = vpop.f32.mrf.mxu0  ;;  %v4950_v27 = vpop.f32.mrf.mxu1  ;;  %v4686_v58 = vadd.f32 %v4685_v41, %v4206_v37  ;;  %v4208_v37 = vld [vmem:[#allocation4 + $0x8f] sm:$0xff] }
 0x4b5   : > { %v4862_v24 = vadd.f32 %v4861_v18, %v4773_v26 }
 0x4b6   : > { %v14001_v4 = vadd.f32 %v4774_v46, %v4686_v58 }
 0x4b7   : > { %v13997_v34 = vadd.f32 %v4950_v27, %v4862_v24  ;;  %4900 = vmatmul.bf16.gmra.mxu0 %v16598_v11  ;;  %4989 = vmatmul.bf16.gmra.mxu1 %v16599_v56  ;;  %v4335_v56 = vsel %vm14008_vm10, %v4207_v45, 0.0  ;;  %v16679_v45 = vld [vmem:[#allocation76_spill] sm:$0xff] }
 0x4b8   : > { %5003 = vmatmul.bf16.vlgmr.msrb.gmra.mxu2 %v16673_v21  ;;  %5092 = vmatmul.bf16.vlgmr.msrb.gmra.mxu3 %v16674_v60  ;;  %v16678_v60 = vld [vmem:[#allocation75_spill] sm:$0xff] }
 0x4bb   : > { %v4688_v1 = vpop.f32.mrf.mxu2  ;;  %v4777_v36 = vpop.f32.mrf.mxu3 }
 0x4bc   : > { %v14012_v38 = vpop.f32.mrf.mxu0  ;;  %v14014_v11 = vpop.f32.mrf.mxu1  ;;  %v4689_v0 = vadd.f32 %v4688_v1, %v4335_v56  ;;  %v16680_v56 = vmov 0  ;;  %v4209_v1 = vld [vmem:[#allocation4 + $0x97] sm:$0xff] }
 0x4bd   : > { %v16681_v56 = vsel %vm14025_vm11, 4294967295, %v16680_v56 }
 0x4be   : > { %v4778_v26 = vadd.f32 %v4777_v36, %v4689_v0  ;;  %16682 = vst [vmem:[#allocation56_spill] sm:$0xff] %v16681_v56 }
 0x4c3   : > { %v4690_v41 = vpop.f32.mrf.mxu2  ;;  %v4779_v46 = vpop.f32.mrf.mxu3 }
 0x4c4   : > { %v4866_v18 = vpop.f32.mrf.mxu0  ;;  %v4955_v27 = vpop.f32.mrf.mxu1  ;;  %v4691_v58 = vadd.f32 %v4690_v41, %v4208_v37  ;;  %v361_v41 = vadd.s32 160, %v13835_v39 }
 0x4c5   : > { %v4867_v24 = vadd.f32 %v4866_v18, %v4778_v26  ;;  %v4337_v26 = vsel %vm14025_vm11, %v4209_v1, 0.0 }
 0x4c6   : > { %v14021_v21 = vadd.f32 %v4779_v46, %v4691_v58  ;;  %v517_v56 = vand.u32 15, %v361_v41 }
 0x4c7   : > { %v14019_v25 = vadd.f32 %v4955_v27, %v4867_v24  ;;  %v12351_v24 = vld [vmem:[%s16162_s5 + $0x78] sm:$0xff] }
 0x4c8   : > { %5008 = vmatmul.bf16.gmra.mxu2 %v16678_v60  ;;  %5097 = vmatmul.bf16.gmra.mxu3 %v16679_v45  ;;  %v4210_v60 = vld [vmem:[#allocation4 + $0x9f] sm:$0xff]  ;;  %vm14048_vm12 = vcmp.gt.s32.totalorder %v517_v56, 0 }
 0x4c9   : > { %6258 = vmatpush.bf16.msrb.mxu1 %v12351_v24  ;;  %v4211_v24 = vld [vmem:[#allocation4 + $0xa7] sm:$0xff] }
 0x4cb   : > { %v4693_v54 = vpop.f32.mrf.mxu2  ;;  %v4782_v18 = vpop.f32.mrf.mxu3 }
 0x4cc   : > { %v14029_v36 = vpop.f32.mrf.mxu0  ;;  %v14031_v0 = vpop.f32.mrf.mxu1  ;;  %v4694_v27 = vadd.f32 %v4693_v54, %v4337_v26  ;;  %v12338_v26 = vld [vmem:[%s16162_s5 + $0x10] sm:$0xff] }
 0x4cd   : > { %v16683_v54 = vld [vmem:[#allocation77_spill] sm:$0xff]  ;;  %6174 = vmatpush.bf16.msrb.mxu0 %v12338_v26 }
 0x4ce   : > { %v4783_v37 = vadd.f32 %v4782_v18, %v4694_v27  ;;  %v16684_v18 = vld [vmem:[#allocation78_spill] sm:$0xff]  ;;  %v16685_v27 = vmov 0 }
 0x4cf   : > { %v16686_v27 = vsel %vm14048_vm12, 4294967295, %v16685_v27 }
 0x4d0   : > { %16687 = vst [vmem:[#allocation59_spill] sm:$0xff] %v16686_v27  ;;  %v16689_v27 = vld [vmem:[#allocation80_spill] sm:$0xff] }
 0x4d3   : > { %v4695_v45 = vpop.f32.mrf.mxu2  ;;  %v4784_v16 = vpop.f32.mrf.mxu3 }
 0x4d4   : > { %v4871_v46 = vpop.f32.mrf.mxu0  ;;  %v4960_v58 = vpop.f32.mrf.mxu1  ;;  %v4696_v12 = vadd.f32 %v4695_v45, %v4210_v60  ;;  %v363_v60 = vadd.s32 176, %v13835_v39 }
 0x4d5   : > { %v4872_v53 = vadd.f32 %v4871_v46, %v4783_v37 }
 0x4d6   : > { %v14041_v42 = vadd.f32 %v4784_v16, %v4696_v12  ;;  %v4339_v12 = vsel %vm14048_vm12, %v4211_v24, 0.0  ;;  %v531_v57 = vand.u32 15, %v363_v60  ;;  %v16690_v24 = vld [vmem:[#allocation81_spill] sm:$0xff] }
 0x4d7   : > { %v14039_v1 = vadd.f32 %v4960_v58, %v4872_v53 }
 0x4d8   : > { %5013 = vmatmul.bf16.gmra.mxu2 %v16683_v54  ;;  %5102 = vmatmul.bf16.gmra.mxu3 %v16684_v18  ;;  %v4212_v18 = vld [vmem:[#allocation4 + $0xaf] sm:$0xff]  ;;  %vm14065_vm13 = vcmp.gt.s32.totalorder %v531_v57, 0  ;;  %v365_v57 = vadd.s32 192, %v13835_v39 }
 0x4db   : > { %v4698_v16 = vpop.f32.mrf.mxu2  ;;  %v4787_v46 = vpop.f32.mrf.mxu3 }
 0x4dc   : > { %v14052_v37 = vpop.f32.mrf.mxu0  ;;  %v14054_v41 = vpop.f32.mrf.mxu1  ;;  %v4699_v58 = vadd.f32 %v4698_v16, %v4339_v12  ;;  %v16691_v12 = vmov 0  ;;  %v4213_v16 = vld [vmem:[#allocation4 + $0xb7] sm:$0xff] }
 0x4dd   : > { %v16692_v12 = vsel %vm14065_vm13, 4294967295, %v16691_v12 }
 0x4de   : > { %v4788_v53 = vadd.f32 %v4787_v46, %v4699_v58  ;;  %16693 = vst [vmem:[#allocation63_spill] sm:$0xff] %v16692_v12  ;;  %v545_v12 = vand.u32 15, %v365_v57 }
 0x4e0   : > { %vm14088_vm14 = vcmp.gt.s32.totalorder %v545_v12, 0 }
 0x4e3   : > { %v4700_v2 = vpop.f32.mrf.mxu2  ;;  %v4789_v20 = vpop.f32.mrf.mxu3 }
 0x4e4   : > { %v4876_v45 = vpop.f32.mrf.mxu0  ;;  %v4965_v56 = vpop.f32.mrf.mxu1  ;;  %v4701_v26 = vadd.f32 %v4700_v2, %v4212_v18  ;;  %v4341_v2 = vsel %vm14065_vm13, %v4213_v16, 0.0 }
 0x4e5   : > { %v4877_v54 = vadd.f32 %v4876_v45, %v4788_v53 }
 0x4e6   : > { %v14061_v35 = vadd.f32 %v4789_v20, %v4701_v26  ;;  %v4214_v26 = vld [vmem:[#allocation4 + $0xbf] sm:$0xff] }
 0x4e7   : > { %v14059_v6 = vadd.f32 %v4965_v56, %v4877_v54 }
 0x4e8   : > { %16688 = vst [vmem:[#allocation60_spill] sm:$0xff] %v14061_v35  ;;  %5018 = vmatmul.bf16.gmra.mxu2 %v16689_v27  ;;  %5107 = vmatmul.bf16.gmra.mxu3 %v16690_v24  ;;  %v12350_v27 = vld [vmem:[%s16162_s5 + $0x70] sm:$0xff] }
 0x4e9   : > { %6259 = vmatpush.bf16.msrb.mxu1 %v12350_v27  ;;  %v4215_v27 = vld [vmem:[#allocation4 + $0xc7] sm:$0xff] }
 0x4eb   : > { %v4703_v53 = vpop.f32.mrf.mxu2  ;;  %v4792_v60 = vpop.f32.mrf.mxu3 }
 0x4ec   : > { %v14069_v46 = vpop.f32.mrf.mxu0  ;;  %v14071_v58 = vpop.f32.mrf.mxu1  ;;  %v4704_v20 = vadd.f32 %v4703_v53, %v4341_v2  ;;  %v12337_v2 = vld [vmem:[%s16162_s5 + $0x8] sm:$0xff]  ;;  %v16698_v53 = vld [vmem:[#allocation82_spill] sm:$0xff] }
 0x4ed   : > { %16694 = vst [vmem:[#allocation64_spill] sm:$0xff] %v14069_v46  ;;  %6175 = vmatpush.bf16.msrb.mxu0 %v12337_v2 }
 0x4ee   : > { %16695 = vst [vmem:[#allocation67_spill] sm:$0xff] %v14071_v58  ;;  %v4793_v45 = vadd.f32 %v4792_v60, %v4704_v20  ;;  %v16699_v60 = vld [vmem:[#allocation83_spill] sm:$0xff]  ;;  %v16700_v20 = vmov 0 }
 0x4ef   : > { %v16701_v20 = vsel %vm14088_vm14, 4294967295, %v16700_v20 }
 0x4f0   : > { %16702 = vst [vmem:[#allocation72_spill] sm:$0xff] %v16701_v20  ;;  %v16707_v20 = vld [vmem:[#allocation85_spill] sm:$0xff] }
 0x4f3   : > { %v4705_v24 = vpop.f32.mrf.mxu2  ;;  %v4794_v61 = vpop.f32.mrf.mxu3 }
 0x4f4   : > { %v4881_v56 = vpop.f32.mrf.mxu0  ;;  %v4970_v54 = vpop.f32.mrf.mxu1  ;;  %v4706_v58 = vadd.f32 %v4705_v24, %v4214_v26  ;;  %v367_v26 = vadd.s32 208, %v13835_v39 }
 0x4f5   : > { %v4882_v18 = vadd.f32 %v4881_v56, %v4793_v45 }
 0x4f6   : > { %v14081_v46 = vadd.f32 %v4794_v61, %v4706_v58  ;;  %v4343_v61 = vsel %vm14088_vm14, %v4215_v27, 0.0  ;;  %v559_v35 = vand.u32 15, %v367_v26  ;;  %v16708_v27 = vld [vmem:[#allocation86_spill] sm:$0xff] }
 0x4f7   : > { %v14079_v16 = vadd.f32 %v4970_v54, %v4882_v18 }
 0x4f8   : > { %16697 = vst [vmem:[#allocation71_spill] sm:$0xff] %v14081_v46  ;;  %5023 = vmatmul.bf16.gmra.mxu2 %v16698_v53  ;;  %5112 = vmatmul.bf16.gmra.mxu3 %v16699_v60  ;;  %v4216_v60 = vld [vmem:[#allocation4 + $0xcf] sm:$0xff]  ;;  %vm14105_vm15 = vcmp.gt.s32.totalorder %v559_v35, 0  ;;  %v369_v35 = vadd.s32 224, %v13835_v39 }
 0x4f9   : > { %16696 = vst [vmem:[#allocation68_spill] sm:$0xff] %v14079_v16 }
 0x4fb   : > { %v4708_v58 = vpop.f32.mrf.mxu2  ;;  %v4797_v56 = vpop.f32.mrf.mxu3 }
 0x4fc   : > { %v14092_v45 = vpop.f32.mrf.mxu0  ;;  %v14094_v57 = vpop.f32.mrf.mxu1  ;;  %v4709_v54 = vadd.f32 %v4708_v58, %v4343_v61  ;;  %v16709_v61 = vmov 0  ;;  %v4217_v58 = vld [vmem:[#allocation4 + $0xd7] sm:$0xff] }
 0x4fd   : > { %16703 = vst [vmem:[#allocation7_spill] sm:$0xff] %v14092_v45  ;;  %v16710_v61 = vsel %vm14105_vm15, 4294967295, %v16709_v61 }
 0x4fe   : > { %16704 = vst [vmem:[#allocation10_spill] sm:$0xff] %v14094_v57  ;;  %v4798_v18 = vadd.f32 %v4797_v56, %v4709_v54 }
 0x4ff   : > { %16711 = vst [vmem:[#allocation13_spill] sm:$0xff] %v16710_v61  ;;  %v573_v61 = vand.u32 15, %v369_v35 }
 0x501   : > { %vm14128_vm0 = vcmp.gt.s32.totalorder %v573_v61, 0 }
 0x503   : > { %v4710_v46 = vpop.f32.mrf.mxu2  ;;  %v4799_v16 = vpop.f32.mrf.mxu3 }
 0x504   : > { %v4886_v24 = vpop.f32.mrf.mxu0  ;;  %v4975_v12 = vpop.f32.mrf.mxu1  ;;  %v4711_v2 = vadd.f32 %v4710_v46, %v4216_v60  ;;  %v4345_v46 = vsel %vm14105_vm15, %v4217_v58, 0.0 }
 0x505   : > { %v4887_v53 = vadd.f32 %v4886_v24, %v4798_v18 }
 0x506   : > { %v14101_v57 = vadd.f32 %v4799_v16, %v4711_v2  ;;  %v4218_v2 = vld [vmem:[#allocation4 + $0xdf] sm:$0xff] }
 0x507   : > { %v14099_v45 = vadd.f32 %v4975_v12, %v4887_v53 }
 0x508   : > { %16706 = vst [vmem:[#allocation12_spill] sm:$0xff] %v14101_v57  ;;  %5028 = vmatmul.bf16.gmra.mxu2 %v16707_v20  ;;  %5117 = vmatmul.bf16.gmra.mxu3 %v16708_v27  ;;  %v12349_v20 = vld [vmem:[%s16162_s5 + $0x68] sm:$0xff] }
 0x509   : > { %16705 = vst [vmem:[#allocation11_spill] sm:$0xff] %v14099_v45  ;;  %6260 = vmatpush.bf16.msrb.mxu1 %v12349_v20  ;;  %v4219_v20 = vld [vmem:[#allocation4 + $0xe7] sm:$0xff] }
 0x50b   : > { %v4713_v18 = vpop.f32.mrf.mxu2  ;;  %v4802_v26 = vpop.f32.mrf.mxu3 }
 0x50c   : > { %v14109_v56 = vpop.f32.mrf.mxu0  ;;  %v14111_v54 = vpop.f32.mrf.mxu1  ;;  %v4714_v16 = vadd.f32 %v4713_v18, %v4345_v46  ;;  %v12336_v46 = vld [vmem:[%s16162_s5] sm:$0xff] }
 0x50d   : > { %16712 = vst [vmem:[#allocation14_spill] sm:$0xff] %v14109_v56  ;;  %v16716_v18 = vld [vmem:[#allocation87_spill] sm:$0xff]  ;;  %6176 = vmatpush.bf16.msrb.mxu0 %v12336_v46 }
 0x50e   : > { %16713 = vst [vmem:[#allocation16_spill] sm:$0xff] %v14111_v54  ;;  %v4803_v24 = vadd.f32 %v4802_v26, %v4714_v16  ;;  %v16717_v26 = vld [vmem:[#allocation88_spill] sm:$0xff]  ;;  %v16718_v16 = vmov 0 }
 0x50f   : > { %v16719_v16 = vsel %vm14128_vm0, 4294967295, %v16718_v16 }
 0x510   : > { %16720 = vst [vmem:[#allocation18_spill] sm:$0xff] %v16719_v16  ;;  %v16724_v16 = vld [vmem:[#allocation90_spill] sm:$0xff] }
 0x513   : > { %v4715_v27 = vpop.f32.mrf.mxu2  ;;  %v4804_v54 = vpop.f32.mrf.mxu3 }
 0x514   : > { %v4891_v12 = vpop.f32.mrf.mxu0  ;;  %v4980_v53 = vpop.f32.mrf.mxu1  ;;  %v4716_v56 = vadd.f32 %v4715_v27, %v4218_v2  ;;  %v371_v2 = vadd.s32 240, %v13835_v39 }
 0x515   : > { %v4892_v60 = vadd.f32 %v4891_v12, %v4803_v24 }
 0x516   : > { %v14121_v57 = vadd.f32 %v4804_v54, %v4716_v56  ;;  %v4347_v56 = vsel %vm14128_vm0, %v4219_v20, 0.0  ;;  %v587_v45 = vand.u32 15, %v371_v2  ;;  %v16725_v20 = vld [vmem:[#allocation91_spill] sm:$0xff] }
 0x517   : > { %v14119_v58 = vadd.f32 %v4980_v53, %v4892_v60 }
 0x518   : > { %16715 = vst [vmem:[#allocation17_spill] sm:$0xff] %v14121_v57  ;;  %5033 = vmatmul.bf16.gmra.mxu2 %v16716_v18  ;;  %5122 = vmatmul.bf16.gmra.mxu3 %v16717_v26  ;;  %v4220_v26 = vld [vmem:[#allocation4 + $0xef] sm:$0xff]  ;;  %vm14145_vm1 = vcmp.gt.s32.totalorder %v587_v45, 0  ;;  %v12348_v45 = vld [vmem:[%s16162_s5 + $0x60] sm:$0xff] }
 0x519   : > { %16714 = vst [vmem:[#allocation15_spill] sm:$0xff] %v14119_v58  ;;  %6261 = vmatpush.bf16.msrb.mxu1 %v12348_v45 }
 0x51b   : > { %v4718_v54 = vpop.f32.mrf.mxu2  ;;  %v4807_v12 = vpop.f32.mrf.mxu3 }
 0x51c   : > { %v14132_v24 = vpop.f32.mrf.mxu0  ;;  %v14134_v35 = vpop.f32.mrf.mxu1  ;;  %v4719_v53 = vadd.f32 %v4718_v54, %v4347_v56  ;;  %v16726_v56 = vmov 0  ;;  %v4221_v54 = vld [vmem:[#allocation4 + $0xf7] sm:$0xff] }
 0x51d   : > { %16721 = vst [vmem:[#allocation19_spill] sm:$0xff] %v14132_v24  ;;  %v16727_v56 = vsel %vm14145_vm1, 4294967295, %v16726_v56 }
 0x51e   : > { %16722 = vst [vmem:[#allocation20_spill] sm:$0xff] %v14134_v35  ;;  %v4808_v60 = vadd.f32 %v4807_v12, %v4719_v53 }
 0x51f   : > { %16728 = vst [vmem:[#allocation22_spill] sm:$0xff] %v16727_v56 }
 0x523   : > { %v4720_v57 = vpop.f32.mrf.mxu2  ;;  %v4809_v58 = vpop.f32.mrf.mxu3 }
 0x524   : > { %v4896_v27 = vpop.f32.mrf.mxu0  ;;  %v4985_v61 = vpop.f32.mrf.mxu1  ;;  %v4721_v46 = vadd.f32 %v4720_v57, %v4220_v26  ;;  %v4349_v57 = vsel %vm14145_vm1, %v4221_v54, 0.0  ;;  %v4222_v26 = vld [vmem:[#allocation4 + $0xff] sm:$0xff] }
 0x525   : > { %v4897_v18 = vadd.f32 %v4896_v27, %v4808_v60 }
 0x526   : > { %v14141_v35 = vadd.f32 %v4809_v58, %v4721_v46 }
 0x527   : > { %v14139_v24 = vadd.f32 %v4985_v61, %v4897_v18 }
 0x528   : > { %16723 = vst [vmem:[#allocation21_spill] sm:$0xff] %v14141_v35  ;;  %5038 = vmatmul.bf16.gmra.mxu2 %v16724_v16  ;;  %5127 = vmatmul.bf16.gmra.mxu3 %v16725_v20  ;;  %v12359_v16 = vld [vmem:[%s16162_s5 + $0xb8] sm:$0xff] }
 0x529   : > { %6347 = vmatpush.bf16.msra.mxu2 %v12359_v16  ;;  %v342_v16 = vadd.s32 8, %v13835_v39 }
 0x52b   : > { %v4723_v60 = vpop.f32.mrf.mxu2  ;;  %v4812_v2 = vpop.f32.mrf.mxu3 }
 0x52c   : > { %v14149_v12 = vpop.f32.mrf.mxu0  ;;  %v14151_v53 = vpop.f32.mrf.mxu1  ;;  %v4724_v58 = vadd.f32 %v4723_v60, %v4349_v57  ;;  %v16733_v60 = vld [vmem:[#allocation92_spill] sm:$0xff] }
 0x52d   : > { %16729 = vst [vmem:[#allocation24_spill] sm:$0xff] %v14149_v12  ;;  %v16736_v12 = vld [vmem:[#allocation9_spill] sm:$0xff] }
 0x52e   : > { %16730 = vst [vmem:[#allocation79_spill] sm:$0xff] %v14151_v53  ;;  %v4813_v27 = vadd.f32 %v4812_v2, %v4724_v58  ;;  %v16734_v2 = vld [vmem:[#allocation93_spill] sm:$0xff]  ;;  %v16735_v58 = vld [vmem:[#allocation8_spill] sm:$0xff] }
 0x52f   : > { %v14169_v35 = vor.u32 %v16736_v12, %v16735_v58  ;;  %v12346_v12 = vld [vmem:[%s16162_s5 + $0x50] sm:$0xff]  ;;  %v12345_v58 = vld [vmem:[%s16162_s5 + $0x48] sm:$0xff] }
 0x531   : > { %6177 = vmatmul.bf16.vlgmr.msrb.gmra.mxu0 %v14169_v35 }
 0x533   : > { %v4725_v46 = vpop.f32.mrf.mxu2  ;;  %v4814_v20 = vpop.f32.mrf.mxu3 }
 0x534   : > { %v4901_v61 = vpop.f32.mrf.mxu0  ;;  %v4990_v53 = vpop.f32.mrf.mxu1  ;;  %v4726_v56 = vadd.f32 %v4725_v46, %v4222_v26  ;;  %v14186_v26 = vld [vmem:[%s16161_s4] ss:$0 sm:$0xff] }
 0x535   : > { %v4902_v18 = vadd.f32 %v4901_v61, %v4813_v27  ;;  %v12391_v27 = vld [vmem:[%s16162_s5 + $0x1b8] sm:$0xff] }
 0x536   : > { %v14163_v57 = vadd.f32 %v4814_v20, %v4726_v56  ;;  %v12347_v61 = vld [vmem:[%s16162_s5 + $0x58] sm:$0xff]  ;;  %6676 = vmatpush.bf16.msra.mxu3 %v12391_v27 }
 0x537   : > { %v14161_v54 = vadd.f32 %v4990_v53, %v4902_v18  ;;  %6262 = vmatpush.bf16.msrb.mxu1 %v12347_v61  ;;  %v4223_v46 = vld [vmem:[#allocation5 + $0x9] sm:$0xff] }
 0x538   : > { %16732 = vst [vmem:[#allocation26_spill] sm:$0xff] %v14163_v57  ;;  %5043 = vmatmul.bf16.gmra.mxu2 %v16733_v60  ;;  %5132 = vmatmul.bf16.gmra.mxu3 %v16734_v2  ;;  %v384_v60 = vand.u32 15, %v342_v16  ;;  %v12399_v2 = vld [vmem:[%s16162_s5 + $0x1f8] sm:$0xff]  ;;  %v4224_v16 = vld [vmem:[#allocation5 + $0x11] sm:$0xff] }
 0x539   : > { %16731 = vst [vmem:[#allocation25_spill] sm:$0xff] %v14161_v54  ;;  %6765 = vmatpush.bf16.msra.mxu0 %v12399_v2 }
 0x53a   : > { %vm14196_vm0 = vcmp.lt.s32.totalorder %v384_v60, 15 }
 0x53b   : > { %v5004_v53 = vpop.f32.mrf.mxu2  ;;  %v5093_v45 = vpop.f32.mrf.mxu3  ;;  %6263 = vmatpush.bf16.msrb.mxu1 %v12346_v12  ;;  %v12344_v12 = vld [vmem:[%s16162_s5 + $0x40] sm:$0xff]  ;;  %v5238_v57 = vsel %vm14196_vm0, %v4224_v16, 0.0 }
 0x53c   : > { %v5005_v56 = vadd.f32 %v5004_v53, %v13859_v10 }
 0x53e   : > { %v5094_v18 = vadd.f32 %v5093_v45, %v5005_v56  ;;  %v16737_v56 = vmov 0 }
 0x53f   : > { %v16738_v56 = vsel %vm14196_vm0, 4294967295, %v16737_v56  ;;  %6264 = vmatpush.bf16.msrb.mxu1 %v12345_v58 }
 0x540   : > { %v5269_v20 = vadd.f32 %v5094_v18, %v4223_v46  ;;  %16739 = vst [vmem:[#allocation27_spill] sm:$0xff] %v16738_v56 }
 0x542   : > { %v5305_v10 = vadd.f32 %v14186_v26, %v5269_v20 }
 0x543   : > { %v5006_v27 = vpop.f32.mrf.mxu2  ;;  %v5095_v61 = vpop.f32.mrf.mxu3  ;;  %6265 = vmatpush.bf16.msrb.mxu1 %v12344_v12 }
 0x544   : > { %vm5337_vm1 = vcmp.gt.f32.partialorder %v5305_v10, 0.0  ;;  %v5369_v53 = vmul.f32 0.2, %v5305_v10  ;;  %v5007_v45 = vadd.f32 %v5006_v27, %v13871_v32  ;;  %v344_v27 = vadd.s32 24, %v13835_v39 }
 0x546   : > { %v5401_v18 = vsel %vm5337_vm1, %v5305_v10, %v5369_v53  ;;  %v5096_v46 = vadd.f32 %v5095_v61, %v5007_v45  ;;  %v4225_v45 = vld [vmem:[#allocation5 + $0x19] sm:$0xff]  ;;  %v398_v16 = vand.u32 15, %v344_v27 }
 0x547   : > { %v5433_v20 = vpack.c.bf16 %v5401_v18, %v5401_v18 }
 0x548   : > { %v5270_v54 = vadd.f32 %v5238_v57, %v5096_v46  ;;  %5048 = vmatmul.bf16.gmra.mxu2 %v13379_v17  ;;  %5137 = vmatmul.bf16.gmra.mxu3 %v13381_v63 }
 0x549   : > { %5465 = vst [vmem:[#allocation2 + $0xf8] sm:$0xf] %v5433_v20 }
 0x54a   : > { %5497 = vst [vmem:[#allocation3 + $0x4] sm:$0xf] %v5433_v20  ;;  %v5306_v32 = vadd.f32 %v14186_v26, %v5270_v54  ;;  %v12358_v54 = vld [vmem:[%s16162_s5 + $0xb0] sm:$0xff] }
 0x54b   : > { %v5009_v60 = vpop.f32.mrf.mxu2  ;;  %v5098_v2 = vpop.f32.mrf.mxu3  ;;  %6348 = vmatpush.bf16.msra.mxu2 %v12358_v54  ;;  %v346_v54 = vadd.s32 40, %v13835_v39 }
 0x54c   : > { %vm5338_vm15 = vcmp.gt.f32.partialorder %v5306_v32, 0.0  ;;  %v5370_v58 = vmul.f32 0.2, %v5306_v32  ;;  %v5010_v10 = vadd.f32 %v5009_v60, %v13874_v8  ;;  %v4226_v60 = vld [vmem:[#allocation5 + $0x21] sm:$0xff] }
 0x54e   : > { %v5402_v61 = vsel %vm5338_vm15, %v5306_v32, %v5370_v58  ;;  %v5099_v53 = vadd.f32 %v5098_v2, %v5010_v10  ;;  %vm14215_vm15 = vcmp.lt.s32.totalorder %v398_v16, 15  ;;  %v16740_v32 = vmov 0  ;;  %v12390_v16 = vld [vmem:[%s16162_s5 + $0x1b0] sm:$0xff] }
 0x54f   : > { %v5434_v57 = vpack.c.bf16 %v5402_v61, %v5402_v61  ;;  %v16741_v32 = vsel %vm14215_vm15, 4294967295, %v16740_v32  ;;  %v5240_v27 = vsel %vm14215_vm15, %v4226_v60, 0.0  ;;  %6677 = vmatpush.bf16.msra.mxu3 %v12390_v16 }
 0x550   : > { %v5271_v17 = vadd.f32 %v5099_v53, %v4225_v45  ;;  %v5531_v12 = vld [vmem:[#allocation2 + $0xf8] sm:$0xf]  ;;  %16742 = vst [vmem:[#allocation28_spill] sm:$0xff] %v16741_v32  ;;  %v16805_v32 = vld [vmem:[#allocation20_spill] sm:$0xff] }
 0x551   : > { %5466 = vst [vmem:[#allocation2 + $0x58] sm:$0xf] %v5434_v57 }
 0x552   : > { %5498 = vst [vmem:[#allocation3 + $0x1c] sm:$0xf] %v5434_v57  ;;  %v5307_v63 = vadd.f32 %v14186_v26, %v5271_v17 }
 0x553   : > { %v5011_v18 = vpop.f32.mrf.mxu2  ;;  %v5100_v46 = vpop.f32.mrf.mxu3  ;;  %5563 = vst [vmem:[#allocation3 + $0x30] sm:$0xf] %v5531_v12 }
 0x554   : > { %vm5339_vm1 = vcmp.gt.f32.partialorder %v5307_v63, 0.0  ;;  %v5371_v8 = vmul.f32 0.2, %v5307_v63  ;;  %v5012_v20 = vadd.f32 %v5011_v18, %v13889_v62  ;;  %v12288_v62 = vld [vmem:[#allocation3 + $0x4] sm:$0xf] }
 0x556   : > { %v5403_v2 = vsel %vm5339_vm1, %v5307_v63, %v5371_v8  ;;  %v5101_v58 = vadd.f32 %v5100_v46, %v5012_v20  ;;  %v4227_v20 = vld [vmem:[#allocation5 + $0x29] sm:$0xff] }
 0x557   : > { %v5435_v10 = vpack.c.bf16 %v5403_v2, %v5403_v2  ;;  %v412_v2 = vand.u32 15, %v346_v54 }
 0x558   : > { %v5272_v61 = vadd.f32 %v5240_v27, %v5101_v58  ;;  %5053 = vmatmul.bf16.gmra.mxu2 %v13393_v40  ;;  %5142 = vmatmul.bf16.gmra.mxu3 %v13395_v59  ;;  %v5532_v53 = vld [vmem:[#allocation2 + $0x58] sm:$0xf] }
 0x559   : > { %5467 = vst [vmem:[#allocation2 + $0x20] sm:$0xf] %v5435_v10  ;;  %v11068_v57 = vld [vmem:[#allocation3 + $0x18] sm:$0xf0]  ;;  %vm14239_vm14 = vcmp.lt.s32.totalorder %v412_v2, 15 }
 0x55a   : > { %5499 = vst [vmem:[#allocation3 + $0x34] sm:$0xf] %v5435_v10  ;;  %v5308_v45 = vadd.f32 %v14186_v26, %v5272_v61  ;;  %v14224_v17 = vor.u32 %v12288_v62, %v11068_v57  ;;  %v11078_v58 = vld [vmem:[#allocation3 + $0x30] sm:$0xf] }
 0x55b   : > { %v5014_v63 = vpop.f32.mrf.mxu2  ;;  %v5103_v12 = vpop.f32.mrf.mxu3  ;;  %5564 = vst [vmem:[#allocation3 + $0x48] sm:$0xf] %v5532_v53  ;;  %v12398_v57 = vld [vmem:[%s16162_s5 + $0x1f0] sm:$0xff] }
 0x55c   : > { %vm5340_vm1 = vcmp.gt.f32.partialorder %v5308_v45, 0.0  ;;  %v5372_v40 = vmul.f32 0.2, %v5308_v45  ;;  %v5015_v59 = vadd.f32 %v5014_v63, %v13898_v28  ;;  %6266 = vmatmul.bf16.vlgmr.msrb.gmra.mxu1 %v14224_v17  ;;  %v16743_v63 = vmov 0  ;;  %6766 = vmatpush.bf16.msra.mxu0 %v12398_v57  ;;  %v4229_v57 = vld [vmem:[#allocation5 + $0x39] sm:$0xff] }
 0x55d   : > { %v16744_v63 = vsel %vm14239_vm14, 4294967295, %v16743_v63 }
 0x55e   : > { %v5404_v18 = vsel %vm5340_vm1, %v5308_v45, %v5372_v40  ;;  %v5104_v46 = vadd.f32 %v5103_v12, %v5015_v59  ;;  %16745 = vst [vmem:[#allocation29_spill] sm:$0xff] %v16744_v63  ;;  %v4228_v12 = vld [vmem:[#allocation5 + $0x31] sm:$0xff] }
 0x55f   : > { %v5436_v8 = vpack.c.bf16 %v5404_v18, %v5404_v18  ;;  %v5242_v18 = vsel %vm14239_vm14, %v4228_v12, 0.0 }
 0x560   : > { %v5273_v60 = vadd.f32 %v5104_v46, %v4227_v20  ;;  %v5533_v61 = vld [vmem:[#allocation2 + $0x20] sm:$0xf] }
 0x561   : > { %5468 = vst [vmem:[#allocation2 + $0x118] sm:$0xf] %v5436_v8 }
 0x562   : > { %5500 = vst [vmem:[#allocation3 + $0x4c] sm:$0xf] %v5436_v8  ;;  %v5309_v10 = vadd.f32 %v14186_v26, %v5273_v60  ;;  %v12292_v27 = vld [vmem:[#allocation3 + $0x44] sm:$0xf0]  ;;  %v12291_v8 = vld [vmem:[#allocation3 + $0x34] sm:$0xf] }
 0x563   : > { %v5016_v53 = vpop.f32.mrf.mxu2  ;;  %v5105_v28 = vpop.f32.mrf.mxu3  ;;  %v14233_v62 = vor.u32 %v12292_v27, %v11078_v58  ;;  %5565 = vst [vmem:[#allocation3 + $0x60] sm:$0xf] %v5533_v61 }
 0x564   : > { %vm5341_vm1 = vcmp.gt.f32.partialorder %v5309_v10, 0.0  ;;  %v5373_v45 = vmul.f32 0.2, %v5309_v10  ;;  %v5017_v16 = vadd.f32 %v5016_v53, %v13910_v50 }
 0x565   : > { %6182 = vmatmul.bf16.gmra.mxu0 %v14233_v62 }
 0x566   : > { %v5405_v40 = vsel %vm5341_vm1, %v5309_v10, %v5373_v45  ;;  %v5106_v59 = vadd.f32 %v5105_v28, %v5017_v16 }
 0x567   : > { %v5437_v54 = vpack.c.bf16 %v5405_v40, %v5405_v40 }
 0x568   : > { %v5274_v46 = vadd.f32 %v5242_v18, %v5106_v59  ;;  %5058 = vmatmul.bf16.gmra.mxu2 %v13416_v44  ;;  %5147 = vmatmul.bf16.gmra.mxu3 %v13418_v52  ;;  %v5534_v50 = vld [vmem:[#allocation2 + $0x118] sm:$0xf]  ;;  %v348_v44 = vadd.s32 56, %v13835_v39 }
 0x569   : > { %5469 = vst [vmem:[#allocation2 + $0x70] sm:$0xf] %v5437_v54  ;;  %v11080_v20 = vld [vmem:[#allocation3 + $0x48] sm:$0xf0] }
 0x56a   : > { %5501 = vst [vmem:[#allocation3 + $0x64] sm:$0xf] %v5437_v54  ;;  %v5310_v60 = vadd.f32 %v14186_v26, %v5274_v46  ;;  %v14249_v2 = vor.u32 %v12291_v8, %v11080_v20  ;;  %v426_v16 = vand.u32 15, %v348_v44  ;;  %v11090_v12 = vld [vmem:[#allocation3 + $0x60] sm:$0xf] }
 0x56b   : > { %v5019_v58 = vpop.f32.mrf.mxu2  ;;  %v5108_v10 = vpop.f32.mrf.mxu3  ;;  %5566 = vst [vmem:[#allocation3 + $0x78] sm:$0xf] %v5534_v50  ;;  %v12357_v50 = vld [vmem:[%s16162_s5 + $0xa8] sm:$0xff] }
 0x56c   : > { %vm5342_vm1 = vcmp.gt.f32.partialorder %v5310_v60, 0.0  ;;  %v5374_v27 = vmul.f32 0.2, %v5310_v60  ;;  %v5020_v61 = vadd.f32 %v5019_v58, %v13913_v22  ;;  %6271 = vmatmul.bf16.gmra.mxu1 %v14249_v2  ;;  %vm14261_vm14 = vcmp.lt.s32.totalorder %v426_v16, 15  ;;  %v4230_v58 = vld [vmem:[#allocation5 + $0x41] sm:$0xff]  ;;  %6349 = vmatpush.bf16.msra.mxu2 %v12357_v50  ;;  %v12389_v16 = vld [vmem:[%s16162_s5 + $0x1a8] sm:$0xff] }
 0x56d   : > { %v5244_v44 = vsel %vm14261_vm14, %v4230_v58, 0.0  ;;  %6678 = vmatpush.bf16.msra.mxu3 %v12389_v16 }
 0x56e   : > { %v5406_v52 = vsel %vm5342_vm1, %v5310_v60, %v5374_v27  ;;  %v5109_v53 = vadd.f32 %v5108_v10, %v5020_v61  ;;  %v16746_v60 = vmov 0 }
 0x56f   : > { %v5438_v28 = vpack.c.bf16 %v5406_v52, %v5406_v52  ;;  %v16747_v60 = vsel %vm14261_vm14, 4294967295, %v16746_v60 }
 0x570   : > { %v5275_v45 = vadd.f32 %v5109_v53, %v4229_v57  ;;  %v5535_v54 = vld [vmem:[#allocation2 + $0x70] sm:$0xf]  ;;  %16748 = vst [vmem:[#allocation30_spill] sm:$0xff] %v16747_v60 }
 0x571   : > { %5470 = vst [vmem:[#allocation2 + $0x100] sm:$0xf] %v5438_v28  ;;  %v12294_v53 = vld [vmem:[#allocation3 + $0x64] sm:$0xf] }
 0x572   : > { %5502 = vst [vmem:[#allocation3 + $0x7c] sm:$0xf] %v5438_v28  ;;  %v5311_v40 = vadd.f32 %v14186_v26, %v5275_v45  ;;  %v12295_v59 = vld [vmem:[#allocation3 + $0x74] sm:$0xf0] }
 0x573   : > { %v5021_v18 = vpop.f32.mrf.mxu2  ;;  %v5110_v46 = vpop.f32.mrf.mxu3  ;;  %v14255_v22 = vor.u32 %v12295_v59, %v11090_v12  ;;  %5567 = vst [vmem:[#allocation3 + $0x90] sm:$0xf] %v5535_v54  ;;  %v350_v59 = vadd.s32 72, %v13835_v39  ;;  %v4849_v54 = vadd.f32 %v13949_v13, %v13941_v49  ;;  %v12397_v49 = vld [vmem:[%s16162_s5 + $0x1e8] sm:$0xff] }
 0x574   : > { %vm5343_vm1 = vcmp.gt.f32.partialorder %v5311_v40, 0.0  ;;  %v5375_v8 = vmul.f32 0.2, %v5311_v40  ;;  %v5022_v20 = vadd.f32 %v5021_v18, %v13928_v51  ;;  %6767 = vmatpush.bf16.msra.mxu0 %v12397_v49 }
 0x575   : > { %6187 = vmatmul.bf16.gmra.mxu0 %v14255_v22  ;;  %v440_v58 = vand.u32 15, %v350_v59 }
 0x576   : > { %v5407_v10 = vsel %vm5343_vm1, %v5311_v40, %v5375_v8  ;;  %v5111_v27 = vadd.f32 %v5110_v46, %v5022_v20  ;;  %v4231_v8 = vld [vmem:[#allocation5 + $0x49] sm:$0xff] }
 0x577   : > { %v5439_v61 = vpack.c.bf16 %v5407_v10, %v5407_v10  ;;  %vm14288_vm14 = vcmp.lt.s32.totalorder %v440_v58, 15 }
 0x578   : > { %v5276_v52 = vadd.f32 %v5244_v44, %v5111_v27  ;;  %5063 = vmatmul.bf16.gmra.mxu2 %v13430_v48  ;;  %5152 = vmatmul.bf16.gmra.mxu3 %v13432_v33  ;;  %v5536_v51 = vld [vmem:[#allocation2 + $0x100] sm:$0xf]  ;;  %v4938_v27 = vadd.f32 %v13951_v7, %v4849_v54 }
 0x579   : > { %5471 = vst [vmem:[#allocation2 + $0x108] sm:$0xf] %v5439_v61  ;;  %v11092_v28 = vld [vmem:[#allocation3 + $0x78] sm:$0xf0]  ;;  %v4232_v7 = vld [vmem:[#allocation5 + $0x51] sm:$0xff] }
 0x57a   : > { %5503 = vst [vmem:[#allocation3 + $0x94] sm:$0xf] %v5439_v61  ;;  %v5312_v57 = vadd.f32 %v14186_v26, %v5276_v52  ;;  %v14271_v45 = vor.u32 %v12294_v53, %v11092_v28  ;;  %v11102_v10 = vld [vmem:[#allocation3 + $0x90] sm:$0xf] }
 0x57b   : > { %v5024_v12 = vpop.f32.mrf.mxu2  ;;  %v5113_v40 = vpop.f32.mrf.mxu3  ;;  %5568 = vst [vmem:[#allocation3 + $0xa8] sm:$0xf] %v5536_v51 }
 0x57c   : > { %vm5344_vm1 = vcmp.gt.f32.partialorder %v5312_v57, 0.0  ;;  %v5376_v48 = vmul.f32 0.2, %v5312_v57  ;;  %v5025_v33 = vadd.f32 %v5024_v12, %v13937_v55  ;;  %6276 = vmatmul.bf16.gmra.mxu1 %v14271_v45 }
 0x57e   : > { %v5408_v18 = vsel %vm5344_vm1, %v5312_v57, %v5376_v48  ;;  %v5114_v46 = vadd.f32 %v5113_v40, %v5025_v33  ;;  %v16749_v57 = vmov 0  ;;  %v5593_v40 = vld [vmem:[#allocation2 + $0x20] sm:$0xf]  ;;  %v5246_v33 = vsel %vm14288_vm14, %v4232_v7, 0.0 }
 0x57f   : > { %v5440_v50 = vpack.c.bf16 %v5408_v18, %v5408_v18  ;;  %v16750_v57 = vsel %vm14288_vm14, 4294967295, %v16749_v57  ;;  %5625 = vst [vmem:[#allocation3 + $0x8] sm:$0xf] %v5593_v40 }
 0x580   : > { %v5277_v20 = vadd.f32 %v5114_v46, %v4231_v8  ;;  %v5537_v44 = vld [vmem:[#allocation2 + $0x108] sm:$0xf]  ;;  %16751 = vst [vmem:[#allocation32_spill] sm:$0xff] %v16750_v57 }
 0x581   : > { %5472 = vst [vmem:[#allocation2 + $0x88] sm:$0xf] %v5440_v50  ;;  %v12297_v18 = vld [vmem:[#allocation3 + $0x94] sm:$0xf] }
 0x582   : > { %5504 = vst [vmem:[#allocation3 + $0xac] sm:$0xf] %v5440_v50  ;;  %v5313_v55 = vadd.f32 %v14186_v26, %v5277_v20  ;;  %v12298_v61 = vld [vmem:[#allocation3 + $0xa4] sm:$0xf0] }
 0x583   : > { %v5026_v52 = vpop.f32.mrf.mxu2  ;;  %v5115_v51 = vpop.f32.mrf.mxu3  ;;  %v14283_v53 = vor.u32 %v12298_v61, %v11102_v10  ;;  %5569 = vst [vmem:[#allocation3 + $0xc0] sm:$0xf] %v5537_v44  ;;  %v5594_v44 = vld [vmem:[#allocation2 + $0x118] sm:$0xf] }
 0x584   : > { %vm5345_vm1 = vcmp.gt.f32.partialorder %v5313_v55, 0.0  ;;  %v5377_v13 = vmul.f32 0.2, %v5313_v55  ;;  %v5027_v28 = vadd.f32 %v5026_v52, %v4938_v27  ;;  %5626 = vst [vmem:[#allocation3 + $0x20] sm:$0xf] %v5594_v44 }
 0x585   : > { %6192 = vmatmul.bf16.gmra.mxu0 %v14283_v53 }
 0x586   : > { %v5409_v16 = vsel %vm5345_vm1, %v5313_v55, %v5377_v13  ;;  %v5116_v12 = vadd.f32 %v5115_v51, %v5027_v28  ;;  %v4233_v51 = vld [vmem:[#allocation5 + $0x59] sm:$0xff] }
 0x587   : > { %v5441_v48 = vpack.c.bf16 %v5409_v16, %v5409_v16 }
 0x588   : > { %v5278_v59 = vadd.f32 %v5246_v33, %v5116_v12  ;;  %5068 = vmatmul.bf16.gmra.mxu2 %v13456_v5  ;;  %5157 = vmatmul.bf16.gmra.mxu3 %v13458_v23  ;;  %v5538_v54 = vld [vmem:[#allocation2 + $0x88] sm:$0xf]  ;;  %v352_v5 = vadd.s32 88, %v13835_v39  ;;  %v4854_v23 = vadd.f32 %v13971_v29, %v13960_v14  ;;  %v12356_v29 = vld [vmem:[%s16162_s5 + $0xa0] sm:$0xff] }
 0x589   : > { %5473 = vst [vmem:[#allocation2 + $0xe8] sm:$0xf] %v5441_v48  ;;  %v11104_v46 = vld [vmem:[#allocation3 + $0xa8] sm:$0xf0]  ;;  %v12388_v33 = vld [vmem:[%s16162_s5 + $0x1a0] sm:$0xff]  ;;  %6350 = vmatpush.bf16.msra.mxu2 %v12356_v29 }
 0x58a   : > { %5505 = vst [vmem:[#allocation3 + $0xc4] sm:$0xf] %v5441_v48  ;;  %v5314_v50 = vadd.f32 %v14186_v26, %v5278_v59  ;;  %v14298_v8 = vor.u32 %v12297_v18, %v11104_v46  ;;  %v454_v13 = vand.u32 15, %v352_v5  ;;  %v11114_v28 = vld [vmem:[#allocation3 + $0xc0] sm:$0xf]  ;;  %v4943_v7 = vadd.f32 %v13973_v31, %v4854_v23  ;;  %v4234_v18 = vld [vmem:[#allocation5 + $0x61] sm:$0xff]  ;;  %6679 = vmatpush.bf16.msra.mxu3 %v12388_v33 }
 0x58b   : > { %v5029_v20 = vpop.f32.mrf.mxu2  ;;  %v5118_v58 = vpop.f32.mrf.mxu3  ;;  %5570 = vst [vmem:[#allocation3 + $0xd8] sm:$0xf] %v5538_v54  ;;  %v16753_v54 = vmov 0  ;;  %v12355_v46 = vld [vmem:[%s16162_s5 + $0x98] sm:$0xff]  ;;  %v12353_v29 = vld [vmem:[%s16162_s5 + $0x88] sm:$0xff]  ;;  %v4859_v33 = vadd.f32 %v13990_v47, %v13982_v43 }
 0x58c   : > { %vm5346_vm1 = vcmp.gt.f32.partialorder %v5314_v50, 0.0  ;;  %v5378_v10 = vmul.f32 0.2, %v5314_v50  ;;  %v5030_v27 = vadd.f32 %v5029_v20, %v13956_v9  ;;  %6281 = vmatmul.bf16.gmra.mxu1 %v14298_v8  ;;  %vm14315_vm14 = vcmp.lt.s32.totalorder %v454_v13, 15 }
 0x58d   : > { %v16754_v54 = vsel %vm14315_vm14, 4294967295, %v16753_v54  ;;  %v5248_v5 = vsel %vm14315_vm14, %v4234_v18, 0.0  ;;  %6351 = vmatpush.bf16.msra.mxu2 %v12355_v46  ;;  %v12385_v18 = vld [vmem:[%s16162_s5 + $0x188] sm:$0xff] }
 0x58e   : > { %v5410_v55 = vsel %vm5346_vm1, %v5314_v50, %v5378_v10  ;;  %v5119_v61 = vadd.f32 %v5118_v58, %v5030_v27  ;;  %16755 = vst [vmem:[#allocation33_spill] sm:$0xff] %v16754_v54  ;;  %v12387_v58 = vld [vmem:[%s16162_s5 + $0x198] sm:$0xff]  ;;  %v5595_v10 = vld [vmem:[#allocation2 + $0x70] sm:$0xf] }
 0x58f   : > { %v5442_v52 = vpack.c.bf16 %v5410_v55, %v5410_v55  ;;  %5627 = vst [vmem:[#allocation3 + $0x38] sm:$0xf] %v5595_v10  ;;  %v16756_v55 = vld [vmem:[#allocation94_spill] sm:$0xff]  ;;  %6680 = vmatpush.bf16.msra.mxu3 %v12387_v58 }
 0x590   : > { %v5279_v49 = vadd.f32 %v5119_v61, %v4233_v51  ;;  %v5539_v12 = vld [vmem:[#allocation2 + $0xe8] sm:$0xf] }
 0x591   : > { %5474 = vst [vmem:[#allocation2 + $0x28] sm:$0xf] %v5442_v52  ;;  %v16757_v61 = vld [vmem:[#allocation95_spill] sm:$0xff] }
 0x592   : > { %5506 = vst [vmem:[#allocation3 + $0xdc] sm:$0xf] %v5442_v52  ;;  %v5315_v9 = vadd.f32 %v14186_v26, %v5279_v49  ;;  %v12301_v16 = vld [vmem:[#allocation3 + $0xd4] sm:$0xf0]  ;;  %v12300_v52 = vld [vmem:[#allocation3 + $0xc4] sm:$0xf] }
 0x593   : > { %v5031_v40 = vpop.f32.mrf.mxu2  ;;  %v5120_v48 = vpop.f32.mrf.mxu3  ;;  %v14307_v14 = vor.u32 %v12301_v16, %v11114_v28  ;;  %5571 = vst [vmem:[#allocation3 + $0xf0] sm:$0xf] %v5539_v12  ;;  %v12354_v28 = vld [vmem:[%s16162_s5 + $0x90] sm:$0xff] }
 0x594   : > { %vm5347_vm1 = vcmp.gt.f32.partialorder %v5315_v9, 0.0  ;;  %v5379_v31 = vmul.f32 0.2, %v5315_v9  ;;  %v5032_v59 = vadd.f32 %v5031_v40, %v4943_v7  ;;  %v12386_v7 = vld [vmem:[%s16162_s5 + $0x190] sm:$0xff]  ;;  %6352 = vmatpush.bf16.msra.mxu2 %v12354_v28  ;;  %v16759_v28 = vmov 0 }
 0x595   : > { %16752 = vst [vmem:[#allocation23_spill] sm:$0xff] %v14307_v14  ;;  %6197 = vmatmul.bf16.gmra.mxu0 %v14307_v14  ;;  %6681 = vmatpush.bf16.msra.mxu3 %v12386_v7  ;;  %v4236_v7 = vld [vmem:[#allocation5 + $0x71] sm:$0xff] }
 0x596   : > { %v5411_v50 = vsel %vm5347_vm1, %v5315_v9, %v5379_v31  ;;  %v5121_v20 = vadd.f32 %v5120_v48, %v5032_v59  ;;  %v354_v48 = vadd.s32 104, %v13835_v39 }
 0x597   : > { %v5443_v27 = vpack.c.bf16 %v5411_v50, %v5411_v50  ;;  %v4235_v50 = vld [vmem:[#allocation5 + $0x69] sm:$0xff] }
 0x598   : > { %v5280_v23 = vadd.f32 %v5248_v5, %v5121_v20  ;;  %5073 = vmatmul.bf16.gmra.mxu2 %v16756_v55  ;;  %5162 = vmatmul.bf16.gmra.mxu3 %v16757_v61  ;;  %v5540_v44 = vld [vmem:[#allocation2 + $0x28] sm:$0xf]  ;;  %v468_v58 = vand.u32 15, %v354_v48 }
 0x599   : > { %5475 = vst [vmem:[#allocation2 + $0x8] sm:$0xf] %v5443_v27  ;;  %v11116_v51 = vld [vmem:[#allocation3 + $0xd8] sm:$0xf0]  ;;  %6353 = vmatpush.bf16.msra.mxu2 %v12353_v29  ;;  %6682 = vmatpush.bf16.msra.mxu3 %v12385_v18 }
 0x59a   : > { %5507 = vst [vmem:[#allocation3 + $0xf4] sm:$0xf] %v5443_v27  ;;  %v5316_v49 = vadd.f32 %v14186_v26, %v5280_v23  ;;  %v14331_v13 = vor.u32 %v12300_v52, %v11116_v51  ;;  %v11126_v10 = vld [vmem:[#allocation3 + $0xf0] sm:$0xf]  ;;  %v4948_v27 = vadd.f32 %v13992_v19, %v4859_v33  ;;  %v12352_v52 = vld [vmem:[%s16162_s5 + $0x80] sm:$0xff]  ;;  %vm14363_vm14 = vcmp.lt.s32.totalorder %v468_v58, 15 }
 0x59b   : > { %v5034_v9 = vpop.f32.mrf.mxu2  ;;  %v5123_v16 = vpop.f32.mrf.mxu3  ;;  %5572 = vst [vmem:[#allocation3 + $0x108] sm:$0xf] %v5540_v44  ;;  %v12396_v44 = vld [vmem:[%s16162_s5 + $0x1e0] sm:$0xff]  ;;  %v16760_v28 = vsel %vm14363_vm14, 4294967295, %v16759_v28  ;;  %v5250_v48 = vsel %vm14363_vm14, %v4236_v7, 0.0 }
 0x59c   : > { %vm5348_vm1 = vcmp.gt.f32.partialorder %v5316_v49, 0.0  ;;  %v5380_v12 = vmul.f32 0.2, %v5316_v49  ;;  %v5035_v40 = vadd.f32 %v5034_v9, %v13978_v30  ;;  %6286 = vmatmul.bf16.gmra.mxu1 %v14331_v13  ;;  %v5596_v30 = vld [vmem:[#allocation2 + $0x100] sm:$0xf]  ;;  %16761 = vst [vmem:[#allocation35_spill] sm:$0xff] %v16760_v28  ;;  %6768 = vmatpush.bf16.msra.mxu0 %v12396_v44 }
 0x59d   : > { %5628 = vst [vmem:[#allocation3 + $0x50] sm:$0xf] %v5596_v30  ;;  %v12384_v19 = vld [vmem:[%s16162_s5 + $0x180] sm:$0xff]  ;;  %6354 = vmatpush.bf16.msra.mxu2 %v12352_v52  ;;  %v16796_v28 = vld [vmem:[#allocation16_spill] sm:$0xff] }
 0x59e   : > { %v5412_v31 = vsel %vm5348_vm1, %v5316_v49, %v5380_v12  ;;  %v5124_v59 = vadd.f32 %v5123_v16, %v5035_v40  ;;  %6683 = vmatpush.bf16.msra.mxu3 %v12384_v19  ;;  %v5597_v12 = vld [vmem:[#allocation2 + $0x108] sm:$0xf] }
 0x59f   : > { %v5444_v46 = vpack.c.bf16 %v5412_v31, %v5412_v31  ;;  %5629 = vst [vmem:[#allocation3 + $0x68] sm:$0xf] %v5597_v12  ;;  %v16763_v12 = vmov 0 }
 0x5a0   : > { %v5281_v20 = vadd.f32 %v5124_v59, %v4235_v50  ;;  %v5541_v5 = vld [vmem:[#allocation2 + $0x8] sm:$0xf] }
 0x5a1   : > { %5476 = vst [vmem:[#allocation2 + $0x68] sm:$0xf] %v5444_v46  ;;  %v12303_v31 = vld [vmem:[#allocation3 + $0xf4] sm:$0xf] }
 0x5a2   : > { %5508 = vst [vmem:[#allocation3 + $0x10c] sm:$0xf] %v5444_v46  ;;  %v5317_v43 = vadd.f32 %v14186_v26, %v5281_v20  ;;  %v12304_v47 = vld [vmem:[#allocation3 + $0x104] sm:$0xf0] }
 0x5a3   : > { %v5036_v23 = vpop.f32.mrf.mxu2  ;;  %v5125_v55 = vpop.f32.mrf.mxu3  ;;  %v14352_v61 = vor.u32 %v12304_v47, %v11126_v10  ;;  %5573 = vst [vmem:[#allocation3 + $0x120] sm:$0xf] %v5541_v5  ;;  %v4237_v5 = vld [vmem:[#allocation5 + $0x79] sm:$0xff] }
 0x5a4   : > { %vm5349_vm1 = vcmp.gt.f32.partialorder %v5317_v43, 0.0  ;;  %v5381_v51 = vmul.f32 0.2, %v5317_v43  ;;  %v5037_v49 = vadd.f32 %v5036_v23, %v4948_v27 }
 0x5a5   : > { %16758 = vst [vmem:[#allocation34_spill] sm:$0xff] %v14352_v61  ;;  %6202 = vmatmul.bf16.gmra.mxu0 %v14352_v61 }
 0x5a6   : > { %v5413_v9 = vsel %vm5349_vm1, %v5317_v43, %v5381_v51  ;;  %v5126_v16 = vadd.f32 %v5125_v55, %v5037_v49  ;;  %v5598_v43 = vld [vmem:[#allocation2 + $0x88] sm:$0xf] }
 0x5a7   : > { %v5445_v40 = vpack.c.bf16 %v5413_v9, %v5413_v9  ;;  %5630 = vst [vmem:[#allocation3 + $0x80] sm:$0xf] %v5598_v43 }
 0x5a8   : > { %v5282_v29 = vadd.f32 %v5250_v48, %v5126_v16  ;;  %5078 = vmatmul.bf16.gmra.mxu2 %v13524_v3  ;;  %5167 = vmatmul.bf16.gmra.mxu3 %v13526_v15  ;;  %v5542_v33 = vld [vmem:[#allocation2 + $0x68] sm:$0xf]  ;;  %v356_v15 = vadd.s32 120, %v13835_v39  ;;  %v4864_v3 = vadd.f32 %v14012_v38, %v14001_v4  ;;  %v12290_v38 = vld [vmem:[#allocation3 + $0x1c] sm:$0xf0] }
 0x5a9   : > { %5477 = vst [vmem:[#allocation2 + $0x10] sm:$0xf] %v5445_v40  ;;  %v11128_v59 = vld [vmem:[#allocation3 + $0x108] sm:$0xf0] }
 0x5aa   : > { %5509 = vst [vmem:[#allocation3 + $0x124] sm:$0xf] %v5445_v40  ;;  %v5318_v18 = vadd.f32 %v14186_v26, %v5282_v29  ;;  %v14373_v30 = vor.u32 %v12303_v31, %v11128_v59  ;;  %v482_v55 = vand.u32 15, %v356_v15  ;;  %v11138_v44 = vld [vmem:[#allocation3 + $0x120] sm:$0xf]  ;;  %v4953_v52 = vadd.f32 %v14014_v11, %v4864_v3  ;;  %v4238_v40 = vld [vmem:[#allocation5 + $0x81] sm:$0xff] }
 0x5ab   : > { %v5039_v46 = vpop.f32.mrf.mxu2  ;;  %v5128_v50 = vpop.f32.mrf.mxu3  ;;  %5574 = vst [vmem:[#allocation3 + $0x138] sm:$0xf] %v5542_v33  ;;  %v11074_v11 = vld [vmem:[#allocation3 + $0x8] sm:$0xf] }
 0x5ac   : > { %vm5350_vm1 = vcmp.gt.f32.partialorder %v5318_v18, 0.0  ;;  %v5382_v20 = vmul.f32 0.2, %v5318_v18  ;;  %v5040_v58 = vadd.f32 %v5039_v46, %v13997_v34  ;;  %6291 = vmatmul.bf16.gmra.mxu1 %v14373_v30  ;;  %vm14384_vm14 = vcmp.lt.s32.totalorder %v482_v55, 15  ;;  %v5599_v31 = vld [vmem:[#allocation2 + $0xe8] sm:$0xf] }
 0x5ad   : > { %v16764_v12 = vsel %vm14384_vm14, 4294967295, %v16763_v12  ;;  %v14389_v33 = vor.u32 %v12290_v38, %v11074_v11  ;;  %5631 = vst [vmem:[#allocation3 + $0x98] sm:$0xf] %v5599_v31 }
 0x5ae   : > { %v5414_v10 = vsel %vm5350_vm1, %v5318_v18, %v5382_v20  ;;  %v5129_v27 = vadd.f32 %v5128_v50, %v5040_v58  ;;  %16765 = vst [vmem:[#allocation37_spill] sm:$0xff] %v16764_v12  ;;  %v5252_v18 = vsel %vm14384_vm14, %v4238_v40, 0.0 }
 0x5af   : > { %v5446_v47 = vpack.c.bf16 %v5414_v10, %v5414_v10  ;;  %16766 = vst [vmem:[#allocation38_spill] sm:$0xff] %v14389_v33 }
 0x5b0   : > { %v5283_v23 = vadd.f32 %v5129_v27, %v4237_v5  ;;  %v5543_v51 = vld [vmem:[#allocation2 + $0x10] sm:$0xf]  ;;  %v358_v5 = vadd.s32 136, %v13835_v39 }
 0x5b1   : > { %5478 = vst [vmem:[#allocation2 + $0xb8] sm:$0xf] %v5446_v47  ;;  %v12306_v20 = vld [vmem:[#allocation3 + $0x124] sm:$0xf] }
 0x5b2   : > { %5510 = vst [vmem:[#allocation3 + $0x13c] sm:$0xf] %v5446_v47  ;;  %v5319_v34 = vadd.f32 %v14186_v26, %v5283_v23  ;;  %v12307_v19 = vld [vmem:[#allocation3 + $0x134] sm:$0xf0]  ;;  %v4869_v23 = vadd.f32 %v14029_v36, %v14021_v21  ;;  %v12293_v36 = vld [vmem:[#allocation3 + $0x4c] sm:$0xf0] }
 0x5b3   : > { %v5041_v49 = vpop.f32.mrf.mxu2  ;;  %v5130_v7 = vpop.f32.mrf.mxu3  ;;  %v14382_v4 = vor.u32 %v12307_v19, %v11138_v44  ;;  %5575 = vst [vmem:[#allocation3 + $0x150] sm:$0xf] %v5543_v51  ;;  %v4239_v19 = vld [vmem:[#allocation5 + $0x89] sm:$0xff] }
 0x5b4   : > { %vm5351_vm1 = vcmp.gt.f32.partialorder %v5319_v34, 0.0  ;;  %v5383_v9 = vmul.f32 0.2, %v5319_v34  ;;  %v5042_v16 = vadd.f32 %v5041_v49, %v4953_v52  ;;  %v5600_v52 = vld [vmem:[#allocation2 + $0x28] sm:$0xf]  ;;  %v496_v49 = vand.u32 15, %v358_v5 }
 0x5b5   : > { %16762 = vst [vmem:[#allocation36_spill] sm:$0xff] %v14382_v4  ;;  %6207 = vmatmul.bf16.gmra.mxu0 %v14382_v4  ;;  %v4958_v38 = vadd.f32 %v14031_v0, %v4869_v23  ;;  %v16768_v0 = vmov 0 }
 0x5b6   : > { %v5415_v48 = vsel %vm5351_vm1, %v5319_v34, %v5383_v9  ;;  %v5131_v29 = vadd.f32 %v5130_v7, %v5042_v16  ;;  %5632 = vst [vmem:[#allocation3 + $0xb0] sm:$0xf] %v5600_v52  ;;  %vm14410_vm14 = vcmp.lt.s32.totalorder %v496_v49, 15  ;;  %v360_v49 = vadd.s32 152, %v13835_v39 }
 0x5b7   : > { %v5447_v59 = vpack.c.bf16 %v5415_v48, %v5415_v48  ;;  %v12395_v48 = vld [vmem:[%s16162_s5 + $0x1d8] sm:$0xff]  ;;  %v16769_v0 = vsel %vm14410_vm14, 4294967295, %v16768_v0 }
 0x5b8   : > { %v5284_v46 = vadd.f32 %v5252_v18, %v5131_v29  ;;  %6355 = vmatmul.bf16.vlgmr.msra.gmra.mxu2 %v14389_v33  ;;  %6684 = vmatmul.bf16.vlgmr.msra.gmra.mxu3 %v14169_v35  ;;  %v5544_v50 = vld [vmem:[#allocation2 + $0xb8] sm:$0xf]  ;;  %16770 = vst [vmem:[#allocation41_spill] sm:$0xff] %v16769_v0 }
 0x5b9   : > { %5479 = vst [vmem:[#allocation2 + $0x80] sm:$0xf] %v5447_v59  ;;  %v11140_v58 = vld [vmem:[#allocation3 + $0x138] sm:$0xf0]  ;;  %v11086_v18 = vld [vmem:[#allocation3 + $0x38] sm:$0xf]  ;;  %6769 = vmatpush.bf16.msra.mxu0 %v12395_v48 }
 0x5ba   : > { %5511 = vst [vmem:[#allocation3 + $0x154] sm:$0xf] %v5447_v59  ;;  %v5320_v15 = vadd.f32 %v14186_v26, %v5284_v46  ;;  %v14396_v3 = vor.u32 %v12306_v20, %v11140_v58  ;;  %v11150_v7 = vld [vmem:[#allocation3 + $0x150] sm:$0xf]  ;;  %v4240_v59 = vld [vmem:[#allocation5 + $0x91] sm:$0xff]  ;;  %v14415_v20 = vor.u32 %v12293_v36, %v11086_v18  ;;  %v510_v48 = vand.u32 15, %v360_v49 }
 0x5bb   : > { %v5044_v10 = vpop.f32.mrf.mxu2  ;;  %v5133_v27 = vpop.f32.mrf.mxu3  ;;  %5576 = vst [vmem:[#allocation3 + $0x168] sm:$0xf] %v5544_v50  ;;  %v5601_v58 = vld [vmem:[#allocation2 + $0x8] sm:$0xf] }
 0x5bc   : > { %vm5352_vm1 = vcmp.gt.f32.partialorder %v5320_v15, 0.0  ;;  %v5384_v43 = vmul.f32 0.2, %v5320_v15  ;;  %v5045_v47 = vadd.f32 %v5044_v10, %v14019_v25  ;;  %6296 = vmatmul.bf16.gmra.mxu1 %v14396_v3  ;;  %16771 = vst [vmem:[#allocation42_spill] sm:$0xff] %v14415_v20  ;;  %v5254_v10 = vsel %vm14410_vm14, %v4240_v59, 0.0 }
 0x5bd   : > { %5633 = vst [vmem:[#allocation3 + $0xc8] sm:$0xf] %v5601_v58  ;;  %v12296_v58 = vld [vmem:[#allocation3 + $0x7c] sm:$0xf0]  ;;  %vm14440_vm14 = vcmp.lt.s32.totalorder %v510_v48, 15 }
 0x5be   : > { %v5416_v55 = vsel %vm5352_vm1, %v5320_v15, %v5384_v43  ;;  %v5134_v44 = vadd.f32 %v5133_v27, %v5045_v47  ;;  %v14419_v27 = vpop.f32.mrf.mxu0 }
 0x5bf   : > { %v5448_v34 = vpack.c.bf16 %v5416_v55, %v5416_v55 }
 0x5c0   : > { %v5285_v51 = vadd.f32 %v5134_v44, %v4239_v19  ;;  %v5545_v16 = vld [vmem:[#allocation2 + $0x80] sm:$0xf] }
 0x5c1   : > { %5480 = vst [vmem:[#allocation2 + $0x90] sm:$0xf] %v5448_v34  ;;  %v12309_v5 = vld [vmem:[#allocation3 + $0x154] sm:$0xf] }
 0x5c2   : > { %5512 = vst [vmem:[#allocation3 + $0x16c] sm:$0xf] %v5448_v34  ;;  %v5321_v25 = vadd.f32 %v14186_v26, %v5285_v51  ;;  %v12310_v9 = vld [vmem:[#allocation3 + $0x164] sm:$0xf0] }
 0x5c3   : > { %v5046_v40 = vpop.f32.mrf.mxu2  ;;  %v5135_v11 = vpop.f32.mrf.mxu3  ;;  %v14405_v21 = vor.u32 %v12310_v9, %v11150_v7  ;;  %5577 = vst [vmem:[#allocation3 + $0x180] sm:$0xf] %v5545_v16  ;;  %v4874_v7 = vadd.f32 %v14052_v37, %v14041_v42  ;;  %v5602_v9 = vld [vmem:[#allocation2 + $0x68] sm:$0xf] }
 0x5c4   : > { %vm5353_vm1 = vcmp.gt.f32.partialorder %v5321_v25, 0.0  ;;  %v5385_v29 = vmul.f32 0.2, %v5321_v25  ;;  %v5047_v31 = vadd.f32 %v5046_v40, %v4958_v38  ;;  %v4241_v40 = vld [vmem:[#allocation5 + $0x99] sm:$0xff]  ;;  %5634 = vst [vmem:[#allocation3 + $0xe0] sm:$0xf] %v5602_v9 }
 0x5c5   : > { %16767 = vst [vmem:[#allocation84_spill] sm:$0xff] %v14405_v21  ;;  %6212 = vmatmul.bf16.gmra.mxu0 %v14405_v21 }
 0x5c6   : > { %v5417_v46 = vsel %vm5353_vm1, %v5321_v25, %v5385_v29  ;;  %v5136_v50 = vadd.f32 %v5135_v11, %v5047_v31  ;;  %v6178_v11 = vpop.f32.mrf.mxu0  ;;  %v14431_v29 = vpop.f32.mrf.mxu1  ;;  %v4963_v31 = vadd.f32 %v14054_v41, %v4874_v7  ;;  %v16773_v41 = vmov 0 }
 0x5c7   : > { %v5449_v15 = vpack.c.bf16 %v5417_v46, %v5417_v46  ;;  %v16774_v41 = vsel %vm14440_vm14, 4294967295, %v16773_v41 }
 0x5c8   : > { %v5286_v43 = vadd.f32 %v5254_v10, %v5136_v50  ;;  %6360 = vmatmul.bf16.gmra.mxu2 %v14415_v20  ;;  %6689 = vmatmul.bf16.gmra.mxu3 %v14233_v62  ;;  %v5546_v47 = vld [vmem:[#allocation2 + $0x90] sm:$0xf]  ;;  %16775 = vst [vmem:[#allocation44_spill] sm:$0xff] %v16774_v41 }
 0x5c9   : > { %5481 = vst [vmem:[#allocation2 + $0x60] sm:$0xf] %v5449_v15  ;;  %v11152_v23 = vld [vmem:[#allocation3 + $0x168] sm:$0xf0] }
 0x5ca   : > { %5513 = vst [vmem:[#allocation3 + $0x184] sm:$0xf] %v5449_v15  ;;  %v5322_v55 = vadd.f32 %v14186_v26, %v5286_v43  ;;  %v14424_v44 = vor.u32 %v12309_v5, %v11152_v23  ;;  %v12407_v15 = vld [vmem:[%s16162_s5 + $0x238] sm:$0xff]  ;;  %v11098_v5 = vld [vmem:[#allocation3 + $0x68] sm:$0xf] }
 0x5cb   : > { %v5049_v52 = vpop.f32.mrf.mxu2  ;;  %v5138_v34 = vpop.f32.mrf.mxu3  ;;  %5578 = vst [vmem:[#allocation3 + $0x198] sm:$0xf] %v5546_v47  ;;  %v4242_v47 = vld [vmem:[#allocation5 + $0xa1] sm:$0xff]  ;;  %6854 = vmatpush.bf16.msra.mxu1 %v12407_v15 }
 0x5cc   : > { %vm5354_vm1 = vcmp.gt.f32.partialorder %v5322_v55, 0.0  ;;  %v5386_v19 = vmul.f32 0.2, %v5322_v55  ;;  %v5050_v51 = vadd.f32 %v5049_v52, %v14039_v1  ;;  %6301 = vmatmul.bf16.gmra.mxu1 %v14424_v44  ;;  %v11162_v1 = vld [vmem:[#allocation3 + $0x180] sm:$0xf]  ;;  %v14445_v52 = vor.u32 %v12296_v58, %v11098_v5 }
 0x5ce   : > { %v5418_v38 = vsel %vm5354_vm1, %v5322_v55, %v5386_v19  ;;  %v5139_v25 = vadd.f32 %v5138_v34, %v5050_v51  ;;  %16776 = vst [vmem:[#allocation45_spill] sm:$0xff] %v14445_v52  ;;  %v5603_v34 = vld [vmem:[#allocation2 + $0x10] sm:$0xf]  ;;  %v5256_v51 = vsel %vm14440_vm14, %v4242_v47, 0.0 }
 0x5cf   : > { %v5450_v16 = vpack.c.bf16 %v5418_v38, %v5418_v38  ;;  %5635 = vst [vmem:[#allocation3 + $0xf8] sm:$0xf] %v5603_v34  ;;  %v16779_v34 = vld [vmem:[#allocation67_spill] sm:$0xff] }
 0x5d0   : > { %v5287_v36 = vadd.f32 %v5139_v25, %v4241_v40  ;;  %v5547_v42 = vld [vmem:[#allocation2 + $0x60] sm:$0xf] }
 0x5d1   : > { %5482 = vst [vmem:[#allocation2 + $0x48] sm:$0xf] %v5450_v16  ;;  %v12312_v25 = vld [vmem:[#allocation3 + $0x184] sm:$0xf] }
 0x5d2   : > { %5514 = vst [vmem:[#allocation3 + $0x19c] sm:$0xf] %v5450_v16  ;;  %v5323_v59 = vadd.f32 %v14186_v26, %v5287_v36  ;;  %v12313_v18 = vld [vmem:[#allocation3 + $0x194] sm:$0xf0]  ;;  %v6180_v16 = vpop.f32.mrf.mxu0 }
 0x5d3   : > { %v5051_v37 = vpop.f32.mrf.mxu2  ;;  %v5140_v46 = vpop.f32.mrf.mxu3  ;;  %v14435_v50 = vor.u32 %v12313_v18, %v11162_v1  ;;  %5579 = vst [vmem:[#allocation3 + $0x1b0] sm:$0xf] %v5547_v42  ;;  %v362_v42 = vadd.s32 168, %v13835_v39 }
 0x5d4   : > { %vm5355_vm1 = vcmp.gt.f32.partialorder %v5323_v59, 0.0  ;;  %v5387_v10 = vmul.f32 0.2, %v5323_v59  ;;  %v5052_v43 = vadd.f32 %v5051_v37, %v4963_v31  ;;  %v16777_v37 = vld [vmem:[#allocation60_spill] sm:$0xff] }
 0x5d5   : > { %16772 = vst [vmem:[#allocation43_spill] sm:$0xff] %v14435_v50  ;;  %6217 = vmatmul.bf16.gmra.mxu0 %v14435_v50  ;;  %v524_v5 = vand.u32 15, %v362_v42 }
 0x5d6   : > { %v5419_v23 = vsel %vm5355_vm1, %v5323_v59, %v5387_v10  ;;  %v5141_v55 = vadd.f32 %v5140_v46, %v5052_v43  ;;  %v16778_v46 = vld [vmem:[#allocation64_spill] sm:$0xff]  ;;  %v4243_v43 = vld [vmem:[#allocation5 + $0xa9] sm:$0xff] }
 0x5d7   : > { %v5451_v19 = vpack.c.bf16 %v5419_v23, %v5419_v23  ;;  %v4879_v58 = vadd.f32 %v16778_v46, %v16777_v37  ;;  %vm14475_vm14 = vcmp.lt.s32.totalorder %v524_v5, 15  ;;  %v16781_v37 = vmov 0  ;;  %v11110_v46 = vld [vmem:[#allocation3 + $0x98] sm:$0xf] }
 0x5d8   : > { %v5288_v49 = vadd.f32 %v5256_v51, %v5141_v55  ;;  %6365 = vmatmul.bf16.gmra.mxu2 %v14445_v52  ;;  %6694 = vmatmul.bf16.gmra.mxu3 %v14255_v22  ;;  %v5548_v7 = vld [vmem:[#allocation2 + $0x48] sm:$0xf]  ;;  %v16782_v37 = vsel %vm14475_vm14, 4294967295, %v16781_v37 }
 0x5d9   : > { %5483 = vst [vmem:[#allocation2 + $0xd0] sm:$0xf] %v5451_v19  ;;  %v6267_v38 = vpop.f32.mrf.mxu1  ;;  %v11164_v9 = vld [vmem:[#allocation3 + $0x198] sm:$0xf0] }
 0x5da   : > { %5515 = vst [vmem:[#allocation3 + $0x1b4] sm:$0xf] %v5451_v19  ;;  %v5324_v40 = vadd.f32 %v14186_v26, %v5288_v49  ;;  %v14452_v36 = vadd.f32 %v6267_v38, %v6178_v11  ;;  %v14454_v48 = vor.u32 %v12312_v25, %v11164_v9  ;;  %v5604_v11 = vld [vmem:[#allocation2 + $0xb8] sm:$0xf]  ;;  %v11174_v55 = vld [vmem:[#allocation3 + $0x1b0] sm:$0xf] }
 0x5db   : > { %v5054_v1 = vpop.f32.mrf.mxu2  ;;  %v5143_v31 = vpop.f32.mrf.mxu3  ;;  %5580 = vst [vmem:[#allocation3 + $0x1c8] sm:$0xf] %v5548_v7  ;;  %v14465_v19 = vld [vmem:[%s16161_s4] ss:$0 sm:$0xff] }
 0x5dc   : > { %vm5356_vm1 = vcmp.gt.f32.partialorder %v5324_v40, 0.0  ;;  %v5388_v59 = vmul.f32 0.2, %v5324_v40  ;;  %v5055_v18 = vadd.f32 %v5054_v1, %v14059_v6  ;;  %6306 = vmatmul.bf16.gmra.mxu1 %v14454_v48  ;;  %5636 = vst [vmem:[#allocation3 + $0x110] sm:$0xf] %v5604_v11  ;;  %v4968_v6 = vadd.f32 %v16779_v34, %v4879_v58 }
 0x5dd   : > { %16783 = vst [vmem:[#allocation49_spill] sm:$0xff] %v16782_v37  ;;  %v5605_v11 = vld [vmem:[#allocation2 + $0x80] sm:$0xf] }
 0x5de   : > { %v5420_v15 = vsel %vm5356_vm1, %v5324_v40, %v5388_v59  ;;  %v5144_v26 = vadd.f32 %v5143_v31, %v5055_v18  ;;  %v12299_v31 = vld [vmem:[#allocation3 + $0xac] sm:$0xf0]  ;;  %5637 = vst [vmem:[#allocation3 + $0x128] sm:$0xf] %v5605_v11 }
 0x5df   : > { %v5452_v10 = vpack.c.bf16 %v5420_v15, %v5420_v15  ;;  %v12394_v59 = vld [vmem:[%s16162_s5 + $0x1d0] sm:$0xff] }
 0x5e0   : > { %v5289_v47 = vadd.f32 %v5144_v26, %v4243_v43  ;;  %v5549_v25 = vld [vmem:[#allocation2 + $0xd0] sm:$0xf]  ;;  %v14480_v26 = vor.u32 %v12299_v31, %v11110_v46  ;;  %6770 = vmatpush.bf16.msra.mxu0 %v12394_v59  ;;  %v16787_v46 = vld [vmem:[#allocation7_spill] sm:$0xff] }
 0x5e1   : > { %5484 = vst [vmem:[#allocation2 + $0x50] sm:$0xf] %v5452_v10  ;;  %v6269_v23 = vpop.f32.mrf.mxu1  ;;  %v16785_v59 = vld [vmem:[#allocation68_spill] sm:$0xff] }
 0x5e2   : > { %5516 = vst [vmem:[#allocation3 + $0x1cc] sm:$0xf] %v5452_v10  ;;  %v5325_v51 = vadd.f32 %v14465_v19, %v5289_v47  ;;  %v6183_v49 = vpop.f32.mrf.mxu0  ;;  %v14468_v7 = vadd.f32 %v6269_v23, %v6180_v16  ;;  %v12316_v38 = vld [vmem:[#allocation3 + $0x1c4] sm:$0xf0] }
 0x5e3   : > { %v5056_v9 = vpop.f32.mrf.mxu2  ;;  %v5145_v40 = vpop.f32.mrf.mxu3  ;;  %v14470_v1 = vor.u32 %v12316_v38, %v11174_v55  ;;  %5581 = vst [vmem:[#allocation3 + $0x1e0] sm:$0xf] %v5549_v25  ;;  %v4244_v16 = vld [vmem:[#allocation5 + $0xb1] sm:$0xff]  ;;  %v12315_v55 = vld [vmem:[#allocation3 + $0x1b4] sm:$0xf] }
 0x5e4   : > { %vm5357_vm1 = vcmp.gt.f32.partialorder %v5325_v51, 0.0  ;;  %v5389_v18 = vmul.f32 0.2, %v5325_v51  ;;  %v5057_v42 = vadd.f32 %v5056_v9, %v4968_v6  ;;  %16784 = vst [vmem:[#allocation50_spill] sm:$0xff] %v14480_v26  ;;  %v5258_v43 = vsel %vm14475_vm14, %v4244_v16, 0.0  ;;  %v16786_v16 = vld [vmem:[#allocation71_spill] sm:$0xff] }
 0x5e5   : > { %16780 = vst [vmem:[#allocation46_spill] sm:$0xff] %v14470_v1  ;;  %6222 = vmatmul.bf16.gmra.mxu0 %v14470_v1 }
 0x5e6   : > { %v5421_v58 = vsel %vm5357_vm1, %v5325_v51, %v5389_v18  ;;  %v5146_v15 = vadd.f32 %v5145_v40, %v5057_v42  ;;  %v364_v42 = vadd.s32 184, %v13835_v39 }
 0x5e7   : > { %v5453_v10 = vpack.c.bf16 %v5421_v58, %v5421_v58  ;;  %v4884_v58 = vadd.f32 %v16787_v46, %v16786_v16  ;;  %v12302_v46 = vld [vmem:[#allocation3 + $0xdc] sm:$0xf0] }
 0x5e8   : > { %v5290_v47 = vadd.f32 %v5258_v43, %v5146_v15  ;;  %6370 = vmatmul.bf16.gmra.mxu2 %v14480_v26  ;;  %6699 = vmatmul.bf16.gmra.mxu3 %v14283_v53  ;;  %v5550_v5 = vld [vmem:[#allocation2 + $0x50] sm:$0xf] }
 0x5e9   : > { %5485 = vst [vmem:[#allocation2 + $0x98] sm:$0xf] %v5453_v10  ;;  %v6272_v23 = vpop.f32.mrf.mxu1  ;;  %v11176_v34 = vld [vmem:[#allocation3 + $0x1c8] sm:$0xf0] }
 0x5ea   : > { %5517 = vst [vmem:[#allocation3 + $0x1e4] sm:$0xf] %v5453_v10  ;;  %v5326_v6 = vadd.f32 %v14465_v19, %v5290_v47  ;;  %v6185_v51 = vpop.f32.mrf.mxu0  ;;  %v14487_v38 = vadd.f32 %v6272_v23, %v6183_v49  ;;  %v14489_v25 = vor.u32 %v12315_v55, %v11176_v34  ;;  %v5606_v49 = vld [vmem:[#allocation2 + $0x90] sm:$0xf]  ;;  %v538_v23 = vand.u32 15, %v364_v42  ;;  %v16788_v34 = vld [vmem:[#allocation10_spill] sm:$0xff] }
 0x5eb   : > { %v5059_v9 = vpop.f32.mrf.mxu2  ;;  %v5148_v40 = vpop.f32.mrf.mxu3  ;;  %5582 = vst [vmem:[#allocation3 + $0x1f8] sm:$0xf] %v5550_v5  ;;  %v4245_v43 = vld [vmem:[#allocation5 + $0xb9] sm:$0xff]  ;;  %v11186_v55 = vld [vmem:[#allocation3 + $0x1e0] sm:$0xf] }
 0x5ec   : > { %vm5358_vm1 = vcmp.gt.f32.partialorder %v5326_v6, 0.0  ;;  %v5390_v31 = vmul.f32 0.2, %v5326_v6  ;;  %v5060_v18 = vadd.f32 %v5059_v9, %v16785_v59  ;;  %6311 = vmatmul.bf16.gmra.mxu1 %v14489_v25  ;;  %5638 = vst [vmem:[#allocation3 + $0x140] sm:$0xf] %v5606_v49  ;;  %v4973_v9 = vadd.f32 %v16788_v34, %v4884_v58  ;;  %v12406_v42 = vld [vmem:[%s16162_s5 + $0x230] sm:$0xff] }
 0x5ed   : > { %vm14505_vm14 = vcmp.lt.s32.totalorder %v538_v23, 15  ;;  %v11122_v49 = vld [vmem:[#allocation3 + $0xc8] sm:$0xf]  ;;  %6855 = vmatpush.bf16.msra.mxu1 %v12406_v42 }
 0x5ee   : > { %v5422_v15 = vsel %vm5358_vm1, %v5326_v6, %v5390_v31  ;;  %v5149_v11 = vadd.f32 %v5148_v40, %v5060_v18 }
 0x5ef   : > { %v5454_v10 = vpack.c.bf16 %v5422_v15, %v5422_v15 }
 0x5f0   : > { %v5291_v47 = vadd.f32 %v5149_v11, %v4245_v43  ;;  %v5551_v6 = vld [vmem:[#allocation2 + $0x98] sm:$0xf]  ;;  %v16790_v11 = vmov 0 }
 0x5f1   : > { %5486 = vst [vmem:[#allocation2 + $0x78] sm:$0xf] %v5454_v10  ;;  %v6274_v5 = vpop.f32.mrf.mxu1  ;;  %v16791_v11 = vsel %vm14505_vm14, 4294967295, %v16790_v11 }
 0x5f2   : > { %5518 = vst [vmem:[#allocation3 + $0x1fc] sm:$0xf] %v5454_v10  ;;  %v5327_v59 = vadd.f32 %v14465_v19, %v5291_v47  ;;  %v6188_v37 = vpop.f32.mrf.mxu0  ;;  %v14498_v41 = vadd.f32 %v6274_v5, %v6185_v51  ;;  %v12319_v16 = vld [vmem:[#allocation3 + $0x1f4] sm:$0xf0]  ;;  %v14510_v47 = vor.u32 %v12302_v46, %v11122_v49  ;;  %v5607_v5 = vld [vmem:[#allocation2 + $0x60] sm:$0xf] }
 0x5f3   : > { %v5061_v40 = vpop.f32.mrf.mxu2  ;;  %v5150_v31 = vpop.f32.mrf.mxu3  ;;  %v14500_v18 = vor.u32 %v12319_v16, %v11186_v55  ;;  %5583 = vst [vmem:[#allocation3 + $0x210] sm:$0xf] %v5551_v6  ;;  %v4246_v51 = vld [vmem:[#allocation5 + $0xc1] sm:$0xff]  ;;  %v12318_v6 = vld [vmem:[#allocation3 + $0x1e4] sm:$0xf] }
 0x5f4   : > { %vm5359_vm1 = vcmp.gt.f32.partialorder %v5327_v59, 0.0  ;;  %v5391_v58 = vmul.f32 0.2, %v5327_v59  ;;  %v5062_v15 = vadd.f32 %v5061_v40, %v4973_v9  ;;  %16792 = vst [vmem:[#allocation54_spill] sm:$0xff] %v16791_v11  ;;  %v5260_v34 = vsel %vm14505_vm14, %v4246_v51, 0.0  ;;  %v16793_v49 = vld [vmem:[#allocation11_spill] sm:$0xff] }
 0x5f5   : > { %16789 = vst [vmem:[#allocation53_spill] sm:$0xff] %v14500_v18  ;;  %6227 = vmatmul.bf16.gmra.mxu0 %v14500_v18 }
 0x5f6   : > { %v5423_v10 = vsel %vm5359_vm1, %v5327_v59, %v5391_v58  ;;  %v5151_v43 = vadd.f32 %v5150_v31, %v5062_v15  ;;  %5639 = vst [vmem:[#allocation3 + $0x158] sm:$0xf] %v5607_v5  ;;  %v16794_v5 = vld [vmem:[#allocation12_spill] sm:$0xff] }
 0x5f7   : > { %v5455_v55 = vpack.c.bf16 %v5423_v10, %v5423_v10 }
 0x5f8   : > { %v5292_v9 = vadd.f32 %v5260_v34, %v5151_v43  ;;  %6375 = vmatmul.bf16.gmra.mxu2 %v14510_v47  ;;  %6704 = vmatmul.bf16.gmra.mxu3 %v14307_v14  ;;  %v5552_v23 = vld [vmem:[#allocation2 + $0x78] sm:$0xf]  ;;  %v366_v43 = vadd.s32 200, %v13835_v39 }
 0x5f9   : > { %5487 = vst [vmem:[#allocation2 + $0xc8] sm:$0xf] %v5455_v55  ;;  %v6277_v16 = vpop.f32.mrf.mxu1  ;;  %v11188_v40 = vld [vmem:[#allocation3 + $0x1f8] sm:$0xf0] }
 0x5fa   : > { %5519 = vst [vmem:[#allocation3 + $0x214] sm:$0xf] %v5455_v55  ;;  %v5328_v59 = vadd.f32 %v14465_v19, %v5292_v9  ;;  %v6190_v31 = vpop.f32.mrf.mxu0  ;;  %v14517_v46 = vadd.f32 %v6277_v16, %v6188_v37  ;;  %v14519_v42 = vor.u32 %v12318_v6, %v11188_v40  ;;  %v16795_v55 = vld [vmem:[#allocation14_spill] sm:$0xff]  ;;  %v5608_v37 = vld [vmem:[#allocation2 + $0x48] sm:$0xf]  ;;  %v552_v0 = vand.u32 15, %v366_v43 }
 0x5fb   : > { %v5064_v58 = vpop.f32.mrf.mxu2  ;;  %v5153_v15 = vpop.f32.mrf.mxu3  ;;  %5584 = vst [vmem:[#allocation3 + $0x228] sm:$0xf] %v5552_v23  ;;  %v4889_v34 = vadd.f32 %v16795_v55, %v16794_v5  ;;  %v4247_v6 = vld [vmem:[#allocation5 + $0xc9] sm:$0xff]  ;;  %v11198_v12 = vld [vmem:[#allocation3 + $0x210] sm:$0xf] }
 0x5fc   : > { %vm5360_vm1 = vcmp.gt.f32.partialorder %v5328_v59, 0.0  ;;  %v5392_v51 = vmul.f32 0.2, %v5328_v59  ;;  %v5065_v10 = vadd.f32 %v5064_v58, %v16793_v49  ;;  %6316 = vmatmul.bf16.gmra.mxu1 %v14519_v42  ;;  %5640 = vst [vmem:[#allocation3 + $0x170] sm:$0xf] %v5608_v37  ;;  %vm14535_vm14 = vcmp.lt.s32.totalorder %v552_v0, 15 }
 0x5fd   : > { %v4978_v58 = vadd.f32 %v16796_v28, %v4889_v34  ;;  %v12305_v55 = vld [vmem:[#allocation3 + $0x10c] sm:$0xf0]  ;;  %v16798_v34 = vmov 0 }
 0x5fe   : > { %v5424_v9 = vsel %vm5360_vm1, %v5328_v59, %v5392_v51  ;;  %v5154_v11 = vadd.f32 %v5153_v15, %v5065_v10  ;;  %v16799_v34 = vsel %vm14535_vm14, 4294967295, %v16798_v34 }
 0x5ff   : > { %v5456_v16 = vpack.c.bf16 %v5424_v9, %v5424_v9  ;;  %16800 = vst [vmem:[#allocation58_spill] sm:$0xff] %v16799_v34  ;;  %v11134_v9 = vld [vmem:[#allocation3 + $0xf8] sm:$0xf] }
 0x600   : > { %v5293_v40 = vadd.f32 %v5154_v11, %v4247_v6  ;;  %v5553_v59 = vld [vmem:[#allocation2 + $0xc8] sm:$0xf]  ;;  %v5609_v6 = vld [vmem:[#allocation2 + $0xd0] sm:$0xf] }
 0x601   : > { %5488 = vst [vmem:[#allocation2 + $0xb0] sm:$0xf] %v5456_v16  ;;  %v6279_v23 = vpop.f32.mrf.mxu1  ;;  %v12393_v11 = vld [vmem:[%s16162_s5 + $0x1c8] sm:$0xff] }
 0x602   : > { %5520 = vst [vmem:[#allocation3 + $0x22c] sm:$0xf] %v5456_v16  ;;  %v5329_v49 = vadd.f32 %v14465_v19, %v5293_v40  ;;  %v6193_v54 = vpop.f32.mrf.mxu0  ;;  %v14528_v57 = vadd.f32 %v6279_v23, %v6190_v31  ;;  %v12322_v5 = vld [vmem:[#allocation3 + $0x224] sm:$0xf0]  ;;  %v14540_v16 = vor.u32 %v12305_v55, %v11134_v9  ;;  %6771 = vmatpush.bf16.msra.mxu0 %v12393_v11 }
 0x603   : > { %v5066_v15 = vpop.f32.mrf.mxu2  ;;  %v5155_v51 = vpop.f32.mrf.mxu3  ;;  %v14530_v10 = vor.u32 %v12322_v5, %v11198_v12  ;;  %5585 = vst [vmem:[#allocation3 + $0x240] sm:$0xf] %v5553_v59  ;;  %v4248_v31 = vld [vmem:[#allocation5 + $0xd1] sm:$0xff]  ;;  %v12321_v59 = vld [vmem:[#allocation3 + $0x214] sm:$0xf] }
 0x604   : > { %vm5361_vm1 = vcmp.gt.f32.partialorder %v5329_v49, 0.0  ;;  %v5393_v28 = vmul.f32 0.2, %v5329_v49  ;;  %v5067_v43 = vadd.f32 %v5066_v15, %v4978_v58  ;;  %v5262_v23 = vsel %vm14535_vm14, %v4248_v31, 0.0  ;;  %5641 = vst [vmem:[#allocation3 + $0x188] sm:$0xf] %v5609_v6 }
 0x605   : > { %16797 = vst [vmem:[#allocation57_spill] sm:$0xff] %v14530_v10  ;;  %6232 = vmatmul.bf16.gmra.mxu0 %v14530_v10  ;;  %v16802_v9 = vld [vmem:[#allocation15_spill] sm:$0xff]  ;;  %v16803_v6 = vld [vmem:[#allocation17_spill] sm:$0xff] }
 0x606   : > { %v5425_v37 = vsel %vm5361_vm1, %v5329_v49, %v5393_v28  ;;  %v5156_v12 = vadd.f32 %v5155_v51, %v5067_v43 }
 0x607   : > { %v5457_v40 = vpack.c.bf16 %v5425_v37, %v5425_v37 }
 0x608   : > { %v5294_v58 = vadd.f32 %v5262_v23, %v5156_v12  ;;  %6380 = vmatmul.bf16.gmra.mxu2 %v14540_v16  ;;  %6709 = vmatmul.bf16.gmra.mxu3 %v14352_v61  ;;  %v5554_v0 = vld [vmem:[#allocation2 + $0xb0] sm:$0xf]  ;;  %v368_v12 = vadd.s32 216, %v13835_v39 }
 0x609   : > { %5489 = vst [vmem:[#allocation2 + $0x40] sm:$0xf] %v5457_v40  ;;  %v6282_v5 = vpop.f32.mrf.mxu1  ;;  %v11200_v49 = vld [vmem:[#allocation3 + $0x228] sm:$0xf0] }
 0x60a   : > { %5521 = vst [vmem:[#allocation3 + $0x244] sm:$0xf] %v5457_v40  ;;  %v5330_v15 = vadd.f32 %v14465_v19, %v5294_v58  ;;  %v6195_v51 = vpop.f32.mrf.mxu0  ;;  %v14547_v55 = vadd.f32 %v6282_v5, %v6193_v54  ;;  %v14549_v11 = vor.u32 %v12321_v59, %v11200_v49  ;;  %v16804_v40 = vld [vmem:[#allocation19_spill] sm:$0xff]  ;;  %v5610_v54 = vld [vmem:[#allocation2 + $0x50] sm:$0xf]  ;;  %v566_v60 = vand.u32 15, %v368_v12 }
 0x60b   : > { %v5069_v28 = vpop.f32.mrf.mxu2  ;;  %v5158_v43 = vpop.f32.mrf.mxu3  ;;  %5586 = vst [vmem:[#allocation3 + $0x258] sm:$0xf] %v5554_v0  ;;  %v4894_v23 = vadd.f32 %v16804_v40, %v16803_v6  ;;  %v4249_v59 = vld [vmem:[#allocation5 + $0xd9] sm:$0xff]  ;;  %v11210_v63 = vld [vmem:[#allocation3 + $0x240] sm:$0xf] }
 0x60c   : > { %16801 = vst [vmem:[#allocation61_spill] sm:$0xff] %v14549_v11  ;;  %vm5362_vm1 = vcmp.gt.f32.partialorder %v5330_v15, 0.0  ;;  %v5394_v31 = vmul.f32 0.2, %v5330_v15  ;;  %v5070_v37 = vadd.f32 %v5069_v28, %v16802_v9  ;;  %6321 = vmatmul.bf16.gmra.mxu1 %v14549_v11  ;;  %v12308_v40 = vld [vmem:[#allocation3 + $0x13c] sm:$0xf0] }
 0x60d   : > { %5642 = vst [vmem:[#allocation3 + $0x1a0] sm:$0xf] %v5610_v54  ;;  %v4983_v28 = vadd.f32 %v16805_v32, %v4894_v23  ;;  %vm14565_vm14 = vcmp.lt.s32.totalorder %v566_v60, 15  ;;  %v16807_v23 = vmov 0  ;;  %v16813_v11 = vld [vmem:[#allocation79_spill] sm:$0xff] }
 0x60e   : > { %v5426_v58 = vsel %vm5362_vm1, %v5330_v15, %v5394_v31  ;;  %v5159_v34 = vadd.f32 %v5158_v43, %v5070_v37  ;;  %v16808_v23 = vsel %vm14565_vm14, 4294967295, %v16807_v23 }
 0x60f   : > { %v5458_v5 = vpack.c.bf16 %v5426_v58, %v5426_v58  ;;  %16809 = vst [vmem:[#allocation65_spill] sm:$0xff] %v16808_v23  ;;  %v11146_v58 = vld [vmem:[#allocation3 + $0x128] sm:$0xf] }
 0x610   : > { %v5295_v49 = vadd.f32 %v5159_v34, %v4249_v59  ;;  %v5555_v15 = vld [vmem:[#allocation2 + $0x40] sm:$0xf]  ;;  %v12405_v34 = vld [vmem:[%s16162_s5 + $0x228] sm:$0xff]  ;;  %v5611_v59 = vld [vmem:[#allocation2 + $0x98] sm:$0xf] }
 0x611   : > { %5490 = vst [vmem:[#allocation2 + $0xe0] sm:$0xf] %v5458_v5  ;;  %v6284_v0 = vpop.f32.mrf.mxu1  ;;  %6856 = vmatpush.bf16.msra.mxu1 %v12405_v34 }
 0x612   : > { %5522 = vst [vmem:[#allocation3 + $0x25c] sm:$0xf] %v5458_v5  ;;  %v5331_v9 = vadd.f32 %v14465_v19, %v5295_v49  ;;  %v6198_v56 = vpop.f32.mrf.mxu0  ;;  %v14558_v61 = vadd.f32 %v6284_v0, %v6195_v51  ;;  %v12325_v6 = vld [vmem:[#allocation3 + $0x254] sm:$0xf0]  ;;  %v14570_v5 = vor.u32 %v12308_v40, %v11146_v58 }
 0x613   : > { %v5071_v43 = vpop.f32.mrf.mxu2  ;;  %v5160_v31 = vpop.f32.mrf.mxu3  ;;  %v14560_v37 = vor.u32 %v12325_v6, %v11210_v63  ;;  %5587 = vst [vmem:[#allocation3 + $0x270] sm:$0xf] %v5555_v15  ;;  %v4250_v51 = vld [vmem:[#allocation5 + $0xe1] sm:$0xff]  ;;  %v12324_v15 = vld [vmem:[#allocation3 + $0x244] sm:$0xf] }
 0x614   : > { %vm5363_vm1 = vcmp.gt.f32.partialorder %v5331_v9, 0.0  ;;  %v5395_v32 = vmul.f32 0.2, %v5331_v9  ;;  %v5072_v12 = vadd.f32 %v5071_v43, %v4983_v28  ;;  %v5264_v0 = vsel %vm14565_vm14, %v4250_v51, 0.0  ;;  %5643 = vst [vmem:[#allocation3 + $0x1b8] sm:$0xf] %v5611_v59 }
 0x615   : > { %16806 = vst [vmem:[#allocation62_spill] sm:$0xff] %v14560_v37  ;;  %6237 = vmatmul.bf16.gmra.mxu0 %v14560_v37  ;;  %v16812_v59 = vld [vmem:[#allocation24_spill] sm:$0xff] }
 0x616   : > { %v5427_v63 = vsel %vm5363_vm1, %v5331_v9, %v5395_v32  ;;  %v5161_v54 = vadd.f32 %v5160_v31, %v5072_v12 }
 0x617   : > { %v5459_v49 = vpack.c.bf16 %v5427_v63, %v5427_v63  ;;  %v370_v63 = vadd.s32 232, %v13835_v39 }
 0x618   : > { %v5296_v28 = vadd.f32 %v5264_v0, %v5161_v54  ;;  %6385 = vmatmul.bf16.gmra.mxu2 %v14570_v5  ;;  %6714 = vmatmul.bf16.gmra.mxu3 %v14382_v4  ;;  %v5556_v60 = vld [vmem:[#allocation2 + $0xe0] sm:$0xf]  ;;  %v16811_v54 = vld [vmem:[#allocation21_spill] sm:$0xff] }
 0x619   : > { %5491 = vst [vmem:[#allocation2 + $0xa8] sm:$0xf] %v5459_v49  ;;  %v6287_v6 = vpop.f32.mrf.mxu1  ;;  %v11212_v43 = vld [vmem:[#allocation3 + $0x258] sm:$0xf0]  ;;  %v580_v23 = vand.u32 15, %v370_v63  ;;  %v12392_v63 = vld [vmem:[%s16162_s5 + $0x1c0] sm:$0xff] }
 0x61a   : > { %5523 = vst [vmem:[#allocation3 + $0x274] sm:$0xf] %v5459_v49  ;;  %v5332_v9 = vadd.f32 %v14465_v19, %v5296_v28  ;;  %v6200_v31 = vpop.f32.mrf.mxu0  ;;  %v14577_v40 = vadd.f32 %v6287_v6, %v6198_v56  ;;  %v14579_v34 = vor.u32 %v12324_v15, %v11212_v43  ;;  %v4899_v49 = vadd.f32 %v16812_v59, %v16811_v54  ;;  %v5612_v56 = vld [vmem:[#allocation2 + $0x78] sm:$0xf]  ;;  %v11222_v4 = vld [vmem:[#allocation3 + $0x270] sm:$0xf] }
 0x61b   : > { %v5074_v32 = vpop.f32.mrf.mxu2  ;;  %v5163_v12 = vpop.f32.mrf.mxu3  ;;  %5588 = vst [vmem:[#allocation3 + $0x288] sm:$0xf] %v5556_v60  ;;  %v4251_v15 = vld [vmem:[#allocation5 + $0xe9] sm:$0xff]  ;;  %v12311_v59 = vld [vmem:[#allocation3 + $0x16c] sm:$0xf0]  ;;  %vm14595_vm14 = vcmp.lt.s32.totalorder %v580_v23, 15  ;;  %6772 = vmatpush.bf16.msra.mxu0 %v12392_v63 }
 0x61c   : > { %16810 = vst [vmem:[#allocation66_spill] sm:$0xff] %v14579_v34  ;;  %vm5364_vm1 = vcmp.gt.f32.partialorder %v5332_v9, 0.0  ;;  %v5396_v51 = vmul.f32 0.2, %v5332_v9  ;;  %v5075_v58 = vadd.f32 %v5074_v32, %v14139_v24  ;;  %6326 = vmatmul.bf16.gmra.mxu1 %v14579_v34  ;;  %v4988_v24 = vadd.f32 %v16813_v11, %v4899_v49 }
 0x61d   : > { %5644 = vst [vmem:[#allocation3 + $0x1d0] sm:$0xf] %v5612_v56 }
 0x61e   : > { %v5428_v0 = vsel %vm5364_vm1, %v5332_v9, %v5396_v51  ;;  %v5164_v28 = vadd.f32 %v5163_v12, %v5075_v58 }
 0x61f   : > { %v5460_v6 = vpack.c.bf16 %v5428_v0, %v5428_v0  ;;  %v16815_v0 = vmov 0 }
 0x620   : > { %v5297_v43 = vadd.f32 %v5164_v28, %v4251_v15  ;;  %v5557_v9 = vld [vmem:[#allocation2 + $0xa8] sm:$0xf]  ;;  %v16816_v0 = vsel %vm14595_vm14, 4294967295, %v16815_v0  ;;  %v11158_v28 = vld [vmem:[#allocation3 + $0x158] sm:$0xf]  ;;  %v12404_v15 = vld [vmem:[%s16162_s5 + $0x220] sm:$0xff] }
 0x621   : > { %5492 = vst [vmem:[#allocation2 + $0x18] sm:$0xf] %v5460_v6  ;;  %v6289_v60 = vpop.f32.mrf.mxu1  ;;  %6857 = vmatpush.bf16.msra.mxu1 %v12404_v15  ;;  %v372_v15 = vadd.s32 248, %v13835_v39 }
 0x622   : > { %5524 = vst [vmem:[#allocation3 + $0x28c] sm:$0xf] %v5460_v6  ;;  %v5333_v32 = vadd.f32 %v14465_v19, %v5297_v43  ;;  %v6203_v34 = vpop.f32.mrf.mxu0  ;;  %v14588_v14 = vadd.f32 %v6289_v60, %v6200_v31  ;;  %v12328_v54 = vld [vmem:[#allocation3 + $0x284] sm:$0xf0]  ;;  %v14600_v6 = vor.u32 %v12311_v59, %v11158_v28 }
 0x623   : > { %v5076_v12 = vpop.f32.mrf.mxu2  ;;  %v5165_v51 = vpop.f32.mrf.mxu3  ;;  %v14590_v58 = vor.u32 %v12328_v54, %v11222_v4  ;;  %5589 = vst [vmem:[#allocation3 + $0x2a0] sm:$0xf] %v5557_v9  ;;  %v4252_v31 = vld [vmem:[#allocation5 + $0xf1] sm:$0xff]  ;;  %v12327_v9 = vld [vmem:[#allocation3 + $0x274] sm:$0xf]  ;;  %v594_v39 = vand.u32 15, %v372_v15 }
 0x624   : > { %vm5365_vm1 = vcmp.gt.f32.partialorder %v5333_v32, 0.0  ;;  %v5397_v11 = vmul.f32 0.2, %v5333_v32  ;;  %v5077_v49 = vadd.f32 %v5076_v12, %v4988_v24  ;;  %16817 = vst [vmem:[#allocation70_spill] sm:$0xff] %v16816_v0  ;;  %v5613_v43 = vld [vmem:[#allocation2 + $0xc8] sm:$0xf] }
 0x625   : > { %16814 = vst [vmem:[#allocation69_spill] sm:$0xff] %v14590_v58  ;;  %6242 = vmatmul.bf16.gmra.mxu0 %v14590_v58  ;;  %v5266_v23 = vsel %vm14595_vm14, %v4252_v31, 0.0  ;;  %vm14637_vm14 = vcmp.lt.s32.totalorder %v594_v39, 15  ;;  %v12401_v39 = vld [vmem:[%s16162_s5 + $0x208] sm:$0xff] }
 0x626   : > { %v5429_v56 = vsel %vm5365_vm1, %v5333_v32, %v5397_v11  ;;  %v5166_v4 = vadd.f32 %v5165_v51, %v5077_v49  ;;  %5645 = vst [vmem:[#allocation3 + $0x1e8] sm:$0xf] %v5613_v43  ;;  %v12367_v49 = vld [vmem:[%s16162_s5 + $0xf8] sm:$0xff] }
 0x627   : > { %v5461_v60 = vpack.c.bf16 %v5429_v56, %v5429_v56  ;;  %7247 = vmatpush.bf16.msrb.mxu2 %v12367_v49 }
 0x628   : > { %v5298_v24 = vadd.f32 %v5266_v23, %v5166_v4  ;;  %6390 = vmatmul.bf16.gmra.mxu2 %v14600_v6  ;;  %6719 = vmatmul.bf16.gmra.mxu3 %v14405_v21  ;;  %v5558_v32 = vld [vmem:[#allocation2 + $0x18] sm:$0xf] }
 0x629   : > { %5493 = vst [vmem:[#allocation2 + $0xf0] sm:$0xf] %v5461_v60  ;;  %v6292_v54 = vpop.f32.mrf.mxu1  ;;  %v11224_v12 = vld [vmem:[#allocation3 + $0x288] sm:$0xf0]  ;;  %v16819_v4 = vld [vmem:[#allocation25_spill] sm:$0xff] }
 0x62a   : > { %5525 = vst [vmem:[#allocation3 + $0x2a4] sm:$0xf] %v5461_v60  ;;  %v5334_v51 = vadd.f32 %v14465_v19, %v5298_v24  ;;  %v6205_v59 = vpop.f32.mrf.mxu0  ;;  %v14610_v63 = vadd.f32 %v6292_v54, %v6203_v34  ;;  %v14612_v11 = vor.u32 %v12327_v9, %v11224_v12  ;;  %v16820_v34 = vld [vmem:[#allocation26_spill] sm:$0xff]  ;;  %v5614_v9 = vld [vmem:[#allocation2 + $0xb0] sm:$0xf] }
 0x62b   : > { %v5079_v31 = vpop.f32.mrf.mxu2  ;;  %v5168_v28 = vpop.f32.mrf.mxu3  ;;  %5590 = vst [vmem:[#allocation3 + $0x2b8] sm:$0xf] %v5558_v32  ;;  %v4904_v60 = vadd.f32 %v14419_v27, %v16820_v34  ;;  %v12375_v54 = vld [vmem:[%s16162_s5 + $0x138] sm:$0xff] }
 0x62c   : > { %16818 = vst [vmem:[#allocation73_spill] sm:$0xff] %v14612_v11  ;;  %vm5366_vm1 = vcmp.gt.f32.partialorder %v5334_v51, 0.0  ;;  %v5398_v56 = vmul.f32 0.2, %v5334_v51  ;;  %v5080_v43 = vadd.f32 %v5079_v31, %v16819_v4  ;;  %6331 = vmatmul.bf16.gmra.mxu1 %v14612_v11  ;;  %v12403_v32 = vld [vmem:[%s16162_s5 + $0x218] sm:$0xff]  ;;  %v4253_v31 = vld [vmem:[#allocation5 + $0xf9] sm:$0xff]  ;;  %7336 = vmatpush.bf16.msrb.mxu3 %v12375_v54 }
 0x62d   : > { %5646 = vst [vmem:[#allocation3 + $0x200] sm:$0xf] %v5614_v9  ;;  %6858 = vmatpush.bf16.msra.mxu1 %v12403_v32  ;;  %v12314_v32 = vld [vmem:[#allocation3 + $0x19c] sm:$0xf0] }
 0x62e   : > { %v5430_v23 = vsel %vm5366_vm1, %v5334_v51, %v5398_v56  ;;  %v5169_v24 = vadd.f32 %v5168_v28, %v5080_v43  ;;  %v11234_v51 = vld [vmem:[#allocation3 + $0x2a0] sm:$0xf]  ;;  %v4993_v28 = vadd.f32 %v14431_v29, %v4904_v60  ;;  %v16822_v60 = vmov 0 }
 0x62f   : > { %v5462_v12 = vpack.c.bf16 %v5430_v23, %v5430_v23  ;;  %v12402_v23 = vld [vmem:[%s16162_s5 + $0x210] sm:$0xff]  ;;  %v16823_v60 = vsel %vm14637_vm14, 4294967295, %v16822_v60 }
 0x630   : > { %v5299_v4 = vadd.f32 %v5169_v24, %v4253_v31  ;;  %v5559_v49 = vld [vmem:[#allocation2 + $0xf0] sm:$0xf]  ;;  %16824 = vst [vmem:[#allocation75_spill] sm:$0xff] %v16823_v60 }
 0x631   : > { %5494 = vst [vmem:[#allocation2] sm:$0xf] %v5462_v12  ;;  %v6294_v27 = vpop.f32.mrf.mxu1  ;;  %6859 = vmatpush.bf16.msra.mxu1 %v12402_v23 }
 0x632   : > { %5526 = vst [vmem:[#allocation3 + $0x2bc] sm:$0xf] %v5462_v12  ;;  %v5335_v56 = vadd.f32 %v14465_v19, %v5299_v4  ;;  %v6208_v43 = vpop.f32.mrf.mxu0  ;;  %v14630_v34 = vadd.f32 %v6294_v27, %v6205_v59  ;;  %v12331_v0 = vld [vmem:[#allocation3 + $0x2b4] sm:$0xf0]  ;;  %v11170_v12 = vld [vmem:[#allocation3 + $0x188] sm:$0xf] }
 0x633   : > { %v5081_v15 = vpop.f32.mrf.mxu2  ;;  %v5170_v24 = vpop.f32.mrf.mxu3  ;;  %v14635_v54 = vor.u32 %v12331_v0, %v11234_v51  ;;  %5591 = vst [vmem:[#allocation3 + $0x2d0] sm:$0xf] %v5559_v49  ;;  %v4254_v59 = vld [vmem:[#allocation5 + $0x101] sm:$0xff]  ;;  %v14642_v27 = vor.u32 %v12314_v32, %v11170_v12 }
 0x634   : > { %vm5367_vm1 = vcmp.gt.f32.partialorder %v5335_v56, 0.0  ;;  %v5399_v9 = vmul.f32 0.2, %v5335_v56  ;;  %v5082_v29 = vadd.f32 %v5081_v15, %v4993_v28  ;;  %v12383_v0 = vld [vmem:[%s16162_s5 + $0x178] sm:$0xff]  ;;  %v5268_v51 = vsel %vm14637_vm14, %v4254_v59, 0.0 }
 0x635   : > { %16821 = vst [vmem:[#allocation74_spill] sm:$0xff] %v14635_v54  ;;  %6247 = vmatmul.bf16.gmra.mxu0 %v14635_v54  ;;  %v5615_v28 = vld [vmem:[#allocation2 + $0x40] sm:$0xf]  ;;  %6860 = vmatpush.bf16.msra.mxu1 %v12401_v39 }
 0x636   : > { %v5431_v31 = vsel %vm5367_vm1, %v5335_v56, %v5399_v9  ;;  %v5171_v4 = vadd.f32 %v5170_v24, %v5082_v29  ;;  %5647 = vst [vmem:[#allocation3 + $0x218] sm:$0xf] %v5615_v28  ;;  %v12330_v24 = vld [vmem:[#allocation3 + $0x2a4] sm:$0xf]  ;;  %7425 = vmatpush.bf16.msrb.mxu0 %v12383_v0 }
 0x637   : > { %v5463_v49 = vpack.c.bf16 %v5431_v31, %v5431_v31  ;;  %v12400_v31 = vld [vmem:[%s16162_s5 + $0x200] sm:$0xff] }
 0x638   : > { %v5300_v23 = vadd.f32 %v5268_v51, %v5171_v4  ;;  %6395 = vmatmul.bf16.gmra.mxu2 %v14642_v27  ;;  %6724 = vmatmul.bf16.gmra.mxu3 %v14435_v50  ;;  %v5560_v56 = vld [vmem:[#allocation2] sm:$0xf] }
 0x639   : > { %5495 = vst [vmem:[#allocation2 + $0x30] sm:$0xf] %v5463_v49  ;;  %v6297_v15 = vpop.f32.mrf.mxu1  ;;  %v11236_v32 = vld [vmem:[#allocation3 + $0x2b8] sm:$0xf0]  ;;  %6861 = vmatpush.bf16.msra.mxu1 %v12400_v31  ;;  %v11182_v31 = vld [vmem:[#allocation3 + $0x1b8] sm:$0xf] }
 0x63a   : > { %5527 = vst [vmem:[#allocation3 + $0x2d4] sm:$0xf] %v5463_v49  ;;  %v5336_v9 = vadd.f32 %v14465_v19, %v5300_v23  ;;  %v6210_v29 = vpop.f32.mrf.mxu0  ;;  %v14655_v12 = vadd.f32 %v6297_v15, %v6208_v43  ;;  %v14657_v59 = vor.u32 %v12330_v24, %v11236_v32  ;;  %v5616_v43 = vld [vmem:[#allocation2 + $0xe0] sm:$0xf]  ;;  %v11246_v24 = vld [vmem:[#allocation3 + $0x2d0] sm:$0xf] }
 0x63b   : > { %v6356_v4 = vpop.f32.mrf.mxu2  ;;  %v14662_v51 = vpop.f32.mrf.mxu3  ;;  %5592 = vst [vmem:[#allocation3 + $0x2e8] sm:$0xf] %v5560_v56 }
 0x63c   : > { %16825 = vst [vmem:[#allocation76_spill] sm:$0xff] %v14657_v59  ;;  %vm5368_vm1 = vcmp.gt.f32.partialorder %v5336_v9, 0.0  ;;  %v5400_v28 = vmul.f32 0.2, %v5336_v9  ;;  %6336 = vmatmul.bf16.gmra.mxu1 %v14657_v59  ;;  %v6357_v0 = vadd.f32 %v6356_v4, %v14452_v36  ;;  %v12317_v36 = vld [vmem:[#allocation3 + $0x1cc] sm:$0xf0] }
 0x63d   : > { %5648 = vst [vmem:[#allocation3 + $0x230] sm:$0xf] %v5616_v43  ;;  %v14674_v4 = vor.u32 %v12317_v36, %v11182_v31  ;;  %v5618_v36 = vld [vmem:[#allocation2 + $0x18] sm:$0xf] }
 0x63e   : > { %v5432_v19 = vsel %vm5368_vm1, %v5336_v9, %v5400_v28  ;;  %6943 = vst [vmem:[#allocation4 + $0x8] sm:$0xff] %v6357_v0  ;;  %v5617_v28 = vld [vmem:[#allocation2 + $0xa8] sm:$0xf] }
 0x63f   : > { %v5464_v39 = vpack.c.bf16 %v5432_v19, %v5432_v19  ;;  %5649 = vst [vmem:[#allocation3 + $0x248] sm:$0xf] %v5617_v28 }
 0x640   : > { %5650 = vst [vmem:[#allocation3 + $0x260] sm:$0xf] %v5618_v36 }
 0x641   : > { %5496 = vst [vmem:[#allocation2 + $0xd8] sm:$0xf] %v5464_v39  ;;  %v6299_v49 = vpop.f32.mrf.mxu1  ;;  %v12333_v0 = vld [vmem:[#allocation3 + $0x2d4] sm:$0xf] }
 0x642   : > { %5528 = vst [vmem:[#allocation3 + $0x2ec] sm:$0xf] %v5464_v39  ;;  %v6213_v23 = vpop.f32.mrf.mxu0  ;;  %v14666_v15 = vadd.f32 %v6299_v49, %v6210_v29  ;;  %v12334_v56 = vld [vmem:[#allocation3 + $0x2e4] sm:$0xf0] }
 0x643   : > { %v14668_v32 = vor.u32 %v12334_v56, %v11246_v24  ;;  %v6358_v60 = vpop.f32.mrf.mxu2  ;;  %v14670_v50 = vpop.f32.mrf.mxu3 }
 0x644   : > { %v6359_v9 = vadd.f32 %v6358_v60, %v14468_v7  ;;  %v12366_v7 = vld [vmem:[%s16162_s5 + $0xf0] sm:$0xff] }
 0x645   : > { %6252 = vmatmul.bf16.gmra.mxu0 %v14668_v32  ;;  %7248 = vmatpush.bf16.msrb.mxu2 %v12366_v7 }
 0x646   : > { %6944 = vst [vmem:[#allocation4 + $0x10] sm:$0xff] %v6359_v9 }
 0x647   : > { %v12326_v59 = vld [vmem:[#allocation3 + $0x25c] sm:$0xf0] }
 0x648   : > { %6400 = vmatmul.bf16.gmra.mxu2 %v14674_v4  ;;  %6729 = vmatmul.bf16.gmra.mxu3 %v14470_v1 }
 0x649   : > { %v6302_v29 = vpop.f32.mrf.mxu1  ;;  %v11248_v19 = vld [vmem:[#allocation3 + $0x2e8] sm:$0xf0] }
 0x64a   : > { %v6215_v43 = vpop.f32.mrf.mxu0  ;;  %v14678_v39 = vadd.f32 %v6302_v29, %v6213_v23  ;;  %v14680_v49 = vor.u32 %v12333_v0, %v11248_v19  ;;  %v12374_v23 = vld [vmem:[%s16162_s5 + $0x130] sm:$0xff]  ;;  %v12320_v19 = vld [vmem:[#allocation3 + $0x1fc] sm:$0xf0] }
 0x64b   : > { %v6361_v60 = vpop.f32.mrf.mxu2  ;;  %v14685_v24 = vpop.f32.mrf.mxu3  ;;  %7337 = vmatpush.bf16.msrb.mxu3 %v12374_v23 }
 0x64c   : > { %16826 = vst [vmem:[#allocation77_spill] sm:$0xff] %v14680_v49  ;;  %6341 = vmatmul.bf16.gmra.mxu1 %v14680_v49  ;;  %v6362_v56 = vadd.f32 %v6361_v60, %v14487_v38  ;;  %v11194_v38 = vld [vmem:[#allocation3 + $0x1e8] sm:$0xf]  ;;  %v12382_v60 = vld [vmem:[%s16162_s5 + $0x170] sm:$0xff] }
 0x64d   : > { %v14698_v7 = vor.u32 %v12320_v19, %v11194_v38  ;;  %7426 = vmatpush.bf16.msrb.mxu0 %v12382_v60  ;;  %v12323_v60 = vld [vmem:[#allocation3 + $0x22c] sm:$0xf0] }
 0x64e   : > { %6945 = vst [vmem:[#allocation4 + $0x18] sm:$0xff] %v6362_v56  ;;  %v5619_v56 = vld [vmem:[#allocation2 + $0xf0] sm:$0xf] }
 0x64f   : > { %5651 = vst [vmem:[#allocation3 + $0x278] sm:$0xf] %v5619_v56 }
 0x651   : > { %v6304_v9 = vpop.f32.mrf.mxu1 }
 0x652   : > { %v6218_v31 = vpop.f32.mrf.mxu0  ;;  %v14692_v28 = vadd.f32 %v6304_v9, %v6215_v43 }
 0x653   : > { %v6363_v29 = vpop.f32.mrf.mxu2  ;;  %v14694_v0 = vpop.f32.mrf.mxu3 }
 0x654   : > { %v6364_v1 = vadd.f32 %v6363_v29, %v14498_v41  ;;  %v5620_v29 = vld [vmem:[#allocation2] sm:$0xf] }
 0x655   : > { %6773 = vmatmul.bf16.vlgmr.msra.gmra.mxu0 %v14224_v17  ;;  %5652 = vst [vmem:[#allocation3 + $0x290] sm:$0xf] %v5620_v29 }
 0x656   : > { %6946 = vst [vmem:[#allocation4 + $0x20] sm:$0xff] %v6364_v1 }
 0x658   : > { %6405 = vmatmul.bf16.gmra.mxu2 %v14698_v7  ;;  %6734 = vmatmul.bf16.gmra.mxu3 %v14500_v18 }
 0x659   : > { %v6307_v43 = vpop.f32.mrf.mxu1 }
 0x65a   : > { %v6220_v23 = vpop.f32.mrf.mxu0  ;;  %v14705_v41 = vadd.f32 %v6307_v43, %v6218_v31  ;;  %v11206_v43 = vld [vmem:[#allocation3 + $0x218] sm:$0xf] }
 0x65b   : > { %v6366_v36 = vpop.f32.mrf.mxu2  ;;  %v14707_v9 = vpop.f32.mrf.mxu3 }
 0x65c   : > { %v6367_v1 = vadd.f32 %v6366_v36, %v14517_v46  ;;  %6862 = vmatmul.bf16.vlgmr.msra.gmra.mxu1 %v14389_v33  ;;  %v14717_v46 = vor.u32 %v12323_v60, %v11206_v43  ;;  %v5621_v36 = vld [vmem:[#allocation2 + $0x30] sm:$0xf]  ;;  %v5622_v43 = vld [vmem:[#allocation2 + $0xd8] sm:$0xf] }
 0x65d   : > { %5653 = vst [vmem:[#allocation3 + $0x2a8] sm:$0xf] %v5621_v36 }
 0x65e   : > { %6947 = vst [vmem:[#allocation4 + $0x28] sm:$0xff] %v6367_v1 }
 0x65f   : > { %5654 = vst [vmem:[#allocation3 + $0x2c0] sm:$0xf] %v5622_v43 }
 0x661   : > { %v6309_v19 = vpop.f32.mrf.mxu1 }
 0x662   : > { %v6223_v38 = vpop.f32.mrf.mxu0  ;;  %v14711_v56 = vadd.f32 %v6309_v19, %v6220_v23 }
 0x663   : > { %v6368_v18 = vpop.f32.mrf.mxu2  ;;  %v14713_v49 = vpop.f32.mrf.mxu3 }
 0x664   : > { %v6369_v31 = vadd.f32 %v6368_v18, %v14528_v57  ;;  %v12365_v57 = vld [vmem:[%s16162_s5 + $0xe8] sm:$0xff] }
 0x665   : > { %6778 = vmatmul.bf16.gmra.mxu0 %v14249_v2  ;;  %7249 = vmatpush.bf16.msrb.mxu2 %v12365_v57  ;;  %v11218_v57 = vld [vmem:[#allocation3 + $0x248] sm:$0xf] }
 0x666   : > { %6948 = vst [vmem:[#allocation4 + $0x30] sm:$0xff] %v6369_v31  ;;  %v12373_v31 = vld [vmem:[%s16162_s5 + $0x128] sm:$0xff] }
 0x667   : > { %7338 = vmatpush.bf16.msrb.mxu3 %v12373_v31 }
 0x668   : > { %6410 = vmatmul.bf16.gmra.mxu2 %v14717_v46  ;;  %6739 = vmatmul.bf16.gmra.mxu3 %v14530_v10 }
 0x669   : > { %v6312_v23 = vpop.f32.mrf.mxu1 }
 0x66a   : > { %v6225_v1 = vpop.f32.mrf.mxu0  ;;  %v14721_v29 = vadd.f32 %v6312_v23, %v6223_v38 }
 0x66b   : > { %v6371_v18 = vpop.f32.mrf.mxu2  ;;  %v14726_v19 = vpop.f32.mrf.mxu3 }
 0x66c   : > { %v6372_v60 = vadd.f32 %v6371_v18, %v14547_v55  ;;  %6867 = vmatmul.bf16.gmra.mxu1 %v14415_v20  ;;  %v14739_v18 = vor.u32 %v12326_v59, %v11218_v57 }
 0x66e   : > { %6949 = vst [vmem:[#allocation4 + $0x38] sm:$0xff] %v6372_v60  ;;  %v12381_v60 = vld [vmem:[%s16162_s5 + $0x168] sm:$0xff] }
 0x66f   : > { %7427 = vmatpush.bf16.msrb.mxu0 %v12381_v60 }
 0x671   : > { %v6314_v38 = vpop.f32.mrf.mxu1 }
 0x672   : > { %v6228_v36 = vpop.f32.mrf.mxu0  ;;  %v14733_v23 = vadd.f32 %v6314_v38, %v6225_v1 }
 0x673   : > { %v6373_v10 = vpop.f32.mrf.mxu2  ;;  %v14735_v33 = vpop.f32.mrf.mxu3 }
 0x674   : > { %v6374_v55 = vadd.f32 %v6373_v10, %v14558_v61 }
 0x675   : > { %6783 = vmatmul.bf16.gmra.mxu0 %v14271_v45 }
 0x676   : > { %6950 = vst [vmem:[#allocation4 + $0x40] sm:$0xff] %v6374_v55 }
 0x678   : > { %6415 = vmatmul.bf16.gmra.mxu2 %v14739_v18  ;;  %6744 = vmatmul.bf16.gmra.mxu3 %v14560_v37  ;;  %v12329_v37 = vld [vmem:[#allocation3 + $0x28c] sm:$0xf0] }
 0x679   : > { %v6317_v1 = vpop.f32.mrf.mxu1 }
 0x67a   : > { %v6230_v31 = vpop.f32.mrf.mxu0  ;;  %v14746_v43 = vadd.f32 %v6317_v1, %v6228_v36  ;;  %v11230_v36 = vld [vmem:[#allocation3 + $0x278] sm:$0xf] }
 0x67b   : > { %v6376_v61 = vpop.f32.mrf.mxu2  ;;  %v14748_v10 = vpop.f32.mrf.mxu3  ;;  %v14758_v1 = vor.u32 %v12329_v37, %v11230_v36  ;;  %v11254_v37 = vld [vmem:[#allocation3 + $0x2d8] sm:$0xf] }
 0x67c   : > { %v6377_v38 = vadd.f32 %v6376_v61, %v14577_v40  ;;  %6872 = vmatmul.bf16.gmra.mxu1 %v14445_v52  ;;  %v12364_v40 = vld [vmem:[%s16162_s5 + $0xe0] sm:$0xff]  ;;  %v7901_v52 = vld [vmem:[#allocation2 + $0x38] sm:$0xf] }
 0x67d   : > { %16827 = vst [vmem:[#allocation78_spill] sm:$0xff] %v14758_v1  ;;  %7250 = vmatpush.bf16.msrb.mxu2 %v12364_v40  ;;  %v12371_v40 = vld [vmem:[%s16162_s5 + $0x118] sm:$0xff] }
 0x67e   : > { %6951 = vst [vmem:[#allocation4 + $0x48] sm:$0xff] %v6377_v38  ;;  %v12335_v38 = vld [vmem:[#allocation3 + $0x2ec] sm:$0xf0] }
 0x67f   : > { %7933 = vst [vmem:[#allocation3 + $0x2f0] sm:$0xf] %v7901_v52  ;;  %v12361_v52 = vld [vmem:[%s16162_s5 + $0xc8] sm:$0xff] }
 0x681   : > { %v6319_v59 = vpop.f32.mrf.mxu1 }
 0x682   : > { %v6233_v55 = vpop.f32.mrf.mxu0  ;;  %v14752_v57 = vadd.f32 %v6319_v59, %v6230_v31  ;;  %v12372_v31 = vld [vmem:[%s16162_s5 + $0x120] sm:$0xff]  ;;  %v7900_v59 = vld [vmem:[#allocation2 + $0x110] sm:$0xf] }
 0x683   : > { %v6378_v20 = vpop.f32.mrf.mxu2  ;;  %v14754_v21 = vpop.f32.mrf.mxu3  ;;  %7339 = vmatpush.bf16.msrb.mxu3 %v12372_v31  ;;  %7932 = vst [vmem:[#allocation3 + $0x2d8] sm:$0xf] %v7900_v59 }
 0x684   : > { %v6379_v60 = vadd.f32 %v6378_v20, %v14588_v14 }
 0x685   : > { %6788 = vmatmul.bf16.gmra.mxu0 %v14298_v8 }
 0x686   : > { %6952 = vst [vmem:[#allocation4 + $0x50] sm:$0xff] %v6379_v60 }
 0x687   : > { %7340 = vmatpush.bf16.msrb.mxu3 %v12371_v40  ;;  %v12332_v40 = vld [vmem:[#allocation3 + $0x2bc] sm:$0xf0] }
 0x688   : > { %6420 = vmatmul.bf16.gmra.mxu2 %v14758_v1  ;;  %6749 = vmatmul.bf16.gmra.mxu3 %v14590_v58  ;;  %v12363_v1 = vld [vmem:[%s16162_s5 + $0xd8] sm:$0xff] }
 0x689   : > { %v6322_v61 = vpop.f32.mrf.mxu1  ;;  %7251 = vmatpush.bf16.msrb.mxu2 %v12363_v1 }
 0x68a   : > { %v6235_v14 = vpop.f32.mrf.mxu0  ;;  %v14768_v20 = vadd.f32 %v6322_v61, %v6233_v55  ;;  %v12362_v55 = vld [vmem:[%s16162_s5 + $0xd0] sm:$0xff] }
 0x68b   : > { %v6381_v60 = vpop.f32.mrf.mxu2  ;;  %v14770_v36 = vpop.f32.mrf.mxu3  ;;  %v12370_v61 = vld [vmem:[%s16162_s5 + $0x110] sm:$0xff] }
 0x68c   : > { %16828 = vst [vmem:[#allocation80_spill] sm:$0xff] %v14770_v36  ;;  %v6382_v31 = vadd.f32 %v6381_v60, %v14610_v63  ;;  %6877 = vmatmul.bf16.gmra.mxu1 %v14480_v26  ;;  %7341 = vmatpush.bf16.msrb.mxu3 %v12370_v61  ;;  %v12369_v63 = vld [vmem:[%s16162_s5 + $0x108] sm:$0xff]  ;;  %v12380_v61 = vld [vmem:[%s16162_s5 + $0x160] sm:$0xff] }
 0x68d   : > { %7252 = vmatpush.bf16.msrb.mxu2 %v12362_v55  ;;  %v11242_v55 = vld [vmem:[#allocation3 + $0x2a8] sm:$0xf]  ;;  %7428 = vmatpush.bf16.msrb.mxu0 %v12380_v61 }
 0x68e   : > { %6953 = vst [vmem:[#allocation4 + $0x58] sm:$0xff] %v6382_v31 }
 0x690   : > { %7342 = vmatpush.bf16.msrb.mxu3 %v12369_v63 }
 0x691   : > { %v6324_v59 = vpop.f32.mrf.mxu1  ;;  %7253 = vmatpush.bf16.msrb.mxu2 %v12361_v52 }
 0x692   : > { %v6238_v58 = vpop.f32.mrf.mxu0  ;;  %v14786_v36 = vadd.f32 %v6324_v59, %v6235_v14  ;;  %v14798_v14 = vor.u32 %v12332_v40, %v11242_v55  ;;  %v12360_v59 = vld [vmem:[%s16162_s5 + $0xc0] sm:$0xff] }
 0x693   : > { %v6383_v1 = vpop.f32.mrf.mxu2  ;;  %v14794_v60 = vpop.f32.mrf.mxu3 }
 0x694   : > { %16829 = vst [vmem:[#allocation81_spill] sm:$0xff] %v14794_v60  ;;  %v6384_v31 = vadd.f32 %v6383_v1, %v14630_v34  ;;  %v12368_v34 = vld [vmem:[%s16162_s5 + $0x100] sm:$0xff] }
 0x695   : > { %6793 = vmatmul.bf16.gmra.mxu0 %v14331_v13  ;;  %16830 = vst [vmem:[#allocation82_spill] sm:$0xff] %v14798_v14  ;;  %7254 = vmatpush.bf16.msrb.mxu2 %v12360_v59 }
 0x696   : > { %6954 = vst [vmem:[#allocation4 + $0x60] sm:$0xff] %v6384_v31  ;;  %7343 = vmatpush.bf16.msrb.mxu3 %v12368_v34 }
 0x698   : > { %6425 = vmatmul.bf16.gmra.mxu2 %v14798_v14  ;;  %6754 = vmatmul.bf16.gmra.mxu3 %v14635_v54 }
 0x699   : > { %v6327_v52 = vpop.f32.mrf.mxu1 }
 0x69a   : > { %v6240_v63 = vpop.f32.mrf.mxu0  ;;  %v14811_v1 = vadd.f32 %v6327_v52, %v6238_v58  ;;  %v14822_v58 = vor.u32 %v12335_v38, %v11254_v37 }
 0x69b   : > { %v6386_v40 = vpop.f32.mrf.mxu2  ;;  %v14813_v31 = vpop.f32.mrf.mxu3 }
 0x69c   : > { %v6387_v55 = vadd.f32 %v6386_v40, %v14655_v12  ;;  %6882 = vmatmul.bf16.gmra.mxu1 %v14510_v47 }
 0x69e   : > { %6955 = vst [vmem:[#allocation4 + $0x68] sm:$0xff] %v6387_v55 }
 0x6a1   : > { %v6329_v26 = vpop.f32.mrf.mxu1 }
 0x6a2   : > { %v6243_v60 = vpop.f32.mrf.mxu0  ;;  %v14817_v14 = vadd.f32 %v6329_v26, %v6240_v63 }
 0x6a3   : > { %v6388_v54 = vpop.f32.mrf.mxu2  ;;  %v14819_v11 = vpop.f32.mrf.mxu3 }
 0x6a4   : > { %v6389_v61 = vadd.f32 %v6388_v54, %v14666_v15 }
 0x6a5   : > { %6798 = vmatmul.bf16.gmra.mxu0 %v14373_v30 }
 0x6a6   : > { %6956 = vst [vmem:[#allocation4 + $0x70] sm:$0xff] %v6389_v61 }
 0x6a8   : > { %6430 = vmatmul.bf16.gmra.mxu2 %v14822_v58  ;;  %6759 = vmatmul.bf16.gmra.mxu3 %v14668_v32 }
 0x6a9   : > { %v6332_v12 = vpop.f32.mrf.mxu1 }
 0x6aa   : > { %v6245_v59 = vpop.f32.mrf.mxu0  ;;  %v14827_v34 = vadd.f32 %v6332_v12, %v6243_v60  ;;  %v12379_v60 = vld [vmem:[%s16162_s5 + $0x158] sm:$0xff] }
 0x6ab   : > { %v6391_v26 = vpop.f32.mrf.mxu2  ;;  %v14829_v52 = vpop.f32.mrf.mxu3  ;;  %7429 = vmatpush.bf16.msrb.mxu0 %v12379_v60 }
 0x6ac   : > { %v6392_v63 = vadd.f32 %v6391_v26, %v14678_v39  ;;  %6887 = vmatmul.bf16.gmra.mxu1 %v14540_v16 }
 0x6ae   : > { %6957 = vst [vmem:[#allocation4 + $0x78] sm:$0xff] %v6392_v63 }
 0x6b1   : > { %v6334_v54 = vpop.f32.mrf.mxu1 }
 0x6b2   : > { %v6248_v15 = vpop.f32.mrf.mxu0  ;;  %v14833_v37 = vadd.f32 %v6334_v54, %v6245_v59 }
 0x6b3   : > { %v6393_v38 = vpop.f32.mrf.mxu2  ;;  %v14835_v40 = vpop.f32.mrf.mxu3 }
 0x6b4   : > { %v6394_v55 = vadd.f32 %v6393_v38, %v14692_v28 }
 0x6b5   : > { %6803 = vmatmul.bf16.gmra.mxu0 %v14396_v3 }
 0x6b6   : > { %6958 = vst [vmem:[#allocation4 + $0x80] sm:$0xff] %v6394_v55 }
 0x6b8   : > { %7255 = vmatmul.bf16.vlgmr.msrb.gmra.mxu2 %v14169_v35  ;;  %7344 = vmatmul.bf16.vlgmr.msrb.gmra.mxu3 %v14224_v17 }
 0x6b9   : > { %v6337_v39 = vpop.f32.mrf.mxu1 }
 0x6ba   : > { %v6250_v61 = vpop.f32.mrf.mxu0  ;;  %v14844_v12 = vadd.f32 %v6337_v39, %v6248_v15  ;;  %v12463_v15 = vld [vmem:[%s16164_s7 + $0x38] sm:$0xff] }
 0x6bb   : > { %v6396_v59 = vpop.f32.mrf.mxu2  ;;  %v14846_v26 = vpop.f32.mrf.mxu3  ;;  %8446 = vmatpush.bf16.msrb.mxu1 %v12463_v15 }
 0x6bc   : > { %v6397_v28 = vadd.f32 %v6396_v59, %v14705_v41  ;;  %6892 = vmatmul.bf16.gmra.mxu1 %v14570_v5 }
 0x6be   : > { %6959 = vst [vmem:[#allocation4 + $0x88] sm:$0xff] %v6397_v28 }
 0x6c1   : > { %v6339_v63 = vpop.f32.mrf.mxu1 }
 0x6c2   : > { %v6253_v54 = vpop.f32.mrf.mxu0  ;;  %v14850_v38 = vadd.f32 %v6339_v63, %v6250_v61 }
 0x6c3   : > { %v6398_v35 = vpop.f32.mrf.mxu2  ;;  %v14852_v55 = vpop.f32.mrf.mxu3 }
 0x6c4   : > { %v6399_v17 = vadd.f32 %v6398_v35, %v14711_v56 }
 0x6c5   : > { %6808 = vmatmul.bf16.gmra.mxu0 %v14424_v44 }
 0x6c6   : > { %6960 = vst [vmem:[#allocation4 + $0x90] sm:$0xff] %v6399_v17 }
 0x6c8   : > { %7260 = vmatmul.bf16.gmra.mxu2 %v14233_v62  ;;  %7349 = vmatmul.bf16.gmra.mxu3 %v14249_v2 }
 0x6c9   : > { %v6342_v41 = vpop.f32.mrf.mxu1 }
 0x6ca   : > { %v6255_v60 = vpop.f32.mrf.mxu0  ;;  %v14861_v39 = vadd.f32 %v6342_v41, %v6253_v54  ;;  %v12378_v54 = vld [vmem:[%s16162_s5 + $0x150] sm:$0xff] }
 0x6cb   : > { %v6401_v61 = vpop.f32.mrf.mxu2  ;;  %v14863_v59 = vpop.f32.mrf.mxu3  ;;  %7430 = vmatpush.bf16.msrb.mxu0 %v12378_v54 }
 0x6cc   : > { %v6402_v56 = vadd.f32 %v6401_v61, %v14721_v29  ;;  %6897 = vmatmul.bf16.gmra.mxu1 %v14600_v6 }
 0x6ce   : > { %6961 = vst [vmem:[#allocation4 + $0x98] sm:$0xff] %v6402_v56 }
 0x6d1   : > { %v6344_v28 = vpop.f32.mrf.mxu1 }
 0x6d2   : > { %v14867_v63 = vadd.f32 %v6344_v28, %v6255_v60  ;;  %v6774_v35 = vpop.f32.mrf.mxu0 }
 0x6d3   : > { %v6403_v62 = vpop.f32.mrf.mxu2  ;;  %v14869_v17 = vpop.f32.mrf.mxu3  ;;  %v6775_v29 = vadd.f32 %v6774_v35, %v14662_v51 }
 0x6d4   : > { %v6404_v2 = vadd.f32 %v6403_v62, %v14733_v23 }
 0x6d5   : > { %6813 = vmatmul.bf16.gmra.mxu0 %v14454_v48 }
 0x6d6   : > { %6962 = vst [vmem:[#allocation4 + $0xa0] sm:$0xff] %v6404_v2 }
 0x6d8   : > { %7265 = vmatmul.bf16.gmra.mxu2 %v14255_v22  ;;  %7354 = vmatmul.bf16.gmra.mxu3 %v14271_v45 }
 0x6d9   : > { %v6863_v15 = vpop.f32.mrf.mxu1 }
 0x6da   : > { %v6776_v41 = vpop.f32.mrf.mxu0  ;;  %v6864_v60 = vadd.f32 %v6863_v15, %v6775_v29 }
 0x6db   : > { %v6406_v61 = vpop.f32.mrf.mxu2  ;;  %v14879_v56 = vpop.f32.mrf.mxu3  ;;  %v6777_v28 = vadd.f32 %v6776_v41, %v14670_v50 }
 0x6dc   : > { %6975 = vst [vmem:[#allocation5 + $0x8] sm:$0xff] %v6864_v60  ;;  %v6407_v23 = vadd.f32 %v6406_v61, %v14746_v43  ;;  %6902 = vmatmul.bf16.gmra.mxu1 %v14642_v27  ;;  %v12462_v43 = vld [vmem:[%s16164_s7 + $0x30] sm:$0xff] }
 0x6dd   : > { %8447 = vmatpush.bf16.msrb.mxu1 %v12462_v43 }
 0x6de   : > { %6963 = vst [vmem:[#allocation4 + $0xa8] sm:$0xff] %v6407_v23 }
 0x6e1   : > { %v6865_v51 = vpop.f32.mrf.mxu1 }
 0x6e2   : > { %v6779_v35 = vpop.f32.mrf.mxu0  ;;  %v6866_v22 = vadd.f32 %v6865_v51, %v6777_v28 }
 0x6e3   : > { %v6408_v62 = vpop.f32.mrf.mxu2  ;;  %v14884_v45 = vpop.f32.mrf.mxu3  ;;  %v6780_v54 = vadd.f32 %v6779_v35, %v14685_v24 }
 0x6e4   : > { %6976 = vst [vmem:[#allocation5 + $0x10] sm:$0xff] %v6866_v22  ;;  %v6409_v2 = vadd.f32 %v6408_v62, %v14752_v57  ;;  %v16831_v22 = vld [vmem:[#allocation23_spill] sm:$0xff] }
 0x6e5   : > { %6818 = vmatmul.bf16.gmra.mxu0 %v14489_v25 }
 0x6e6   : > { %6964 = vst [vmem:[#allocation4 + $0xb0] sm:$0xff] %v6409_v2 }
 0x6e8   : > { %7270 = vmatmul.bf16.gmra.mxu2 %v14283_v53  ;;  %7359 = vmatmul.bf16.gmra.mxu3 %v14298_v8 }
 0x6e9   : > { %v6868_v50 = vpop.f32.mrf.mxu1 }
 0x6ea   : > { %v6781_v29 = vpop.f32.mrf.mxu0  ;;  %v6869_v15 = vadd.f32 %v6868_v50, %v6780_v54 }
 0x6eb   : > { %v6411_v41 = vpop.f32.mrf.mxu2  ;;  %v14894_v60 = vpop.f32.mrf.mxu3  ;;  %v6782_v61 = vadd.f32 %v6781_v29, %v14694_v0 }
 0x6ec   : > { %6977 = vst [vmem:[#allocation5 + $0x18] sm:$0xff] %v6869_v15  ;;  %v6412_v57 = vadd.f32 %v6411_v41, %v14768_v20  ;;  %6907 = vmatmul.bf16.gmra.mxu1 %v14674_v4  ;;  %v12377_v20 = vld [vmem:[%s16162_s5 + $0x148] sm:$0xff] }
 0x6ed   : > { %7431 = vmatpush.bf16.msrb.mxu0 %v12377_v20 }
 0x6ee   : > { %6965 = vst [vmem:[#allocation4 + $0xb8] sm:$0xff] %v6412_v57 }
 0x6f1   : > { %v6870_v24 = vpop.f32.mrf.mxu1 }
 0x6f2   : > { %v6784_v23 = vpop.f32.mrf.mxu0  ;;  %v6871_v53 = vadd.f32 %v6870_v24, %v6782_v61  ;;  %v16832_v61 = vld [vmem:[#allocation61_spill] sm:$0xff] }
 0x6f3   : > { %v6413_v28 = vpop.f32.mrf.mxu2  ;;  %v14899_v8 = vpop.f32.mrf.mxu3  ;;  %v6785_v35 = vadd.f32 %v6784_v23, %v14707_v9  ;;  %v16833_v23 = vld [vmem:[#allocation34_spill] sm:$0xff] }
 0x6f4   : > { %6978 = vst [vmem:[#allocation5 + $0x20] sm:$0xff] %v6871_v53  ;;  %v6414_v51 = vadd.f32 %v6413_v28, %v14786_v36 }
 0x6f5   : > { %6823 = vmatmul.bf16.gmra.mxu0 %v14519_v42 }
 0x6f6   : > { %6966 = vst [vmem:[#allocation4 + $0xc0] sm:$0xff] %v6414_v51 }
 0x6f8   : > { %7275 = vmatmul.bf16.gmra.mxu2 %v16831_v22  ;;  %7364 = vmatmul.bf16.gmra.mxu3 %v14331_v13 }
 0x6f9   : > { %v6873_v0 = vpop.f32.mrf.mxu1 }
 0x6fa   : > { %v6786_v62 = vpop.f32.mrf.mxu0  ;;  %v6874_v2 = vadd.f32 %v6873_v0, %v6785_v35 }
 0x6fb   : > { %v6416_v43 = vpop.f32.mrf.mxu2  ;;  %v14909_v54 = vpop.f32.mrf.mxu3  ;;  %v6787_v50 = vadd.f32 %v6786_v62, %v14713_v49 }
 0x6fc   : > { %6979 = vst [vmem:[#allocation5 + $0x28] sm:$0xff] %v6874_v2  ;;  %v6417_v36 = vadd.f32 %v6416_v43, %v14811_v1  ;;  %6912 = vmatmul.bf16.gmra.mxu1 %v14698_v7  ;;  %v12461_v1 = vld [vmem:[%s16164_s7 + $0x28] sm:$0xff]  ;;  %v16834_v43 = vld [vmem:[#allocation66_spill] sm:$0xff] }
 0x6fd   : > { %8448 = vmatpush.bf16.msrb.mxu1 %v12461_v1 }
 0x6fe   : > { %6967 = vst [vmem:[#allocation4 + $0xc8] sm:$0xff] %v6417_v36 }
 0x701   : > { %v6875_v9 = vpop.f32.mrf.mxu1 }
 0x702   : > { %v6789_v29 = vpop.f32.mrf.mxu0  ;;  %v6876_v15 = vadd.f32 %v6875_v9, %v6787_v50  ;;  %v16835_v50 = vld [vmem:[#allocation36_spill] sm:$0xff] }
 0x703   : > { %v6418_v41 = vpop.f32.mrf.mxu2  ;;  %v14914_v13 = vpop.f32.mrf.mxu3  ;;  %v6790_v24 = vadd.f32 %v6789_v29, %v14726_v19 }
 0x704   : > { %6980 = vst [vmem:[#allocation5 + $0x30] sm:$0xff] %v6876_v15  ;;  %v6419_v57 = vadd.f32 %v6418_v41, %v14817_v14 }
 0x705   : > { %6828 = vmatmul.bf16.gmra.mxu0 %v16832_v61 }
 0x706   : > { %6968 = vst [vmem:[#allocation4 + $0xd0] sm:$0xff] %v6419_v57 }
 0x708   : > { %7280 = vmatmul.bf16.gmra.mxu2 %v16833_v23  ;;  %7369 = vmatmul.bf16.gmra.mxu3 %v14373_v30 }
 0x709   : > { %v6878_v49 = vpop.f32.mrf.mxu1 }
 0x70a   : > { %v6791_v53 = vpop.f32.mrf.mxu0  ;;  %v6879_v28 = vadd.f32 %v6878_v49, %v6790_v24 }
 0x70b   : > { %v6421_v51 = vpop.f32.mrf.mxu2  ;;  %v14924_v20 = vpop.f32.mrf.mxu3  ;;  %v6792_v35 = vadd.f32 %v6791_v53, %v14735_v33  ;;  %v16836_v53 = vld [vmem:[#allocation73_spill] sm:$0xff] }
 0x70c   : > { %6981 = vst [vmem:[#allocation5 + $0x38] sm:$0xff] %v6879_v28  ;;  %v6422_v14 = vadd.f32 %v6421_v51, %v14827_v34  ;;  %6917 = vmatmul.bf16.gmra.mxu1 %v14717_v46  ;;  %v12376_v34 = vld [vmem:[%s16162_s5 + $0x140] sm:$0xff]  ;;  %v16837_v28 = vld [vmem:[#allocation80_spill] sm:$0xff] }
 0x70d   : > { %7432 = vmatpush.bf16.msrb.mxu0 %v12376_v34 }
 0x70e   : > { %6969 = vst [vmem:[#allocation4 + $0xd8] sm:$0xff] %v6422_v14  ;;  %v16838_v14 = vld [vmem:[#allocation84_spill] sm:$0xff] }
 0x711   : > { %v6880_v19 = vpop.f32.mrf.mxu1 }
 0x712   : > { %v6794_v22 = vpop.f32.mrf.mxu0  ;;  %v6881_v0 = vadd.f32 %v6880_v19, %v6792_v35 }
 0x713   : > { %v6423_v62 = vpop.f32.mrf.mxu2  ;;  %v14929_v30 = vpop.f32.mrf.mxu3  ;;  %v6795_v36 = vadd.f32 %v6794_v22, %v14748_v10 }
 0x714   : > { %6982 = vst [vmem:[#allocation5 + $0x40] sm:$0xff] %v6881_v0  ;;  %v6424_v2 = vadd.f32 %v6423_v62, %v14833_v37  ;;  %v16839_v62 = vld [vmem:[#allocation78_spill] sm:$0xff] }
 0x715   : > { %6833 = vmatmul.bf16.gmra.mxu0 %v16834_v43 }
 0x716   : > { %6970 = vst [vmem:[#allocation4 + $0xe0] sm:$0xff] %v6424_v2  ;;  %v16840_v2 = vld [vmem:[#allocation81_spill] sm:$0xff] }
 0x718   : > { %7285 = vmatmul.bf16.gmra.mxu2 %v16835_v50  ;;  %7374 = vmatmul.bf16.gmra.mxu3 %v14396_v3 }
 0x719   : > { %v6883_v33 = vpop.f32.mrf.mxu1 }
 0x71a   : > { %v6796_v9 = vpop.f32.mrf.mxu0  ;;  %v6884_v29 = vadd.f32 %v6883_v33, %v6795_v36 }
 0x71b   : > { %v6426_v15 = vpop.f32.mrf.mxu2  ;;  %v14939_v41 = vpop.f32.mrf.mxu3  ;;  %v6797_v57 = vadd.f32 %v6796_v9, %v14754_v21 }
 0x71c   : > { %6983 = vst [vmem:[#allocation5 + $0x48] sm:$0xff] %v6884_v29  ;;  %v6427_v37 = vadd.f32 %v6426_v15, %v14844_v12  ;;  %6922 = vmatmul.bf16.gmra.mxu1 %v14739_v18  ;;  %v12460_v12 = vld [vmem:[%s16164_s7 + $0x20] sm:$0xff]  ;;  %v16841_v15 = vld [vmem:[#allocation76_spill] sm:$0xff] }
 0x71d   : > { %8449 = vmatpush.bf16.msrb.mxu1 %v12460_v12 }
 0x71e   : > { %6971 = vst [vmem:[#allocation4 + $0xe8] sm:$0xff] %v6427_v37 }
 0x721   : > { %v6885_v10 = vpop.f32.mrf.mxu1 }
 0x722   : > { %v6799_v1 = vpop.f32.mrf.mxu0  ;;  %v6886_v24 = vadd.f32 %v6885_v10, %v6797_v57  ;;  %v7007_v57 = vld [vmem:[#allocation4 + $0x7] sm:$0xff] }
 0x723   : > { %v6428_v23 = vpop.f32.mrf.mxu2  ;;  %v14944_v3 = vpop.f32.mrf.mxu3  ;;  %v6800_v51 = vadd.f32 %v6799_v1, %v16837_v28 }
 0x724   : > { %6984 = vst [vmem:[#allocation5 + $0x50] sm:$0xff] %v6886_v24  ;;  %v6429_v49 = vadd.f32 %v6428_v23, %v14850_v38 }
 0x725   : > { %6838 = vmatmul.bf16.gmra.mxu0 %v16836_v53 }
 0x726   : > { %6972 = vst [vmem:[#allocation4 + $0xf0] sm:$0xff] %v6429_v49  ;;  %v7071_v49 = vsel %vm13846_vm2, %v7007_v57, 0.0 }
 0x728   : > { %7290 = vmatmul.bf16.gmra.mxu2 %v16838_v14  ;;  %7379 = vmatmul.bf16.gmra.mxu3 %v14424_v44 }
 0x729   : > { %v6888_v21 = vpop.f32.mrf.mxu1 }
 0x72a   : > { %v6801_v35 = vpop.f32.mrf.mxu0  ;;  %v6889_v19 = vadd.f32 %v6888_v21, %v6800_v51 }
 0x72b   : > { %v6431_v22 = vpop.f32.mrf.mxu2  ;;  %v14954_v0 = vpop.f32.mrf.mxu3  ;;  %v6802_v34 = vadd.f32 %v6801_v35, %v16840_v2 }
 0x72c   : > { %6985 = vst [vmem:[#allocation5 + $0x58] sm:$0xff] %v6889_v19  ;;  %v6432_v38 = vadd.f32 %v6431_v22, %v14861_v39  ;;  %6927 = vmatmul.bf16.gmra.mxu1 %v16839_v62  ;;  %v16842_v39 = vld [vmem:[#allocation43_spill] sm:$0xff]  ;;  %v7008_v19 = vld [vmem:[#allocation4 + $0xf] sm:$0xff] }
 0x72e   : > { %6973 = vst [vmem:[#allocation4 + $0xf8] sm:$0xff] %v6432_v38 }
 0x731   : > { %v6890_v36 = vpop.f32.mrf.mxu1 }
 0x732   : > { %v6804_v50 = vpop.f32.mrf.mxu0  ;;  %v6891_v33 = vadd.f32 %v6890_v36, %v6802_v34  ;;  %v16845_v34 = vld [vmem:[#allocation77_spill] sm:$0xff] }
 0x733   : > { %v6433_v9 = vpop.f32.mrf.mxu2  ;;  %v14959_v44 = vpop.f32.mrf.mxu3  ;;  %v6805_v37 = vadd.f32 %v6804_v50, %v14813_v31  ;;  %v12459_v50 = vld [vmem:[%s16164_s7 + $0x18] sm:$0xff] }
 0x734   : > { %6986 = vst [vmem:[#allocation5 + $0x60] sm:$0xff] %v6891_v33  ;;  %v6434_v29 = vadd.f32 %v6433_v9, %v14867_v63  ;;  %v16844_v63 = vld [vmem:[#allocation82_spill] sm:$0xff]  ;;  %8450 = vmatpush.bf16.msrb.mxu1 %v12459_v50  ;;  %v7011_v50 = vld [vmem:[#allocation4 + $0x27] sm:$0xff] }
 0x735   : > { %6843 = vmatmul.bf16.gmra.mxu0 %v16841_v15  ;;  %v16846_v9 = vld [vmem:[#allocation46_spill] sm:$0xff] }
 0x736   : > { %6974 = vst [vmem:[#allocation4 + $0x100] sm:$0xff] %v6434_v29 }
 0x738   : > { %7295 = vmatmul.bf16.gmra.mxu2 %v16842_v39  ;;  %7384 = vmatmul.bf16.gmra.mxu3 %v14454_v48 }
 0x739   : > { %v6893_v10 = vpop.f32.mrf.mxu1 }
 0x73a   : > { %v6806_v1 = vpop.f32.mrf.mxu0  ;;  %v6894_v24 = vadd.f32 %v6893_v10, %v6805_v37 }
 0x73b   : > { %v7256_v12 = vpop.f32.mrf.mxu2  ;;  %v7345_v28 = vpop.f32.mrf.mxu3  ;;  %v6807_v31 = vadd.f32 %v6806_v1, %v14819_v11  ;;  %v7009_v11 = vld [vmem:[#allocation4 + $0x17] sm:$0xff] }
 0x73c   : > { %6987 = vst [vmem:[#allocation5 + $0x68] sm:$0xff] %v6894_v24  ;;  %6932 = vmatmul.bf16.gmra.mxu1 %v16844_v63  ;;  %v7257_v51 = vadd.f32 %v7256_v12, %v7071_v49  ;;  %v7073_v10 = vsel %vm13865_vm3, %v7009_v11, 0.0 }
 0x73e   : > { %v14969_v14 = vadd.f32 %v7345_v28, %v7257_v51 }
 0x741   : > { %v6895_v21 = vpop.f32.mrf.mxu1 }
 0x742   : > { %v6809_v35 = vpop.f32.mrf.mxu0  ;;  %v6896_v48 = vadd.f32 %v6895_v21, %v6807_v31  ;;  %v7010_v31 = vld [vmem:[#allocation4 + $0x1f] sm:$0xff] }
 0x743   : > { %v7258_v22 = vpop.f32.mrf.mxu2  ;;  %v7347_v38 = vpop.f32.mrf.mxu3  ;;  %v6810_v33 = vadd.f32 %v6809_v35, %v14829_v52 }
 0x744   : > { %6988 = vst [vmem:[#allocation5 + $0x70] sm:$0xff] %v6896_v48  ;;  %v7259_v2 = vadd.f32 %v7258_v22, %v7008_v19  ;;  %v16848_v19 = vld [vmem:[#allocation38_spill] sm:$0xff] }
 0x745   : > { %6848 = vmatmul.bf16.gmra.mxu0 %v16845_v34 }
 0x746   : > { %v14973_v36 = vadd.f32 %v7347_v38, %v7259_v2  ;;  %v16849_v2 = vld [vmem:[#allocation53_spill] sm:$0xff] }
 0x748   : > { %7300 = vmatmul.bf16.gmra.mxu2 %v16846_v9  ;;  %7389 = vmatmul.bf16.gmra.mxu3 %v14489_v25 }
 0x749   : > { %v6898_v29 = vpop.f32.mrf.mxu1 }
 0x74a   : > { %v6811_v37 = vpop.f32.mrf.mxu0  ;;  %v6899_v39 = vadd.f32 %v6898_v29, %v6810_v33  ;;  %v7075_v29 = vsel %vm13883_vm4, %v7011_v50, 0.0 }
 0x74b   : > { %v7261_v1 = vpop.f32.mrf.mxu2  ;;  %v7350_v24 = vpop.f32.mrf.mxu3  ;;  %v6812_v52 = vadd.f32 %v6811_v37, %v14835_v40 }
 0x74c   : > { %6989 = vst [vmem:[#allocation5 + $0x78] sm:$0xff] %v6899_v39  ;;  %6937 = vmatmul.bf16.gmra.mxu1 %v14822_v58  ;;  %v7262_v49 = vadd.f32 %v7261_v1, %v7073_v10 }
 0x74e   : > { %v14984_v12 = vadd.f32 %v7350_v24, %v7262_v49 }
 0x751   : > { %v6900_v28 = vpop.f32.mrf.mxu1 }
 0x752   : > { %v6814_v25 = vpop.f32.mrf.mxu0  ;;  %v6901_v51 = vadd.f32 %v6900_v28, %v6812_v52  ;;  %v7012_v28 = vld [vmem:[#allocation4 + $0x2f] sm:$0xff] }
 0x753   : > { %v7263_v21 = vpop.f32.mrf.mxu2  ;;  %v7352_v35 = vpop.f32.mrf.mxu3  ;;  %v6815_v38 = vadd.f32 %v6814_v25, %v14846_v26 }
 0x754   : > { %6990 = vst [vmem:[#allocation5 + $0x80] sm:$0xff] %v6901_v51  ;;  %v7264_v48 = vadd.f32 %v7263_v21, %v7010_v31  ;;  %v16851_v31 = vld [vmem:[#allocation42_spill] sm:$0xff] }
 0x755   : > { %7433 = vmatmul.bf16.vlgmr.msrb.gmra.mxu0 %v16848_v19  ;;  %v16852_v19 = vld [vmem:[#allocation57_spill] sm:$0xff] }
 0x756   : > { %v14988_v22 = vadd.f32 %v7352_v35, %v7264_v48  ;;  %v12458_v35 = vld [vmem:[%s16164_s7 + $0x10] sm:$0xff] }
 0x757   : > { %8451 = vmatpush.bf16.msrb.mxu1 %v12458_v35  ;;  %v7015_v35 = vld [vmem:[#allocation4 + $0x47] sm:$0xff] }
 0x758   : > { %7305 = vmatmul.bf16.gmra.mxu2 %v16849_v2  ;;  %7394 = vmatmul.bf16.gmra.mxu3 %v14519_v42 }
 0x759   : > { %v6903_v40 = vpop.f32.mrf.mxu1 }
 0x75a   : > { %v6816_v33 = vpop.f32.mrf.mxu0  ;;  %v6904_v9 = vadd.f32 %v6903_v40, %v6815_v38 }
 0x75b   : > { %v7266_v37 = vpop.f32.mrf.mxu2  ;;  %v7355_v39 = vpop.f32.mrf.mxu3  ;;  %v6817_v24 = vadd.f32 %v6816_v33, %v14852_v55  ;;  %v7013_v55 = vld [vmem:[#allocation4 + $0x37] sm:$0xff] }
 0x75c   : > { %6991 = vst [vmem:[#allocation5 + $0x88] sm:$0xff] %v6904_v9  ;;  %v7267_v10 = vadd.f32 %v7266_v37, %v7075_v29  ;;  %v7077_v33 = vsel %vm13904_vm5, %v7013_v55, 0.0 }
 0x75e   : > { %v14995_v1 = vadd.f32 %v7355_v39, %v7267_v10 }
 0x761   : > { %v6905_v26 = vpop.f32.mrf.mxu1 }
 0x762   : > { %v6819_v49 = vpop.f32.mrf.mxu0  ;;  %v6906_v52 = vadd.f32 %v6905_v26, %v6817_v24 }
 0x763   : > { %v7268_v42 = vpop.f32.mrf.mxu2  ;;  %v7357_v25 = vpop.f32.mrf.mxu3  ;;  %v6820_v48 = vadd.f32 %v6819_v49, %v14863_v59 }
 0x764   : > { %6992 = vst [vmem:[#allocation5 + $0x90] sm:$0xff] %v6906_v52  ;;  %v7269_v51 = vadd.f32 %v7268_v42, %v7012_v28  ;;  %v16854_v42 = vld [vmem:[#allocation45_spill] sm:$0xff] }
 0x765   : > { %7438 = vmatmul.bf16.gmra.mxu0 %v16851_v31  ;;  %v16855_v31 = vld [vmem:[#allocation62_spill] sm:$0xff] }
 0x766   : > { %v14999_v21 = vadd.f32 %v7357_v25, %v7269_v51 }
 0x768   : > { %7310 = vmatmul.bf16.gmra.mxu2 %v16852_v19  ;;  %7399 = vmatmul.bf16.gmra.mxu3 %v16832_v61  ;;  %v7014_v61 = vld [vmem:[#allocation4 + $0x3f] sm:$0xff] }
 0x769   : > { %v6908_v38 = vpop.f32.mrf.mxu1 }
 0x76a   : > { %v6821_v2 = vpop.f32.mrf.mxu0  ;;  %v6909_v50 = vadd.f32 %v6908_v38, %v6820_v48  ;;  %v7079_v38 = vsel %vm13922_vm6, %v7015_v35, 0.0 }
 0x76b   : > { %v7271_v9 = vpop.f32.mrf.mxu2  ;;  %v7360_v29 = vpop.f32.mrf.mxu3  ;;  %v6822_v59 = vadd.f32 %v6821_v2, %v14869_v17 }
 0x76c   : > { %6993 = vst [vmem:[#allocation5 + $0x98] sm:$0xff] %v6909_v50  ;;  %v7272_v37 = vadd.f32 %v7271_v9, %v7077_v33 }
 0x76e   : > { %v15009_v39 = vadd.f32 %v7360_v29, %v7272_v37 }
 0x771   : > { %v6910_v10 = vpop.f32.mrf.mxu1 }
 0x772   : > { %v6824_v24 = vpop.f32.mrf.mxu0  ;;  %v6911_v26 = vadd.f32 %v6910_v10, %v6822_v59 }
 0x773   : > { %v7273_v49 = vpop.f32.mrf.mxu2  ;;  %v7362_v52 = vpop.f32.mrf.mxu3  ;;  %v6825_v51 = vadd.f32 %v6824_v24, %v14879_v56  ;;  %v16857_v24 = vld [vmem:[#allocation50_spill] sm:$0xff] }
 0x774   : > { %6994 = vst [vmem:[#allocation5 + $0xa0] sm:$0xff] %v6911_v26  ;;  %v7274_v28 = vadd.f32 %v7273_v49, %v7014_v61  ;;  %v12457_v26 = vld [vmem:[%s16164_s7 + $0x8] sm:$0xff]  ;;  %v16858_v49 = vld [vmem:[#allocation69_spill] sm:$0xff] }
 0x775   : > { %7443 = vmatmul.bf16.gmra.mxu0 %v16854_v42  ;;  %8452 = vmatpush.bf16.msrb.mxu1 %v12457_v26 }
 0x776   : > { %v15013_v25 = vadd.f32 %v7362_v52, %v7274_v28 }
 0x778   : > { %7315 = vmatmul.bf16.gmra.mxu2 %v16855_v31  ;;  %7404 = vmatmul.bf16.gmra.mxu3 %v16834_v43 }
 0x779   : > { %v6913_v17 = vpop.f32.mrf.mxu1 }
 0x77a   : > { %v6826_v48 = vpop.f32.mrf.mxu0  ;;  %v6914_v19 = vadd.f32 %v6913_v17, %v6825_v51 }
 0x77b   : > { %v7276_v2 = vpop.f32.mrf.mxu2  ;;  %v7365_v50 = vpop.f32.mrf.mxu3  ;;  %v6827_v29 = vadd.f32 %v6826_v48, %v14884_v45  ;;  %v7017_v45 = vld [vmem:[#allocation4 + $0x57] sm:$0xff] }
 0x77c   : > { %6995 = vst [vmem:[#allocation5 + $0xa8] sm:$0xff] %v6914_v19  ;;  %v7277_v33 = vadd.f32 %v7276_v2, %v7079_v38  ;;  %v7081_v31 = vsel %vm13945_vm7, %v7017_v45, 0.0 }
 0x77e   : > { %v15020_v9 = vadd.f32 %v7365_v50, %v7277_v33 }
 0x781   : > { %v6915_v56 = vpop.f32.mrf.mxu1 }
 0x782   : > { %v6829_v37 = vpop.f32.mrf.mxu0  ;;  %v6916_v59 = vadd.f32 %v6915_v56, %v6827_v29  ;;  %v16860_v56 = vld [vmem:[#allocation74_spill] sm:$0xff] }
 0x783   : > { %v15023_v10 = vpop.f32.mrf.mxu2  ;;  %v15025_v43 = vpop.f32.mrf.mxu3  ;;  %v6830_v61 = vadd.f32 %v6829_v37, %v14894_v60  ;;  %v7019_v37 = vld [vmem:[#allocation4 + $0x67] sm:$0xff] }
 0x784   : > { %6996 = vst [vmem:[#allocation5 + $0xb0] sm:$0xff] %v6916_v59 }
 0x785   : > { %7448 = vmatmul.bf16.gmra.mxu0 %v16857_v24 }
 0x788   : > { %7320 = vmatmul.bf16.gmra.mxu2 %v16858_v49  ;;  %7409 = vmatmul.bf16.gmra.mxu3 %v16836_v53 }
 0x789   : > { %v6918_v52 = vpop.f32.mrf.mxu1 }
 0x78a   : > { %v6831_v28 = vpop.f32.mrf.mxu0  ;;  %v6919_v42 = vadd.f32 %v6918_v52, %v6830_v61  ;;  %v7083_v61 = vsel %vm13967_vm8, %v7019_v37, 0.0  ;;  %vm9220_vm8 = vcmask 64512  }
 0x78b   : > { %v7281_v35 = vpop.f32.mrf.mxu2  ;;  %v7370_v17 = vpop.f32.mrf.mxu3  ;;  %v6832_v60 = vadd.f32 %v6831_v28, %v14899_v8 }
 0x78c   : > { %6997 = vst [vmem:[#allocation5 + $0xb8] sm:$0xff] %v6919_v42  ;;  %v7282_v48 = vadd.f32 %v7281_v35, %v7081_v31 }
 0x78e   : > { %v15036_v19 = vadd.f32 %v7370_v17, %v7282_v48  ;;  %v12456_v17 = vld [vmem:[%s16164_s7] sm:$0xff] }
 0x78f   : > { %8453 = vmatpush.bf16.msrb.mxu1 %v12456_v17 }
 0x791   : > { %v6920_v38 = vpop.f32.mrf.mxu1 }
 0x792   : > { %v6834_v2 = vpop.f32.mrf.mxu0  ;;  %v6921_v50 = vadd.f32 %v6920_v38, %v6832_v60 }
 0x793   : > { %v15039_v53 = vpop.f32.mrf.mxu2  ;;  %v15041_v33 = vpop.f32.mrf.mxu3  ;;  %v6835_v29 = vadd.f32 %v6834_v2, %v14909_v54 }
 0x794   : > { %6998 = vst [vmem:[#allocation5 + $0xc0] sm:$0xff] %v6921_v50 }
 0x795   : > { %7453 = vmatmul.bf16.gmra.mxu0 %v14510_v47 }
 0x798   : > { %7325 = vmatmul.bf16.gmra.mxu2 %v16860_v56  ;;  %7414 = vmatmul.bf16.gmra.mxu3 %v16841_v15 }
 0x799   : > { %v6923_v59 = vpop.f32.mrf.mxu1 }
 0x79a   : > { %v6836_v24 = vpop.f32.mrf.mxu0  ;;  %v6924_v8 = vadd.f32 %v6923_v59, %v6835_v29 }
 0x79b   : > { %v7286_v49 = vpop.f32.mrf.mxu2  ;;  %v7375_v45 = vpop.f32.mrf.mxu3  ;;  %v6837_v47 = vadd.f32 %v6836_v24, %v14914_v13  ;;  %v7021_v13 = vld [vmem:[#allocation4 + $0x77] sm:$0xff] }
 0x79c   : > { %6999 = vst [vmem:[#allocation5 + $0xc8] sm:$0xff] %v6924_v8  ;;  %v7287_v52 = vadd.f32 %v7286_v49, %v7083_v61  ;;  %v7085_v29 = vsel %vm13986_vm9, %v7021_v13, 0.0 }
 0x79e   : > { %v15049_v28 = vadd.f32 %v7375_v45, %v7287_v52  ;;  %v7023_v52 = vld [vmem:[#allocation4 + $0x87] sm:$0xff] }
 0x7a1   : > { %v6925_v54 = vpop.f32.mrf.mxu1 }
 0x7a2   : > { %v6839_v42 = vpop.f32.mrf.mxu0  ;;  %v6926_v31 = vadd.f32 %v6925_v54, %v6837_v47 }
 0x7a3   : > { %v15052_v35 = vpop.f32.mrf.mxu2  ;;  %v15054_v15 = vpop.f32.mrf.mxu3  ;;  %v6840_v48 = vadd.f32 %v6839_v42, %v14924_v20 }
 0x7a4   : > { %7000 = vst [vmem:[#allocation5 + $0xd0] sm:$0xff] %v6926_v31 }
 0x7a5   : > { %7458 = vmatmul.bf16.gmra.mxu0 %v14540_v16 }
 0x7a8   : > { %7330 = vmatmul.bf16.gmra.mxu2 %v14668_v32  ;;  %7419 = vmatmul.bf16.gmra.mxu3 %v16845_v34  ;;  %v12471_v32 = vld [vmem:[%s16164_s7 + $0x78] sm:$0xff] }
 0x7a9   : > { %v6928_v60 = vpop.f32.mrf.mxu1  ;;  %8535 = vmatpush.bf16.msra.mxu2 %v12471_v32  ;;  %v12479_v32 = vld [vmem:[%s16164_s7 + $0xb8] sm:$0xff] }
 0x7aa   : > { %v6841_v38 = vpop.f32.mrf.mxu0  ;;  %v6929_v2 = vadd.f32 %v6928_v60, %v6840_v48  ;;  %8624 = vmatpush.bf16.msra.mxu3 %v12479_v32 }
 0x7ab   : > { %v7291_v56 = vpop.f32.mrf.mxu2  ;;  %v7380_v16 = vpop.f32.mrf.mxu3  ;;  %v6842_v20 = vadd.f32 %v6841_v38, %v14929_v30  ;;  %v7087_v30 = vsel %vm14008_vm10, %v7023_v52, 0.0  ;;  %v12470_v38 = vld [vmem:[%s16164_s7 + $0x70] sm:$0xff] }
 0x7ac   : > { %7001 = vst [vmem:[#allocation5 + $0xd8] sm:$0xff] %v6929_v2  ;;  %v7292_v37 = vadd.f32 %v7291_v56, %v7085_v29  ;;  %v12469_v2 = vld [vmem:[%s16164_s7 + $0x68] sm:$0xff] }
 0x7ad   : > { %8536 = vmatpush.bf16.msra.mxu2 %v12470_v38  ;;  %v12466_v38 = vld [vmem:[%s16164_s7 + $0x50] sm:$0xff] }
 0x7ae   : > { %v15065_v59 = vadd.f32 %v7380_v16, %v7292_v37 }
 0x7b1   : > { %v6930_v34 = vpop.f32.mrf.mxu1  ;;  %8537 = vmatpush.bf16.msra.mxu2 %v12469_v2 }
 0x7b2   : > { %v6844_v24 = vpop.f32.mrf.mxu0  ;;  %v6931_v8 = vadd.f32 %v6930_v34, %v6842_v20  ;;  %v11546_v20 = vld [vmem:[#allocation3] sm:$0xf] }
 0x7b3   : > { %v15071_v61 = vpop.f32.mrf.mxu2  ;;  %v15073_v49 = vpop.f32.mrf.mxu3  ;;  %v6845_v45 = vadd.f32 %v6844_v24, %v14939_v41  ;;  %v7025_v24 = vld [vmem:[#allocation4 + $0x97] sm:$0xff] }
 0x7b4   : > { %7002 = vst [vmem:[#allocation5 + $0xe0] sm:$0xff] %v6931_v8  ;;  %v12409_v8 = vld [vmem:[#allocation3 + $0x14] sm:$0xf0] }
 0x7b5   : > { %7463 = vmatmul.bf16.gmra.mxu0 %v14570_v5  ;;  %v15100_v52 = vor.u32 %v12409_v8, %v11546_v20  ;;  %v15124_v20 = vld [vmem:[%s16163_s6] ss:$0 sm:$0xff] }
 0x7b7   : > { %8454 = vmatmul.bf16.vlgmr.msrb.gmra.mxu1 %v15100_v52 }
 0x7b9   : > { %v6933_v47 = vpop.f32.mrf.mxu1 }
 0x7ba   : > { %v6846_v54 = vpop.f32.mrf.mxu0  ;;  %v6934_v42 = vadd.f32 %v6933_v47, %v6845_v45 }
 0x7bb   : > { %v7296_v17 = vpop.f32.mrf.mxu2  ;;  %v7385_v48 = vpop.f32.mrf.mxu3  ;;  %v6847_v5 = vadd.f32 %v6846_v54, %v14944_v3  ;;  %v12468_v3 = vld [vmem:[%s16164_s7 + $0x60] sm:$0xff] }
 0x7bc   : > { %7003 = vst [vmem:[#allocation5 + $0xe8] sm:$0xff] %v6934_v42  ;;  %v7297_v13 = vadd.f32 %v7296_v17, %v7087_v30  ;;  %8538 = vmatpush.bf16.msra.mxu2 %v12468_v3  ;;  %v7089_v30 = vsel %vm14025_vm11, %v7025_v24, 0.0 }
 0x7be   : > { %v15079_v60 = vadd.f32 %v7385_v48, %v7297_v13 }
 0x7c1   : > { %v6935_v41 = vpop.f32.mrf.mxu1 }
 0x7c2   : > { %v6849_v29 = vpop.f32.mrf.mxu0  ;;  %v6936_v56 = vadd.f32 %v6935_v41, %v6847_v5  ;;  %v12519_v5 = vld [vmem:[%s16164_s7 + $0x1f8] sm:$0xff] }
 0x7c3   : > { %v15088_v16 = vpop.f32.mrf.mxu2  ;;  %v15090_v37 = vpop.f32.mrf.mxu3  ;;  %v6850_v34 = vadd.f32 %v6849_v29, %v14954_v0  ;;  %9042 = vmatpush.bf16.msra.mxu1 %v12519_v5  ;;  %v12465_v29 = vld [vmem:[%s16164_s7 + $0x48] sm:$0xff] }
 0x7c4   : > { %7004 = vst [vmem:[#allocation5 + $0xf0] sm:$0xff] %v6936_v56 }
 0x7c5   : > { %7468 = vmatmul.bf16.gmra.mxu0 %v14600_v6  ;;  %v12467_v6 = vld [vmem:[%s16164_s7 + $0x58] sm:$0xff] }
 0x7c6   : > { %8539 = vmatpush.bf16.msra.mxu2 %v12467_v6  ;;  %v12478_v6 = vld [vmem:[%s16164_s7 + $0xb0] sm:$0xff] }
 0x7c7   : > { %8625 = vmatpush.bf16.msra.mxu3 %v12478_v6 }
 0x7c9   : > { %v6938_v45 = vpop.f32.mrf.mxu1 }
 0x7ca   : > { %v6851_v47 = vpop.f32.mrf.mxu0  ;;  %v6939_v54 = vadd.f32 %v6938_v45, %v6850_v34  ;;  %8540 = vmatpush.bf16.msra.mxu2 %v12466_v38 }
 0x7cb   : > { %v7301_v17 = vpop.f32.mrf.mxu2  ;;  %v7390_v48 = vpop.f32.mrf.mxu3  ;;  %v6852_v41 = vadd.f32 %v6851_v47, %v14959_v44  ;;  %v7039_v44 = vld [vmem:[#allocation5 + $0x9] sm:$0xff]  ;;  %v7027_v47 = vld [vmem:[#allocation4 + $0xa7] sm:$0xff] }
 0x7cc   : > { %7005 = vst [vmem:[#allocation5 + $0xf8] sm:$0xff] %v6939_v54  ;;  %v7302_v0 = vadd.f32 %v7301_v17, %v7089_v30  ;;  %v7040_v30 = vld [vmem:[#allocation5 + $0x11] sm:$0xff]  ;;  %v7091_v5 = vsel %vm14048_vm12, %v7027_v47, 0.0  ;;  %v12475_v47 = vld [vmem:[%s16164_s7 + $0x98] sm:$0xff] }
 0x7ce   : > { %v15108_v13 = vadd.f32 %v7390_v48, %v7302_v0  ;;  %8541 = vmatpush.bf16.msra.mxu2 %v12465_v29 }
 0x7d1   : > { %v6940_v2 = vpop.f32.mrf.mxu1 }
 0x7d2   : > { %v6941_v56 = vadd.f32 %v6940_v2, %v6852_v41  ;;  %v7434_v3 = vpop.f32.mrf.mxu0 }
 0x7d3   : > { %v7435_v32 = vadd.f32 %v7434_v3, %v14969_v14  ;;  %v15126_v34 = vpop.f32.mrf.mxu2  ;;  %v15128_v24 = vpop.f32.mrf.mxu3  ;;  %v12464_v14 = vld [vmem:[%s16164_s7 + $0x40] sm:$0xff]  ;;  %v7515_v3 = vsel %vm14196_vm0, %v7040_v30, 0.0 }
 0x7d4   : > { %7006 = vst [vmem:[#allocation5 + $0x100] sm:$0xff] %v6941_v56  ;;  %8542 = vmatpush.bf16.msra.mxu2 %v12464_v14  ;;  %v12511_v14 = vld [vmem:[%s16164_s7 + $0x1b8] sm:$0xff] }
 0x7d5   : > { %v7546_v8 = vadd.f32 %v7435_v32, %v7039_v44  ;;  %7473 = vmatmul.bf16.gmra.mxu0 %v14642_v27  ;;  %v12477_v27 = vld [vmem:[%s16164_s7 + $0xa8] sm:$0xff] }
 0x7d6   : > { %8626 = vmatpush.bf16.msra.mxu3 %v12477_v27  ;;  %8953 = vmatpush.bf16.msra.mxu0 %v12511_v14 }
 0x7d7   : > { %v7582_v45 = vadd.f32 %v15124_v20, %v7546_v8 }
 0x7d9   : > { %vm7614_vm1 = vcmp.gt.f32.partialorder %v7582_v45, 0.0  ;;  %v7646_v54 = vmul.f32 0.2, %v7582_v45 }
 0x7da   : > { %v7436_v17 = vpop.f32.mrf.mxu0 }
 0x7db   : > { %v7678_v48 = vsel %vm7614_vm1, %v7582_v45, %v7646_v54  ;;  %v7437_v0 = vadd.f32 %v7436_v17, %v14973_v36  ;;  %v7306_v41 = vpop.f32.mrf.mxu2  ;;  %v7395_v2 = vpop.f32.mrf.mxu3  ;;  %v12476_v36 = vld [vmem:[%s16164_s7 + $0xa0] sm:$0xff] }
 0x7dc   : > { %v7710_v29 = vpack.c.bf16 %v7678_v48, %v7678_v48  ;;  %v7307_v32 = vadd.f32 %v7306_v41, %v7091_v5  ;;  %8627 = vmatpush.bf16.msra.mxu3 %v12476_v36  ;;  %v7041_v5 = vld [vmem:[#allocation5 + $0x19] sm:$0xff] }
 0x7dd   : > { %v7547_v44 = vadd.f32 %v7515_v3, %v7437_v0  ;;  %v12474_v3 = vld [vmem:[%s16164_s7 + $0x90] sm:$0xff] }
 0x7de   : > { %7742 = vst [vmem:[#allocation2 + $0xf8] sm:$0xf] %v7710_v29  ;;  %v15146_v8 = vadd.f32 %v7395_v2, %v7307_v32 }
 0x7df   : > { %7774 = vst [vmem:[#allocation3 + $0x4] sm:$0xf] %v7710_v29  ;;  %v7583_v45 = vadd.f32 %v15124_v20, %v7547_v44  ;;  %v7042_v44 = vld [vmem:[#allocation5 + $0x21] sm:$0xff] }
 0x7e0   : > { %8628 = vmatpush.bf16.msra.mxu3 %v12475_v47 }
 0x7e1   : > { %vm7615_vm1 = vcmp.gt.f32.partialorder %v7583_v45, 0.0  ;;  %v7647_v6 = vmul.f32 0.2, %v7583_v45 }
 0x7e2   : > { %v7439_v54 = vpop.f32.mrf.mxu0 }
 0x7e3   : > { %v7679_v30 = vsel %vm7615_vm1, %v7583_v45, %v7647_v6  ;;  %v7440_v27 = vadd.f32 %v7439_v54, %v14984_v12  ;;  %v15159_v17 = vpop.f32.mrf.mxu2  ;;  %v15161_v48 = vpop.f32.mrf.mxu3  ;;  %v7029_v12 = vld [vmem:[#allocation4 + $0xb7] sm:$0xff] }
 0x7e4   : > { %v7711_v0 = vpack.c.bf16 %v7679_v30, %v7679_v30  ;;  %8629 = vmatpush.bf16.msra.mxu3 %v12474_v3  ;;  %v7093_v47 = vsel %vm14065_vm13, %v7029_v12, 0.0  ;;  %v12472_v12 = vld [vmem:[%s16164_s7 + $0x80] sm:$0xff] }
 0x7e5   : > { %v7548_v41 = vadd.f32 %v7440_v27, %v7041_v5  ;;  %7478 = vmatmul.bf16.gmra.mxu0 %v14674_v4  ;;  %v7808_v2 = vld [vmem:[#allocation2 + $0xf8] sm:$0xf]  ;;  %v12473_v4 = vld [vmem:[%s16164_s7 + $0x88] sm:$0xff]  ;;  %v7517_v5 = vsel %vm14215_vm15, %v7042_v44, 0.0  ;;  %v12518_v44 = vld [vmem:[%s16164_s7 + $0x1f0] sm:$0xff] }
 0x7e6   : > { %7743 = vst [vmem:[#allocation2 + $0x58] sm:$0xf] %v7711_v0  ;;  %v12408_v42 = vld [vmem:[#allocation3 + $0x4] sm:$0xf]  ;;  %9043 = vmatpush.bf16.msra.mxu1 %v12518_v44 }
 0x7e7   : > { %7775 = vst [vmem:[#allocation3 + $0x1c] sm:$0xf] %v7711_v0  ;;  %v7584_v29 = vadd.f32 %v15124_v20, %v7548_v41  ;;  %v7044_v44 = vld [vmem:[#allocation5 + $0x31] sm:$0xff] }
 0x7e8   : > { %7840 = vst [vmem:[#allocation3 + $0x30] sm:$0xf] %v7808_v2  ;;  %8630 = vmatpush.bf16.msra.mxu3 %v12473_v4 }
 0x7e9   : > { %vm7616_vm1 = vcmp.gt.f32.partialorder %v7584_v29, 0.0  ;;  %v7648_v32 = vmul.f32 0.2, %v7584_v29 }
 0x7ea   : > { %v7441_v45 = vpop.f32.mrf.mxu0 }
 0x7eb   : > { %v7680_v36 = vsel %vm7616_vm1, %v7584_v29, %v7648_v32  ;;  %v7442_v14 = vadd.f32 %v7441_v45, %v14988_v22  ;;  %v7311_v54 = vpop.f32.mrf.mxu2  ;;  %v7400_v30 = vpop.f32.mrf.mxu3 }
 0x7ec   : > { %v7712_v27 = vpack.c.bf16 %v7680_v36, %v7680_v36  ;;  %v7312_v41 = vadd.f32 %v7311_v54, %v7093_v47  ;;  %8631 = vmatpush.bf16.msra.mxu3 %v12472_v12 }
 0x7ed   : > { %v7549_v2 = vadd.f32 %v7517_v5, %v7442_v14  ;;  %v7809_v3 = vld [vmem:[#allocation2 + $0x58] sm:$0xf] }
 0x7ee   : > { %7744 = vst [vmem:[#allocation2 + $0x20] sm:$0xf] %v7712_v27  ;;  %v15176_v38 = vadd.f32 %v7400_v30, %v7312_v41  ;;  %v11548_v29 = vld [vmem:[#allocation3 + $0x18] sm:$0xf0] }
 0x7ef   : > { %7776 = vst [vmem:[#allocation3 + $0x34] sm:$0xf] %v7712_v27  ;;  %v7585_v22 = vadd.f32 %v15124_v20, %v7549_v2  ;;  %v15179_v32 = vor.u32 %v12408_v42, %v11548_v29  ;;  %v7043_v30 = vld [vmem:[#allocation5 + $0x29] sm:$0xff] }
 0x7f0   : > { %7841 = vst [vmem:[#allocation3 + $0x48] sm:$0xf] %v7809_v3  ;;  %v11558_v3 = vld [vmem:[#allocation3 + $0x30] sm:$0xf] }
 0x7f1   : > { %vm7617_vm1 = vcmp.gt.f32.partialorder %v7585_v22, 0.0  ;;  %v7649_v4 = vmul.f32 0.2, %v7585_v22  ;;  %8543 = vmatmul.bf16.vlgmr.msra.gmra.mxu2 %v15179_v32 }
 0x7f2   : > { %v7444_v45 = vpop.f32.mrf.mxu0 }
 0x7f3   : > { %v7681_v36 = vsel %vm7617_vm1, %v7585_v22, %v7649_v4  ;;  %v7445_v42 = vadd.f32 %v7444_v45, %v14995_v1  ;;  %v15189_v14 = vpop.f32.mrf.mxu2  ;;  %v15191_v47 = vpop.f32.mrf.mxu3  ;;  %v7031_v1 = vld [vmem:[#allocation4 + $0xc7] sm:$0xff] }
 0x7f4   : > { %v7713_v54 = vpack.c.bf16 %v7681_v36, %v7681_v36  ;;  %v16869_v36 = vld [vmem:[#allocation72_spill] sm:$0xff] }
 0x7f5   : > { %v7550_v27 = vadd.f32 %v7445_v42, %v7043_v30  ;;  %7483 = vmatmul.bf16.gmra.mxu0 %v14698_v7  ;;  %v7810_v5 = vld [vmem:[#allocation2 + $0x20] sm:$0xf]  ;;  %vm16870_vm13 = vnez %v16869_v36 }
 0x7f6   : > { %7745 = vst [vmem:[#allocation2 + $0x118] sm:$0xf] %v7713_v54  ;;  %v7870_v41 = vld [vmem:[#allocation2 + $0x20] sm:$0xf]  ;;  %v7095_v42 = vsel %vm16870_vm13, %v7031_v1, 0.0  ;;  %v12510_v1 = vld [vmem:[%s16164_s7 + $0x1b0] sm:$0xff] }
 0x7f7   : > { %7777 = vst [vmem:[#allocation3 + $0x4c] sm:$0xf] %v7713_v54  ;;  %v7586_v2 = vadd.f32 %v15124_v20, %v7550_v27  ;;  %v12412_v29 = vld [vmem:[#allocation3 + $0x44] sm:$0xf0]  ;;  %v12411_v31 = vld [vmem:[#allocation3 + $0x34] sm:$0xf]  ;;  %8954 = vmatpush.bf16.msra.mxu0 %v12510_v1 }
 0x7f8   : > { %v15195_v22 = vor.u32 %v12412_v29, %v11558_v3  ;;  %7842 = vst [vmem:[#allocation3 + $0x60] sm:$0xf] %v7810_v5  ;;  %v16871_v3 = vld [vmem:[#allocation29_spill] sm:$0xff]  ;;  %v16876_v36 = vld [vmem:[#allocation30_spill] sm:$0xff] }
 0x7f9   : > { %vm7618_vm1 = vcmp.gt.f32.partialorder %v7586_v2, 0.0  ;;  %v7650_v12 = vmul.f32 0.2, %v7586_v2  ;;  %7902 = vst [vmem:[#allocation3 + $0x8] sm:$0xf] %v7870_v41  ;;  %vm16872_vm12 = vnez %v16871_v3  ;;  %vm16877_vm11 = vnez %v16876_v36 }
 0x7fa   : > { %8459 = vmatmul.bf16.gmra.mxu1 %v15195_v22  ;;  %v7446_v4 = vpop.f32.mrf.mxu0  ;;  %v7519_v29 = vsel %vm16872_vm12, %v7044_v44, 0.0 }
 0x7fb   : > { %v7682_v7 = vsel %vm7618_vm1, %v7586_v2, %v7650_v12  ;;  %v7447_v45 = vadd.f32 %v7446_v4, %v14999_v21  ;;  %v7316_v54 = vpop.f32.mrf.mxu2  ;;  %v7405_v30 = vpop.f32.mrf.mxu3 }
 0x7fc   : > { %v7714_v27 = vpack.c.bf16 %v7682_v7, %v7682_v7  ;;  %v7317_v5 = vadd.f32 %v7316_v54, %v7095_v42 }
 0x7fd   : > { %v7551_v6 = vadd.f32 %v7519_v29, %v7447_v45  ;;  %v7811_v50 = vld [vmem:[#allocation2 + $0x118] sm:$0xf] }
 0x7fe   : > { %7746 = vst [vmem:[#allocation2 + $0x70] sm:$0xf] %v7714_v27  ;;  %v15203_v41 = vadd.f32 %v7405_v30, %v7317_v5  ;;  %v11560_v26 = vld [vmem:[#allocation3 + $0x48] sm:$0xf0]  ;;  %v7871_v2 = vld [vmem:[#allocation2 + $0x118] sm:$0xf] }
 0x7ff   : > { %7778 = vst [vmem:[#allocation3 + $0x64] sm:$0xf] %v7714_v27  ;;  %v7587_v21 = vadd.f32 %v15124_v20, %v7551_v6  ;;  %v15206_v12 = vor.u32 %v12411_v31, %v11560_v26  ;;  %v7045_v31 = vld [vmem:[#allocation5 + $0x39] sm:$0xff]  ;;  %v7033_v30 = vld [vmem:[#allocation4 + $0xd7] sm:$0xff]  ;;  %v11570_v5 = vld [vmem:[#allocation3 + $0x60] sm:$0xf] }
 0x800   : > { %7843 = vst [vmem:[#allocation3 + $0x78] sm:$0xf] %v7811_v50 }
 0x801   : > { %vm7619_vm1 = vcmp.gt.f32.partialorder %v7587_v21, 0.0  ;;  %v7651_v44 = vmul.f32 0.2, %v7587_v21  ;;  %8548 = vmatmul.bf16.gmra.mxu2 %v15206_v12  ;;  %7903 = vst [vmem:[#allocation3 + $0x20] sm:$0xf] %v7871_v2 }
 0x802   : > { %v7449_v4 = vpop.f32.mrf.mxu0 }
 0x803   : > { %v7683_v7 = vsel %vm7619_vm1, %v7587_v21, %v7651_v44  ;;  %v7450_v45 = vadd.f32 %v7449_v4, %v15009_v39  ;;  %v15213_v42 = vpop.f32.mrf.mxu2  ;;  %v15215_v6 = vpop.f32.mrf.mxu3  ;;  %v11554_v39 = vld [vmem:[#allocation3 + $0x8] sm:$0xf] }
 0x804   : > { %v7715_v26 = vpack.c.bf16 %v7683_v7, %v7683_v7  ;;  %v7046_v7 = vld [vmem:[#allocation5 + $0x41] sm:$0xff] }
 0x805   : > { %v7552_v54 = vadd.f32 %v7450_v45, %v7045_v31  ;;  %7488 = vmatmul.bf16.gmra.mxu0 %v14717_v46  ;;  %v7812_v50 = vld [vmem:[#allocation2 + $0x70] sm:$0xf] }
 0x806   : > { %7747 = vst [vmem:[#allocation2 + $0x100] sm:$0xf] %v7715_v26  ;;  %v7872_v27 = vld [vmem:[#allocation2 + $0x70] sm:$0xf] }
 0x807   : > { %7779 = vst [vmem:[#allocation3 + $0x7c] sm:$0xf] %v7715_v26  ;;  %v7588_v29 = vadd.f32 %v15124_v20, %v7552_v54  ;;  %v12415_v2 = vld [vmem:[#allocation3 + $0x74] sm:$0xf0] }
 0x808   : > { %v15219_v21 = vor.u32 %v12415_v2, %v11570_v5  ;;  %v12410_v1 = vld [vmem:[#allocation3 + $0x1c] sm:$0xf0]  ;;  %7844 = vst [vmem:[#allocation3 + $0x90] sm:$0xf] %v7812_v50  ;;  %v16874_v31 = vld [vmem:[#allocation13_spill] sm:$0xff] }
 0x809   : > { %vm7620_vm1 = vcmp.gt.f32.partialorder %v7588_v29, 0.0  ;;  %v7652_v44 = vmul.f32 0.2, %v7588_v29  ;;  %v15221_v4 = vor.u32 %v12410_v1, %v11554_v39  ;;  %7904 = vst [vmem:[#allocation3 + $0x38] sm:$0xf] %v7872_v27  ;;  %vm16875_vm13 = vnez %v16874_v31 }
 0x80a   : > { %8464 = vmatmul.bf16.gmra.mxu1 %v15219_v21  ;;  %v7451_v46 = vpop.f32.mrf.mxu0  ;;  %v7097_v54 = vsel %vm16875_vm13, %v7033_v30, 0.0  ;;  %v7521_v39 = vsel %vm16877_vm11, %v7046_v7, 0.0  ;;  %v12414_v27 = vld [vmem:[#allocation3 + $0x64] sm:$0xf]  ;;  %v12517_v30 = vld [vmem:[%s16164_s7 + $0x1e8] sm:$0xff] }
 0x80b   : > { %16873 = vst [vmem:[#allocation83_spill] sm:$0xff] %v15221_v4  ;;  %v7684_v45 = vsel %vm7620_vm1, %v7588_v29, %v7652_v44  ;;  %8632 = vmatmul.bf16.vlgmr.msra.gmra.mxu3 %v15221_v4  ;;  %v7452_v26 = vadd.f32 %v7451_v46, %v15013_v25  ;;  %v7321_v5 = vpop.f32.mrf.mxu2  ;;  %v7410_v2 = vpop.f32.mrf.mxu3  ;;  %9044 = vmatpush.bf16.msra.mxu1 %v12517_v30 }
 0x80c   : > { %v7716_v50 = vpack.c.bf16 %v7684_v45, %v7684_v45  ;;  %v7322_v1 = vadd.f32 %v7321_v5, %v7097_v54 }
 0x80d   : > { %v7553_v51 = vadd.f32 %v7521_v39, %v7452_v26  ;;  %v7813_v55 = vld [vmem:[#allocation2 + $0x100] sm:$0xf] }
 0x80e   : > { %7748 = vst [vmem:[#allocation2 + $0x108] sm:$0xf] %v7716_v50  ;;  %v15230_v40 = vadd.f32 %v7410_v2, %v7322_v1  ;;  %v11572_v29 = vld [vmem:[#allocation3 + $0x78] sm:$0xf0]  ;;  %v7873_v44 = vld [vmem:[#allocation2 + $0x100] sm:$0xf] }
 0x80f   : > { %7780 = vst [vmem:[#allocation3 + $0x94] sm:$0xf] %v7716_v50  ;;  %v7589_v25 = vadd.f32 %v15124_v20, %v7553_v51  ;;  %v15233_v46 = vor.u32 %v12414_v27, %v11572_v29  ;;  %v7016_v2 = vld [vmem:[#allocation4 + $0x4f] sm:$0xff]  ;;  %v7047_v39 = vld [vmem:[#allocation5 + $0x49] sm:$0xff]  ;;  %v7035_v29 = vld [vmem:[#allocation4 + $0xe7] sm:$0xff] }
 0x810   : > { %7845 = vst [vmem:[#allocation3 + $0xa8] sm:$0xf] %v7813_v55  ;;  %v7279_v1 = vadd.f32 %v15023_v10, %v7016_v2 }
 0x811   : > { %vm7621_vm1 = vcmp.gt.f32.partialorder %v7589_v25, 0.0  ;;  %v7653_v7 = vmul.f32 0.2, %v7589_v25  ;;  %8553 = vmatmul.bf16.gmra.mxu2 %v15233_v46  ;;  %7905 = vst [vmem:[#allocation3 + $0x50] sm:$0xf] %v7873_v44 }
 0x812   : > { %v7454_v45 = vpop.f32.mrf.mxu0 }
 0x813   : > { %v7685_v26 = vsel %vm7621_vm1, %v7589_v25, %v7653_v7  ;;  %v7455_v54 = vadd.f32 %v7454_v45, %v15020_v9  ;;  %v15240_v5 = vpop.f32.mrf.mxu2  ;;  %v15242_v51 = vpop.f32.mrf.mxu3  ;;  %v11582_v9 = vld [vmem:[#allocation3 + $0x90] sm:$0xf]  ;;  %v11566_v45 = vld [vmem:[#allocation3 + $0x38] sm:$0xf] }
 0x814   : > { %v7717_v50 = vpack.c.bf16 %v7685_v26, %v7685_v26  ;;  %v7368_v26 = vadd.f32 %v15025_v43, %v7279_v1  ;;  %v16881_v43 = vld [vmem:[#allocation32_spill] sm:$0xff] }
 0x815   : > { %v7554_v55 = vadd.f32 %v7455_v54, %v7047_v39  ;;  %7493 = vmatmul.bf16.gmra.mxu0 %v14739_v18  ;;  %v7814_v27 = vld [vmem:[#allocation2 + $0x108] sm:$0xf]  ;;  %vm16882_vm10 = vnez %v16881_v43  ;;  %v16886_v43 = vld [vmem:[#allocation33_spill] sm:$0xff] }
 0x816   : > { %7749 = vst [vmem:[#allocation2 + $0x88] sm:$0xf] %v7717_v50  ;;  %v7874_v44 = vld [vmem:[#allocation2 + $0x108] sm:$0xf]  ;;  %v12417_v3 = vld [vmem:[#allocation3 + $0x94] sm:$0xf]  ;;  %vm16887_vm9 = vnez %v16886_v43 }
 0x817   : > { %7781 = vst [vmem:[#allocation3 + $0xac] sm:$0xf] %v7717_v50  ;;  %v7590_v25 = vadd.f32 %v15124_v20, %v7554_v55  ;;  %v12418_v30 = vld [vmem:[#allocation3 + $0xa4] sm:$0xf0]  ;;  %v16879_v55 = vld [vmem:[#allocation18_spill] sm:$0xff] }
 0x818   : > { %v15247_v7 = vor.u32 %v12418_v30, %v11582_v9  ;;  %v12413_v31 = vld [vmem:[#allocation3 + $0x4c] sm:$0xf0]  ;;  %7846 = vst [vmem:[#allocation3 + $0xc0] sm:$0xf] %v7814_v27  ;;  %v7048_v18 = vld [vmem:[#allocation5 + $0x51] sm:$0xff]  ;;  %vm16880_vm13 = vnez %v16879_v55 }
 0x819   : > { %vm7622_vm1 = vcmp.gt.f32.partialorder %v7590_v25, 0.0  ;;  %v7654_v10 = vmul.f32 0.2, %v7590_v25  ;;  %v15250_v54 = vor.u32 %v12413_v31, %v11566_v45  ;;  %7906 = vst [vmem:[#allocation3 + $0x68] sm:$0xf] %v7874_v44  ;;  %v7099_v9 = vsel %vm16880_vm13, %v7035_v29, 0.0 }
 0x81a   : > { %8469 = vmatmul.bf16.gmra.mxu1 %v15247_v7  ;;  %v7456_v2 = vpop.f32.mrf.mxu0  ;;  %v7523_v1 = vsel %vm16882_vm10, %v7048_v18, 0.0  ;;  %v12509_v29 = vld [vmem:[%s16164_s7 + $0x1a8] sm:$0xff] }
 0x81b   : > { %16878 = vst [vmem:[#allocation85_spill] sm:$0xff] %v15250_v54  ;;  %v7686_v50 = vsel %vm7622_vm1, %v7590_v25, %v7654_v10  ;;  %8637 = vmatmul.bf16.gmra.mxu3 %v15250_v54  ;;  %v7457_v39 = vadd.f32 %v7456_v2, %v7368_v26  ;;  %v7326_v30 = vpop.f32.mrf.mxu2  ;;  %v7415_v27 = vpop.f32.mrf.mxu3  ;;  %8955 = vmatpush.bf16.msra.mxu0 %v12509_v29 }
 0x81c   : > { %v7718_v36 = vpack.c.bf16 %v7686_v50, %v7686_v50  ;;  %v7327_v31 = vadd.f32 %v7326_v30, %v7099_v9 }
 0x81d   : > { %v7555_v45 = vadd.f32 %v7523_v1, %v7457_v39  ;;  %v7815_v44 = vld [vmem:[#allocation2 + $0x88] sm:$0xf] }
 0x81e   : > { %7750 = vst [vmem:[#allocation2 + $0xe8] sm:$0xf] %v7718_v36  ;;  %v15258_v0 = vadd.f32 %v7415_v27, %v7327_v31  ;;  %v11584_v25 = vld [vmem:[#allocation3 + $0xa8] sm:$0xf0]  ;;  %v7875_v10 = vld [vmem:[#allocation2 + $0x88] sm:$0xf] }
 0x81f   : > { %7782 = vst [vmem:[#allocation3 + $0xc4] sm:$0xf] %v7718_v36  ;;  %v7591_v26 = vadd.f32 %v15124_v20, %v7555_v45  ;;  %v15261_v2 = vor.u32 %v12417_v3, %v11584_v25  ;;  %v7018_v3 = vld [vmem:[#allocation4 + $0x5f] sm:$0xff]  ;;  %v7049_v1 = vld [vmem:[#allocation5 + $0x59] sm:$0xff]  ;;  %v7037_v25 = vld [vmem:[#allocation4 + $0xf7] sm:$0xff] }
 0x820   : > { %7847 = vst [vmem:[#allocation3 + $0xd8] sm:$0xf] %v7815_v44  ;;  %v7284_v31 = vadd.f32 %v15039_v53, %v7018_v3 }
 0x821   : > { %vm7623_vm1 = vcmp.gt.f32.partialorder %v7591_v26, 0.0  ;;  %v7655_v18 = vmul.f32 0.2, %v7591_v26  ;;  %8558 = vmatmul.bf16.gmra.mxu2 %v15261_v2  ;;  %7907 = vst [vmem:[#allocation3 + $0x80] sm:$0xf] %v7875_v10 }
 0x822   : > { %v7459_v50 = vpop.f32.mrf.mxu0 }
 0x823   : > { %v7687_v39 = vsel %vm7623_vm1, %v7591_v26, %v7655_v18  ;;  %v7460_v9 = vadd.f32 %v7459_v50, %v15036_v19  ;;  %v15268_v36 = vpop.f32.mrf.mxu2  ;;  %v15270_v30 = vpop.f32.mrf.mxu3  ;;  %v11594_v19 = vld [vmem:[#allocation3 + $0xc0] sm:$0xf]  ;;  %v11578_v50 = vld [vmem:[#allocation3 + $0x68] sm:$0xf] }
 0x824   : > { %v7719_v27 = vpack.c.bf16 %v7687_v39, %v7687_v39  ;;  %v7373_v39 = vadd.f32 %v15041_v33, %v7284_v31 }
 0x825   : > { %v7556_v45 = vadd.f32 %v7460_v9, %v7049_v1  ;;  %7498 = vmatmul.bf16.gmra.mxu0 %v16839_v62  ;;  %v7816_v44 = vld [vmem:[#allocation2 + $0xe8] sm:$0xf]  ;;  %v7050_v62 = vld [vmem:[#allocation5 + $0x61] sm:$0xff] }
 0x826   : > { %7751 = vst [vmem:[#allocation2 + $0x28] sm:$0xf] %v7719_v27  ;;  %v7876_v10 = vld [vmem:[#allocation2 + $0xe8] sm:$0xf]  ;;  %v7525_v33 = vsel %vm16887_vm9, %v7050_v62, 0.0  ;;  %v12516_v62 = vld [vmem:[%s16164_s7 + $0x1e0] sm:$0xff] }
 0x827   : > { %7783 = vst [vmem:[#allocation3 + $0xdc] sm:$0xf] %v7719_v27  ;;  %v7592_v26 = vadd.f32 %v15124_v20, %v7556_v45  ;;  %v12421_v29 = vld [vmem:[#allocation3 + $0xd4] sm:$0xf0]  ;;  %v12420_v56 = vld [vmem:[#allocation3 + $0xc4] sm:$0xf]  ;;  %9045 = vmatpush.bf16.msra.mxu1 %v12516_v62 }
 0x828   : > { %v15275_v18 = vor.u32 %v12421_v29, %v11594_v19  ;;  %v12416_v55 = vld [vmem:[#allocation3 + $0x7c] sm:$0xf0]  ;;  %7848 = vst [vmem:[#allocation3 + $0xf0] sm:$0xf] %v7816_v44 }
 0x829   : > { %vm7624_vm1 = vcmp.gt.f32.partialorder %v7592_v26, 0.0  ;;  %v7656_v53 = vmul.f32 0.2, %v7592_v26  ;;  %v15278_v9 = vor.u32 %v12416_v55, %v11578_v50  ;;  %7908 = vst [vmem:[#allocation3 + $0x98] sm:$0xf] %v7876_v10  ;;  %v16884_v45 = vld [vmem:[#allocation22_spill] sm:$0xff] }
 0x82a   : > { %8474 = vmatmul.bf16.gmra.mxu1 %v15275_v18  ;;  %v7461_v3 = vpop.f32.mrf.mxu0  ;;  %vm16885_vm13 = vnez %v16884_v45  ;;  %v16899_v45 = vld [vmem:[#allocation44_spill] sm:$0xff] }
 0x82b   : > { %16883 = vst [vmem:[#allocation86_spill] sm:$0xff] %v15278_v9  ;;  %v7688_v27 = vsel %vm7624_vm1, %v7592_v26, %v7656_v53  ;;  %8642 = vmatmul.bf16.gmra.mxu3 %v15278_v9  ;;  %v7462_v1 = vadd.f32 %v7461_v3, %v7373_v39  ;;  %v7101_v19 = vsel %vm16885_vm13, %v7037_v25, 0.0  ;;  %v7331_v29 = vpop.f32.mrf.mxu2  ;;  %v7420_v50 = vpop.f32.mrf.mxu3  ;;  %v12508_v25 = vld [vmem:[%s16164_s7 + $0x1a0] sm:$0xff] }
 0x82c   : > { %v7720_v44 = vpack.c.bf16 %v7688_v27, %v7688_v27  ;;  %v7332_v31 = vadd.f32 %v7331_v29, %v7101_v19  ;;  %8956 = vmatpush.bf16.msra.mxu0 %v12508_v25 }
 0x82d   : > { %v7557_v55 = vadd.f32 %v7525_v33, %v7462_v1  ;;  %v7817_v10 = vld [vmem:[#allocation2 + $0x28] sm:$0xf] }
 0x82e   : > { %7752 = vst [vmem:[#allocation2 + $0x8] sm:$0xf] %v7720_v44  ;;  %v15286_v11 = vadd.f32 %v7420_v50, %v7332_v31  ;;  %v11596_v26 = vld [vmem:[#allocation3 + $0xd8] sm:$0xf0]  ;;  %v7877_v53 = vld [vmem:[#allocation2 + $0x28] sm:$0xf] }
 0x82f   : > { %7784 = vst [vmem:[#allocation3 + $0xf4] sm:$0xf] %v7720_v44  ;;  %v7593_v39 = vadd.f32 %v15124_v20, %v7557_v55  ;;  %v15289_v3 = vor.u32 %v12420_v56, %v11596_v26  ;;  %v12507_v56 = vld [vmem:[%s16164_s7 + $0x198] sm:$0xff]  ;;  %v7020_v44 = vld [vmem:[#allocation4 + $0x6f] sm:$0xff] }
 0x830   : > { %7849 = vst [vmem:[#allocation3 + $0x108] sm:$0xf] %v7817_v10  ;;  %v7051_v31 = vld [vmem:[#allocation5 + $0x69] sm:$0xff]  ;;  %v7289_v55 = vadd.f32 %v15052_v35, %v7020_v44  ;;  %v11606_v26 = vld [vmem:[#allocation3 + $0xf0] sm:$0xf]  ;;  %8957 = vmatpush.bf16.msra.mxu0 %v12507_v56  ;;  %v7052_v56 = vld [vmem:[#allocation5 + $0x71] sm:$0xff] }
 0x831   : > { %vm7625_vm1 = vcmp.gt.f32.partialorder %v7593_v39, 0.0  ;;  %v7657_v27 = vmul.f32 0.2, %v7593_v39  ;;  %8563 = vmatmul.bf16.gmra.mxu2 %v15289_v3  ;;  %7909 = vst [vmem:[#allocation3 + $0xb0] sm:$0xf] %v7877_v53  ;;  %v12505_v44 = vld [vmem:[%s16164_s7 + $0x188] sm:$0xff] }
 0x832   : > { %v7464_v1 = vpop.f32.mrf.mxu0 }
 0x833   : > { %v7689_v19 = vsel %vm7625_vm1, %v7593_v39, %v7657_v27  ;;  %v7465_v29 = vadd.f32 %v7464_v1, %v15049_v28  ;;  %v12506_v28 = vld [vmem:[%s16164_s7 + $0x190] sm:$0xff]  ;;  %v11590_v27 = vld [vmem:[#allocation3 + $0x98] sm:$0xf] }
 0x834   : > { %v7721_v33 = vpack.c.bf16 %v7689_v19, %v7689_v19  ;;  %8958 = vmatpush.bf16.msra.mxu0 %v12506_v28 }
 0x835   : > { %v7558_v50 = vadd.f32 %v7465_v29, %v7051_v31  ;;  %7503 = vmatmul.bf16.gmra.mxu0 %v16844_v63  ;;  %v7818_v10 = vld [vmem:[#allocation2 + $0x8] sm:$0xf]  ;;  %v7378_v63 = vadd.f32 %v15054_v15, %v7289_v55 }
 0x836   : > { %7753 = vst [vmem:[#allocation2 + $0x68] sm:$0xf] %v7721_v33  ;;  %v7878_v53 = vld [vmem:[#allocation2 + $0x8] sm:$0xf] }
 0x837   : > { %7785 = vst [vmem:[#allocation3 + $0x10c] sm:$0xf] %v7721_v33  ;;  %v7594_v25 = vadd.f32 %v15124_v20, %v7558_v50  ;;  %v12424_v62 = vld [vmem:[#allocation3 + $0x104] sm:$0xf0] }
 0x838   : > { %v15308_v39 = vor.u32 %v12424_v62, %v11606_v26  ;;  %v12419_v35 = vld [vmem:[#allocation3 + $0xac] sm:$0xf0]  ;;  %7850 = vst [vmem:[#allocation3 + $0x120] sm:$0xf] %v7818_v10  ;;  %v16889_v15 = vld [vmem:[#allocation35_spill] sm:$0xff]  ;;  %8959 = vmatpush.bf16.msra.mxu0 %v12505_v44 }
 0x839   : > { %vm7626_vm1 = vcmp.gt.f32.partialorder %v7594_v25, 0.0  ;;  %v7658_v1 = vmul.f32 0.2, %v7594_v25  ;;  %v15311_v19 = vor.u32 %v12419_v35, %v11590_v27  ;;  %7910 = vst [vmem:[#allocation3 + $0xc8] sm:$0xf] %v7878_v53  ;;  %vm16890_vm13 = vnez %v16889_v15  ;;  %v7022_v44 = vld [vmem:[#allocation4 + $0x7f] sm:$0xff] }
 0x83a   : > { %8479 = vmatmul.bf16.gmra.mxu1 %v15308_v39  ;;  %v7466_v29 = vpop.f32.mrf.mxu0  ;;  %v7527_v55 = vsel %vm16890_vm13, %v7052_v56, 0.0  ;;  %v12423_v26 = vld [vmem:[#allocation3 + $0xf4] sm:$0xf] }
 0x83b   : > { %16888 = vst [vmem:[#allocation87_spill] sm:$0xff] %v15311_v19  ;;  %v7690_v33 = vsel %vm7626_vm1, %v7594_v25, %v7658_v1  ;;  %8647 = vmatmul.bf16.gmra.mxu3 %v15311_v19  ;;  %v7467_v31 = vadd.f32 %v7466_v29, %v7378_v63  ;;  %v12504_v25 = vld [vmem:[%s16164_s7 + $0x180] sm:$0xff] }
 0x83c   : > { %v7722_v50 = vpack.c.bf16 %v7690_v33, %v7690_v33  ;;  %8960 = vmatpush.bf16.msra.mxu0 %v12504_v25 }
 0x83d   : > { %v7559_v10 = vadd.f32 %v7527_v55, %v7467_v31  ;;  %v7819_v62 = vld [vmem:[#allocation2 + $0x68] sm:$0xf] }
 0x83e   : > { %7754 = vst [vmem:[#allocation2 + $0x10] sm:$0xf] %v7722_v50  ;;  %v11608_v53 = vld [vmem:[#allocation3 + $0x108] sm:$0xf0]  ;;  %v7879_v27 = vld [vmem:[#allocation2 + $0x68] sm:$0xf] }
 0x83f   : > { %7786 = vst [vmem:[#allocation3 + $0x124] sm:$0xf] %v7722_v50  ;;  %v7595_v28 = vadd.f32 %v15124_v20, %v7559_v10  ;;  %v15321_v35 = vor.u32 %v12423_v26, %v11608_v53  ;;  %v7053_v31 = vld [vmem:[#allocation5 + $0x79] sm:$0xff]  ;;  %v7294_v50 = vadd.f32 %v15071_v61, %v7022_v44  ;;  %v11618_v53 = vld [vmem:[#allocation3 + $0x120] sm:$0xf] }
 0x840   : > { %7851 = vst [vmem:[#allocation3 + $0x138] sm:$0xf] %v7819_v62 }
 0x841   : > { %vm7627_vm1 = vcmp.gt.f32.partialorder %v7595_v28, 0.0  ;;  %v7659_v63 = vmul.f32 0.2, %v7595_v28  ;;  %8568 = vmatmul.bf16.gmra.mxu2 %v15321_v35  ;;  %7911 = vst [vmem:[#allocation3 + $0xe0] sm:$0xf] %v7879_v27 }
 0x842   : > { %v7469_v1 = vpop.f32.mrf.mxu0 }
 0x843   : > { %v7691_v56 = vsel %vm7627_vm1, %v7595_v28, %v7659_v63  ;;  %v7470_v29 = vadd.f32 %v7469_v1, %v15065_v59  ;;  %v11602_v28 = vld [vmem:[#allocation3 + $0xc8] sm:$0xf]  ;;  %v7383_v63 = vadd.f32 %v15073_v49, %v7294_v50 }
 0x844   : > { %v7723_v33 = vpack.c.bf16 %v7691_v56, %v7691_v56 }
 0x845   : > { %v7560_v55 = vadd.f32 %v7470_v29, %v7053_v31  ;;  %7508 = vmatmul.bf16.gmra.mxu0 %v14822_v58  ;;  %v7820_v10 = vld [vmem:[#allocation2 + $0x10] sm:$0xf] }
 0x846   : > { %7755 = vst [vmem:[#allocation2 + $0xb8] sm:$0xf] %v7723_v33  ;;  %v7880_v26 = vld [vmem:[#allocation2 + $0x10] sm:$0xf] }
 0x847   : > { %7787 = vst [vmem:[#allocation3 + $0x13c] sm:$0xf] %v7723_v33  ;;  %v7596_v62 = vadd.f32 %v15124_v20, %v7560_v55  ;;  %v12427_v27 = vld [vmem:[#allocation3 + $0x134] sm:$0xf0] }
 0x848   : > { %v15331_v25 = vor.u32 %v12427_v27, %v11618_v53  ;;  %v12422_v59 = vld [vmem:[#allocation3 + $0xdc] sm:$0xf0]  ;;  %7852 = vst [vmem:[#allocation3 + $0x150] sm:$0xf] %v7820_v10  ;;  %v7054_v58 = vld [vmem:[#allocation5 + $0x81] sm:$0xff] }
 0x849   : > { %vm7628_vm1 = vcmp.gt.f32.partialorder %v7596_v62, 0.0  ;;  %v7660_v61 = vmul.f32 0.2, %v7596_v62  ;;  %v15334_v1 = vor.u32 %v12422_v59, %v11602_v28  ;;  %7912 = vst [vmem:[#allocation3 + $0xf8] sm:$0xf] %v7880_v26  ;;  %v16892_v31 = vld [vmem:[#allocation37_spill] sm:$0xff] }
 0x84a   : > { %8484 = vmatmul.bf16.gmra.mxu1 %v15331_v25  ;;  %v7471_v56 = vpop.f32.mrf.mxu0  ;;  %vm16893_vm13 = vnez %v16892_v31  ;;  %v12426_v53 = vld [vmem:[#allocation3 + $0x124] sm:$0xf] }
 0x84b   : > { %16891 = vst [vmem:[#allocation88_spill] sm:$0xff] %v15334_v1  ;;  %v7692_v29 = vsel %vm7628_vm1, %v7596_v62, %v7660_v61  ;;  %8652 = vmatmul.bf16.gmra.mxu3 %v15334_v1  ;;  %v7472_v44 = vadd.f32 %v7471_v56, %v7383_v63  ;;  %v7529_v55 = vsel %vm16893_vm13, %v7054_v58, 0.0  ;;  %v12515_v62 = vld [vmem:[%s16164_s7 + $0x1d8] sm:$0xff]  ;;  %v7024_v56 = vld [vmem:[#allocation4 + $0x8f] sm:$0xff] }
 0x84c   : > { %v7724_v33 = vpack.c.bf16 %v7692_v29, %v7692_v29  ;;  %9046 = vmatpush.bf16.msra.mxu1 %v12515_v62 }
 0x84d   : > { %v7561_v10 = vadd.f32 %v7529_v55, %v7472_v44  ;;  %v7821_v49 = vld [vmem:[#allocation2 + $0xb8] sm:$0xf] }
 0x84e   : > { %7756 = vst [vmem:[#allocation2 + $0x80] sm:$0xf] %v7724_v33  ;;  %v11620_v50 = vld [vmem:[#allocation3 + $0x138] sm:$0xf0]  ;;  %v7881_v27 = vld [vmem:[#allocation2 + $0xb8] sm:$0xf] }
 0x84f   : > { %7788 = vst [vmem:[#allocation3 + $0x154] sm:$0xf] %v7724_v33  ;;  %v7597_v26 = vadd.f32 %v15124_v20, %v7561_v10  ;;  %v15341_v28 = vor.u32 %v12426_v53, %v11620_v50  ;;  %v7055_v44 = vld [vmem:[#allocation5 + $0x89] sm:$0xff]  ;;  %v7299_v33 = vadd.f32 %v15088_v16, %v7024_v56  ;;  %v11630_v50 = vld [vmem:[#allocation3 + $0x150] sm:$0xf] }
 0x850   : > { %7853 = vst [vmem:[#allocation3 + $0x168] sm:$0xf] %v7821_v49 }
 0x851   : > { %vm7629_vm1 = vcmp.gt.f32.partialorder %v7597_v26, 0.0  ;;  %v7661_v59 = vmul.f32 0.2, %v7597_v26  ;;  %8573 = vmatmul.bf16.gmra.mxu2 %v15341_v28  ;;  %7913 = vst [vmem:[#allocation3 + $0x110] sm:$0xf] %v7881_v27 }
 0x852   : > { %v7474_v63 = vpop.f32.mrf.mxu0 }
 0x853   : > { %v7693_v61 = vsel %vm7629_vm1, %v7597_v26, %v7661_v59  ;;  %v7475_v58 = vadd.f32 %v7474_v63, %v15079_v60  ;;  %v11614_v26 = vld [vmem:[#allocation3 + $0xf8] sm:$0xf]  ;;  %v7388_v59 = vadd.f32 %v15090_v37, %v7299_v33 }
 0x854   : > { %v7725_v29 = vpack.c.bf16 %v7693_v61, %v7693_v61  ;;  %v7056_v61 = vld [vmem:[#allocation5 + $0x91] sm:$0xff] }
 0x855   : > { %v7562_v55 = vadd.f32 %v7475_v58, %v7055_v44  ;;  %8961 = vmatmul.bf16.vlgmr.msra.gmra.mxu0 %v15100_v52  ;;  %v7822_v10 = vld [vmem:[#allocation2 + $0x80] sm:$0xf] }
 0x856   : > { %7757 = vst [vmem:[#allocation2 + $0x90] sm:$0xf] %v7725_v29  ;;  %v7882_v53 = vld [vmem:[#allocation2 + $0x80] sm:$0xf] }
 0x857   : > { %7789 = vst [vmem:[#allocation3 + $0x16c] sm:$0xf] %v7725_v29  ;;  %v7598_v49 = vadd.f32 %v15124_v20, %v7562_v55  ;;  %v12430_v27 = vld [vmem:[#allocation3 + $0x164] sm:$0xf0]  ;;  %v16895_v55 = vld [vmem:[#allocation41_spill] sm:$0xff] }
 0x858   : > { %v15351_v62 = vor.u32 %v12430_v27, %v11630_v50  ;;  %v12425_v60 = vld [vmem:[#allocation3 + $0x10c] sm:$0xf0]  ;;  %7854 = vst [vmem:[#allocation3 + $0x180] sm:$0xf] %v7822_v10  ;;  %vm16896_vm13 = vnez %v16895_v55  ;;  %v12429_v27 = vld [vmem:[#allocation3 + $0x154] sm:$0xf] }
 0x859   : > { %vm7630_vm1 = vcmp.gt.f32.partialorder %v7598_v49, 0.0  ;;  %v7662_v16 = vmul.f32 0.2, %v7598_v49  ;;  %v15354_v63 = vor.u32 %v12425_v60, %v11614_v26  ;;  %7914 = vst [vmem:[#allocation3 + $0x128] sm:$0xf] %v7882_v53  ;;  %v7531_v50 = vsel %vm16896_vm13, %v7056_v61, 0.0 }
 0x85a   : > { %8489 = vmatmul.bf16.gmra.mxu1 %v15351_v62  ;;  %v7476_v58 = vpop.f32.mrf.mxu0  ;;  %vm16900_vm13 = vnez %v16899_v45 }
 0x85b   : > { %16894 = vst [vmem:[#allocation90_spill] sm:$0xff] %v15354_v63  ;;  %v7694_v56 = vsel %vm7630_vm1, %v7598_v49, %v7662_v16  ;;  %8657 = vmatmul.bf16.gmra.mxu3 %v15354_v63  ;;  %v7477_v29 = vadd.f32 %v7476_v58, %v7388_v59  ;;  %v7026_v58 = vld [vmem:[#allocation4 + $0x9f] sm:$0xff] }
 0x85c   : > { %v7726_v44 = vpack.c.bf16 %v7694_v56, %v7694_v56 }
 0x85d   : > { %v7563_v10 = vadd.f32 %v7531_v50, %v7477_v29  ;;  %v7823_v37 = vld [vmem:[#allocation2 + $0x90] sm:$0xf]  ;;  %v7304_v50 = vadd.f32 %v15126_v34, %v7026_v58 }
 0x85e   : > { %7758 = vst [vmem:[#allocation2 + $0x60] sm:$0xf] %v7726_v44  ;;  %v11632_v33 = vld [vmem:[#allocation3 + $0x168] sm:$0xf0]  ;;  %v7883_v26 = vld [vmem:[#allocation2 + $0x90] sm:$0xf] }
 0x85f   : > { %7790 = vst [vmem:[#allocation3 + $0x184] sm:$0xf] %v7726_v44  ;;  %v7599_v53 = vadd.f32 %v15124_v20, %v7563_v10  ;;  %v15361_v60 = vor.u32 %v12429_v27, %v11632_v33  ;;  %v7057_v29 = vld [vmem:[#allocation5 + $0x99] sm:$0xff]  ;;  %v15366_v44 = vpop.f32.mrf.mxu1  ;;  %v7393_v34 = vadd.f32 %v15128_v24, %v7304_v50  ;;  %v7058_v58 = vld [vmem:[#allocation5 + $0xa1] sm:$0xff] }
 0x860   : > { %7855 = vst [vmem:[#allocation3 + $0x198] sm:$0xf] %v7823_v37 }
 0x861   : > { %16897 = vst [vmem:[#allocation91_spill] sm:$0xff] %v15361_v60  ;;  %vm7631_vm1 = vcmp.gt.f32.partialorder %v7599_v53, 0.0  ;;  %v7663_v49 = vmul.f32 0.2, %v7599_v53  ;;  %8578 = vmatmul.bf16.gmra.mxu2 %v15361_v60 }
 0x862   : > { %7915 = vst [vmem:[#allocation3 + $0x140] sm:$0xf] %v7883_v26  ;;  %v7479_v59 = vpop.f32.mrf.mxu0  ;;  %v11642_v26 = vld [vmem:[#allocation3 + $0x180] sm:$0xf] }
 0x863   : > { %v7695_v16 = vsel %vm7631_vm1, %v7599_v53, %v7663_v49  ;;  %v7480_v61 = vadd.f32 %v7479_v59, %v15108_v13  ;;  %v11626_v13 = vld [vmem:[#allocation3 + $0x128] sm:$0xf] }
 0x864   : > { %v7727_v56 = vpack.c.bf16 %v7695_v16, %v7695_v16 }
 0x865   : > { %v7564_v10 = vadd.f32 %v7480_v61, %v7057_v29  ;;  %8966 = vmatmul.bf16.gmra.mxu0 %v15195_v22  ;;  %v7824_v27 = vld [vmem:[#allocation2 + $0x60] sm:$0xf] }
 0x866   : > { %7759 = vst [vmem:[#allocation2 + $0x48] sm:$0xf] %v7727_v56  ;;  %v7884_v37 = vld [vmem:[#allocation2 + $0x60] sm:$0xf]  ;;  %v12432_v50 = vld [vmem:[#allocation3 + $0x184] sm:$0xf] }
 0x867   : > { %7791 = vst [vmem:[#allocation3 + $0x19c] sm:$0xf] %v7727_v56  ;;  %v7600_v33 = vadd.f32 %v15124_v20, %v7564_v10  ;;  %v12433_v53 = vld [vmem:[#allocation3 + $0x194] sm:$0xf0] }
 0x868   : > { %v15370_v49 = vor.u32 %v12433_v53, %v11642_v26  ;;  %7856 = vst [vmem:[#allocation3 + $0x1b0] sm:$0xf] %v7824_v27  ;;  %v15377_v26 = vpop.f32.mrf.mxu2  ;;  %v7533_v27 = vsel %vm16900_vm13, %v7058_v58, 0.0 }
 0x869   : > { %v12428_v59 = vld [vmem:[#allocation3 + $0x13c] sm:$0xf0]  ;;  %vm7632_vm1 = vcmp.gt.f32.partialorder %v7600_v33, 0.0  ;;  %v7664_v16 = vmul.f32 0.2, %v7600_v33 }
 0x86a   : > { %v15373_v61 = vor.u32 %v12428_v59, %v11626_v13  ;;  %7916 = vst [vmem:[#allocation3 + $0x158] sm:$0xf] %v7884_v37  ;;  %8494 = vmatmul.bf16.gmra.mxu1 %v15370_v49  ;;  %v7481_v56 = vpop.f32.mrf.mxu0  ;;  %v15381_v37 = vpop.f32.mrf.mxu1 }
 0x86b   : > { %v7696_v29 = vsel %vm7632_vm1, %v7600_v33, %v7664_v16  ;;  %v7482_v10 = vadd.f32 %v7481_v56, %v7393_v34  ;;  %v12514_v34 = vld [vmem:[%s16164_s7 + $0x1d0] sm:$0xff] }
 0x86c   : > { %16898 = vst [vmem:[#allocation92_spill] sm:$0xff] %v15373_v61  ;;  %8662 = vmatmul.bf16.gmra.mxu3 %v15373_v61  ;;  %v7728_v53 = vpack.c.bf16 %v7696_v29, %v7696_v29  ;;  %9047 = vmatpush.bf16.msra.mxu1 %v12514_v34 }
 0x86d   : > { %v7565_v24 = vadd.f32 %v7533_v27, %v7482_v10  ;;  %v7825_v55 = vld [vmem:[#allocation2 + $0x48] sm:$0xf] }
 0x86e   : > { %7760 = vst [vmem:[#allocation2 + $0xd0] sm:$0xf] %v7728_v53  ;;  %v11644_v13 = vld [vmem:[#allocation3 + $0x198] sm:$0xf0]  ;;  %v7885_v59 = vld [vmem:[#allocation2 + $0x48] sm:$0xf] }
 0x86f   : > { %7792 = vst [vmem:[#allocation3 + $0x1b4] sm:$0xf] %v7728_v53  ;;  %v7601_v33 = vadd.f32 %v15124_v20, %v7565_v24  ;;  %v15384_v16 = vor.u32 %v12432_v50, %v11644_v13  ;;  %v7028_v53 = vld [vmem:[#allocation4 + $0xaf] sm:$0xff]  ;;  %v7059_v20 = vld [vmem:[#allocation5 + $0xa9] sm:$0xff] }
 0x870   : > { %7857 = vst [vmem:[#allocation3 + $0x1c8] sm:$0xf] %v7825_v55  ;;  %v7309_v50 = vadd.f32 %v15159_v17, %v7028_v53  ;;  %v11654_v34 = vld [vmem:[#allocation3 + $0x1b0] sm:$0xf] }
 0x871   : > { %16901 = vst [vmem:[#allocation93_spill] sm:$0xff] %v15384_v16  ;;  %vm7633_vm1 = vcmp.gt.f32.partialorder %v7601_v33, 0.0  ;;  %v7665_v58 = vmul.f32 0.2, %v7601_v33  ;;  %8583 = vmatmul.bf16.gmra.mxu2 %v15384_v16  ;;  %v11638_v17 = vld [vmem:[#allocation3 + $0x158] sm:$0xf] }
 0x872   : > { %7917 = vst [vmem:[#allocation3 + $0x170] sm:$0xf] %v7885_v59  ;;  %v7484_v56 = vpop.f32.mrf.mxu0  ;;  %v15398_v59 = vld [vmem:[%s16163_s6] ss:$0 sm:$0xff] }
 0x873   : > { %v7697_v29 = vsel %vm7633_vm1, %v7601_v33, %v7665_v58  ;;  %v7485_v10 = vadd.f32 %v7484_v56, %v15146_v8 }
 0x874   : > { %v7729_v27 = vpack.c.bf16 %v7697_v29, %v7697_v29  ;;  %v15391_v24 = vpop.f32.mrf.mxu2 }
 0x875   : > { %v7566_v13 = vadd.f32 %v7485_v10, %v7059_v20  ;;  %8971 = vmatmul.bf16.gmra.mxu0 %v15219_v21  ;;  %v7826_v55 = vld [vmem:[#allocation2 + $0xd0] sm:$0xf]  ;;  %v7398_v10 = vadd.f32 %v15161_v48, %v7309_v50  ;;  %v7060_v20 = vld [vmem:[#allocation5 + $0xb1] sm:$0xff] }
 0x876   : > { %7761 = vst [vmem:[#allocation2 + $0x50] sm:$0xf] %v7729_v27  ;;  %v7886_v45 = vld [vmem:[#allocation2 + $0xd0] sm:$0xf]  ;;  %v12435_v50 = vld [vmem:[#allocation3 + $0x1b4] sm:$0xf] }
 0x877   : > { %7793 = vst [vmem:[#allocation3 + $0x1cc] sm:$0xf] %v7729_v27  ;;  %v7602_v8 = vadd.f32 %v15398_v59, %v7566_v13  ;;  %v15401_v33 = vpop.f32.mrf.mxu1  ;;  %v12436_v58 = vld [vmem:[#allocation3 + $0x1c4] sm:$0xf0] }
 0x878   : > { %v15403_v56 = vor.u32 %v12436_v58, %v11654_v34  ;;  %7858 = vst [vmem:[#allocation3 + $0x1e0] sm:$0xf] %v7826_v55  ;;  %v16903_v58 = vld [vmem:[#allocation49_spill] sm:$0xff] }
 0x879   : > { %v12431_v29 = vld [vmem:[#allocation3 + $0x16c] sm:$0xf0]  ;;  %vm7634_vm1 = vcmp.gt.f32.partialorder %v7602_v8, 0.0  ;;  %v7666_v53 = vmul.f32 0.2, %v7602_v8  ;;  %vm16904_vm13 = vnez %v16903_v58 }
 0x87a   : > { %v15406_v27 = vor.u32 %v12431_v29, %v11638_v17  ;;  %7918 = vst [vmem:[#allocation3 + $0x188] sm:$0xf] %v7886_v45  ;;  %8499 = vmatmul.bf16.gmra.mxu1 %v15403_v56  ;;  %v7486_v13 = vpop.f32.mrf.mxu0  ;;  %v7535_v43 = vsel %vm16904_vm13, %v7060_v20, 0.0 }
 0x87b   : > { %v7698_v31 = vsel %vm7634_vm1, %v7602_v8, %v7666_v53  ;;  %v7487_v15 = vadd.f32 %v7486_v13, %v7398_v10  ;;  %v7030_v53 = vld [vmem:[#allocation4 + $0xbf] sm:$0xff]  ;;  %v7061_v13 = vld [vmem:[#allocation5 + $0xb9] sm:$0xff] }
 0x87c   : > { %16902 = vst [vmem:[#allocation8_spill] sm:$0xff] %v15406_v27  ;;  %8667 = vmatmul.bf16.gmra.mxu3 %v15406_v27  ;;  %v7730_v34 = vpack.c.bf16 %v7698_v31, %v7698_v31  ;;  %v15412_v55 = vpop.f32.mrf.mxu2 }
 0x87d   : > { %v7567_v48 = vadd.f32 %v7535_v43, %v7487_v15  ;;  %v7827_v57 = vld [vmem:[#allocation2 + $0x50] sm:$0xf] }
 0x87e   : > { %7762 = vst [vmem:[#allocation2 + $0x98] sm:$0xf] %v7730_v34  ;;  %v11656_v17 = vld [vmem:[#allocation3 + $0x1c8] sm:$0xf0]  ;;  %v7887_v29 = vld [vmem:[#allocation2 + $0x50] sm:$0xf] }
 0x87f   : > { %7794 = vst [vmem:[#allocation3 + $0x1e4] sm:$0xf] %v7730_v34  ;;  %v7603_v45 = vadd.f32 %v15398_v59, %v7567_v48  ;;  %v15415_v23 = vpop.f32.mrf.mxu1  ;;  %v15417_v8 = vor.u32 %v12435_v50, %v11656_v17  ;;  %v7314_v48 = vadd.f32 %v15189_v14, %v7030_v53  ;;  %v15425_v50 = vpop.f32.mrf.mxu3 }
 0x880   : > { %7859 = vst [vmem:[#allocation3 + $0x1f8] sm:$0xf] %v7827_v57 }
 0x881   : > { %16905 = vst [vmem:[#allocation9_spill] sm:$0xff] %v15417_v8  ;;  %vm7635_vm1 = vcmp.gt.f32.partialorder %v7603_v45, 0.0  ;;  %v7667_v31 = vmul.f32 0.2, %v7603_v45  ;;  %8588 = vmatmul.bf16.gmra.mxu2 %v15417_v8  ;;  %v7403_v14 = vadd.f32 %v15191_v47, %v7314_v48  ;;  %v8545_v47 = vadd.f32 %v15391_v24, %v15366_v44  ;;  %v12513_v44 = vld [vmem:[%s16164_s7 + $0x1c8] sm:$0xff] }
 0x882   : > { %7919 = vst [vmem:[#allocation3 + $0x1a0] sm:$0xf] %v7887_v29  ;;  %v7489_v10 = vpop.f32.mrf.mxu0  ;;  %9048 = vmatpush.bf16.msra.mxu1 %v12513_v44 }
 0x883   : > { %v7699_v43 = vsel %vm7635_vm1, %v7603_v45, %v7667_v31  ;;  %v7490_v15 = vadd.f32 %v7489_v10, %v15176_v38  ;;  %v11666_v38 = vld [vmem:[#allocation3 + $0x1e0] sm:$0xf] }
 0x884   : > { %v7731_v20 = vpack.c.bf16 %v7699_v43, %v7699_v43  ;;  %v15421_v34 = vpop.f32.mrf.mxu2  ;;  %v11650_v43 = vld [vmem:[#allocation3 + $0x188] sm:$0xf] }
 0x885   : > { %v7568_v58 = vadd.f32 %v7490_v15, %v7061_v13  ;;  %8976 = vmatmul.bf16.gmra.mxu0 %v15247_v7  ;;  %v7828_v57 = vld [vmem:[#allocation2 + $0x98] sm:$0xf] }
 0x886   : > { %7763 = vst [vmem:[#allocation2 + $0x78] sm:$0xf] %v7731_v20  ;;  %v7888_v17 = vld [vmem:[#allocation2 + $0x98] sm:$0xf] }
 0x887   : > { %7795 = vst [vmem:[#allocation3 + $0x1fc] sm:$0xf] %v7731_v20  ;;  %v7604_v29 = vadd.f32 %v15398_v59, %v7568_v58  ;;  %v15428_v45 = vpop.f32.mrf.mxu1  ;;  %v12439_v31 = vld [vmem:[#allocation3 + $0x1f4] sm:$0xf0] }
 0x888   : > { %v15430_v10 = vor.u32 %v12439_v31, %v11666_v38  ;;  %7860 = vst [vmem:[#allocation3 + $0x210] sm:$0xf] %v7828_v57  ;;  %v7062_v13 = vld [vmem:[#allocation5 + $0xc1] sm:$0xff]  ;;  %v16906_v31 = vld [vmem:[#allocation54_spill] sm:$0xff] }
 0x889   : > { %v12434_v8 = vld [vmem:[#allocation3 + $0x19c] sm:$0xf0]  ;;  %vm7636_vm1 = vcmp.gt.f32.partialorder %v7604_v29, 0.0  ;;  %v7668_v15 = vmul.f32 0.2, %v7604_v29  ;;  %vm16907_vm13 = vnez %v16906_v31 }
 0x88a   : > { %v15433_v53 = vor.u32 %v12434_v8, %v11650_v43  ;;  %7920 = vst [vmem:[#allocation3 + $0x1b8] sm:$0xf] %v7888_v17  ;;  %8504 = vmatmul.bf16.gmra.mxu1 %v15430_v10  ;;  %v7491_v58 = vpop.f32.mrf.mxu0  ;;  %v7537_v27 = vsel %vm16907_vm13, %v7062_v13, 0.0  ;;  %v12438_v43 = vld [vmem:[#allocation3 + $0x1e4] sm:$0xf] }
 0x88b   : > { %v7700_v20 = vsel %vm7636_vm1, %v7604_v29, %v7668_v15  ;;  %v7492_v16 = vadd.f32 %v7491_v58, %v7403_v14 }
 0x88c   : > { %8672 = vmatmul.bf16.gmra.mxu3 %v15433_v53  ;;  %v7732_v38 = vpack.c.bf16 %v7700_v20, %v7700_v20  ;;  %v15439_v57 = vpop.f32.mrf.mxu2 }
 0x88d   : > { %v7569_v8 = vadd.f32 %v7537_v27, %v7492_v16  ;;  %v7829_v48 = vld [vmem:[#allocation2 + $0x78] sm:$0xf] }
 0x88e   : > { %7764 = vst [vmem:[#allocation2 + $0xc8] sm:$0xf] %v7732_v38  ;;  %v8633_v17 = vpop.f32.mrf.mxu3  ;;  %v11668_v60 = vld [vmem:[#allocation3 + $0x1f8] sm:$0xf0]  ;;  %v7889_v13 = vld [vmem:[#allocation2 + $0x78] sm:$0xf] }
 0x88f   : > { %7796 = vst [vmem:[#allocation3 + $0x214] sm:$0xf] %v7732_v38  ;;  %v7605_v29 = vadd.f32 %v15398_v59, %v7569_v8  ;;  %v8634_v14 = vadd.f32 %v8633_v17, %v8545_v47  ;;  %v15444_v15 = vpop.f32.mrf.mxu1  ;;  %v15446_v58 = vor.u32 %v12438_v43, %v11668_v60  ;;  %v7032_v60 = vld [vmem:[#allocation4 + $0xcf] sm:$0xff]  ;;  %v7063_v47 = vld [vmem:[#allocation5 + $0xc9] sm:$0xff] }
 0x890   : > { %7861 = vst [vmem:[#allocation3 + $0x228] sm:$0xf] %v7829_v48  ;;  %v7319_v17 = vadd.f32 %v15213_v42, %v7032_v60  ;;  %v8547_v48 = vadd.f32 %v15412_v55, %v15381_v37  ;;  %v7064_v60 = vld [vmem:[#allocation5 + $0xd1] sm:$0xff] }
 0x891   : > { %16908 = vst [vmem:[#allocation94_spill] sm:$0xff] %v15446_v58  ;;  %vm7637_vm1 = vcmp.gt.f32.partialorder %v7605_v29, 0.0  ;;  %v7669_v16 = vmul.f32 0.2, %v7605_v29  ;;  %8593 = vmatmul.bf16.gmra.mxu2 %v15446_v58  ;;  %v11662_v42 = vld [vmem:[#allocation3 + $0x1b8] sm:$0xf] }
 0x892   : > { %9221 = vst.msk [vmem:[#allocation4 + $0x8] sm:$0xff] %vm9220_vm8, %v8634_v14  ;;  %v7494_v24 = vpop.f32.mrf.mxu0  ;;  %v7408_v37 = vadd.f32 %v15215_v6, %v7319_v17  ;;  %v8550_v17 = vadd.f32 %v15421_v34, %v15401_v33 }
 0x893   : > { %7921 = vst [vmem:[#allocation3 + $0x1d0] sm:$0xf] %v7889_v13  ;;  %v7701_v27 = vsel %vm7637_vm1, %v7605_v29, %v7669_v16  ;;  %v7495_v20 = vadd.f32 %v7494_v24, %v15203_v41  ;;  %v11678_v13 = vld [vmem:[#allocation3 + $0x210] sm:$0xf] }
 0x894   : > { %v7733_v38 = vpack.c.bf16 %v7701_v27, %v7701_v27  ;;  %v15454_v8 = vpop.f32.mrf.mxu2 }
 0x895   : > { %v7570_v43 = vadd.f32 %v7495_v20, %v7063_v47  ;;  %8981 = vmatmul.bf16.gmra.mxu0 %v15275_v18  ;;  %v7830_v14 = vld [vmem:[#allocation2 + $0xc8] sm:$0xf] }
 0x896   : > { %7765 = vst [vmem:[#allocation2 + $0xb0] sm:$0xf] %v7733_v38  ;;  %v8635_v44 = vpop.f32.mrf.mxu3  ;;  %v7890_v27 = vld [vmem:[#allocation2 + $0xc8] sm:$0xf] }
 0x897   : > { %7797 = vst [vmem:[#allocation3 + $0x22c] sm:$0xf] %v7733_v38  ;;  %v7606_v41 = vadd.f32 %v15398_v59, %v7570_v43  ;;  %v8636_v29 = vadd.f32 %v8635_v44, %v8547_v48  ;;  %v15461_v16 = vpop.f32.mrf.mxu1  ;;  %v12442_v24 = vld [vmem:[#allocation3 + $0x224] sm:$0xf0] }
 0x898   : > { %v15463_v31 = vor.u32 %v12442_v24, %v11678_v13  ;;  %7862 = vst [vmem:[#allocation3 + $0x240] sm:$0xf] %v7830_v14  ;;  %v16909_v13 = vld [vmem:[#allocation58_spill] sm:$0xff] }
 0x899   : > { %vm7638_vm1 = vcmp.gt.f32.partialorder %v7606_v41, 0.0  ;;  %v7670_v55 = vmul.f32 0.2, %v7606_v41  ;;  %9222 = vst.msk [vmem:[#allocation4 + $0x10] sm:$0xff] %vm9220_vm8, %v8636_v29  ;;  %vm16910_vm13 = vnez %v16909_v13 }
 0x89a   : > { %v12437_v20 = vld [vmem:[#allocation3 + $0x1cc] sm:$0xf0]  ;;  %8509 = vmatmul.bf16.gmra.mxu1 %v15463_v31  ;;  %v7496_v47 = vpop.f32.mrf.mxu0  ;;  %7922 = vst [vmem:[#allocation3 + $0x1e8] sm:$0xf] %v7890_v27  ;;  %v7539_v14 = vsel %vm16910_vm13, %v7064_v60, 0.0 }
 0x89b   : > { %v15468_v38 = vor.u32 %v12437_v20, %v11662_v42  ;;  %v7702_v48 = vsel %vm7638_vm1, %v7606_v41, %v7670_v55  ;;  %v7497_v43 = vadd.f32 %v7496_v47, %v7408_v37  ;;  %v12441_v20 = vld [vmem:[#allocation3 + $0x214] sm:$0xf] }
 0x89c   : > { %v7734_v44 = vpack.c.bf16 %v7702_v48, %v7702_v48  ;;  %v15473_v6 = vpop.f32.mrf.mxu2 }
 0x89d   : > { %8677 = vmatmul.bf16.gmra.mxu3 %v15468_v38  ;;  %v7571_v29 = vadd.f32 %v7539_v14, %v7497_v43  ;;  %v7831_v24 = vld [vmem:[#allocation2 + $0xb0] sm:$0xf]  ;;  %v7034_v43 = vld [vmem:[#allocation4 + $0xdf] sm:$0xff] }
 0x89e   : > { %7766 = vst [vmem:[#allocation2 + $0x40] sm:$0xf] %v7734_v44  ;;  %v8638_v42 = vpop.f32.mrf.mxu3  ;;  %v11680_v58 = vld [vmem:[#allocation3 + $0x228] sm:$0xf0]  ;;  %v7891_v60 = vld [vmem:[#allocation2 + $0xb0] sm:$0xf] }
 0x89f   : > { %7798 = vst [vmem:[#allocation3 + $0x244] sm:$0xf] %v7734_v44  ;;  %v7607_v41 = vadd.f32 %v15398_v59, %v7571_v29  ;;  %v8639_v27 = vadd.f32 %v8638_v42, %v8550_v17  ;;  %v15478_v37 = vpop.f32.mrf.mxu1  ;;  %v15480_v55 = vor.u32 %v12441_v20, %v11680_v58  ;;  %v7065_v14 = vld [vmem:[#allocation5 + $0xd9] sm:$0xff]  ;;  %v7324_v58 = vadd.f32 %v15240_v5, %v7034_v43  ;;  %v7066_v43 = vld [vmem:[#allocation5 + $0xe1] sm:$0xff] }
 0x8a0   : > { %7863 = vst [vmem:[#allocation3 + $0x258] sm:$0xf] %v7831_v24  ;;  %v8552_v29 = vadd.f32 %v15439_v57, %v15415_v23 }
 0x8a1   : > { %vm7639_vm1 = vcmp.gt.f32.partialorder %v7607_v41, 0.0  ;;  %v7671_v47 = vmul.f32 0.2, %v7607_v41  ;;  %9223 = vst.msk [vmem:[#allocation4 + $0x18] sm:$0xff] %vm9220_vm8, %v8639_v27  ;;  %8598 = vmatmul.bf16.gmra.mxu2 %v15480_v55  ;;  %v11690_v27 = vld [vmem:[#allocation3 + $0x240] sm:$0xf]  ;;  %v7413_v23 = vadd.f32 %v15242_v51, %v7324_v58  ;;  %v8555_v58 = vadd.f32 %v15454_v8, %v15428_v45 }
 0x8a2   : > { %v7499_v33 = vpop.f32.mrf.mxu0  ;;  %7923 = vst [vmem:[#allocation3 + $0x200] sm:$0xf] %v7891_v60  ;;  %v11674_v5 = vld [vmem:[#allocation3 + $0x1e8] sm:$0xf] }
 0x8a3   : > { %v7703_v34 = vsel %vm7639_vm1, %v7607_v41, %v7671_v47  ;;  %v7500_v48 = vadd.f32 %v7499_v33, %v15230_v40 }
 0x8a4   : > { %v7735_v44 = vpack.c.bf16 %v7703_v34, %v7703_v34  ;;  %v15485_v17 = vpop.f32.mrf.mxu2 }
 0x8a5   : > { %v7572_v24 = vadd.f32 %v7500_v48, %v7065_v14  ;;  %8986 = vmatmul.bf16.gmra.mxu0 %v15308_v39  ;;  %v7832_v42 = vld [vmem:[#allocation2 + $0x40] sm:$0xf] }
 0x8a6   : > { %7767 = vst [vmem:[#allocation2 + $0xe0] sm:$0xf] %v7735_v44  ;;  %v8640_v20 = vpop.f32.mrf.mxu3  ;;  %v7892_v33 = vld [vmem:[#allocation2 + $0x40] sm:$0xf] }
 0x8a7   : > { %7799 = vst [vmem:[#allocation3 + $0x25c] sm:$0xf] %v7735_v44  ;;  %v7608_v40 = vadd.f32 %v15398_v59, %v7572_v24  ;;  %v8641_v41 = vadd.f32 %v8640_v20, %v8552_v29  ;;  %v15492_v60 = vpop.f32.mrf.mxu1  ;;  %v12445_v47 = vld [vmem:[#allocation3 + $0x254] sm:$0xf0] }
 0x8a8   : > { %v15494_v34 = vor.u32 %v12445_v47, %v11690_v27  ;;  %7864 = vst [vmem:[#allocation3 + $0x270] sm:$0xf] %v7832_v42  ;;  %v16911_v27 = vld [vmem:[#allocation65_spill] sm:$0xff] }
 0x8a9   : > { %vm7640_vm1 = vcmp.gt.f32.partialorder %v7608_v40, 0.0  ;;  %v7672_v57 = vmul.f32 0.2, %v7608_v40  ;;  %9224 = vst.msk [vmem:[#allocation4 + $0x20] sm:$0xff] %vm9220_vm8, %v8641_v41  ;;  %v12440_v48 = vld [vmem:[#allocation3 + $0x1fc] sm:$0xf0]  ;;  %vm16912_vm13 = vnez %v16911_v27 }
 0x8aa   : > { %8514 = vmatmul.bf16.gmra.mxu1 %v15494_v34  ;;  %v15499_v44 = vor.u32 %v12440_v48, %v11674_v5  ;;  %v7501_v14 = vpop.f32.mrf.mxu0  ;;  %7924 = vst [vmem:[#allocation3 + $0x218] sm:$0xf] %v7892_v33  ;;  %v7541_v42 = vsel %vm16912_vm13, %v7066_v43, 0.0  ;;  %v12444_v48 = vld [vmem:[#allocation3 + $0x244] sm:$0xf] }
 0x8ab   : > { %v7704_v29 = vsel %vm7640_vm1, %v7608_v40, %v7672_v57  ;;  %v7502_v24 = vadd.f32 %v7501_v14, %v7413_v23  ;;  %v12512_v14 = vld [vmem:[%s16164_s7 + $0x1c0] sm:$0xff] }
 0x8ac   : > { %v7736_v20 = vpack.c.bf16 %v7704_v29, %v7704_v29  ;;  %v15504_v51 = vpop.f32.mrf.mxu2  ;;  %9049 = vmatpush.bf16.msra.mxu1 %v12512_v14 }
 0x8ad   : > { %8682 = vmatmul.bf16.gmra.mxu3 %v15499_v44  ;;  %v7573_v41 = vadd.f32 %v7541_v42, %v7502_v24  ;;  %v7833_v47 = vld [vmem:[#allocation2 + $0xe0] sm:$0xf] }
 0x8ae   : > { %7768 = vst [vmem:[#allocation2 + $0xa8] sm:$0xf] %v7736_v20  ;;  %v8643_v5 = vpop.f32.mrf.mxu3  ;;  %v11692_v13 = vld [vmem:[#allocation3 + $0x258] sm:$0xf0]  ;;  %v7893_v43 = vld [vmem:[#allocation2 + $0xe0] sm:$0xf] }
 0x8af   : > { %7800 = vst [vmem:[#allocation3 + $0x274] sm:$0xf] %v7736_v20  ;;  %v7609_v40 = vadd.f32 %v15398_v59, %v7573_v41  ;;  %v8644_v33 = vadd.f32 %v8643_v5, %v8555_v58  ;;  %v15509_v23 = vpop.f32.mrf.mxu1  ;;  %v15511_v57 = vor.u32 %v12444_v48, %v11692_v13  ;;  %v7036_v13 = vld [vmem:[#allocation4 + $0xef] sm:$0xff]  ;;  %v7067_v42 = vld [vmem:[#allocation5 + $0xe9] sm:$0xff] }
 0x8b0   : > { %7865 = vst [vmem:[#allocation3 + $0x288] sm:$0xf] %v7833_v47  ;;  %v7329_v41 = vadd.f32 %v15268_v36, %v7036_v13  ;;  %v8557_v47 = vadd.f32 %v15473_v6, %v15444_v15  ;;  %v12527_v36 = vld [vmem:[%s16164_s7 + $0x238] sm:$0xff] }
 0x8b1   : > { %vm7641_vm1 = vcmp.gt.f32.partialorder %v7609_v40, 0.0  ;;  %v7673_v45 = vmul.f32 0.2, %v7609_v40  ;;  %9225 = vst.msk [vmem:[#allocation4 + $0x28] sm:$0xff] %vm9220_vm8, %v8644_v33  ;;  %8603 = vmatmul.bf16.gmra.mxu2 %v15511_v57  ;;  %v11686_v6 = vld [vmem:[#allocation3 + $0x218] sm:$0xf] }
 0x8b2   : > { %v7504_v8 = vpop.f32.mrf.mxu0  ;;  %7925 = vst [vmem:[#allocation3 + $0x230] sm:$0xf] %v7893_v43  ;;  %v11702_v43 = vld [vmem:[#allocation3 + $0x270] sm:$0xf]  ;;  %9131 = vmatpush.bf16.msrb.mxu2 %v12527_v36 }
 0x8b3   : > { %v7705_v29 = vsel %vm7641_vm1, %v7609_v40, %v7673_v45  ;;  %v7505_v24 = vadd.f32 %v7504_v8, %v15258_v0 }
 0x8b4   : > { %v7737_v20 = vpack.c.bf16 %v7705_v29, %v7705_v29  ;;  %v15519_v58 = vpop.f32.mrf.mxu2  ;;  %v7068_v29 = vld [vmem:[#allocation5 + $0xf1] sm:$0xff] }
 0x8b5   : > { %v7574_v5 = vadd.f32 %v7505_v24, %v7067_v42  ;;  %8991 = vmatmul.bf16.gmra.mxu0 %v15331_v25  ;;  %v7834_v48 = vld [vmem:[#allocation2 + $0xa8] sm:$0xf]  ;;  %v7418_v24 = vadd.f32 %v15270_v30, %v7329_v41  ;;  %v16913_v30 = vld [vmem:[#allocation70_spill] sm:$0xff] }
 0x8b6   : > { %7769 = vst [vmem:[#allocation2 + $0x18] sm:$0xf] %v7737_v20  ;;  %v8645_v33 = vpop.f32.mrf.mxu3  ;;  %v7894_v40 = vld [vmem:[#allocation2 + $0xa8] sm:$0xf]  ;;  %vm16914_vm13 = vnez %v16913_v30 }
 0x8b7   : > { %7801 = vst [vmem:[#allocation3 + $0x28c] sm:$0xf] %v7737_v20  ;;  %v7610_v0 = vadd.f32 %v15398_v59, %v7574_v5  ;;  %v8646_v14 = vadd.f32 %v8645_v33, %v8557_v47  ;;  %v15526_v45 = vpop.f32.mrf.mxu1  ;;  %v12448_v8 = vld [vmem:[#allocation3 + $0x284] sm:$0xf0]  ;;  %v12526_v5 = vld [vmem:[%s16164_s7 + $0x230] sm:$0xff]  ;;  %v7543_v41 = vsel %vm16914_vm13, %v7068_v29, 0.0 }
 0x8b8   : > { %v15531_v15 = vor.u32 %v12448_v8, %v11702_v43  ;;  %7866 = vst [vmem:[#allocation3 + $0x2a0] sm:$0xf] %v7834_v48  ;;  %v8560_v8 = vadd.f32 %v15485_v17, %v15461_v16  ;;  %9132 = vmatpush.bf16.msrb.mxu2 %v12526_v5 }
 0x8b9   : > { %vm7642_vm1 = vcmp.gt.f32.partialorder %v7610_v0, 0.0  ;;  %v7674_v13 = vmul.f32 0.2, %v7610_v0  ;;  %9226 = vst.msk [vmem:[#allocation4 + $0x30] sm:$0xff] %vm9220_vm8, %v8646_v14  ;;  %v12443_v20 = vld [vmem:[#allocation3 + $0x22c] sm:$0xf0] }
 0x8ba   : > { %8519 = vmatmul.bf16.gmra.mxu1 %v15531_v15  ;;  %v15536_v42 = vor.u32 %v12443_v20, %v11686_v6  ;;  %v7506_v47 = vpop.f32.mrf.mxu0  ;;  %7926 = vst [vmem:[#allocation3 + $0x248] sm:$0xf] %v7894_v40  ;;  %v12447_v6 = vld [vmem:[#allocation3 + $0x274] sm:$0xf] }
 0x8bb   : > { %v7706_v33 = vsel %vm7642_vm1, %v7610_v0, %v7674_v13  ;;  %v7507_v48 = vadd.f32 %v7506_v47, %v7418_v24  ;;  %v12525_v0 = vld [vmem:[%s16164_s7 + $0x228] sm:$0xff] }
 0x8bc   : > { %v7738_v43 = vpack.c.bf16 %v7706_v33, %v7706_v33  ;;  %v15544_v14 = vpop.f32.mrf.mxu2  ;;  %9133 = vmatpush.bf16.msrb.mxu2 %v12525_v0  ;;  %v12524_v33 = vld [vmem:[%s16164_s7 + $0x220] sm:$0xff] }
 0x8bd   : > { %8687 = vmatmul.bf16.gmra.mxu3 %v15536_v42  ;;  %v7575_v36 = vadd.f32 %v7543_v41, %v7507_v48  ;;  %v7835_v40 = vld [vmem:[#allocation2 + $0x18] sm:$0xf]  ;;  %v7038_v41 = vld [vmem:[#allocation4 + $0xff] sm:$0xff] }
 0x8be   : > { %7770 = vst [vmem:[#allocation2 + $0xf0] sm:$0xf] %v7738_v43  ;;  %v8648_v20 = vpop.f32.mrf.mxu3  ;;  %v11704_v27 = vld [vmem:[#allocation3 + $0x288] sm:$0xf0]  ;;  %v7895_v16 = vld [vmem:[#allocation2 + $0x18] sm:$0xf] }
 0x8bf   : > { %7802 = vst [vmem:[#allocation3 + $0x2a4] sm:$0xf] %v7738_v43  ;;  %v7611_v24 = vadd.f32 %v15398_v59, %v7575_v36  ;;  %v8649_v29 = vadd.f32 %v8648_v20, %v8560_v8  ;;  %v15552_v13 = vpop.f32.mrf.mxu1  ;;  %v15554_v47 = vor.u32 %v12447_v6, %v11704_v27  ;;  %v12487_v27 = vld [vmem:[%s16164_s7 + $0xf8] sm:$0xff]  ;;  %v7069_v36 = vld [vmem:[#allocation5 + $0xf9] sm:$0xff]  ;;  %v8562_v20 = vadd.f32 %v15504_v51, %v15478_v37 }
 0x8c0   : > { %7867 = vst [vmem:[#allocation3 + $0x2b8] sm:$0xf] %v7835_v40  ;;  %9525 = vmatpush.bf16.msrb.mxu3 %v12487_v27  ;;  %v7334_v40 = vadd.f32 %v15377_v26, %v7038_v41  ;;  %9134 = vmatpush.bf16.msrb.mxu2 %v12524_v33 }
 0x8c1   : > { %vm7643_vm1 = vcmp.gt.f32.partialorder %v7611_v24, 0.0  ;;  %v7675_v17 = vmul.f32 0.2, %v7611_v24  ;;  %9227 = vst.msk [vmem:[#allocation4 + $0x38] sm:$0xff] %vm9220_vm8, %v8649_v29  ;;  %8608 = vmatmul.bf16.gmra.mxu2 %v15554_v47 }
 0x8c2   : > { %v7509_v5 = vpop.f32.mrf.mxu0  ;;  %7927 = vst [vmem:[#allocation3 + $0x260] sm:$0xf] %v7895_v16  ;;  %v7423_v41 = vadd.f32 %v15425_v50, %v7334_v40 }
 0x8c3   : > { %v7707_v48 = vsel %vm7643_vm1, %v7611_v24, %v7675_v17  ;;  %v7510_v43 = vadd.f32 %v7509_v5, %v15286_v11  ;;  %v11714_v24 = vld [vmem:[#allocation3 + $0x2a0] sm:$0xf]  ;;  %v12523_v11 = vld [vmem:[%s16164_s7 + $0x218] sm:$0xff] }
 0x8c4   : > { %v7739_v8 = vpack.c.bf16 %v7707_v48, %v7707_v48  ;;  %v15565_v6 = vpop.f32.mrf.mxu2  ;;  %v11698_v48 = vld [vmem:[#allocation3 + $0x248] sm:$0xf]  ;;  %9135 = vmatpush.bf16.msrb.mxu2 %v12523_v11  ;;  %v8565_v11 = vadd.f32 %v15519_v58, %v15492_v60 }
 0x8c5   : > { %v7576_v0 = vadd.f32 %v7510_v43, %v7069_v36  ;;  %8996 = vmatmul.bf16.gmra.mxu0 %v15351_v62  ;;  %v7836_v29 = vld [vmem:[#allocation2 + $0xf0] sm:$0xf] }
 0x8c6   : > { %7771 = vst [vmem:[#allocation2] sm:$0xf] %v7739_v8  ;;  %v8650_v16 = vpop.f32.mrf.mxu3  ;;  %v7896_v37 = vld [vmem:[#allocation2 + $0xf0] sm:$0xf] }
 0x8c7   : > { %7803 = vst [vmem:[#allocation3 + $0x2bc] sm:$0xf] %v7739_v8  ;;  %v7612_v17 = vadd.f32 %v15398_v59, %v7576_v0  ;;  %v8651_v5 = vadd.f32 %v8650_v16, %v8562_v20  ;;  %v15575_v26 = vpop.f32.mrf.mxu1  ;;  %v12451_v27 = vld [vmem:[#allocation3 + $0x2b4] sm:$0xf0]  ;;  %v12522_v0 = vld [vmem:[%s16164_s7 + $0x210] sm:$0xff] }
 0x8c8   : > { %v15577_v51 = vor.u32 %v12451_v27, %v11714_v24  ;;  %v7070_v43 = vld [vmem:[#allocation5 + $0x101] sm:$0xff]  ;;  %7868 = vst [vmem:[#allocation3 + $0x2d0] sm:$0xf] %v7836_v29  ;;  %9136 = vmatpush.bf16.msrb.mxu2 %v12522_v0 }
 0x8c9   : > { %vm7644_vm1 = vcmp.gt.f32.partialorder %v7612_v17, 0.0  ;;  %v7676_v33 = vmul.f32 0.2, %v7612_v17  ;;  %9228 = vst.msk [vmem:[#allocation4 + $0x40] sm:$0xff] %vm9220_vm8, %v8651_v5  ;;  %v12446_v36 = vld [vmem:[#allocation3 + $0x25c] sm:$0xf0] }
 0x8ca   : > { %16915 = vst [vmem:[#allocation95_spill] sm:$0xff] %v15577_v51  ;;  %8524 = vmatmul.bf16.gmra.mxu1 %v15577_v51  ;;  %v15582_v8 = vor.u32 %v12446_v36, %v11698_v48  ;;  %v7511_v20 = vpop.f32.mrf.mxu0  ;;  %v7545_v40 = vsel %vm14637_vm14, %v7070_v43, 0.0  ;;  %v12503_v27 = vld [vmem:[%s16164_s7 + $0x178] sm:$0xff]  ;;  %v12450_v48 = vld [vmem:[#allocation3 + $0x2a4] sm:$0xf]  ;;  %v12521_v43 = vld [vmem:[%s16164_s7 + $0x208] sm:$0xff] }
 0x8cb   : > { %7928 = vst [vmem:[#allocation3 + $0x278] sm:$0xf] %v7896_v37  ;;  %v7708_v16 = vsel %vm7644_vm1, %v7612_v17, %v7676_v33  ;;  %v7512_v29 = vadd.f32 %v7511_v20, %v7423_v41  ;;  %9703 = vmatpush.bf16.msrb.mxu1 %v12503_v27 }
 0x8cc   : > { %v7740_v24 = vpack.c.bf16 %v7708_v16, %v7708_v16  ;;  %v15590_v5 = vpop.f32.mrf.mxu2  ;;  %9137 = vmatpush.bf16.msrb.mxu2 %v12521_v43 }
 0x8cd   : > { %8692 = vmatmul.bf16.gmra.mxu3 %v15582_v8  ;;  %v7577_v37 = vadd.f32 %v7545_v40, %v7512_v29  ;;  %v7837_v36 = vld [vmem:[#allocation2] sm:$0xf]  ;;  %v12486_v29 = vld [vmem:[%s16164_s7 + $0xf0] sm:$0xff] }
 0x8ce   : > { %7772 = vst [vmem:[#allocation2 + $0x30] sm:$0xf] %v7740_v24  ;;  %v8653_v17 = vpop.f32.mrf.mxu3  ;;  %v11716_v41 = vld [vmem:[#allocation3 + $0x2b8] sm:$0xf0]  ;;  %v7897_v60 = vld [vmem:[#allocation2] sm:$0xf]  ;;  %9526 = vmatpush.bf16.msrb.mxu3 %v12486_v29 }
 0x8cf   : > { %7804 = vst [vmem:[#allocation3 + $0x2d4] sm:$0xf] %v7740_v24  ;;  %v7613_v33 = vadd.f32 %v15398_v59, %v7577_v37  ;;  %v8654_v20 = vadd.f32 %v8653_v17, %v8565_v11  ;;  %v15601_v16 = vpop.f32.mrf.mxu1  ;;  %v15603_v50 = vor.u32 %v12450_v48, %v11716_v41  ;;  %v12520_v59 = vld [vmem:[%s16164_s7 + $0x200] sm:$0xff]  ;;  %v12485_v11 = vld [vmem:[%s16164_s7 + $0xe8] sm:$0xff]  ;;  %v8567_v37 = vadd.f32 %v15544_v14, %v15509_v23  ;;  %v11726_v43 = vld [vmem:[#allocation3 + $0x2d0] sm:$0xf] }
 0x8d0   : > { %7869 = vst [vmem:[#allocation3 + $0x2e8] sm:$0xf] %v7837_v36  ;;  %9138 = vmatpush.bf16.msrb.mxu2 %v12520_v59  ;;  %v12484_v14 = vld [vmem:[%s16164_s7 + $0xe0] sm:$0xff] }
 0x8d1   : > { %16917 = vst [vmem:[#allocation60_spill] sm:$0xff] %v15603_v50  ;;  %vm7645_vm1 = vcmp.gt.f32.partialorder %v7613_v33, 0.0  ;;  %v7677_v58 = vmul.f32 0.2, %v7613_v33  ;;  %8613 = vmatmul.bf16.gmra.mxu2 %v15603_v50 }
 0x8d2   : > { %9229 = vst.msk [vmem:[#allocation4 + $0x48] sm:$0xff] %vm9220_vm8, %v8654_v20  ;;  %v15607_v0 = vpop.f32.mrf.mxu0  ;;  %9527 = vmatpush.bf16.msrb.mxu3 %v12485_v11 }
 0x8d3   : > { %7929 = vst [vmem:[#allocation3 + $0x290] sm:$0xf] %v7897_v60  ;;  %v7709_v24 = vsel %vm7645_vm1, %v7613_v33, %v7677_v58  ;;  %v11710_v60 = vld [vmem:[#allocation3 + $0x278] sm:$0xf] }
 0x8d4   : > { %v7741_v40 = vpack.c.bf16 %v7709_v24, %v7709_v24  ;;  %v15615_v27 = vpop.f32.mrf.mxu2  ;;  %v12495_v58 = vld [vmem:[%s16164_s7 + $0x138] sm:$0xff] }
 0x8d5   : > { %9001 = vmatmul.bf16.gmra.mxu0 %v15370_v49  ;;  %v7898_v48 = vld [vmem:[#allocation2 + $0x30] sm:$0xf]  ;;  %12534 = vmatpush.bf16.msra.mxu2 %v12495_v58 }
 0x8d6   : > { %7773 = vst [vmem:[#allocation2 + $0xd8] sm:$0xf] %v7741_v40  ;;  %v8655_v36 = vpop.f32.mrf.mxu3  ;;  %9614 = vmatpush.bf16.msrb.mxu0 %v12495_v58  ;;  %9528 = vmatpush.bf16.msrb.mxu3 %v12484_v14  ;;  %v8572_v14 = vadd.f32 %v15590_v5, %v15552_v13  ;;  %v12480_v13 = vld [vmem:[%s16164_s7 + $0xc0] sm:$0xff] }
 0x8d7   : > { %7805 = vst [vmem:[#allocation3 + $0x2ec] sm:$0xf] %v7741_v40  ;;  %v8656_v17 = vadd.f32 %v8655_v36, %v8567_v37  ;;  %v15623_v41 = vpop.f32.mrf.mxu1  ;;  %v12454_v33 = vld [vmem:[#allocation3 + $0x2e4] sm:$0xf0]  ;;  %v8570_v40 = vadd.f32 %v15565_v6, %v15526_v45  ;;  %v12483_v37 = vld [vmem:[%s16164_s7 + $0xd8] sm:$0xff]  ;;  %v12482_v45 = vld [vmem:[%s16164_s7 + $0xd0] sm:$0xff] }
 0x8d8   : > { %v15625_v20 = vor.u32 %v12454_v33, %v11726_v43  ;;  %7930 = vst [vmem:[#allocation3 + $0x2a8] sm:$0xf] %v7898_v48  ;;  %v12453_v36 = vld [vmem:[#allocation3 + $0x2d4] sm:$0xf] }
 0x8d9   : > { %9230 = vst.msk [vmem:[#allocation4 + $0x50] sm:$0xff] %vm9220_vm8, %v8656_v17 }
 0x8da   : > { %v12449_v23 = vld [vmem:[#allocation3 + $0x28c] sm:$0xf0]  ;;  %8529 = vmatmul.bf16.gmra.mxu1 %v15625_v20  ;;  %v15637_v29 = vpop.f32.mrf.mxu0  ;;  %9529 = vmatpush.bf16.msrb.mxu3 %v12483_v37 }
 0x8db   : > { %v15635_v59 = vor.u32 %v12449_v23, %v11710_v60 }
 0x8dc   : > { %v8576_v24 = vpop.f32.mrf.mxu2 }
 0x8dd   : > { %8697 = vmatmul.bf16.gmra.mxu3 %v15635_v59  ;;  %v7899_v11 = vld [vmem:[#allocation2 + $0xd8] sm:$0xf]  ;;  %v8577_v30 = vadd.f32 %v8576_v24, %v15601_v16 }
 0x8de   : > { %v8658_v48 = vpop.f32.mrf.mxu3  ;;  %v11728_v17 = vld [vmem:[#allocation3 + $0x2e8] sm:$0xf0]  ;;  %7931 = vst [vmem:[#allocation3 + $0x2c0] sm:$0xf] %v7899_v11  ;;  %9530 = vmatpush.bf16.msrb.mxu3 %v12482_v45  ;;  %v12502_v45 = vld [vmem:[%s16164_s7 + $0x170] sm:$0xff] }
 0x8df   : > { %v8659_v43 = vadd.f32 %v8658_v48, %v8570_v40  ;;  %v8492_v33 = vpop.f32.mrf.mxu1  ;;  %v15645_v60 = vor.u32 %v12453_v36, %v11728_v17  ;;  %v12481_v40 = vld [vmem:[%s16164_s7 + $0xc8] sm:$0xff]  ;;  %9704 = vmatpush.bf16.msrb.mxu1 %v12502_v45  ;;  %v12494_v45 = vld [vmem:[%s16164_s7 + $0x130] sm:$0xff] }
 0x8e0   : > { %v11722_v36 = vld [vmem:[#allocation3 + $0x2a8] sm:$0xf]  ;;  %9615 = vmatpush.bf16.msrb.mxu0 %v12494_v45  ;;  %12535 = vmatpush.bf16.msra.mxu2 %v12494_v45 }
 0x8e1   : > { %16918 = vst [vmem:[#allocation64_spill] sm:$0xff] %v15645_v60  ;;  %8618 = vmatmul.bf16.gmra.mxu2 %v15645_v60  ;;  %v11734_v60 = vld [vmem:[#allocation3 + $0x2d8] sm:$0xf] }
 0x8e2   : > { %9231 = vst.msk [vmem:[#allocation4 + $0x58] sm:$0xff] %vm9220_vm8, %v8659_v43  ;;  %v15652_v6 = vpop.f32.mrf.mxu0  ;;  %9531 = vmatpush.bf16.msrb.mxu3 %v12481_v40 }
 0x8e4   : > { %v8579_v23 = vpop.f32.mrf.mxu2 }
 0x8e5   : > { %9006 = vmatmul.bf16.gmra.mxu0 %v15403_v56  ;;  %v12452_v58 = vld [vmem:[#allocation3 + $0x2bc] sm:$0xf0] }
 0x8e6   : > { %v8660_v11 = vpop.f32.mrf.mxu3  ;;  %v15660_v17 = vor.u32 %v12452_v58, %v11722_v36  ;;  %9532 = vmatpush.bf16.msrb.mxu3 %v12480_v13 }
 0x8e7   : > { %v8661_v37 = vadd.f32 %v8660_v11, %v8572_v14  ;;  %v8495_v48 = vpop.f32.mrf.mxu1  ;;  %v8575_v14 = vadd.f32 %v15615_v27, %v15575_v26 }
 0x8e8   : > { %16919 = vst [vmem:[#allocation67_spill] sm:$0xff] %v15660_v17 }
 0x8e9   : > { %9232 = vst.msk [vmem:[#allocation4 + $0x60] sm:$0xff] %vm9220_vm8, %v8661_v37 }
 0x8ea   : > { %9050 = vmatmul.bf16.vlgmr.msra.gmra.mxu1 %v15179_v32  ;;  %v15667_v5 = vpop.f32.mrf.mxu0 }
 0x8ec   : > { %v8581_v43 = vpop.f32.mrf.mxu2 }
 0x8ed   : > { %8702 = vmatmul.bf16.gmra.mxu3 %v15660_v17  ;;  %v12455_v17 = vld [vmem:[#allocation3 + $0x2ec] sm:$0xf0] }
 0x8ee   : > { %v15681_v13 = vor.u32 %v12455_v17, %v11734_v60 }
 0x8ef   : > { %v8663_v58 = vpop.f32.mrf.mxu3  ;;  %v8497_v11 = vpop.f32.mrf.mxu1 }
 0x8f0   : > { %v8664_v40 = vadd.f32 %v8663_v58, %v8575_v14  ;;  %16920 = vst [vmem:[#allocation68_spill] sm:$0xff] %v15681_v13 }
 0x8f1   : > { %9139 = vmatmul.bf16.vlgmr.msrb.gmra.mxu2 %v15221_v4 }
 0x8f2   : > { %9233 = vst.msk [vmem:[#allocation4 + $0x68] sm:$0xff] %vm9220_vm8, %v8664_v40  ;;  %v15677_v37 = vpop.f32.mrf.mxu0  ;;  %v8582_v40 = vadd.f32 %v8581_v43, %v8492_v33 }
 0x8f4   : > { %v8584_v36 = vpop.f32.mrf.mxu2 }
 0x8f5   : > { %9011 = vmatmul.bf16.gmra.mxu0 %v15430_v10 }
 0x8f7   : > { %v8665_v50 = vpop.f32.mrf.mxu3  ;;  %v8500_v27 = vpop.f32.mrf.mxu1 }
 0x8f8   : > { %v8666_v26 = vadd.f32 %v8665_v50, %v8577_v30  ;;  %v8580_v30 = vadd.f32 %v8579_v23, %v15623_v41 }
 0x8fa   : > { %9234 = vst.msk [vmem:[#allocation4 + $0x70] sm:$0xff] %vm9220_vm8, %v8666_v26  ;;  %9055 = vmatmul.bf16.gmra.mxu1 %v15206_v12  ;;  %v15688_v14 = vpop.f32.mrf.mxu0 }
 0x8fc   : > { %v8586_v16 = vpop.f32.mrf.mxu2 }
 0x8fd   : > { %8707 = vmatmul.bf16.gmra.mxu3 %v15681_v13 }
 0x8ff   : > { %v8668_v50 = vpop.f32.mrf.mxu3  ;;  %v8502_v60 = vpop.f32.mrf.mxu1 }
 0x900   : > { %v8669_v24 = vadd.f32 %v8668_v50, %v8580_v30  ;;  %v12501_v30 = vld [vmem:[%s16164_s7 + $0x168] sm:$0xff]  ;;  %v8585_v50 = vadd.f32 %v8584_v36, %v8495_v48 }
 0x901   : > { %9144 = vmatmul.bf16.gmra.mxu2 %v15250_v54  ;;  %9705 = vmatpush.bf16.msrb.mxu1 %v12501_v30  ;;  %v12493_v36 = vld [vmem:[%s16164_s7 + $0x128] sm:$0xff] }
 0x902   : > { %9235 = vst.msk [vmem:[#allocation4 + $0x78] sm:$0xff] %vm9220_vm8, %v8669_v24  ;;  %v15694_v17 = vpop.f32.mrf.mxu0  ;;  %9616 = vmatpush.bf16.msrb.mxu0 %v12493_v36  ;;  %12536 = vmatpush.bf16.msra.mxu2 %v12493_v36 }
 0x904   : > { %v8589_v58 = vpop.f32.mrf.mxu2 }
 0x905   : > { %9016 = vmatmul.bf16.gmra.mxu0 %v15463_v31 }
 0x907   : > { %v8670_v26 = vpop.f32.mrf.mxu3  ;;  %v8505_v4 = vpop.f32.mrf.mxu1 }
 0x908   : > { %v8671_v45 = vadd.f32 %v8670_v26, %v8582_v40 }
 0x90a   : > { %9236 = vst.msk [vmem:[#allocation4 + $0x80] sm:$0xff] %vm9220_vm8, %v8671_v45  ;;  %9060 = vmatmul.bf16.gmra.mxu1 %v15233_v46  ;;  %v15699_v41 = vpop.f32.mrf.mxu0  ;;  %v8587_v45 = vadd.f32 %v8586_v16, %v8497_v11  ;;  %v8590_v11 = vadd.f32 %v8589_v58, %v8500_v27 }
 0x90c   : > { %v8591_v23 = vpop.f32.mrf.mxu2 }
 0x90d   : > { %9533 = vmatmul.bf16.vlgmr.msrb.gmra.mxu3 %v15100_v52 }
 0x90f   : > { %v8673_v33 = vpop.f32.mrf.mxu3  ;;  %v8507_v24 = vpop.f32.mrf.mxu1 }
 0x910   : > { %v8674_v43 = vadd.f32 %v8673_v33, %v8585_v50 }
 0x911   : > { %9149 = vmatmul.bf16.gmra.mxu2 %v15278_v9 }
 0x912   : > { %9237 = vst.msk [vmem:[#allocation4 + $0x88] sm:$0xff] %vm9220_vm8, %v8674_v43  ;;  %v15707_v40 = vpop.f32.mrf.mxu0  ;;  %v12492_v43 = vld [vmem:[%s16164_s7 + $0x120] sm:$0xff] }
 0x913   : > { %9617 = vmatpush.bf16.msrb.mxu0 %v12492_v43  ;;  %12537 = vmatpush.bf16.msra.mxu2 %v12492_v43 }
 0x914   : > { %v8594_v26 = vpop.f32.mrf.mxu2 }
 0x915   : > { %9021 = vmatmul.bf16.gmra.mxu0 %v15494_v34 }
 0x917   : > { %v8675_v52 = vpop.f32.mrf.mxu3  ;;  %v8510_v13 = vpop.f32.mrf.mxu1 }
 0x918   : > { %v8676_v54 = vadd.f32 %v8675_v52, %v8587_v45 }
 0x91a   : > { %9238 = vst.msk [vmem:[#allocation4 + $0x90] sm:$0xff] %vm9220_vm8, %v8676_v54  ;;  %9065 = vmatmul.bf16.gmra.mxu1 %v15261_v2  ;;  %v15712_v48 = vpop.f32.mrf.mxu0 }
 0x91c   : > { %v8596_v30 = vpop.f32.mrf.mxu2 }
 0x91d   : > { %9538 = vmatmul.bf16.gmra.mxu3 %v15195_v22  ;;  %v8592_v22 = vadd.f32 %v8591_v23, %v8502_v60  ;;  %v12500_v60 = vld [vmem:[%s16164_s7 + $0x160] sm:$0xff]  ;;  %v12490_v23 = vld [vmem:[%s16164_s7 + $0x110] sm:$0xff] }
 0x91e   : > { %9706 = vmatpush.bf16.msrb.mxu1 %v12500_v60 }
 0x91f   : > { %v8512_v50 = vpop.f32.mrf.mxu1 }
 0x920   : > { %v8678_v16 = vpop.f32.mrf.mxu3 }
 0x921   : > { %v8679_v33 = vadd.f32 %v8678_v16, %v8590_v11  ;;  %9154 = vmatmul.bf16.gmra.mxu2 %v15311_v19  ;;  %v12491_v11 = vld [vmem:[%s16164_s7 + $0x118] sm:$0xff] }
 0x922   : > { %v15720_v54 = vpop.f32.mrf.mxu0  ;;  %9618 = vmatpush.bf16.msrb.mxu0 %v12491_v11  ;;  %12538 = vmatpush.bf16.msra.mxu2 %v12491_v11 }
 0x923   : > { %9239 = vst.msk [vmem:[#allocation4 + $0x98] sm:$0xff] %vm9220_vm8, %v8679_v33  ;;  %v8595_v33 = vadd.f32 %v8594_v26, %v8505_v4  ;;  %v12488_v4 = vld [vmem:[%s16164_s7 + $0x100] sm:$0xff]  ;;  %v8597_v26 = vadd.f32 %v8596_v30, %v8507_v24 }
 0x924   : > { %v8599_v45 = vpop.f32.mrf.mxu2 }
 0x925   : > { %9026 = vmatmul.bf16.gmra.mxu0 %v15531_v15 }
 0x926   : > { %9619 = vmatpush.bf16.msrb.mxu0 %v12490_v23  ;;  %12539 = vmatpush.bf16.msra.mxu2 %v12490_v23 }
 0x927   : > { %v8515_v58 = vpop.f32.mrf.mxu1 }
 0x928   : > { %v8680_v27 = vpop.f32.mrf.mxu3 }
 0x929   : > { %v8681_v52 = vadd.f32 %v8680_v27, %v8592_v22 }
 0x92a   : > { %9070 = vmatmul.bf16.gmra.mxu1 %v15289_v3  ;;  %v15728_v36 = vpop.f32.mrf.mxu0 }
 0x92b   : > { %9240 = vst.msk [vmem:[#allocation4 + $0xa0] sm:$0xff] %vm9220_vm8, %v8681_v52  ;;  %v12489_v52 = vld [vmem:[%s16164_s7 + $0x108] sm:$0xff] }
 0x92c   : > { %v8601_v16 = vpop.f32.mrf.mxu2  ;;  %9620 = vmatpush.bf16.msrb.mxu0 %v12489_v52  ;;  %12540 = vmatpush.bf16.msra.mxu2 %v12489_v52 }
 0x92d   : > { %9543 = vmatmul.bf16.gmra.mxu3 %v15219_v21  ;;  %v8602_v52 = vadd.f32 %v8601_v16, %v8512_v50 }
 0x92f   : > { %v8517_v22 = vpop.f32.mrf.mxu1 }
 0x930   : > { %v8683_v43 = vpop.f32.mrf.mxu3  ;;  %9621 = vmatpush.bf16.msrb.mxu0 %v12488_v4  ;;  %12541 = vmatpush.bf16.msra.mxu2 %v12488_v4 }
 0x931   : > { %v8684_v27 = vadd.f32 %v8683_v43, %v8595_v33  ;;  %9159 = vmatmul.bf16.gmra.mxu2 %v15334_v1 }
 0x932   : > { %v15742_v21 = vpop.f32.mrf.mxu0 }
 0x933   : > { %9241 = vst.msk [vmem:[#allocation4 + $0xa8] sm:$0xff] %vm9220_vm8, %v8684_v27  ;;  %v8600_v27 = vadd.f32 %v8599_v45, %v8510_v13 }
 0x934   : > { %v8604_v19 = vpop.f32.mrf.mxu2 }
 0x935   : > { %9031 = vmatmul.bf16.gmra.mxu0 %v15577_v51  ;;  %v8605_v13 = vadd.f32 %v8604_v19, %v8515_v58  ;;  %v16921_v19 = vld [vmem:[#allocation91_spill] sm:$0xff] }
 0x937   : > { %v8520_v60 = vpop.f32.mrf.mxu1 }
 0x938   : > { %v8685_v11 = vpop.f32.mrf.mxu3 }
 0x939   : > { %v8686_v33 = vadd.f32 %v8685_v11, %v8597_v26 }
 0x93a   : > { %9075 = vmatmul.bf16.gmra.mxu1 %v15321_v35  ;;  %v15753_v43 = vpop.f32.mrf.mxu0 }
 0x93b   : > { %9242 = vst.msk [vmem:[#allocation4 + $0xb0] sm:$0xff] %vm9220_vm8, %v8686_v33 }
 0x93c   : > { %v8606_v23 = vpop.f32.mrf.mxu2 }
 0x93d   : > { %9548 = vmatmul.bf16.gmra.mxu3 %v15247_v7 }
 0x93f   : > { %v8522_v9 = vpop.f32.mrf.mxu1 }
 0x940   : > { %v8688_v1 = vpop.f32.mrf.mxu3 }
 0x941   : > { %v8689_v51 = vadd.f32 %v8688_v1, %v8600_v27  ;;  %9164 = vmatmul.bf16.gmra.mxu2 %v15354_v63  ;;  %v16922_v63 = vld [vmem:[#allocation8_spill] sm:$0xff] }
 0x942   : > { %v15758_v24 = vpop.f32.mrf.mxu0 }
 0x943   : > { %9243 = vst.msk [vmem:[#allocation4 + $0xb8] sm:$0xff] %vm9220_vm8, %v8689_v51  ;;  %v12499_v51 = vld [vmem:[%s16164_s7 + $0x158] sm:$0xff] }
 0x944   : > { %v8609_v30 = vpop.f32.mrf.mxu2  ;;  %9707 = vmatpush.bf16.msrb.mxu1 %v12499_v51 }
 0x945   : > { %9036 = vmatmul.bf16.gmra.mxu0 %v15625_v20 }
 0x947   : > { %v8525_v11 = vpop.f32.mrf.mxu1 }
 0x948   : > { %v8690_v26 = vpop.f32.mrf.mxu3 }
 0x949   : > { %v8691_v4 = vadd.f32 %v8690_v26, %v8602_v52 }
 0x94a   : > { %9080 = vmatmul.bf16.gmra.mxu1 %v15341_v28  ;;  %v15763_v7 = vpop.f32.mrf.mxu0 }
 0x94b   : > { %9244 = vst.msk [vmem:[#allocation4 + $0xc0] sm:$0xff] %vm9220_vm8, %v8691_v4 }
 0x94c   : > { %v8611_v1 = vpop.f32.mrf.mxu2 }
 0x94d   : > { %9553 = vmatmul.bf16.gmra.mxu3 %v15275_v18  ;;  %v8607_v18 = vadd.f32 %v8606_v23, %v8517_v22  ;;  %v8612_v23 = vadd.f32 %v8611_v1, %v8522_v9 }
 0x94f   : > { %v8527_v50 = vpop.f32.mrf.mxu1 }
 0x950   : > { %v8693_v45 = vpop.f32.mrf.mxu3 }
 0x951   : > { %v8694_v16 = vadd.f32 %v8693_v45, %v8605_v13  ;;  %9169 = vmatmul.bf16.gmra.mxu2 %v15373_v61  ;;  %v8610_v13 = vadd.f32 %v8609_v30, %v8520_v60 }
 0x952   : > { %v15771_v33 = vpop.f32.mrf.mxu0 }
 0x953   : > { %9245 = vst.msk [vmem:[#allocation4 + $0xc8] sm:$0xff] %vm9220_vm8, %v8694_v16 }
 0x954   : > { %v8614_v27 = vpop.f32.mrf.mxu2 }
 0x955   : > { %9622 = vmatmul.bf16.vlgmr.msrb.gmra.mxu0 %v15179_v32 }
 0x957   : > { %v8530_v26 = vpop.f32.mrf.mxu1 }
 0x958   : > { %v8695_v52 = vpop.f32.mrf.mxu3 }
 0x959   : > { %v8696_v4 = vadd.f32 %v8695_v52, %v8607_v18 }
 0x95a   : > { %9085 = vmatmul.bf16.gmra.mxu1 %v16921_v19  ;;  %v15776_v58 = vpop.f32.mrf.mxu0 }
 0x95b   : > { %9246 = vst.msk [vmem:[#allocation4 + $0xd0] sm:$0xff] %vm9220_vm8, %v8696_v4 }
 0x95c   : > { %v8616_v51 = vpop.f32.mrf.mxu2 }
 0x95d   : > { %9558 = vmatmul.bf16.gmra.mxu3 %v15308_v39  ;;  %v16923_v39 = vld [vmem:[#allocation93_spill] sm:$0xff] }
 0x95f   : > { %v8532_v16 = vpop.f32.mrf.mxu1 }
 0x960   : > { %v8698_v45 = vpop.f32.mrf.mxu3 }
 0x961   : > { %v8699_v61 = vadd.f32 %v8698_v45, %v8610_v13  ;;  %9174 = vmatmul.bf16.gmra.mxu2 %v16922_v63  ;;  %v8615_v13 = vadd.f32 %v8614_v27, %v8525_v11 }
 0x962   : > { %v15781_v32 = vpop.f32.mrf.mxu0 }
 0x963   : > { %9247 = vst.msk [vmem:[#allocation4 + $0xd8] sm:$0xff] %vm9220_vm8, %v8699_v61  ;;  %v12498_v61 = vld [vmem:[%s16164_s7 + $0x150] sm:$0xff] }
 0x964   : > { %v8619_v22 = vpop.f32.mrf.mxu2  ;;  %9708 = vmatpush.bf16.msrb.mxu1 %v12498_v61  ;;  %v16924_v61 = vld [vmem:[#allocation9_spill] sm:$0xff] }
 0x965   : > { %9627 = vmatmul.bf16.gmra.mxu0 %v15206_v12 }
 0x967   : > { %v9051_v52 = vpop.f32.mrf.mxu1 }
 0x968   : > { %v8700_v18 = vpop.f32.mrf.mxu3 }
 0x969   : > { %v8701_v4 = vadd.f32 %v8700_v18, %v8612_v23  ;;  %v9052_v23 = vadd.f32 %v9051_v52, %v15607_v0 }
 0x96a   : > { %9090 = vmatmul.bf16.gmra.mxu1 %v16923_v39  ;;  %v15786_v60 = vpop.f32.mrf.mxu0 }
 0x96b   : > { %9248 = vst.msk [vmem:[#allocation4 + $0xe0] sm:$0xff] %vm9220_vm8, %v8701_v4  ;;  %v8617_v4 = vadd.f32 %v8616_v51, %v8527_v50 }
 0x96c   : > { %v8621_v30 = vpop.f32.mrf.mxu2 }
 0x96d   : > { %9563 = vmatmul.bf16.gmra.mxu3 %v15331_v25 }
 0x96f   : > { %v9053_v9 = vpop.f32.mrf.mxu1 }
 0x970   : > { %v8703_v12 = vpop.f32.mrf.mxu3 }
 0x971   : > { %v8704_v1 = vadd.f32 %v8703_v12, %v8615_v13  ;;  %9179 = vmatmul.bf16.gmra.mxu2 %v15433_v53  ;;  %v9054_v12 = vadd.f32 %v9053_v9, %v15637_v29 }
 0x972   : > { %v15794_v45 = vpop.f32.mrf.mxu0 }
 0x973   : > { %9249 = vst.msk [vmem:[#allocation4 + $0xe8] sm:$0xff] %vm9220_vm8, %v8704_v1  ;;  %v8620_v1 = vadd.f32 %v8619_v22, %v8530_v26 }
 0x974   : > { %v9140_v18 = vpop.f32.mrf.mxu2 }
 0x975   : > { %v9141_v25 = vadd.f32 %v9140_v18, %v9052_v23  ;;  %9632 = vmatmul.bf16.gmra.mxu0 %v15233_v46 }
 0x977   : > { %9253 = vst.msk [vmem:[#allocation5 + $0x8] sm:$0xff] %vm9220_vm8, %v9141_v25  ;;  %v9056_v11 = vpop.f32.mrf.mxu1  ;;  %v16925_v25 = vld [vmem:[#allocation94_spill] sm:$0xff] }
 0x978   : > { %v8705_v63 = vpop.f32.mrf.mxu3  ;;  %v9057_v23 = vadd.f32 %v9056_v11, %v15652_v6 }
 0x979   : > { %v8706_v27 = vadd.f32 %v8705_v63, %v8617_v4 }
 0x97a   : > { %9095 = vmatmul.bf16.gmra.mxu1 %v16924_v61  ;;  %v15801_v13 = vpop.f32.mrf.mxu0 }
 0x97b   : > { %9250 = vst.msk [vmem:[#allocation4 + $0xf0] sm:$0xff] %vm9220_vm8, %v8706_v27 }
 0x97c   : > { %v9142_v0 = vpop.f32.mrf.mxu2 }
 0x97d   : > { %9568 = vmatmul.bf16.gmra.mxu3 %v15351_v62  ;;  %v9143_v52 = vadd.f32 %v9142_v0, %v9054_v12  ;;  %v8622_v62 = vadd.f32 %v8621_v30, %v8532_v16 }
 0x97f   : > { %9254 = vst.msk [vmem:[#allocation5 + $0x10] sm:$0xff] %vm9220_vm8, %v9143_v52  ;;  %v9058_v50 = vpop.f32.mrf.mxu1 }
 0x980   : > { %v8708_v46 = vpop.f32.mrf.mxu3  ;;  %v9059_v27 = vadd.f32 %v9058_v50, %v15667_v5 }
 0x981   : > { %v8709_v51 = vadd.f32 %v8708_v46, %v8620_v1  ;;  %9184 = vmatmul.bf16.gmra.mxu2 %v15468_v38 }
 0x982   : > { %v15808_v63 = vpop.f32.mrf.mxu0 }
 0x983   : > { %9251 = vst.msk [vmem:[#allocation4 + $0xf8] sm:$0xff] %vm9220_vm8, %v8709_v51 }
 0x984   : > { %v9145_v18 = vpop.f32.mrf.mxu2 }
 0x985   : > { %v9146_v29 = vadd.f32 %v9145_v18, %v9057_v23  ;;  %9637 = vmatmul.bf16.gmra.mxu0 %v15261_v2  ;;  %v12497_v2 = vld [vmem:[%s16164_s7 + $0x148] sm:$0xff] }
 0x986   : > { %9709 = vmatpush.bf16.msrb.mxu1 %v12497_v2 }
 0x987   : > { %9255 = vst.msk [vmem:[#allocation5 + $0x18] sm:$0xff] %vm9220_vm8, %v9146_v29  ;;  %v9061_v26 = vpop.f32.mrf.mxu1 }
 0x988   : > { %v8710_v9 = vpop.f32.mrf.mxu3  ;;  %v9062_v12 = vadd.f32 %v9061_v26, %v15677_v37 }
 0x989   : > { %v8711_v22 = vadd.f32 %v8710_v9, %v8622_v62 }
 0x98a   : > { %9100 = vmatmul.bf16.gmra.mxu1 %v16925_v25  ;;  %v15815_v4 = vpop.f32.mrf.mxu0 }
 0x98b   : > { %9252 = vst.msk [vmem:[#allocation4 + $0x100] sm:$0xff] %vm9220_vm8, %v8711_v22 }
 0x98c   : > { %v9147_v6 = vpop.f32.mrf.mxu2 }
 0x98d   : > { %9573 = vmatmul.bf16.gmra.mxu3 %v15370_v49  ;;  %v9148_v16 = vadd.f32 %v9147_v6, %v9059_v27 }
 0x98f   : > { %9256 = vst.msk [vmem:[#allocation5 + $0x20] sm:$0xff] %vm9220_vm8, %v9148_v16  ;;  %v9063_v30 = vpop.f32.mrf.mxu1 }
 0x990   : > { %v9064_v1 = vadd.f32 %v9063_v30, %v15688_v14 }
 0x991   : > { %9189 = vmatmul.bf16.gmra.mxu2 %v15499_v44 }
 0x992   : > { %v15824_v11 = vpop.f32.mrf.mxu0 }
 0x994   : > { %v9150_v0 = vpop.f32.mrf.mxu2 }
 0x995   : > { %v9151_v5 = vadd.f32 %v9150_v0, %v9062_v12  ;;  %9642 = vmatmul.bf16.gmra.mxu0 %v15289_v3 }
 0x997   : > { %9257 = vst.msk [vmem:[#allocation5 + $0x28] sm:$0xff] %vm9220_vm8, %v9151_v5  ;;  %v9066_v49 = vpop.f32.mrf.mxu1 }
 0x998   : > { %v9067_v3 = vadd.f32 %v9066_v49, %v15694_v17  ;;  %v12496_v17 = vld [vmem:[%s16164_s7 + $0x140] sm:$0xff] }
 0x999   : > { %9710 = vmatpush.bf16.msrb.mxu1 %v12496_v17 }
 0x99a   : > { %9105 = vmatmul.bf16.gmra.mxu1 %v15480_v55  ;;  %v15830_v52 = vpop.f32.mrf.mxu0 }
 0x99c   : > { %v9152_v46 = vpop.f32.mrf.mxu2 }
 0x99d   : > { %9578 = vmatmul.bf16.gmra.mxu3 %v15403_v56  ;;  %v9153_v50 = vadd.f32 %v9152_v46, %v9064_v1  ;;  %v16926_v46 = vld [vmem:[#allocation60_spill] sm:$0xff] }
 0x99f   : > { %9258 = vst.msk [vmem:[#allocation5 + $0x30] sm:$0xff] %vm9220_vm8, %v9153_v50  ;;  %v9068_v37 = vpop.f32.mrf.mxu1 }
 0x9a0   : > { %v9069_v29 = vadd.f32 %v9068_v37, %v15699_v41 }
 0x9a1   : > { %9194 = vmatmul.bf16.gmra.mxu2 %v15536_v42 }
 0x9a2   : > { %v15836_v51 = vpop.f32.mrf.mxu0 }
 0x9a4   : > { %v9155_v23 = vpop.f32.mrf.mxu2 }
 0x9a5   : > { %v9156_v18 = vadd.f32 %v9155_v23, %v9067_v3  ;;  %9647 = vmatmul.bf16.gmra.mxu0 %v15321_v35  ;;  %v9285_v23 = vld [vmem:[#allocation4 + $0x7] sm:$0xff] }
 0x9a7   : > { %9259 = vst.msk [vmem:[#allocation5 + $0x38] sm:$0xff] %vm9220_vm8, %v9156_v18  ;;  %v9071_v14 = vpop.f32.mrf.mxu1 }
 0x9a8   : > { %v9072_v22 = vadd.f32 %v9071_v14, %v15707_v40 }
 0x9aa   : > { %9110 = vmatmul.bf16.gmra.mxu1 %v15511_v57  ;;  %v15842_v56 = vpop.f32.mrf.mxu0 }
 0x9ac   : > { %v9157_v62 = vpop.f32.mrf.mxu2 }
 0x9ad   : > { %9583 = vmatmul.bf16.gmra.mxu3 %v15430_v10  ;;  %v9158_v9 = vadd.f32 %v9157_v62, %v9069_v29  ;;  %v9534_v10 = vpop.f32.mrf.mxu3  ;;  %v16928_v62 = vld [vmem:[#allocation67_spill] sm:$0xff] }
 0x9af   : > { %9260 = vst.msk [vmem:[#allocation5 + $0x40] sm:$0xff] %vm9220_vm8, %v9158_v9  ;;  %v9073_v35 = vpop.f32.mrf.mxu1 }
 0x9b0   : > { %v9074_v16 = vadd.f32 %v9073_v35, %v15712_v48 }
 0x9b1   : > { %9199 = vmatmul.bf16.gmra.mxu2 %v15582_v8 }
 0x9b2   : > { %v15851_v26 = vpop.f32.mrf.mxu0 }
 0x9b4   : > { %v9160_v27 = vpop.f32.mrf.mxu2 }
 0x9b5   : > { %v9161_v41 = vadd.f32 %v9160_v27, %v9072_v22  ;;  %9652 = vmatmul.bf16.gmra.mxu0 %v15341_v28  ;;  %v9536_v0 = vpop.f32.mrf.mxu3 }
 0x9b7   : > { %9261 = vst.msk [vmem:[#allocation5 + $0x48] sm:$0xff] %vm9220_vm8, %v9161_v41  ;;  %v9076_v6 = vpop.f32.mrf.mxu1  ;;  %v9286_v41 = vld [vmem:[#allocation4 + $0xf] sm:$0xff] }
 0x9b8   : > { %v9077_v5 = vadd.f32 %v9076_v6, %v15720_v54  ;;  %v12554_v6 = vld [vmem:[#allocation6] ss:$0 sm:$0xff] }
 0x9b9   : > { %9860 = vperm.xlu0 %12551, %v12554_v6  }
 0x9ba   : > { %9115 = vmatmul.bf16.gmra.mxu1 %v15554_v47  ;;  %v15857_v2 = vpop.f32.mrf.mxu0 }
 0x9bc   : > { %v9162_v30 = vpop.f32.mrf.mxu2 }
 0x9bd   : > { %9588 = vmatmul.bf16.gmra.mxu3 %v15463_v31  ;;  %v9163_v12 = vadd.f32 %v9162_v30, %v9074_v16  ;;  %v9539_v31 = vpop.f32.mrf.mxu3  ;;  %v9537_v16 = vadd.f32 %v9536_v0, %v9286_v41  ;;  %v16929_v30 = vld [vmem:[#allocation64_spill] sm:$0xff] }
 0x9be   : > { %v9289_v41 = vld [vmem:[#allocation4 + $0x27] sm:$0xff] }
 0x9bf   : > { %9262 = vst.msk [vmem:[#allocation5 + $0x50] sm:$0xff] %vm9220_vm8, %v9163_v12  ;;  %v9078_v40 = vpop.f32.mrf.mxu1 }
 0x9c0   : > { %v9079_v37 = vadd.f32 %v9078_v40, %v15728_v36 }
 0x9c1   : > { %9204 = vmatmul.bf16.gmra.mxu2 %v15635_v59 }
 0x9c2   : > { %v15863_v28 = vpop.f32.mrf.mxu0 }
 0x9c4   : > { %v9165_v49 = vpop.f32.mrf.mxu2 }
 0x9c5   : > { %v9166_v1 = vadd.f32 %v9165_v49, %v9077_v5  ;;  %9657 = vmatmul.bf16.gmra.mxu0 %v16921_v19  ;;  %v9349_v19 = vsel %vm13846_vm2, %v9285_v23, 0.0  ;;  %v9541_v36 = vpop.f32.mrf.mxu3  ;;  %v9287_v5 = vld [vmem:[#allocation4 + $0x17] sm:$0xff]  ;;  %vm9895_vm2 = vcmask 7168  }
 0x9c6   : > { %v9535_v29 = vadd.f32 %v9534_v10, %v9349_v19  ;;  %v9351_v0 = vsel %vm13865_vm3, %v9287_v5, 0.0  ;;  %v9288_v19 = vld [vmem:[#allocation4 + $0x1f] sm:$0xff] }
 0x9c7   : > { %9263 = vst.msk [vmem:[#allocation5 + $0x58] sm:$0xff] %vm9220_vm8, %v9166_v1  ;;  %v9081_v48 = vpop.f32.mrf.mxu1 }
 0x9c8   : > { %v9082_v9 = vadd.f32 %v9081_v48, %v15742_v21 }
 0x9ca   : > { %9120 = vmatmul.bf16.gmra.mxu1 %v16926_v46  ;;  %v15869_v50 = vpop.f32.mrf.mxu0 }
 0x9cc   : > { %v9167_v3 = vpop.f32.mrf.mxu2 }
 0x9cd   : > { %9593 = vmatmul.bf16.gmra.mxu3 %v15494_v34  ;;  %v9168_v18 = vadd.f32 %v9167_v3, %v9079_v37  ;;  %v9540_v37 = vadd.f32 %v9539_v31, %v9351_v0  ;;  %v16931_v3 = vld [vmem:[#allocation68_spill] sm:$0xff] }
 0x9ce   : > { %v9290_v0 = vld [vmem:[#allocation4 + $0x2f] sm:$0xff] }
 0x9cf   : > { %9264 = vst.msk [vmem:[#allocation5 + $0x60] sm:$0xff] %vm9220_vm8, %v9168_v18  ;;  %v9083_v54 = vpop.f32.mrf.mxu1 }
 0x9d0   : > { %v9084_v12 = vadd.f32 %v9083_v54, %v15753_v43 }
 0x9d1   : > { %9209 = vmatmul.bf16.gmra.mxu2 %v16928_v62 }
 0x9d2   : > { %v9623_v17 = vpop.f32.mrf.mxu0 }
 0x9d3   : > { %v15878_v35 = vadd.f32 %v9623_v17, %v9535_v29  ;;  %v9542_v17 = vadd.f32 %v9541_v36, %v9288_v19 }
 0x9d4   : > { %v9170_v22 = vpop.f32.mrf.mxu2 }
 0x9d5   : > { %v9171_v34 = vadd.f32 %v9170_v22, %v9082_v9  ;;  %9662 = vmatmul.bf16.gmra.mxu0 %v16923_v39  ;;  %v9544_v39 = vpop.f32.mrf.mxu3  ;;  %v16932_v9 = vld [vmem:[#allocation83_spill] sm:$0xff] }
 0x9d7   : > { %9265 = vst.msk [vmem:[#allocation5 + $0x68] sm:$0xff] %vm9220_vm8, %v9171_v34  ;;  %v9086_v27 = vpop.f32.mrf.mxu1 }
 0x9d8   : > { %v9087_v43 = vadd.f32 %v9086_v27, %v15758_v24  ;;  %v16933_v24 = vld [vmem:[#allocation95_spill] sm:$0xff] }
 0x9da   : > { %9125 = vmatmul.bf16.gmra.mxu1 %v16929_v30  ;;  %v9625_v10 = vpop.f32.mrf.mxu0 }
 0x9db   : > { %v15884_v21 = vadd.f32 %v9625_v10, %v9537_v16  ;;  %v9353_v10 = vsel %vm13883_vm4, %v9289_v41, 0.0  ;;  %v16937_v41 = vld [vmem:[#allocation87_spill] sm:$0xff] }
 0x9dc   : > { %v9172_v40 = vpop.f32.mrf.mxu2 }
 0x9dd   : > { %9598 = vmatmul.bf16.gmra.mxu3 %v15531_v15  ;;  %v9173_v49 = vadd.f32 %v9172_v40, %v9084_v12  ;;  %v9546_v29 = vpop.f32.mrf.mxu3  ;;  %v9545_v12 = vadd.f32 %v9544_v39, %v9353_v10 }
 0x9df   : > { %9266 = vst.msk [vmem:[#allocation5 + $0x70] sm:$0xff] %vm9220_vm8, %v9173_v49  ;;  %v9088_v1 = vpop.f32.mrf.mxu1 }
 0x9e0   : > { %v9089_v22 = vadd.f32 %v9088_v1, %v15763_v7 }
 0x9e1   : > { %9214 = vmatmul.bf16.gmra.mxu2 %v16931_v3 }
 0x9e2   : > { %v9628_v23 = vpop.f32.mrf.mxu0 }
 0x9e3   : > { %v15892_v18 = vadd.f32 %v9628_v23, %v9540_v37  ;;  %v9547_v37 = vadd.f32 %v9546_v29, %v9290_v0  ;;  %v16935_v23 = vld [vmem:[#allocation85_spill] sm:$0xff] }
 0x9e4   : > { %v9175_v54 = vpop.f32.mrf.mxu2 }
 0x9e5   : > { %v9176_v15 = vadd.f32 %v9175_v54, %v9087_v43  ;;  %9667 = vmatmul.bf16.gmra.mxu0 %v16924_v61  ;;  %v15905_v36 = vpop.f32.mrf.mxu3 }
 0x9e7   : > { %9267 = vst.msk [vmem:[#allocation5 + $0x78] sm:$0xff] %vm9220_vm8, %v9176_v15  ;;  %v9091_v14 = vpop.f32.mrf.mxu1 }
 0x9e8   : > { %v9092_v7 = vadd.f32 %v9091_v14, %v15771_v33 }
 0x9ea   : > { %9711 = vmatmul.bf16.vlgmr.msrb.gmra.mxu1 %v16932_v9  ;;  %v9630_v31 = vpop.f32.mrf.mxu0 }
 0x9eb   : > { %v15898_v34 = vadd.f32 %v9630_v31, %v9542_v17  ;;  %v16936_v17 = vld [vmem:[#allocation86_spill] sm:$0xff] }
 0x9ec   : > { %v9177_v27 = vpop.f32.mrf.mxu2 }
 0x9ed   : > { %9603 = vmatmul.bf16.gmra.mxu3 %v16933_v24  ;;  %v9178_v6 = vadd.f32 %v9177_v27, %v9089_v22  ;;  %v15916_v54 = vpop.f32.mrf.mxu3 }
 0x9ef   : > { %9268 = vst.msk [vmem:[#allocation5 + $0x80] sm:$0xff] %vm9220_vm8, %v9178_v6  ;;  %v9093_v61 = vpop.f32.mrf.mxu1 }
 0x9f1   : > { %9697 = vmatmul.bf16.vlgmr.msra.gmra.mxu2 %v16929_v30  ;;  %v9094_v30 = vadd.f32 %v9093_v61, %v15776_v58 }
 0x9f2   : > { %v9633_v40 = vpop.f32.mrf.mxu0 }
 0x9f3   : > { %v15908_v5 = vadd.f32 %v9633_v40, %v9545_v12  ;;  %v16938_v40 = vld [vmem:[#allocation88_spill] sm:$0xff] }
 0x9f4   : > { %v9180_v49 = vpop.f32.mrf.mxu2 }
 0x9f5   : > { %v9181_v1 = vadd.f32 %v9180_v49, %v9092_v7  ;;  %9672 = vmatmul.bf16.gmra.mxu0 %v16925_v25 }
 0x9f7   : > { %9269 = vst.msk [vmem:[#allocation5 + $0x88] sm:$0xff] %vm9220_vm8, %v9181_v1  ;;  %v9096_v48 = vpop.f32.mrf.mxu1 }
 0x9f8   : > { %v9097_v14 = vadd.f32 %v9096_v48, %v15781_v32 }
 0x9fa   : > { %9716 = vmatmul.bf16.gmra.mxu1 %v16935_v23  ;;  %v9635_v39 = vpop.f32.mrf.mxu0 }
 0x9fb   : > { %v15914_v43 = vadd.f32 %v9635_v39, %v9547_v37  ;;  %v16939_v37 = vld [vmem:[#allocation90_spill] sm:$0xff] }
 0x9fc   : > { %v9182_v33 = vpop.f32.mrf.mxu2 }
 0x9fd   : > { %9608 = vmatmul.bf16.gmra.mxu3 %v15625_v20  ;;  %v9183_v15 = vadd.f32 %v9182_v33, %v9094_v30 }
 0x9ff   : > { %9270 = vst.msk [vmem:[#allocation5 + $0x90] sm:$0xff] %vm9220_vm8, %v9183_v15  ;;  %v9098_v25 = vpop.f32.mrf.mxu1 }
 0xa00   : > { %v9099_v9 = vadd.f32 %v9098_v25, %v15786_v60 }
 0xa04   : > { %v9185_v19 = vpop.f32.mrf.mxu2 }
 0xa05   : > { %v9186_v29 = vadd.f32 %v9185_v19, %v9097_v14  ;;  %9677 = vmatmul.bf16.gmra.mxu0 %v15480_v55 }
 0xa07   : > { %9271 = vst.msk [vmem:[#allocation5 + $0x98] sm:$0xff] %vm9220_vm8, %v9186_v29  ;;  %v9101_v58 = vpop.f32.mrf.mxu1 }
 0xa08   : > { %v9102_v24 = vadd.f32 %v9101_v58, %v15794_v45 }
 0xa0a   : > { %9721 = vmatmul.bf16.gmra.mxu1 %v16936_v17 }
 0xa0c   : > { %v9187_v31 = vpop.f32.mrf.mxu2 }
 0xa0d   : > { %v9188_v20 = vadd.f32 %v9187_v31, %v9099_v9  ;;  %v16941_v31 = vld [vmem:[#allocation8_spill] sm:$0xff] }
 0xa0f   : > { %9272 = vst.msk [vmem:[#allocation5 + $0xa0] sm:$0xff] %vm9220_vm8, %v9188_v20  ;;  %v9103_v22 = vpop.f32.mrf.mxu1 }
 0xa10   : > { %v9104_v6 = vadd.f32 %v9103_v22, %v15801_v13 }
 0xa14   : > { %v9190_v27 = vpop.f32.mrf.mxu2 }
 0xa15   : > { %v9191_v32 = vadd.f32 %v9190_v27, %v9102_v24  ;;  %9682 = vmatmul.bf16.gmra.mxu0 %v15511_v57 }
 0xa17   : > { %9273 = vst.msk [vmem:[#allocation5 + $0xa8] sm:$0xff] %vm9220_vm8, %v9191_v32  ;;  %v9106_v55 = vpop.f32.mrf.mxu1 }
 0xa18   : > { %v9107_v10 = vadd.f32 %v9106_v55, %v15808_v63  ;;  %v15955_v55 = vpop.f32.mrf.mxu0 }
 0xa1a   : > { %9726 = vmatmul.bf16.gmra.mxu1 %v16937_v41 }
 0xa1c   : > { %v9192_v61 = vpop.f32.mrf.mxu2 }
 0xa1d   : > { %v9193_v60 = vadd.f32 %v9192_v61, %v9104_v6  ;;  %v9317_v61 = vld [vmem:[#allocation5 + $0x9] sm:$0xff] }
 0xa1f   : > { %9274 = vst.msk [vmem:[#allocation5 + $0xb0] sm:$0xff] %vm9220_vm8, %v9193_v60  ;;  %v9108_v16 = vpop.f32.mrf.mxu1 }
 0xa20   : > { %v9109_v7 = vadd.f32 %v9108_v16, %v15815_v4 }
 0xa24   : > { %v9195_v12 = vpop.f32.mrf.mxu2 }
 0xa25   : > { %v9196_v45 = vadd.f32 %v9195_v12, %v9107_v10  ;;  %9687 = vmatmul.bf16.gmra.mxu0 %v15554_v47  ;;  %v9318_v12 = vld [vmem:[#allocation5 + $0x11] sm:$0xff] }
 0xa27   : > { %9275 = vst.msk [vmem:[#allocation5 + $0xb8] sm:$0xff] %vm9220_vm8, %v9196_v45  ;;  %v9111_v57 = vpop.f32.mrf.mxu1  ;;  %v9640_v45 = vpop.f32.mrf.mxu0 }
 0xa28   : > { %v9112_v48 = vadd.f32 %v9111_v57, %v15824_v11 }
 0xa2a   : > { %9731 = vmatmul.bf16.gmra.mxu1 %v16938_v40  ;;  %v15974_v40 = vpop.f32.mrf.mxu3 }
 0xa2b   : > { %v15960_v60 = vpop.permute.xlu0 %9860 }
 0xa2c   : > { %v9197_v49 = vpop.f32.mrf.mxu2 }
 0xa2d   : > { %v9198_v13 = vadd.f32 %v9197_v49, %v9109_v7 }
 0xa2f   : > { %9276 = vst.msk [vmem:[#allocation5 + $0xc0] sm:$0xff] %vm9220_vm8, %v9198_v13  ;;  %v9113_v1 = vpop.f32.mrf.mxu1 }
 0xa30   : > { %v9114_v23 = vadd.f32 %v9113_v1, %v15830_v52 }
 0xa34   : > { %v9200_v0 = vpop.f32.mrf.mxu2 }
 0xa35   : > { %v9201_v63 = vadd.f32 %v9200_v0, %v9112_v48  ;;  %9692 = vmatmul.bf16.gmra.mxu0 %v16926_v46  ;;  %v16940_v46 = vld [vmem:[#allocation92_spill] sm:$0xff]  ;;  %v9643_v0 = vpop.f32.mrf.mxu0 }
 0xa37   : > { %9277 = vst.msk [vmem:[#allocation5 + $0xc8] sm:$0xff] %vm9220_vm8, %v9201_v63  ;;  %v9116_v47 = vpop.f32.mrf.mxu1  ;;  %v9319_v63 = vld [vmem:[#allocation5 + $0x19] sm:$0xff] }
 0xa38   : > { %v9117_v33 = vadd.f32 %v9116_v47, %v15836_v51 }
 0xa3a   : > { %9736 = vmatmul.bf16.gmra.mxu1 %v16939_v37 }
 0xa3c   : > { %v9202_v39 = vpop.f32.mrf.mxu2 }
 0xa3d   : > { %v9203_v4 = vadd.f32 %v9202_v39, %v9114_v23  ;;  %v9320_v23 = vld [vmem:[#allocation5 + $0x21] sm:$0xff] }
 0xa3f   : > { %9278 = vst.msk [vmem:[#allocation5 + $0xd0] sm:$0xff] %vm9220_vm8, %v9203_v4  ;;  %v9118_v30 = vpop.f32.mrf.mxu1 }
 0xa40   : > { %v9119_v14 = vadd.f32 %v9118_v30, %v15842_v56 }
 0xa44   : > { %v9205_v15 = vpop.f32.mrf.mxu2 }
 0xa45   : > { %v9206_v11 = vadd.f32 %v9205_v15, %v9117_v33  ;;  %v9645_v15 = vpop.f32.mrf.mxu0 }
 0xa47   : > { %9279 = vst.msk [vmem:[#allocation5 + $0xd8] sm:$0xff] %vm9220_vm8, %v9206_v11  ;;  %v9121_v25 = vpop.f32.mrf.mxu1 }
 0xa48   : > { %v9122_v58 = vadd.f32 %v9121_v25, %v15851_v26 }
 0xa4a   : > { %9741 = vmatmul.bf16.gmra.mxu1 %v16940_v46 }
 0xa4c   : > { %v9207_v19 = vpop.f32.mrf.mxu2 }
 0xa4d   : > { %v9208_v29 = vadd.f32 %v9207_v19, %v9119_v14  ;;  %v9321_v14 = vld [vmem:[#allocation5 + $0x29] sm:$0xff] }
 0xa4f   : > { %9280 = vst.msk [vmem:[#allocation5 + $0xe0] sm:$0xff] %vm9220_vm8, %v9208_v29  ;;  %v9123_v52 = vpop.f32.mrf.mxu1  ;;  %v9648_v29 = vpop.f32.mrf.mxu0 }
 0xa50   : > { %v9124_v20 = vadd.f32 %v9123_v52, %v15857_v2  ;;  %v9322_v52 = vld [vmem:[#allocation5 + $0x31] sm:$0xff] }
 0xa54   : > { %v9210_v17 = vpop.f32.mrf.mxu2 }
 0xa55   : > { %v9211_v9 = vadd.f32 %v9210_v17, %v9122_v58 }
 0xa57   : > { %9281 = vst.msk [vmem:[#allocation5 + $0xe8] sm:$0xff] %vm9220_vm8, %v9211_v9  ;;  %v9126_v51 = vpop.f32.mrf.mxu1  ;;  %v9291_v9 = vld [vmem:[#allocation4 + $0x37] sm:$0xff] }
 0xa58   : > { %v9127_v27 = vadd.f32 %v9126_v51, %v15863_v28 }
 0xa5a   : > { %9746 = vmatmul.bf16.gmra.mxu1 %v16941_v31 }
 0xa5c   : > { %v9212_v22 = vpop.f32.mrf.mxu2 }
 0xa5d   : > { %v9213_v24 = vadd.f32 %v9212_v22, %v9124_v20  ;;  %v9296_v22 = vld [vmem:[#allocation4 + $0x5f] sm:$0xff] }
 0xa5f   : > { %9282 = vst.msk [vmem:[#allocation5 + $0xf0] sm:$0xff] %vm9220_vm8, %v9213_v24  ;;  %v9128_v56 = vpop.f32.mrf.mxu1  ;;  %v9355_v24 = vsel %vm13904_vm5, %v9291_v9, 0.0 }
 0xa60   : > { %v9129_v28 = vadd.f32 %v9128_v56, %v15869_v50  ;;  %v9793_v50 = vsel %vm14196_vm0, %v9318_v12, 0.0 }
 0xa64   : > { %v9215_v32 = vpop.f32.mrf.mxu2 }
 0xa65   : > { %v9216_v26 = vadd.f32 %v9215_v32, %v9127_v27  ;;  %v9650_v32 = vpop.f32.mrf.mxu0 }
 0xa67   : > { %9283 = vst.msk [vmem:[#allocation5 + $0xf8] sm:$0xff] %vm9220_vm8, %v9216_v26  ;;  %v9712_v41 = vpop.f32.mrf.mxu1 }
 0xa68   : > { %v9713_v6 = vadd.f32 %v9712_v41, %v15878_v35 }
 0xa6a   : > { %v9824_v2 = vadd.f32 %v9713_v6, %v9317_v61  ;;  %9751 = vmatmul.bf16.gmra.mxu1 %v15433_v53  ;;  %v9323_v6 = vld [vmem:[#allocation5 + $0x39] sm:$0xff] }
 0xa6c   : > { %v9863_v16 = vadd.f32 %v15960_v60, %v9824_v2  ;;  %v9217_v10 = vpop.f32.mrf.mxu2  ;;  %v9292_v2 = vld [vmem:[#allocation4 + $0x3f] sm:$0xff] }
 0xa6d   : > { %v9218_v35 = vadd.f32 %v9217_v10, %v9129_v28  ;;  %v9552_v28 = vadd.f32 %v15916_v54, %v9292_v2 }
 0xa6e   : > { %9896 = vst.msk [vmem:[%s15966_s25] sm:$0xff] %vm9895_vm2, %v9863_v16 }
 0xa6f   : > { %9284 = vst.msk [vmem:[#allocation5 + $0x100] sm:$0xff] %vm9220_vm8, %v9218_v35  ;;  %v9714_v53 = vpop.f32.mrf.mxu1  ;;  %v9641_v16 = vadd.f32 %v9640_v45, %v9552_v28  ;;  %v9293_v35 = vld [vmem:[#allocation4 + $0x47] sm:$0xff] }
 0xa70   : > { %v9715_v57 = vadd.f32 %v9714_v53, %v15884_v21  ;;  %v15983_v21 = vpop.f32.mrf.mxu3  ;;  %v9653_v53 = vpop.f32.mrf.mxu0 }
 0xa72   : > { %v9825_v49 = vadd.f32 %v9793_v50, %v9715_v57 }
 0xa74   : > { %v9864_v13 = vadd.f32 %v15960_v60, %v9825_v49 }
 0xa76   : > { %9897 = vst.msk [vmem:[%s15966_s25 + $0x8] sm:$0xff] %vm9895_vm2, %v9864_v13 }
 0xa77   : > { %v9717_v1 = vpop.f32.mrf.mxu1 }
 0xa78   : > { %v9718_v48 = vadd.f32 %v9717_v1, %v15892_v18  ;;  %v9795_v18 = vsel %vm14215_vm15, %v9320_v23, 0.0  ;;  %v15992_v25 = vpop.f32.mrf.mxu3  ;;  %v9294_v23 = vld [vmem:[#allocation4 + $0x4f] sm:$0xff] }
 0xa7a   : > { %v9826_v47 = vadd.f32 %v9718_v48, %v9319_v63  ;;  %9756 = vmatmul.bf16.gmra.mxu1 %v15468_v38 }
 0xa7c   : > { %v9865_v37 = vadd.f32 %v15960_v60, %v9826_v47  ;;  %v9325_v47 = vld [vmem:[#allocation5 + $0x49] sm:$0xff] }
 0xa7e   : > { %9898 = vst.msk [vmem:[%s15966_s25 + $0x10] sm:$0xff] %vm9895_vm2, %v9865_v37 }
 0xa7f   : > { %v9719_v39 = vpop.f32.mrf.mxu1 }
 0xa80   : > { %v9720_v4 = vadd.f32 %v9719_v39, %v15898_v34  ;;  %v16001_v58 = vpop.f32.mrf.mxu3  ;;  %v9655_v39 = vpop.f32.mrf.mxu0 }
 0xa82   : > { %v9827_v33 = vadd.f32 %v9795_v18, %v9720_v4  ;;  %v9557_v4 = vadd.f32 %v15983_v21, %v9294_v23 }
 0xa84   : > { %v9866_v11 = vadd.f32 %v15960_v60, %v9827_v33 }
 0xa86   : > { %9899 = vst.msk [vmem:[%s15966_s25 + $0x18] sm:$0xff] %vm9895_vm2, %v9866_v11  ;;  %v9295_v11 = vld [vmem:[#allocation4 + $0x57] sm:$0xff] }
 0xa87   : > { %v9722_v38 = vpop.f32.mrf.mxu1 }
 0xa88   : > { %v9723_v46 = vadd.f32 %v9722_v38, %v15908_v5  ;;  %v9797_v5 = vsel %vm16872_vm12, %v9322_v52, 0.0 }
 0xa8a   : > { %v9828_v19 = vadd.f32 %v9723_v46, %v9321_v14  ;;  %9761 = vmatmul.bf16.gmra.mxu1 %v15499_v44  ;;  %v9550_v44 = vadd.f32 %v15905_v36, %v9355_v24  ;;  %v9562_v24 = vadd.f32 %v16001_v58, %v9296_v22 }
 0xa8c   : > { %v9867_v34 = vadd.f32 %v15960_v60, %v9828_v19  ;;  %v9639_v27 = vadd.f32 %v15955_v55, %v9550_v44  ;;  %v9324_v55 = vld [vmem:[#allocation5 + $0x41] sm:$0xff] }
 0xa8d   : > { %v9799_v7 = vsel %vm16877_vm11, %v9324_v55, 0.0 }
 0xa8e   : > { %9900 = vst.msk [vmem:[%s15966_s25 + $0x20] sm:$0xff] %vm9895_vm2, %v9867_v34  ;;  %v9359_v34 = vsel %vm13945_vm7, %v9295_v11, 0.0 }
 0xa8f   : > { %v9724_v17 = vpop.f32.mrf.mxu1  ;;  %v9560_v21 = vadd.f32 %v15992_v25, %v9359_v34  ;;  %v9651_v25 = vadd.f32 %v9650_v32, %v9562_v24 }
 0xa90   : > { %v9725_v51 = vadd.f32 %v9724_v17, %v15914_v43  ;;  %v16013_v43 = vpop.f32.mrf.mxu3  ;;  %v9658_v17 = vpop.f32.mrf.mxu0 }
 0xa92   : > { %v9829_v20 = vadd.f32 %v9797_v5, %v9725_v51  ;;  %v9327_v5 = vld [vmem:[#allocation5 + $0x59] sm:$0xff] }
 0xa94   : > { %v9868_v56 = vadd.f32 %v15960_v60, %v9829_v20 }
 0xa96   : > { %9901 = vst.msk [vmem:[%s15966_s25 + $0x28] sm:$0xff] %vm9895_vm2, %v9868_v56  ;;  %v9328_v56 = vld [vmem:[#allocation5 + $0x61] sm:$0xff] }
 0xa97   : > { %v9727_v26 = vpop.f32.mrf.mxu1  ;;  %v9803_v2 = vsel %vm16887_vm9, %v9328_v56, 0.0 }
 0xa98   : > { %v9728_v41 = vadd.f32 %v9727_v26, %v9639_v27  ;;  %v9566_v13 = vpop.f32.mrf.mxu3  ;;  %v9297_v26 = vld [vmem:[#allocation4 + $0x67] sm:$0xff] }
 0xa9a   : > { %v9830_v61 = vadd.f32 %v9728_v41, %v9323_v6  ;;  %9766 = vmatmul.bf16.gmra.mxu1 %v15536_v42  ;;  %v9357_v42 = vsel %vm13922_vm6, %v9293_v35, 0.0 }
 0xa9b   : > { %v9555_v54 = vadd.f32 %v15974_v40, %v9357_v42  ;;  %v9646_v40 = vadd.f32 %v9645_v15, %v9557_v4  ;;  %v9649_v15 = vadd.f32 %v9648_v29, %v9560_v21  ;;  %v9660_v29 = vpop.f32.mrf.mxu0 }
 0xa9c   : > { %v9869_v36 = vadd.f32 %v15960_v60, %v9830_v61 }
 0xa9d   : > { %v9644_v1 = vadd.f32 %v9643_v0, %v9555_v54  ;;  %v9326_v0 = vld [vmem:[#allocation5 + $0x51] sm:$0xff] }
 0xa9e   : > { %9902 = vst.msk [vmem:[%s15966_s25 + $0x30] sm:$0xff] %vm9895_vm2, %v9869_v36  ;;  %v9801_v14 = vsel %vm16882_vm10, %v9326_v0, 0.0 }
 0xa9f   : > { %v9729_v10 = vpop.f32.mrf.mxu1 }
 0xaa0   : > { %v9730_v12 = vadd.f32 %v9729_v10, %v9641_v16  ;;  %v9569_v18 = vpop.f32.mrf.mxu3 }
 0xaa2   : > { %v9831_v50 = vadd.f32 %v9799_v7, %v9730_v12  ;;  %v9329_v12 = vld [vmem:[#allocation5 + $0x69] sm:$0xff]  ;;  %v9298_v7 = vld [vmem:[#allocation4 + $0x6f] sm:$0xff] }
 0xaa3   : > { %v9663_v35 = vpop.f32.mrf.mxu0  ;;  %v9567_v49 = vadd.f32 %v9566_v13, %v9298_v7 }
 0xaa4   : > { %v9870_v45 = vadd.f32 %v15960_v60, %v9831_v50 }
 0xaa5   : > { %v9656_v54 = vadd.f32 %v9655_v39, %v9567_v49 }
 0xaa6   : > { %9903 = vst.msk [vmem:[%s15966_s25 + $0x38] sm:$0xff] %vm9895_vm2, %v9870_v45  ;;  %v9299_v45 = vld [vmem:[#allocation4 + $0x77] sm:$0xff] }
 0xaa7   : > { %v9732_v48 = vpop.f32.mrf.mxu1 }
 0xaa8   : > { %v9733_v63 = vadd.f32 %v9732_v48, %v9644_v1  ;;  %v9571_v9 = vpop.f32.mrf.mxu3  ;;  %v16953_v48 = vld [vmem:[#allocation35_spill] sm:$0xff] }
 0xaa9   : > { %vm16954_vm4 = vnez %v16953_v48 }
 0xaaa   : > { %v9832_v37 = vadd.f32 %v9733_v63, %v9325_v47  ;;  %9771 = vmatmul.bf16.gmra.mxu1 %v15582_v8 }
 0xaab   : > { %v9665_v23 = vpop.f32.mrf.mxu0 }
 0xaac   : > { %v9871_v30 = vadd.f32 %v15960_v60, %v9832_v37  ;;  %v16955_v37 = vld [vmem:[#allocation52_spill] sm:$0xff] }
 0xaad   : > { %vm16956_vm5 = vnez %v16955_v37  ;;  %v9336_v37 = vld [vmem:[#allocation5 + $0xa1] sm:$0xff] }
 0xaae   : > { %9904 = vst.msk [vmem:[%s15966_s25 + $0x40] sm:$0xff] %vm9895_vm2, %v9871_v30 }
 0xaaf   : > { %v9734_v33 = vpop.f32.mrf.mxu1 }
 0xab0   : > { %v9735_v38 = vadd.f32 %v9734_v33, %v9646_v40  ;;  %v9574_v6 = vpop.f32.mrf.mxu3  ;;  %v9331_v33 = vld [vmem:[#allocation5 + $0x79] sm:$0xff] }
 0xab2   : > { %v9833_v19 = vadd.f32 %v9801_v14, %v9735_v38  ;;  %v9300_v38 = vld [vmem:[#allocation4 + $0x7f] sm:$0xff] }
 0xab3   : > { %v9572_v46 = vadd.f32 %v9571_v9, %v9300_v38 }
 0xab4   : > { %v9872_v52 = vadd.f32 %v15960_v60, %v9833_v19  ;;  %v9668_v19 = vpop.f32.mrf.mxu0 }
 0xab5   : > { %v9661_v8 = vadd.f32 %v9660_v29, %v9572_v46  ;;  %v9333_v29 = vld [vmem:[#allocation5 + $0x89] sm:$0xff] }
 0xab6   : > { %9905 = vst.msk [vmem:[%s15966_s25 + $0x48] sm:$0xff] %vm9895_vm2, %v9872_v52  ;;  %v9301_v52 = vld [vmem:[#allocation4 + $0x87] sm:$0xff] }
 0xab7   : > { %v9737_v51 = vpop.f32.mrf.mxu1 }
 0xab8   : > { %v9738_v31 = vadd.f32 %v9737_v51, %v9649_v15  ;;  %v9576_v50 = vpop.f32.mrf.mxu3  ;;  %v16957_v15 = vld [vmem:[#allocation37_spill] sm:$0xff] }
 0xab9   : > { %vm16958_vm6 = vnez %v16957_v15 }
 0xaba   : > { %v9834_v20 = vadd.f32 %v9738_v31, %v9327_v5  ;;  %9776 = vmatmul.bf16.gmra.mxu1 %v15635_v59  ;;  %v16951_v59 = vld [vmem:[#allocation51_spill] sm:$0xff] }
 0xabb   : > { %vm16952_vm3 = vnez %v16951_v59  ;;  %v16959_v5 = vld [vmem:[#allocation55_spill] sm:$0xff]  ;;  %v9303_v59 = vld [vmem:[#allocation4 + $0x97] sm:$0xff] }
 0xabc   : > { %v9873_v44 = vadd.f32 %v15960_v60, %v9834_v20  ;;  %v9361_v36 = vsel %vm16952_vm3, %v9297_v26, 0.0  ;;  %vm16960_vm7 = vnez %v16959_v5  ;;  %v9670_v24 = vpop.f32.mrf.mxu0  ;;  %v9302_v26 = vld [vmem:[#allocation4 + $0x8f] sm:$0xff] }
 0xabd   : > { %v9565_v58 = vadd.f32 %v16013_v43, %v9361_v36  ;;  %v9330_v43 = vld [vmem:[#allocation5 + $0x71] sm:$0xff] }
 0xabe   : > { %9906 = vst.msk [vmem:[%s15966_s25 + $0x50] sm:$0xff] %vm9895_vm2, %v9873_v44  ;;  %v9805_v63 = vsel %vm16954_vm4, %v9330_v43, 0.0 }
 0xabf   : > { %v9739_v27 = vpop.f32.mrf.mxu1  ;;  %v9654_v16 = vadd.f32 %v9653_v53, %v9565_v58 }
 0xac0   : > { %v9740_v41 = vadd.f32 %v9739_v27, %v9651_v25  ;;  %v9579_v30 = vpop.f32.mrf.mxu3 }
 0xac2   : > { %v9835_v28 = vadd.f32 %v9803_v2, %v9740_v41  ;;  %v9577_v41 = vadd.f32 %v9576_v50, %v9302_v26 }
 0xac4   : > { %v9874_v32 = vadd.f32 %v15960_v60, %v9835_v28  ;;  %v9666_v2 = vadd.f32 %v9665_v23, %v9577_v41  ;;  %v9673_v58 = vpop.f32.mrf.mxu0  ;;  %v9305_v23 = vld [vmem:[#allocation4 + $0xa7] sm:$0xff] }
 0xac6   : > { %9907 = vst.msk [vmem:[%s15966_s25 + $0x58] sm:$0xff] %vm9895_vm2, %v9874_v32  ;;  %v16961_v32 = vld [vmem:[#allocation41_spill] sm:$0xff] }
 0xac7   : > { %v9742_v55 = vpop.f32.mrf.mxu1  ;;  %vm16962_vm8 = vnez %v16961_v32 }
 0xac8   : > { %v9743_v10 = vadd.f32 %v9742_v55, %v9654_v16  ;;  %v9581_v34 = vpop.f32.mrf.mxu3 }
 0xaca   : > { %v9836_v57 = vadd.f32 %v9743_v10, %v9329_v12  ;;  %9781 = vmatmul.bf16.gmra.mxu1 %v16928_v62  ;;  %v9363_v62 = vsel %vm16956_vm5, %v9299_v45, 0.0  ;;  %v16963_v10 = vld [vmem:[#allocation56_spill] sm:$0xff] }
 0xacb   : > { %v9570_v13 = vadd.f32 %v9569_v18, %v9363_v62  ;;  %v9332_v18 = vld [vmem:[#allocation5 + $0x81] sm:$0xff]  ;;  %vm16964_vm9 = vnez %v16963_v10 }
 0xacc   : > { %v9875_v42 = vadd.f32 %v15960_v60, %v9836_v57  ;;  %v9807_v51 = vsel %vm16958_vm6, %v9332_v18, 0.0  ;;  %v9675_v45 = vpop.f32.mrf.mxu0  ;;  %v9337_v18 = vld [vmem:[#allocation5 + $0xa9] sm:$0xff] }
 0xacd   : > { %v9659_v39 = vadd.f32 %v9658_v17, %v9570_v13 }
 0xace   : > { %9908 = vst.msk [vmem:[%s15966_s25 + $0x60] sm:$0xff] %vm9895_vm2, %v9875_v42 }
 0xacf   : > { %v9744_v53 = vpop.f32.mrf.mxu1 }
 0xad0   : > { %v9745_v1 = vadd.f32 %v9744_v53, %v9656_v54  ;;  %v9584_v56 = vpop.f32.mrf.mxu3  ;;  %v9335_v54 = vld [vmem:[#allocation5 + $0x99] sm:$0xff]  ;;  %v9304_v53 = vld [vmem:[#allocation4 + $0x9f] sm:$0xff] }
 0xad2   : > { %v9837_v47 = vadd.f32 %v9805_v63, %v9745_v1  ;;  %v9582_v1 = vadd.f32 %v9581_v34, %v9304_v53 }
 0xad4   : > { %v9876_v4 = vadd.f32 %v15960_v60, %v9837_v47  ;;  %v9671_v47 = vadd.f32 %v9670_v24, %v9582_v1  ;;  %v9678_v38 = vpop.f32.mrf.mxu0 }
 0xad6   : > { %9909 = vst.msk [vmem:[%s15966_s25 + $0x68] sm:$0xff] %vm9895_vm2, %v9876_v4  ;;  %v16965_v4 = vld [vmem:[#allocation44_spill] sm:$0xff] }
 0xad7   : > { %v9747_v40 = vpop.f32.mrf.mxu1  ;;  %vm16966_vm10 = vnez %v16965_v4 }
 0xad8   : > { %v9748_v0 = vadd.f32 %v9747_v40, %v9659_v39  ;;  %v9586_v12 = vpop.f32.mrf.mxu3  ;;  %v16967_v40 = vld [vmem:[#allocation59_spill] sm:$0xff] }
 0xad9   : > { %vm16968_vm11 = vnez %v16967_v40 }
 0xada   : > { %v9838_v11 = vadd.f32 %v9748_v0, %v9331_v33  ;;  %9786 = vmatmul.bf16.gmra.mxu1 %v16931_v3  ;;  %v9365_v3 = vsel %vm16960_vm7, %v9301_v52, 0.0  ;;  %v9369_v0 = vsel %vm16968_vm11, %v9305_v23, 0.0 }
 0xadb   : > { %v9575_v9 = vadd.f32 %v9574_v6, %v9365_v3  ;;  %v9334_v6 = vld [vmem:[#allocation5 + $0x91] sm:$0xff]  ;;  %v9585_v33 = vadd.f32 %v9584_v56, %v9369_v0  ;;  %v9307_v3 = vld [vmem:[#allocation4 + $0xb7] sm:$0xff] }
 0xadc   : > { %v9877_v14 = vadd.f32 %v15960_v60, %v9838_v11  ;;  %v9809_v16 = vsel %vm16962_vm8, %v9334_v6, 0.0  ;;  %v9339_v6 = vld [vmem:[#allocation5 + $0xb9] sm:$0xff] }
 0xadd   : > { %v9664_v22 = vadd.f32 %v9663_v35, %v9575_v9  ;;  %v9367_v35 = vsel %vm16964_vm9, %v9303_v59, 0.0  ;;  %v9674_v46 = vadd.f32 %v9673_v58, %v9585_v33  ;;  %v9308_v59 = vld [vmem:[#allocation4 + $0xbf] sm:$0xff]  ;;  %v9311_v33 = vld [vmem:[#allocation4 + $0xd7] sm:$0xff] }
 0xade   : > { %9910 = vst.msk [vmem:[%s15966_s25 + $0x70] sm:$0xff] %vm9895_vm2, %v9877_v14  ;;  %v9580_v57 = vadd.f32 %v9579_v30, %v9367_v35  ;;  %v9811_v30 = vsel %vm16966_vm10, %v9336_v37, 0.0  ;;  %v9309_v35 = vld [vmem:[#allocation4 + $0xc7] sm:$0xff] }
 0xadf   : > { %v9749_v21 = vpop.f32.mrf.mxu1 }
 0xae0   : > { %v9750_v17 = vadd.f32 %v9749_v21, %v9661_v8  ;;  %v9669_v50 = vadd.f32 %v9668_v19, %v9580_v57  ;;  %v9589_v63 = vpop.f32.mrf.mxu3  ;;  %v9306_v21 = vld [vmem:[#allocation4 + $0xaf] sm:$0xff]  ;;  %v16973_v57 = vld [vmem:[#allocation54_spill] sm:$0xff] }
 0xae1   : > { %v9587_v52 = vadd.f32 %v9586_v12, %v9306_v21  ;;  %vm16974_vm15 = vnez %v16973_v57 }
 0xae2   : > { %v9839_v31 = vadd.f32 %v9807_v51, %v9750_v17  ;;  %v9338_v51 = vld [vmem:[#allocation5 + $0xb1] sm:$0xff] }
 0xae3   : > { %v9676_v15 = vadd.f32 %v9675_v45, %v9587_v52 }
 0xae4   : > { %v9878_v20 = vadd.f32 %v15960_v60, %v9839_v31  ;;  %v9680_v31 = vpop.f32.mrf.mxu0 }
 0xae6   : > { %9911 = vst.msk [vmem:[%s15966_s25 + $0x78] sm:$0xff] %vm9895_vm2, %v9878_v20 }
 0xae7   : > { %v9752_v44 = vpop.f32.mrf.mxu1 }
 0xae8   : > { %v9753_v25 = vadd.f32 %v9752_v44, %v9664_v22  ;;  %v9591_v14 = vpop.f32.mrf.mxu3  ;;  %v16969_v22 = vld [vmem:[#allocation49_spill] sm:$0xff] }
 0xae9   : > { %vm16970_vm12 = vnez %v16969_v22  ;;  %v9592_v58 = vadd.f32 %v9591_v14, %v9308_v59 }
 0xaea   : > { %v9840_v27 = vadd.f32 %v9753_v25, %v9333_v29  ;;  %v9813_v24 = vsel %vm16970_vm12, %v9338_v51, 0.0  ;;  %v16971_v25 = vld [vmem:[#allocation63_spill] sm:$0xff] }
 0xaeb   : > { %vm16972_vm0 = vnez %v16971_v25  ;;  %v9313_v25 = vld [vmem:[#allocation4 + $0xe7] sm:$0xff] }
 0xaec   : > { %v9879_v61 = vadd.f32 %v15960_v60, %v9840_v27  ;;  %v9371_v56 = vsel %vm16972_vm0, %v9307_v3, 0.0  ;;  %v9312_v3 = vld [vmem:[#allocation4 + $0xdf] sm:$0xff] }
 0xaed   : > { %v9590_v29 = vadd.f32 %v9589_v63, %v9371_v56 }
 0xaee   : > { %9912 = vst.msk [vmem:[%s15966_s25 + $0x80] sm:$0xff] %vm9895_vm2, %v9879_v61 }
 0xaef   : > { %v9754_v28 = vpop.f32.mrf.mxu1  ;;  %v9679_v26 = vadd.f32 %v9678_v38, %v9590_v29  ;;  %v16977_v38 = vld [vmem:[#allocation58_spill] sm:$0xff] }
 0xaf0   : > { %v9755_v36 = vadd.f32 %v9754_v28, %v9666_v2  ;;  %v9594_v20 = vpop.f32.mrf.mxu3  ;;  %v9683_v2 = vpop.f32.mrf.mxu0  ;;  %vm16978_vm3 = vnez %v16977_v38 }
 0xaf2   : > { %v9841_v55 = vadd.f32 %v9809_v16, %v9755_v36  ;;  %v9681_v16 = vadd.f32 %v9680_v31, %v9592_v58  ;;  %v9343_v31 = vld [vmem:[#allocation5 + $0xd9] sm:$0xff] }
 0xaf4   : > { %v9880_v7 = vadd.f32 %v15960_v60, %v9841_v55  ;;  %v9340_v55 = vld [vmem:[#allocation5 + $0xc1] sm:$0xff] }
 0xaf6   : > { %9913 = vst.msk [vmem:[%s15966_s25 + $0x88] sm:$0xff] %vm9895_vm2, %v9880_v7  ;;  %v9815_v7 = vsel %vm16974_vm15, %v9340_v55, 0.0 }
 0xaf7   : > { %v9757_v49 = vpop.f32.mrf.mxu1 }
 0xaf8   : > { %v9758_v42 = vadd.f32 %v9757_v49, %v9669_v50  ;;  %v9596_v36 = vpop.f32.mrf.mxu3  ;;  %v16975_v49 = vld [vmem:[#allocation72_spill] sm:$0xff] }
 0xaf9   : > { %vm16976_vm1 = vnez %v16975_v49 }
 0xafa   : > { %v9842_v43 = vadd.f32 %v9758_v42, %v9335_v54  ;;  %v9373_v42 = vsel %vm16976_vm1, %v9309_v35, 0.0  ;;  %v9685_v54 = vpop.f32.mrf.mxu0 }
 0xafc   : > { %v9881_v48 = vadd.f32 %v15960_v60, %v9842_v43  ;;  %v9595_v43 = vadd.f32 %v9594_v20, %v9373_v42  ;;  %v9346_v42 = vld [vmem:[#allocation5 + $0xf1] sm:$0xff] }
 0xafe   : > { %9914 = vst.msk [vmem:[%s15966_s25 + $0x90] sm:$0xff] %vm9895_vm2, %v9881_v48  ;;  %v9684_v1 = vadd.f32 %v9683_v2, %v9595_v43 }
 0xaff   : > { %v9759_v62 = vpop.f32.mrf.mxu1 }
 0xb00   : > { %v9760_v13 = vadd.f32 %v9759_v62, %v9671_v47  ;;  %v9599_v45 = vpop.f32.mrf.mxu3  ;;  %v9341_v47 = vld [vmem:[#allocation5 + $0xc9] sm:$0xff]  ;;  %v9310_v62 = vld [vmem:[#allocation4 + $0xcf] sm:$0xff] }
 0xb01   : > { %v9597_v23 = vadd.f32 %v9596_v36, %v9310_v62 }
 0xb02   : > { %v9843_v39 = vadd.f32 %v9811_v30, %v9760_v13  ;;  %v9688_v4 = vpop.f32.mrf.mxu0 }
 0xb03   : > { %v9686_v30 = vadd.f32 %v9685_v54, %v9597_v23 }
 0xb04   : > { %v9882_v11 = vadd.f32 %v15960_v60, %v9843_v39  ;;  %v9342_v39 = vld [vmem:[#allocation5 + $0xd1] sm:$0xff] }
 0xb06   : > { %9915 = vst.msk [vmem:[%s15966_s25 + $0x98] sm:$0xff] %vm9895_vm2, %v9882_v11 }
 0xb07   : > { %v9762_v19 = vpop.f32.mrf.mxu1 }
 0xb08   : > { %v9763_v8 = vadd.f32 %v9762_v19, %v9674_v46  ;;  %v9601_v40 = vpop.f32.mrf.mxu3  ;;  %v9817_v46 = vsel %vm16978_vm3, %v9342_v39, 0.0  ;;  %v16979_v19 = vld [vmem:[#allocation13_spill] sm:$0xff]  ;;  %v9316_v39 = vld [vmem:[#allocation4 + $0xff] sm:$0xff] }
 0xb09   : > { %vm16980_vm4 = vnez %v16979_v19 }
 0xb0a   : > { %v9844_v34 = vadd.f32 %v9763_v8, %v9337_v18  ;;  %v9375_v8 = vsel %vm16980_vm4, %v9311_v33, 0.0  ;;  %v9690_v52 = vpop.f32.mrf.mxu0 }
 0xb0b   : > { %v9600_v18 = vadd.f32 %v9599_v45, %v9375_v8 }
 0xb0c   : > { %v9883_v17 = vadd.f32 %v15960_v60, %v9844_v34 }
 0xb0d   : > { %v9689_v21 = vadd.f32 %v9688_v4, %v9600_v18 }
 0xb0e   : > { %9916 = vst.msk [vmem:[%s15966_s25 + $0xa0] sm:$0xff] %vm9895_vm2, %v9883_v17 }
 0xb0f   : > { %v9764_v5 = vpop.f32.mrf.mxu1 }
 0xb10   : > { %v9765_v9 = vadd.f32 %v9764_v5, %v9676_v15  ;;  %v9604_v51 = vpop.f32.mrf.mxu3 }
 0xb12   : > { %v9845_v44 = vadd.f32 %v9813_v24, %v9765_v9  ;;  %v9602_v9 = vadd.f32 %v9601_v40, %v9312_v3  ;;  %v9344_v24 = vld [vmem:[#allocation5 + $0xe1] sm:$0xff]  ;;  %v9693_v29 = vpop.f32.mrf.mxu0  ;;  %v9347_v40 = vld [vmem:[#allocation5 + $0xf9] sm:$0xff] }
 0xb14   : > { %v9884_v27 = vadd.f32 %v15960_v60, %v9845_v44  ;;  %v9691_v22 = vadd.f32 %v9690_v52, %v9602_v9 }
 0xb16   : > { %9917 = vst.msk [vmem:[%s15966_s25 + $0xa8] sm:$0xff] %vm9895_vm2, %v9884_v27  ;;  %v16981_v27 = vld [vmem:[#allocation65_spill] sm:$0xff] }
 0xb17   : > { %v9767_v41 = vpop.f32.mrf.mxu1  ;;  %vm16982_vm5 = vnez %v16981_v27 }
 0xb18   : > { %v9768_v61 = vadd.f32 %v9767_v41, %v9679_v26  ;;  %v9819_v26 = vsel %vm16982_vm5, %v9344_v24, 0.0 }
 0xb1a   : > { %v9846_v28 = vadd.f32 %v9768_v61, %v9339_v6  ;;  %v16983_v61 = vld [vmem:[#allocation18_spill] sm:$0xff]  ;;  %v9606_v6 = vpop.f32.mrf.mxu3  ;;  %v9695_v35 = vpop.f32.mrf.mxu0 }
 0xb1b   : > { %vm16984_vm6 = vnez %v16983_v61 }
 0xb1c   : > { %v9885_v32 = vadd.f32 %v15960_v60, %v9846_v28  ;;  %v9377_v2 = vsel %vm16984_vm6, %v9313_v25, 0.0 }
 0xb1d   : > { %v9605_v28 = vadd.f32 %v9604_v51, %v9377_v2 }
 0xb1e   : > { %9918 = vst.msk [vmem:[%s15966_s25 + $0xb0] sm:$0xff] %vm9895_vm2, %v9885_v32 }
 0xb1f   : > { %v9769_v10 = vpop.f32.mrf.mxu1  ;;  %v9694_v36 = vadd.f32 %v9693_v29, %v9605_v28 }
 0xb20   : > { %v9770_v12 = vadd.f32 %v9769_v10, %v9681_v16  ;;  %v9345_v16 = vld [vmem:[#allocation5 + $0xe9] sm:$0xff]  ;;  %v9314_v10 = vld [vmem:[#allocation4 + $0xef] sm:$0xff] }
 0xb22   : > { %v9847_v50 = vadd.f32 %v9815_v7, %v9770_v12  ;;  %v9607_v12 = vadd.f32 %v9606_v6, %v9314_v10  ;;  %v9609_v7 = vpop.f32.mrf.mxu3 }
 0xb24   : > { %v9886_v53 = vadd.f32 %v15960_v60, %v9847_v50  ;;  %v9315_v50 = vld [vmem:[#allocation4 + $0xf7] sm:$0xff]  ;;  %v9696_v49 = vadd.f32 %v9695_v35, %v9607_v12 }
 0xb26   : > { %9919 = vst.msk [vmem:[%s15966_s25 + $0xb8] sm:$0xff] %vm9895_vm2, %v9886_v53  ;;  %v16985_v53 = vld [vmem:[#allocation22_spill] sm:$0xff] }
 0xb27   : > { %v9772_v48 = vpop.f32.mrf.mxu1  ;;  %vm16986_vm7 = vnez %v16985_v53 }
 0xb28   : > { %v9773_v63 = vadd.f32 %v9772_v48, %v9684_v1  ;;  %v9379_v45 = vsel %vm16986_vm7, %v9315_v50, 0.0  ;;  %v9821_v48 = vsel %vm16914_vm13, %v9346_v42, 0.0 }
 0xb2a   : > { %v9848_v37 = vadd.f32 %v9773_v63, %v9341_v47  ;;  %v9610_v63 = vadd.f32 %v9609_v7, %v9379_v45 }
 0xb2c   : > { %v9887_v13 = vadd.f32 %v15960_v60, %v9848_v37  ;;  %v9698_v37 = vpop.f32.mrf.mxu2 }
 0xb2d   : > { %v9699_v23 = vadd.f32 %v9698_v37, %v9610_v63 }
 0xb2e   : > { %9920 = vst.msk [vmem:[%s15966_s25 + $0xc0] sm:$0xff] %vm9895_vm2, %v9887_v13  ;;  %v9611_v13 = vpop.f32.mrf.mxu3 }
 0xb2f   : > { %v9774_v0 = vpop.f32.mrf.mxu1 }
 0xb30   : > { %v9775_v11 = vadd.f32 %v9774_v0, %v9686_v30  ;;  %v9612_v0 = vadd.f32 %v9611_v13, %v9316_v39 }
 0xb32   : > { %v9849_v14 = vadd.f32 %v9817_v46, %v9775_v11  ;;  %v9348_v46 = vld [vmem:[#allocation5 + $0x101] sm:$0xff] }
 0xb34   : > { %v9888_v34 = vadd.f32 %v15960_v60, %v9849_v14  ;;  %v9700_v38 = vpop.f32.mrf.mxu2 }
 0xb35   : > { %v9701_v14 = vadd.f32 %v9700_v38, %v9612_v0 }
 0xb36   : > { %9921 = vst.msk [vmem:[%s15966_s25 + $0xc8] sm:$0xff] %vm9895_vm2, %v9888_v34  ;;  %v9823_v34 = vsel %vm14637_vm14, %v9348_v46, 0.0 }
 0xb37   : > { %v9777_v17 = vpop.f32.mrf.mxu1 }
 0xb38   : > { %v9778_v15 = vadd.f32 %v9777_v17, %v9689_v21 }
 0xb3a   : > { %v9850_v5 = vadd.f32 %v9778_v15, %v9343_v31 }
 0xb3c   : > { %v9889_v20 = vadd.f32 %v15960_v60, %v9850_v5 }
 0xb3e   : > { %9922 = vst.msk [vmem:[%s15966_s25 + $0xd0] sm:$0xff] %vm9895_vm2, %v9889_v20 }
 0xb3f   : > { %v9779_v44 = vpop.f32.mrf.mxu1 }
 0xb40   : > { %v9780_v56 = vadd.f32 %v9779_v44, %v9691_v22 }
 0xb42   : > { %v9851_v41 = vadd.f32 %v9819_v26, %v9780_v56 }
 0xb44   : > { %v9890_v59 = vadd.f32 %v15960_v60, %v9851_v41 }
 0xb46   : > { %9923 = vst.msk [vmem:[%s15966_s25 + $0xd8] sm:$0xff] %vm9895_vm2, %v9890_v59 }
 0xb47   : > { %v9782_v58 = vpop.f32.mrf.mxu1 }
 0xb48   : > { %v9783_v32 = vadd.f32 %v9782_v58, %v9694_v36 }
 0xb4a   : > { %v9852_v55 = vadd.f32 %v9783_v32, %v9345_v16 }
 0xb4c   : > { %v9891_v57 = vadd.f32 %v15960_v60, %v9852_v55 }
 0xb4e   : > { %9924 = vst.msk [vmem:[%s15966_s25 + $0xe0] sm:$0xff] %vm9895_vm2, %v9891_v57 }
 0xb4f   : > { %v9784_v54 = vpop.f32.mrf.mxu1 }
 0xb50   : > { %v9785_v43 = vadd.f32 %v9784_v54, %v9696_v49 }
 0xb52   : > { %v9853_v47 = vadd.f32 %v9821_v48, %v9785_v43 }
 0xb54   : > { %v9892_v62 = vadd.f32 %v15960_v60, %v9853_v47 }
 0xb56   : > { %9925 = vst.msk [vmem:[%s15966_s25 + $0xe8] sm:$0xff] %vm9895_vm2, %v9892_v62 }
 0xb57   : > { %v9787_v4 = vpop.f32.mrf.mxu1 }
 0xb58   : > { %v9788_v30 = vadd.f32 %v9787_v4, %v9699_v23 }
 0xb5a   : > { %v9854_v33 = vadd.f32 %v9788_v30, %v9347_v40 }
 0xb5c   : > { %v9893_v11 = vadd.f32 %v15960_v60, %v9854_v33 }
 0xb5e   : > { %9926 = vst.msk [vmem:[%s15966_s25 + $0xf0] sm:$0xff] %vm9895_vm2, %v9893_v11 }
 0xb5f   : > { %v9789_v19 = vpop.f32.mrf.mxu1 }
 0xb60   : > { %v9790_v8 = vadd.f32 %v9789_v19, %v9701_v14 }
 0xb62   : > { %v9855_v21 = vadd.f32 %v9823_v34, %v9790_v8 }
 0xb64   : > { %v9894_v52 = vadd.f32 %v15960_v60, %v9855_v21 }
 0xb66   : > { %9927 = vst.msk [vmem:[%s15966_s25 + $0xf8] sm:$0xff] %vm9895_vm2, %v9894_v52 }
 0xb67 PF: > { %s21_s11 = sadd.s32 1, %s12563_s11  }
 0xb68   : > { %p18_p4 = scmp.ge.s32.totalorder %s21_s11, 4  }
 0xb6a   :  { %20 = sbr.rel (!%p18_p4) target bundleno = 3 (0x3), region = 86 }

</bundles_post_ra>
